<compile_context>
chip_gen: v6e
topology: v6e:2x2x1
jax: 0.10.0
libtpu: 0.0.40
codegen_flags: <defaults>
</compile_context>

<pallas_src>
import functools

import jax
import jax.numpy as jnp
import numpy as np
from jax.experimental import pallas as pl
from jax.experimental.pallas import tpu as pltpu

LEAK = 0.2
EPS = 1e-5
KSIZE = 4


# ------------------------------ in-kernel helpers ---------------------------


def _conv_rows(act, w2, s_cat, batch, hin, hout, stride, k=KSIZE):
    """Valid k x k conv (given stride) as per-output-row GEMMs on VMEM values.

    act:   (Cin, hin*batch*hin) value, columns ordered (h, n, w).
    w2:    (OC, k*k*Cin) weight, columns ordered (kh, kw, c).
    s_cat: (batch*hin, k*batch*hout) constant 0/1 gather matrix; column block kw
           picks input column w = stride*ow + kw for every (n, ow).
    Returns (OC, hout*batch*hout), columns ordered (oh, n, ow).
    """
    nw_in = batch * hin
    nw_out = batch * hout
    out_rows = []
    for oh in range(hout):
        pieces = []
        for kh in range(k):
            r = stride * oh + kh
            slab = act[:, r * nw_in:(r + 1) * nw_in]                   # (Cin, n*W)
            g = jnp.dot(slab, s_cat, preferred_element_type=jnp.float32)
            for kw in range(k):
                pieces.append(g[:, kw * nw_out:(kw + 1) * nw_out])     # (Cin, n*OW)
        at_row = jnp.concatenate(pieces, axis=0)                        # (k*k*Cin, n*OW)
        out_rows.append(jnp.dot(w2, at_row, preferred_element_type=jnp.float32))
    return jnp.concatenate(out_rows, axis=1)                            # (OC, OH*n*OW)


def _bn_lrelu(y, gb, count):
    """Training-mode BatchNorm (one-pass stats) + LeakyReLU(0.2) on a (OC, M) value."""
    inv = 1.0 / float(count)
    mean = jnp.sum(y, axis=1, keepdims=True) * inv
    var = jnp.sum(y * y, axis=1, keepdims=True) * inv - mean * mean
    var = jnp.maximum(var, 0.0)
    scale = gb[:, 0:1] * jax.lax.rsqrt(var + EPS)
    shift = gb[:, 1:2] - mean * scale
    z = y * scale + shift
    return jnp.where(z >= 0, z, LEAK * z)


def _fused_disc_kernel(*refs, batch, block_dims, final_dims):
    """Whole Discriminator forward in one kernel invocation.

    refs = (at0, w0, b0, [w, gamma_beta, gather]*n_blocks,
            wf, bf, gather_f, reflect_pad, out)
    """
    nb = len(block_dims)
    at0_ref, w0_ref, b0_ref = refs[0:3]
    blk_refs = refs[3:3 + 3 * nb]
    wf_ref, bf_ref, sf_ref, p_ref = refs[3 + 3 * nb:3 + 3 * nb + 4]
    o_ref = refs[-1]

    # initial: Conv(2C -> f0, k4, s2, p1 reflect, bias) + LeakyReLU(0.2) as one GEMM
    # on the XLA-prepared bf16 A^T (columns ordered (oh, n, ow)).
    a = jnp.dot(w0_ref[...], at0_ref[...], preferred_element_type=jnp.float32)
    a = a + b0_ref[...]
    a = jnp.where(a >= 0, a, LEAK * a)

    # CNN blocks: conv(no bias) + BatchNorm(train) + LeakyReLU, fully in registers.
    for i, (hin, hout, stride) in enumerate(block_dims):
        w_ref, gb_ref, s_ref = blk_refs[3 * i:3 * i + 3]
        y = _conv_rows(a, w_ref[...], s_ref[...], batch, hin, hout, stride)
        a = _bn_lrelu(y, gb_ref[...], batch * hout * hout)

    # final: ReflectionPad(1) via a tiny selection GEMM, then Conv(-> 1, k4, s1, bias).
    hpad, hf, stride_f = final_dims
    a = jnp.dot(a, p_ref[...], preferred_element_type=jnp.float32)     # (C, n*hpad*hpad)
    yf = _conv_rows(a, wf_ref[...], sf_ref[...], batch, hpad, hf, stride_f)
    yf = yf + bf_ref[...]                                               # (1, hf*n*hf)

    # scatter the handful of outputs into the NCHW-shaped output ref.
    for oh in range(hf):
        for b in range(batch):
            start = (oh * batch + b) * hf
            piece = yf[:, start:start + hf].reshape(1, 1, 1, hf)
            o_ref[b:b + 1, 0:1, oh:oh + 1, :] = piece


# --------------------------- host-side constant prep ------------------------


def _gather_matrix(hin, hout, batch, stride, k=KSIZE):
    """0/1 matrix gathering columns w = stride*ow + kw per (n, ow), all kw blocks."""
    s = np.zeros((batch * hin, k * batch * hout), np.float32)
    for kw in range(k):
        for b in range(batch):
            for ow in range(hout):
                s[b * hin + stride * ow + kw, (kw * batch + b) * hout + ow] = 1.0
    return jnp.asarray(s)


def _reflect_pad_matrix(h, batch, pad=1):
    """0/1 matrix implementing ReflectionPad2d(pad) on the flattened (h, n, w) axis."""
    hp = h + 2 * pad

    def refl(i):
        if i < 0:
            return -i
        if i >= h:
            return 2 * (h - 1) - i
        return i

    p = np.zeros((batch * h * h, batch * hp * hp), np.float32)
    for b in range(batch):
        for i in range(hp):
            for j in range(hp):
                si, sj = refl(i - pad), refl(j - pad)
                p[(si * batch + b) * h + sj, (i * batch + b) * hp + j] = 1.0
    return jnp.asarray(p)


def prepare_params(params, batch, height, width):
    """One-time repack of the PyTorch-layout params into kernel-ready operands."""
    assert height == width, "square inputs only"
    f0 = params["initial_w"].shape[0]
    prep = {}
    # (f0, 2C*16), column order (c, kh, kw) == plain reshape of the (OC,C,4,4) weight.
    prep["w0"] = params["initial_w"].reshape(f0, -1).astype(jnp.bfloat16)
    prep["b0"] = params["initial_b"].reshape(f0, 1).astype(jnp.float32)

    h = (height + 2 - KSIZE) // 2 + 1          # initial conv output size
    block_dims = []
    blocks = []
    for blk in params["blocks"]:
        oc, ic, k, _ = blk["w"].shape
        stride = blk["stride"]
        hout = (h - k) // stride + 1
        w2 = jnp.transpose(blk["w"], (0, 2, 3, 1)).reshape(oc, k * k * ic)  # (kh,kw,c)
        gb = jnp.stack([blk["gamma"], blk["beta"]], axis=1)                 # (oc, 2)
        blocks.append((w2.astype(jnp.float32), gb.astype(jnp.float32),
                       _gather_matrix(h, hout, batch, stride, k)))
        block_dims.append((h, hout, stride))
        h = hout
    prep["blocks"] = blocks

    ocf, icf, k, _ = params["final_w"].shape
    hpad = h + 2
    hf = hpad - k + 1
    prep["wf"] = jnp.transpose(params["final_w"], (0, 2, 3, 1)).reshape(
        ocf, k * k * icf).astype(jnp.float32)
    prep["bf"] = params["final_b"].reshape(ocf, 1).astype(jnp.float32)
    prep["sf"] = _gather_matrix(hpad, hf, batch, 1, k)
    prep["pmat"] = _reflect_pad_matrix(h, batch, 1)

    cfg = {"batch": batch, "block_dims": tuple(block_dims),
           "final_dims": (hpad, hf, 1), "hf": hf}
    return prep, cfg


def _initial_patches(x, y, k=KSIZE, stride=2, pad=1):
    """XLA-side patch extraction for the first conv only, directly in (K, M) bf16
    layout with columns ordered (oh, n, ow) and rows ordered (c, kh, kw)."""
    z = jnp.concatenate([x, y], axis=1)
    z = jnp.pad(z, ((0, 0), (0, 0), (pad, pad), (pad, pad)), mode="reflect")
    n, c2, hp, wp = z.shape
    oh = (hp - k) // stride + 1
    ow = (wp - k) // stride + 1
    taps = []
    for kh in range(k):
        for kw in range(k):
            taps.append(z[:, :, kh:kh + stride * (oh - 1) + 1:stride,
                               kw:kw + stride * (ow - 1) + 1:stride])
    a = jnp.stack(taps, axis=2)                   # (n, c2, k*k, oh, ow)
    a = jnp.transpose(a, (1, 2, 3, 0, 4))         # (c2, k*k, oh, n, ow)
    return a.reshape(c2 * k * k, oh * n * ow).astype(jnp.bfloat16)


def discriminator_forward(prep, cfg, x, y):
    """x, y: (N, C, H, W) float32 NCHW.  Returns (N, 1, hf, hf) NCHW, like PyTorch."""
    batch = cfg["batch"]
    hf = cfg["hf"]
    at0 = _initial_patches(x, y)

    args = [at0, prep["w0"], prep["b0"]]
    for w2, gb, s in prep["blocks"]:
        args += [w2, gb, s]
    args += [prep["wf"], prep["bf"], prep["sf"], prep["pmat"]]

    kernel = functools.partial(_fused_disc_kernel, batch=batch,
                               block_dims=cfg["block_dims"],
                               final_dims=cfg["final_dims"])
    return pl.pallas_call(
        kernel,
        out_shape=jax.ShapeDtypeStruct((batch, 1, hf, hf), jnp.float32),
        grid=(1,),
        in_specs=[pl.BlockSpec(a.shape, lambda i: (0, 0)) for a in args],
        out_specs=pl.BlockSpec((batch, 1, hf, hf), lambda i: (0, 0, 0, 0)),
        compiler_params=pltpu.CompilerParams(dimension_semantics=("arbitrary",)),
    )(*args)


# ----------------------------- pure-JAX reference ---------------------------


def _conv2d_ref(x, w, b, stride, padding, pad_mode):
    if padding > 0:
        x = jnp.pad(x, ((0, 0), (0, 0), (padding, padding), (padding, padding)),
                    mode=pad_mode)
    out = jax.lax.conv_general_dilated(
        x, w, window_strides=(stride, stride), padding="VALID",
        dimension_numbers=("NCHW", "OIHW", "NCHW"))
    if b is not None:
        out = out + b.reshape(1, -1, 1, 1)
    return out


def reference_forward(params, x, y):
    z = jnp.concatenate([x, y], axis=1)
    z = _conv2d_ref(z, params["initial_w"], params["initial_b"], 2, 1, "reflect")
    z = jnp.where(z >= 0, z, LEAK * z)
    for blk in params["blocks"]:
        z = _conv2d_ref(z, blk["w"], None, blk["stride"], 0, "constant")
        mean = jnp.mean(z, axis=(0, 2, 3), keepdims=True)
        var = jnp.mean((z - mean) ** 2, axis=(0, 2, 3), keepdims=True)
        z = (z - mean) * jax.lax.rsqrt(var + EPS)
        z = z * blk["gamma"].reshape(1, -1, 1, 1) + blk["beta"].reshape(1, -1, 1, 1)
        z = jnp.where(z >= 0, z, LEAK * z)
    return _conv2d_ref(z, params["final_w"], params["final_b"], 1, 1, "reflect")


# -------------------------------- parameters --------------------------------


def init_params(key, in_channels=3, features=(8, 16, 32, 64)):
    """Deterministic synthetic init (shapes match the nn.Module __init__)."""
    n_blocks = len(features) - 1
    keys = jax.random.split(key, 2 + n_blocks + 2)
    ki = iter(range(len(keys)))
    params = {}
    params["initial_w"] = 0.02 * jax.random.normal(
        keys[next(ki)], (features[0], in_channels * 2, 4, 4), jnp.float32)
    params["initial_b"] = 0.02 * jax.random.normal(
        keys[next(ki)], (features[0],), jnp.float32)
    blocks = []
    in_c = features[0]
    for feature in features[1:]:
        stride = 1 if feature == features[-1] else 2
        w = 0.02 * jax.random.normal(keys[next(ki)], (feature, in_c, 4, 4), jnp.float32)
        blocks.append({
            "w": w,
            "gamma": jnp.ones((feature,), jnp.float32),
            "beta": jnp.zeros((feature,), jnp.float32),
            "stride": stride,
        })
        in_c = feature
    params["blocks"] = blocks
    params["final_w"] = 0.02 * jax.random.normal(
        keys[next(ki)], (1, in_c, 4, 4), jnp.float32)
    params["final_b"] = 0.02 * jax.random.normal(keys[next(ki)], (1,), jnp.float32)
    return params


if __name__ == "__main__":
    key = jax.random.PRNGKey(0)
    kp, kx, ky = jax.random.split(key, 3)

    N, C, H, W = 2, 3, 64, 64   # deep enough to survive the un-padded stride-2 convs
    params = init_params(kp, in_channels=C, features=(8, 16, 32, 64))
    prep, cfg = prepare_params(params, N, H, W)

    x = jax.random.normal(kx, (N, C, H, W), jnp.float32)
    y = jax.random.normal(ky, (N, C, H, W), jnp.float32)

    fwd = jax.jit(lambda xx, yy: discriminator_forward(prep, cfg, xx, yy))
    out = fwd(x, y)
    jax.block_until_ready(out)

    assert out.shape == (N, 1, cfg["hf"], cfg["hf"]), out.shape
    assert bool(jnp.all(jnp.isfinite(out)))

    ref = jax.jit(lambda xx, yy: reference_forward(params, xx, yy))(x, y)
    jax.block_until_ready(ref)
    max_err = float(jnp.max(jnp.abs(out - ref)))
    assert max_err < 5e-2, f"mismatch vs reference: {max_err}"

    print("KERNEL_OK")
</pallas_src>

<mosaic_0001>
module attributes {stable_mosaic.version = 11 : i64} {
  func.func @_fused_disc_kernel(%arg0: i32, %arg1: memref<96x2048xbf16, #tpu.memory_space<vmem>>, %arg2: memref<8x96xbf16, #tpu.memory_space<vmem>>, %arg3: memref<8x1xf32, #tpu.memory_space<vmem>>, %arg4: memref<16x128xf32, #tpu.memory_space<vmem>>, %arg5: memref<16x2xf32, #tpu.memory_space<vmem>>, %arg6: memref<64x120xf32, #tpu.memory_space<vmem>>, %arg7: memref<32x256xf32, #tpu.memory_space<vmem>>, %arg8: memref<32x2xf32, #tpu.memory_space<vmem>>, %arg9: memref<30x48xf32, #tpu.memory_space<vmem>>, %arg10: memref<64x512xf32, #tpu.memory_space<vmem>>, %arg11: memref<64x2xf32, #tpu.memory_space<vmem>>, %arg12: memref<12x24xf32, #tpu.memory_space<vmem>>, %arg13: memref<1x1024xf32, #tpu.memory_space<vmem>>, %arg14: memref<1x1xf32, #tpu.memory_space<vmem>>, %arg15: memref<10x16xf32, #tpu.memory_space<vmem>>, %arg16: memref<18x50xf32, #tpu.memory_space<vmem>>, %arg17: memref<2x1x2x2xf32, #tpu.memory_space<vmem>>) attributes {dimension_semantics = [#tpu.dimension_semantics<arbitrary>], iteration_bounds = array<i64: 1>, scalar_prefetch = 0 : i64, scratch_operands = 0 : i64, tpu.core_type = #tpu.core_type<tc>, window_params = [{pipeline_mode = #tpu.pipeline_mode<synchronous>, transform_indices = @transform_0, window_bounds = array<i64: 96, 2048>}, {pipeline_mode = #tpu.pipeline_mode<synchronous>, transform_indices = @transform_1, window_bounds = array<i64: 8, 96>}, {pipeline_mode = #tpu.pipeline_mode<synchronous>, transform_indices = @transform_2, window_bounds = array<i64: 8, 1>}, {pipeline_mode = #tpu.pipeline_mode<synchronous>, transform_indices = @transform_3, window_bounds = array<i64: 16, 128>}, {pipeline_mode = #tpu.pipeline_mode<synchronous>, transform_indices = @transform_4, window_bounds = array<i64: 16, 2>}, {pipeline_mode = #tpu.pipeline_mode<synchronous>, transform_indices = @transform_5, window_bounds = array<i64: 64, 120>}, {pipeline_mode = #tpu.pipeline_mode<synchronous>, transform_indices = @transform_6, window_bounds = array<i64: 32, 256>}, {pipeline_mode = #tpu.pipeline_mode<synchronous>, transform_indices = @transform_7, window_bounds = array<i64: 32, 2>}, {pipeline_mode = #tpu.pipeline_mode<synchronous>, transform_indices = @transform_8, window_bounds = array<i64: 30, 48>}, {pipeline_mode = #tpu.pipeline_mode<synchronous>, transform_indices = @transform_9, window_bounds = array<i64: 64, 512>}, {pipeline_mode = #tpu.pipeline_mode<synchronous>, transform_indices = @transform_10, window_bounds = array<i64: 64, 2>}, {pipeline_mode = #tpu.pipeline_mode<synchronous>, transform_indices = @transform_11, window_bounds = array<i64: 12, 24>}, {pipeline_mode = #tpu.pipeline_mode<synchronous>, transform_indices = @transform_12, window_bounds = array<i64: 1, 1024>}, {pipeline_mode = #tpu.pipeline_mode<synchronous>, transform_indices = @transform_13, window_bounds = array<i64: 1, 1>}, {pipeline_mode = #tpu.pipeline_mode<synchronous>, transform_indices = @transform_14, window_bounds = array<i64: 10, 16>}, {pipeline_mode = #tpu.pipeline_mode<synchronous>, transform_indices = @transform_15, window_bounds = array<i64: 18, 50>}, {pipeline_mode = #tpu.pipeline_mode<synchronous>, transform_indices = @transform_16, window_bounds = array<i64: 2, 1, 2, 2>}]} {
    %c0 = arith.constant 0 : index
    %c0_0 = arith.constant 0 : index
    %0 = vector.load %arg2[%c0, %c0_0] : memref<8x96xbf16, #tpu.memory_space<vmem>>, vector<8x96xbf16>
    %c0_1 = arith.constant 0 : index
    %c0_2 = arith.constant 0 : index
    %1 = vector.load %arg1[%c0_1, %c0_2] : memref<96x2048xbf16, #tpu.memory_space<vmem>>, vector<96x2048xbf16>
    %cst = arith.constant dense<0.000000e+00> : vector<8x2048xf32>
    %2 = tpu.matmul %0, %1, %cst {dimension_numbers = #tpu.dot_dimension_numbers<[1], [0], [0], [1], [0, 0, 1, 1], [], []>} : vector<8x96xbf16>, vector<96x2048xbf16>, vector<8x2048xf32> -> vector<8x2048xf32>
    %c0_3 = arith.constant 0 : index
    %c0_4 = arith.constant 0 : index
    %3 = vector.load %arg3[%c0_3, %c0_4] : memref<8x1xf32, #tpu.memory_space<vmem>>, vector<8x1xf32>
    %4 = vector.broadcast %3 : vector<8x1xf32> to vector<8x2048xf32>
    %5 = arith.addf %2, %4 : vector<8x2048xf32>
    %cst_5 = arith.constant 0.000000e+00 : f32
    %6 = vector.broadcast %cst_5 : f32 to vector<8x2048xf32>
    %7 = arith.cmpf oge, %5, %6 : vector<8x2048xf32>
    %cst_6 = arith.constant 2.000000e-01 : f32
    %8 = vector.broadcast %cst_6 : f32 to vector<8x2048xf32>
    %9 = arith.mulf %8, %5 : vector<8x2048xf32>
    %10 = arith.select %7, %5, %9 : vector<8x2048xi1>, vector<8x2048xf32>
    %c0_7 = arith.constant 0 : index
    %c0_8 = arith.constant 0 : index
    %11 = vector.load %arg4[%c0_7, %c0_8] : memref<16x128xf32, #tpu.memory_space<vmem>>, vector<16x128xf32>
    %c0_9 = arith.constant 0 : index
    %c0_10 = arith.constant 0 : index
    %12 = vector.load %arg6[%c0_9, %c0_10] : memref<64x120xf32, #tpu.memory_space<vmem>>, vector<64x120xf32>
    %13 = vector.extract_strided_slice %10 {offsets = [0, 0], sizes = [8, 64], strides = [1, 1]} : vector<8x2048xf32> to vector<8x64xf32>
    %cst_11 = arith.constant dense<0.000000e+00> : vector<8x120xf32>
    %14 = tpu.matmul %13, %12, %cst_11 {dimension_numbers = #tpu.dot_dimension_numbers<[1], [0], [0], [1], [0, 0, 1, 1], [], []>} : vector<8x64xf32>, vector<64x120xf32>, vector<8x120xf32> -> vector<8x120xf32>
    %15 = vector.extract_strided_slice %14 {offsets = [0, 0], sizes = [8, 30], strides = [1, 1]} : vector<8x120xf32> to vector<8x30xf32>
    %16 = vector.extract_strided_slice %14 {offsets = [0, 30], sizes = [8, 30], strides = [1, 1]} : vector<8x120xf32> to vector<8x30xf32>
    %17 = vector.extract_strided_slice %14 {offsets = [0, 60], sizes = [8, 30], strides = [1, 1]} : vector<8x120xf32> to vector<8x30xf32>
    %18 = vector.extract_strided_slice %14 {offsets = [0, 90], sizes = [8, 30], strides = [1, 1]} : vector<8x120xf32> to vector<8x30xf32>
    %19 = vector.extract_strided_slice %10 {offsets = [0, 64], sizes = [8, 64], strides = [1, 1]} : vector<8x2048xf32> to vector<8x64xf32>
    %cst_12 = arith.constant dense<0.000000e+00> : vector<8x120xf32>
    %20 = tpu.matmul %19, %12, %cst_12 {dimension_numbers = #tpu.dot_dimension_numbers<[1], [0], [0], [1], [0, 0, 1, 1], [], []>} : vector<8x64xf32>, vector<64x120xf32>, vector<8x120xf32> -> vector<8x120xf32>
    %21 = vector.extract_strided_slice %20 {offsets = [0, 0], sizes = [8, 30], strides = [1, 1]} : vector<8x120xf32> to vector<8x30xf32>
    %22 = vector.extract_strided_slice %20 {offsets = [0, 30], sizes = [8, 30], strides = [1, 1]} : vector<8x120xf32> to vector<8x30xf32>
    %23 = vector.extract_strided_slice %20 {offsets = [0, 60], sizes = [8, 30], strides = [1, 1]} : vector<8x120xf32> to vector<8x30xf32>
    %24 = vector.extract_strided_slice %20 {offsets = [0, 90], sizes = [8, 30], strides = [1, 1]} : vector<8x120xf32> to vector<8x30xf32>
    %25 = vector.extract_strided_slice %10 {offsets = [0, 128], sizes = [8, 64], strides = [1, 1]} : vector<8x2048xf32> to vector<8x64xf32>
    %cst_13 = arith.constant dense<0.000000e+00> : vector<8x120xf32>
    %26 = tpu.matmul %25, %12, %cst_13 {dimension_numbers = #tpu.dot_dimension_numbers<[1], [0], [0], [1], [0, 0, 1, 1], [], []>} : vector<8x64xf32>, vector<64x120xf32>, vector<8x120xf32> -> vector<8x120xf32>
    %27 = vector.extract_strided_slice %26 {offsets = [0, 0], sizes = [8, 30], strides = [1, 1]} : vector<8x120xf32> to vector<8x30xf32>
    %28 = vector.extract_strided_slice %26 {offsets = [0, 30], sizes = [8, 30], strides = [1, 1]} : vector<8x120xf32> to vector<8x30xf32>
    %29 = vector.extract_strided_slice %26 {offsets = [0, 60], sizes = [8, 30], strides = [1, 1]} : vector<8x120xf32> to vector<8x30xf32>
    %30 = vector.extract_strided_slice %26 {offsets = [0, 90], sizes = [8, 30], strides = [1, 1]} : vector<8x120xf32> to vector<8x30xf32>
    %31 = vector.extract_strided_slice %10 {offsets = [0, 192], sizes = [8, 64], strides = [1, 1]} : vector<8x2048xf32> to vector<8x64xf32>
    %cst_14 = arith.constant dense<0.000000e+00> : vector<8x120xf32>
    %32 = tpu.matmul %31, %12, %cst_14 {dimension_numbers = #tpu.dot_dimension_numbers<[1], [0], [0], [1], [0, 0, 1, 1], [], []>} : vector<8x64xf32>, vector<64x120xf32>, vector<8x120xf32> -> vector<8x120xf32>
    %33 = vector.extract_strided_slice %32 {offsets = [0, 0], sizes = [8, 30], strides = [1, 1]} : vector<8x120xf32> to vector<8x30xf32>
    %34 = vector.extract_strided_slice %32 {offsets = [0, 30], sizes = [8, 30], strides = [1, 1]} : vector<8x120xf32> to vector<8x30xf32>
    %35 = vector.extract_strided_slice %32 {offsets = [0, 60], sizes = [8, 30], strides = [1, 1]} : vector<8x120xf32> to vector<8x30xf32>
    %36 = vector.extract_strided_slice %32 {offsets = [0, 90], sizes = [8, 30], strides = [1, 1]} : vector<8x120xf32> to vector<8x30xf32>
    %37 = tpu.concatenate %15, %16, %17, %18, %21, %22, %23, %24, %27, %28, %29, %30, %33, %34, %35, %36 in 0 : vector<8x30xf32>, vector<8x30xf32>, vector<8x30xf32>, vector<8x30xf32>, vector<8x30xf32>, vector<8x30xf32>, vector<8x30xf32>, vector<8x30xf32>, vector<8x30xf32>, vector<8x30xf32>, vector<8x30xf32>, vector<8x30xf32>, vector<8x30xf32>, vector<8x30xf32>, vector<8x30xf32>, vector<8x30xf32> -> vector<128x30xf32>
    %cst_15 = arith.constant dense<0.000000e+00> : vector<16x30xf32>
    %38 = tpu.matmul %11, %37, %cst_15 {dimension_numbers = #tpu.dot_dimension_numbers<[1], [0], [0], [1], [0, 0, 1, 1], [], []>} : vector<16x128xf32>, vector<128x30xf32>, vector<16x30xf32> -> vector<16x30xf32>
    %39 = vector.extract_strided_slice %10 {offsets = [0, 128], sizes = [8, 64], strides = [1, 1]} : vector<8x2048xf32> to vector<8x64xf32>
    %cst_16 = arith.constant dense<0.000000e+00> : vector<8x120xf32>
    %40 = tpu.matmul %39, %12, %cst_16 {dimension_numbers = #tpu.dot_dimension_numbers<[1], [0], [0], [1], [0, 0, 1, 1], [], []>} : vector<8x64xf32>, vector<64x120xf32>, vector<8x120xf32> -> vector<8x120xf32>
    %41 = vector.extract_strided_slice %40 {offsets = [0, 0], sizes = [8, 30], strides = [1, 1]} : vector<8x120xf32> to vector<8x30xf32>
    %42 = vector.extract_strided_slice %40 {offsets = [0, 30], sizes = [8, 30], strides = [1, 1]} : vector<8x120xf32> to vector<8x30xf32>
    %43 = vector.extract_strided_slice %40 {offsets = [0, 60], sizes = [8, 30], strides = [1, 1]} : vector<8x120xf32> to vector<8x30xf32>
    %44 = vector.extract_strided_slice %40 {offsets = [0, 90], sizes = [8, 30], strides = [1, 1]} : vector<8x120xf32> to vector<8x30xf32>
    %45 = vector.extract_strided_slice %10 {offsets = [0, 192], sizes = [8, 64], strides = [1, 1]} : vector<8x2048xf32> to vector<8x64xf32>
    %cst_17 = arith.constant dense<0.000000e+00> : vector<8x120xf32>
    %46 = tpu.matmul %45, %12, %cst_17 {dimension_numbers = #tpu.dot_dimension_numbers<[1], [0], [0], [1], [0, 0, 1, 1], [], []>} : vector<8x64xf32>, vector<64x120xf32>, vector<8x120xf32> -> vector<8x120xf32>
    %47 = vector.extract_strided_slice %46 {offsets = [0, 0], sizes = [8, 30], strides = [1, 1]} : vector<8x120xf32> to vector<8x30xf32>
    %48 = vector.extract_strided_slice %46 {offsets = [0, 30], sizes = [8, 30], strides = [1, 1]} : vector<8x120xf32> to vector<8x30xf32>
    %49 = vector.extract_strided_slice %46 {offsets = [0, 60], sizes = [8, 30], strides = [1, 1]} : vector<8x120xf32> to vector<8x30xf32>
    %50 = vector.extract_strided_slice %46 {offsets = [0, 90], sizes = [8, 30], strides = [1, 1]} : vector<8x120xf32> to vector<8x30xf32>
    %51 = vector.extract_strided_slice %10 {offsets = [0, 256], sizes = [8, 64], strides = [1, 1]} : vector<8x2048xf32> to vector<8x64xf32>
    %cst_18 = arith.constant dense<0.000000e+00> : vector<8x120xf32>
    %52 = tpu.matmul %51, %12, %cst_18 {dimension_numbers = #tpu.dot_dimension_numbers<[1], [0], [0], [1], [0, 0, 1, 1], [], []>} : vector<8x64xf32>, vector<64x120xf32>, vector<8x120xf32> -> vector<8x120xf32>
    %53 = vector.extract_strided_slice %52 {offsets = [0, 0], sizes = [8, 30], strides = [1, 1]} : vector<8x120xf32> to vector<8x30xf32>
    %54 = vector.extract_strided_slice %52 {offsets = [0, 30], sizes = [8, 30], strides = [1, 1]} : vector<8x120xf32> to vector<8x30xf32>
    %55 = vector.extract_strided_slice %52 {offsets = [0, 60], sizes = [8, 30], strides = [1, 1]} : vector<8x120xf32> to vector<8x30xf32>
    %56 = vector.extract_strided_slice %52 {offsets = [0, 90], sizes = [8, 30], strides = [1, 1]} : vector<8x120xf32> to vector<8x30xf32>
    %57 = vector.extract_strided_slice %10 {offsets = [0, 320], sizes = [8, 64], strides = [1, 1]} : vector<8x2048xf32> to vector<8x64xf32>
    %cst_19 = arith.constant dense<0.000000e+00> : vector<8x120xf32>
    %58 = tpu.matmul %57, %12, %cst_19 {dimension_numbers = #tpu.dot_dimension_numbers<[1], [0], [0], [1], [0, 0, 1, 1], [], []>} : vector<8x64xf32>, vector<64x120xf32>, vector<8x120xf32> -> vector<8x120xf32>
    %59 = vector.extract_strided_slice %58 {offsets = [0, 0], sizes = [8, 30], strides = [1, 1]} : vector<8x120xf32> to vector<8x30xf32>
    %60 = vector.extract_strided_slice %58 {offsets = [0, 30], sizes = [8, 30], strides = [1, 1]} : vector<8x120xf32> to vector<8x30xf32>
    %61 = vector.extract_strided_slice %58 {offsets = [0, 60], sizes = [8, 30], strides = [1, 1]} : vector<8x120xf32> to vector<8x30xf32>
    %62 = vector.extract_strided_slice %58 {offsets = [0, 90], sizes = [8, 30], strides = [1, 1]} : vector<8x120xf32> to vector<8x30xf32>
    %63 = tpu.concatenate %41, %42, %43, %44, %47, %48, %49, %50, %53, %54, %55, %56, %59, %60, %61, %62 in 0 : vector<8x30xf32>, vector<8x30xf32>, vector<8x30xf32>, vector<8x30xf32>, vector<8x30xf32>, vector<8x30xf32>, vector<8x30xf32>, vector<8x30xf32>, vector<8x30xf32>, vector<8x30xf32>, vector<8x30xf32>, vector<8x30xf32>, vector<8x30xf32>, vector<8x30xf32>, vector<8x30xf32>, vector<8x30xf32> -> vector<128x30xf32>
    %cst_20 = arith.constant dense<0.000000e+00> : vector<16x30xf32>
    %64 = tpu.matmul %11, %63, %cst_20 {dimension_numbers = #tpu.dot_dimension_numbers<[1], [0], [0], [1], [0, 0, 1, 1], [], []>} : vector<16x128xf32>, vector<128x30xf32>, vector<16x30xf32> -> vector<16x30xf32>
    %65 = vector.extract_strided_slice %10 {offsets = [0, 256], sizes = [8, 64], strides = [1, 1]} : vector<8x2048xf32> to vector<8x64xf32>
    %cst_21 = arith.constant dense<0.000000e+00> : vector<8x120xf32>
    %66 = tpu.matmul %65, %12, %cst_21 {dimension_numbers = #tpu.dot_dimension_numbers<[1], [0], [0], [1], [0, 0, 1, 1], [], []>} : vector<8x64xf32>, vector<64x120xf32>, vector<8x120xf32> -> vector<8x120xf32>
    %67 = vector.extract_strided_slice %66 {offsets = [0, 0], sizes = [8, 30], strides = [1, 1]} : vector<8x120xf32> to vector<8x30xf32>
    %68 = vector.extract_strided_slice %66 {offsets = [0, 30], sizes = [8, 30], strides = [1, 1]} : vector<8x120xf32> to vector<8x30xf32>
    %69 = vector.extract_strided_slice %66 {offsets = [0, 60], sizes = [8, 30], strides = [1, 1]} : vector<8x120xf32> to vector<8x30xf32>
    %70 = vector.extract_strided_slice %66 {offsets = [0, 90], sizes = [8, 30], strides = [1, 1]} : vector<8x120xf32> to vector<8x30xf32>
    %71 = vector.extract_strided_slice %10 {offsets = [0, 320], sizes = [8, 64], strides = [1, 1]} : vector<8x2048xf32> to vector<8x64xf32>
    %cst_22 = arith.constant dense<0.000000e+00> : vector<8x120xf32>
    %72 = tpu.matmul %71, %12, %cst_22 {dimension_numbers = #tpu.dot_dimension_numbers<[1], [0], [0], [1], [0, 0, 1, 1], [], []>} : vector<8x64xf32>, vector<64x120xf32>, vector<8x120xf32> -> vector<8x120xf32>
    %73 = vector.extract_strided_slice %72 {offsets = [0, 0], sizes = [8, 30], strides = [1, 1]} : vector<8x120xf32> to vector<8x30xf32>
    %74 = vector.extract_strided_slice %72 {offsets = [0, 30], sizes = [8, 30], strides = [1, 1]} : vector<8x120xf32> to vector<8x30xf32>
    %75 = vector.extract_strided_slice %72 {offsets = [0, 60], sizes = [8, 30], strides = [1, 1]} : vector<8x120xf32> to vector<8x30xf32>
    %76 = vector.extract_strided_slice %72 {offsets = [0, 90], sizes = [8, 30], strides = [1, 1]} : vector<8x120xf32> to vector<8x30xf32>
    %77 = vector.extract_strided_slice %10 {offsets = [0, 384], sizes = [8, 64], strides = [1, 1]} : vector<8x2048xf32> to vector<8x64xf32>
    %cst_23 = arith.constant dense<0.000000e+00> : vector<8x120xf32>
    %78 = tpu.matmul %77, %12, %cst_23 {dimension_numbers = #tpu.dot_dimension_numbers<[1], [0], [0], [1], [0, 0, 1, 1], [], []>} : vector<8x64xf32>, vector<64x120xf32>, vector<8x120xf32> -> vector<8x120xf32>
    %79 = vector.extract_strided_slice %78 {offsets = [0, 0], sizes = [8, 30], strides = [1, 1]} : vector<8x120xf32> to vector<8x30xf32>
    %80 = vector.extract_strided_slice %78 {offsets = [0, 30], sizes = [8, 30], strides = [1, 1]} : vector<8x120xf32> to vector<8x30xf32>
    %81 = vector.extract_strided_slice %78 {offsets = [0, 60], sizes = [8, 30], strides = [1, 1]} : vector<8x120xf32> to vector<8x30xf32>
    %82 = vector.extract_strided_slice %78 {offsets = [0, 90], sizes = [8, 30], strides = [1, 1]} : vector<8x120xf32> to vector<8x30xf32>
    %83 = vector.extract_strided_slice %10 {offsets = [0, 448], sizes = [8, 64], strides = [1, 1]} : vector<8x2048xf32> to vector<8x64xf32>
    %cst_24 = arith.constant dense<0.000000e+00> : vector<8x120xf32>
    %84 = tpu.matmul %83, %12, %cst_24 {dimension_numbers = #tpu.dot_dimension_numbers<[1], [0], [0], [1], [0, 0, 1, 1], [], []>} : vector<8x64xf32>, vector<64x120xf32>, vector<8x120xf32> -> vector<8x120xf32>
    %85 = vector.extract_strided_slice %84 {offsets = [0, 0], sizes = [8, 30], strides = [1, 1]} : vector<8x120xf32> to vector<8x30xf32>
    %86 = vector.extract_strided_slice %84 {offsets = [0, 30], sizes = [8, 30], strides = [1, 1]} : vector<8x120xf32> to vector<8x30xf32>
    %87 = vector.extract_strided_slice %84 {offsets = [0, 60], sizes = [8, 30], strides = [1, 1]} : vector<8x120xf32> to vector<8x30xf32>
    %88 = vector.extract_strided_slice %84 {offsets = [0, 90], sizes = [8, 30], strides = [1, 1]} : vector<8x120xf32> to vector<8x30xf32>
    %89 = tpu.concatenate %67, %68, %69, %70, %73, %74, %75, %76, %79, %80, %81, %82, %85, %86, %87, %88 in 0 : vector<8x30xf32>, vector<8x30xf32>, vector<8x30xf32>, vector<8x30xf32>, vector<8x30xf32>, vector<8x30xf32>, vector<8x30xf32>, vector<8x30xf32>, vector<8x30xf32>, vector<8x30xf32>, vector<8x30xf32>, vector<8x30xf32>, vector<8x30xf32>, vector<8x30xf32>, vector<8x30xf32>, vector<8x30xf32> -> vector<128x30xf32>
    %cst_25 = arith.constant dense<0.000000e+00> : vector<16x30xf32>
    %90 = tpu.matmul %11, %89, %cst_25 {dimension_numbers = #tpu.dot_dimension_numbers<[1], [0], [0], [1], [0, 0, 1, 1], [], []>} : vector<16x128xf32>, vector<128x30xf32>, vector<16x30xf32> -> vector<16x30xf32>
    %91 = vector.extract_strided_slice %10 {offsets = [0, 384], sizes = [8, 64], strides = [1, 1]} : vector<8x2048xf32> to vector<8x64xf32>
    %cst_26 = arith.constant dense<0.000000e+00> : vector<8x120xf32>
    %92 = tpu.matmul %91, %12, %cst_26 {dimension_numbers = #tpu.dot_dimension_numbers<[1], [0], [0], [1], [0, 0, 1, 1], [], []>} : vector<8x64xf32>, vector<64x120xf32>, vector<8x120xf32> -> vector<8x120xf32>
    %93 = vector.extract_strided_slice %92 {offsets = [0, 0], sizes = [8, 30], strides = [1, 1]} : vector<8x120xf32> to vector<8x30xf32>
    %94 = vector.extract_strided_slice %92 {offsets = [0, 30], sizes = [8, 30], strides = [1, 1]} : vector<8x120xf32> to vector<8x30xf32>
    %95 = vector.extract_strided_slice %92 {offsets = [0, 60], sizes = [8, 30], strides = [1, 1]} : vector<8x120xf32> to vector<8x30xf32>
    %96 = vector.extract_strided_slice %92 {offsets = [0, 90], sizes = [8, 30], strides = [1, 1]} : vector<8x120xf32> to vector<8x30xf32>
    %97 = vector.extract_strided_slice %10 {offsets = [0, 448], sizes = [8, 64], strides = [1, 1]} : vector<8x2048xf32> to vector<8x64xf32>
    %cst_27 = arith.constant dense<0.000000e+00> : vector<8x120xf32>
    %98 = tpu.matmul %97, %12, %cst_27 {dimension_numbers = #tpu.dot_dimension_numbers<[1], [0], [0], [1], [0, 0, 1, 1], [], []>} : vector<8x64xf32>, vector<64x120xf32>, vector<8x120xf32> -> vector<8x120xf32>
    %99 = vector.extract_strided_slice %98 {offsets = [0, 0], sizes = [8, 30], strides = [1, 1]} : vector<8x120xf32> to vector<8x30xf32>
    %100 = vector.extract_strided_slice %98 {offsets = [0, 30], sizes = [8, 30], strides = [1, 1]} : vector<8x120xf32> to vector<8x30xf32>
    %101 = vector.extract_strided_slice %98 {offsets = [0, 60], sizes = [8, 30], strides = [1, 1]} : vector<8x120xf32> to vector<8x30xf32>
    %102 = vector.extract_strided_slice %98 {offsets = [0, 90], sizes = [8, 30], strides = [1, 1]} : vector<8x120xf32> to vector<8x30xf32>
    %103 = vector.extract_strided_slice %10 {offsets = [0, 512], sizes = [8, 64], strides = [1, 1]} : vector<8x2048xf32> to vector<8x64xf32>
    %cst_28 = arith.constant dense<0.000000e+00> : vector<8x120xf32>
    %104 = tpu.matmul %103, %12, %cst_28 {dimension_numbers = #tpu.dot_dimension_numbers<[1], [0], [0], [1], [0, 0, 1, 1], [], []>} : vector<8x64xf32>, vector<64x120xf32>, vector<8x120xf32> -> vector<8x120xf32>
    %105 = vector.extract_strided_slice %104 {offsets = [0, 0], sizes = [8, 30], strides = [1, 1]} : vector<8x120xf32> to vector<8x30xf32>
    %106 = vector.extract_strided_slice %104 {offsets = [0, 30], sizes = [8, 30], strides = [1, 1]} : vector<8x120xf32> to vector<8x30xf32>
    %107 = vector.extract_strided_slice %104 {offsets = [0, 60], sizes = [8, 30], strides = [1, 1]} : vector<8x120xf32> to vector<8x30xf32>
    %108 = vector.extract_strided_slice %104 {offsets = [0, 90], sizes = [8, 30], strides = [1, 1]} : vector<8x120xf32> to vector<8x30xf32>
    %109 = vector.extract_strided_slice %10 {offsets = [0, 576], sizes = [8, 64], strides = [1, 1]} : vector<8x2048xf32> to vector<8x64xf32>
    %cst_29 = arith.constant dense<0.000000e+00> : vector<8x120xf32>
    %110 = tpu.matmul %109, %12, %cst_29 {dimension_numbers = #tpu.dot_dimension_numbers<[1], [0], [0], [1], [0, 0, 1, 1], [], []>} : vector<8x64xf32>, vector<64x120xf32>, vector<8x120xf32> -> vector<8x120xf32>
    %111 = vector.extract_strided_slice %110 {offsets = [0, 0], sizes = [8, 30], strides = [1, 1]} : vector<8x120xf32> to vector<8x30xf32>
    %112 = vector.extract_strided_slice %110 {offsets = [0, 30], sizes = [8, 30], strides = [1, 1]} : vector<8x120xf32> to vector<8x30xf32>
    %113 = vector.extract_strided_slice %110 {offsets = [0, 60], sizes = [8, 30], strides = [1, 1]} : vector<8x120xf32> to vector<8x30xf32>
    %114 = vector.extract_strided_slice %110 {offsets = [0, 90], sizes = [8, 30], strides = [1, 1]} : vector<8x120xf32> to vector<8x30xf32>
    %115 = tpu.concatenate %93, %94, %95, %96, %99, %100, %101, %102, %105, %106, %107, %108, %111, %112, %113, %114 in 0 : vector<8x30xf32>, vector<8x30xf32>, vector<8x30xf32>, vector<8x30xf32>, vector<8x30xf32>, vector<8x30xf32>, vector<8x30xf32>, vector<8x30xf32>, vector<8x30xf32>, vector<8x30xf32>, vector<8x30xf32>, vector<8x30xf32>, vector<8x30xf32>, vector<8x30xf32>, vector<8x30xf32>, vector<8x30xf32> -> vector<128x30xf32>
    %cst_30 = arith.constant dense<0.000000e+00> : vector<16x30xf32>
    %116 = tpu.matmul %11, %115, %cst_30 {dimension_numbers = #tpu.dot_dimension_numbers<[1], [0], [0], [1], [0, 0, 1, 1], [], []>} : vector<16x128xf32>, vector<128x30xf32>, vector<16x30xf32> -> vector<16x30xf32>
    %117 = vector.extract_strided_slice %10 {offsets = [0, 512], sizes = [8, 64], strides = [1, 1]} : vector<8x2048xf32> to vector<8x64xf32>
    %cst_31 = arith.constant dense<0.000000e+00> : vector<8x120xf32>
    %118 = tpu.matmul %117, %12, %cst_31 {dimension_numbers = #tpu.dot_dimension_numbers<[1], [0], [0], [1], [0, 0, 1, 1], [], []>} : vector<8x64xf32>, vector<64x120xf32>, vector<8x120xf32> -> vector<8x120xf32>
    %119 = vector.extract_strided_slice %118 {offsets = [0, 0], sizes = [8, 30], strides = [1, 1]} : vector<8x120xf32> to vector<8x30xf32>
    %120 = vector.extract_strided_slice %118 {offsets = [0, 30], sizes = [8, 30], strides = [1, 1]} : vector<8x120xf32> to vector<8x30xf32>
    %121 = vector.extract_strided_slice %118 {offsets = [0, 60], sizes = [8, 30], strides = [1, 1]} : vector<8x120xf32> to vector<8x30xf32>
    %122 = vector.extract_strided_slice %118 {offsets = [0, 90], sizes = [8, 30], strides = [1, 1]} : vector<8x120xf32> to vector<8x30xf32>
    %123 = vector.extract_strided_slice %10 {offsets = [0, 576], sizes = [8, 64], strides = [1, 1]} : vector<8x2048xf32> to vector<8x64xf32>
    %cst_32 = arith.constant dense<0.000000e+00> : vector<8x120xf32>
    %124 = tpu.matmul %123, %12, %cst_32 {dimension_numbers = #tpu.dot_dimension_numbers<[1], [0], [0], [1], [0, 0, 1, 1], [], []>} : vector<8x64xf32>, vector<64x120xf32>, vector<8x120xf32> -> vector<8x120xf32>
    %125 = vector.extract_strided_slice %124 {offsets = [0, 0], sizes = [8, 30], strides = [1, 1]} : vector<8x120xf32> to vector<8x30xf32>
    %126 = vector.extract_strided_slice %124 {offsets = [0, 30], sizes = [8, 30], strides = [1, 1]} : vector<8x120xf32> to vector<8x30xf32>
    %127 = vector.extract_strided_slice %124 {offsets = [0, 60], sizes = [8, 30], strides = [1, 1]} : vector<8x120xf32> to vector<8x30xf32>
    %128 = vector.extract_strided_slice %124 {offsets = [0, 90], sizes = [8, 30], strides = [1, 1]} : vector<8x120xf32> to vector<8x30xf32>
    %129 = vector.extract_strided_slice %10 {offsets = [0, 640], sizes = [8, 64], strides = [1, 1]} : vector<8x2048xf32> to vector<8x64xf32>
    %cst_33 = arith.constant dense<0.000000e+00> : vector<8x120xf32>
    %130 = tpu.matmul %129, %12, %cst_33 {dimension_numbers = #tpu.dot_dimension_numbers<[1], [0], [0], [1], [0, 0, 1, 1], [], []>} : vector<8x64xf32>, vector<64x120xf32>, vector<8x120xf32> -> vector<8x120xf32>
    %131 = vector.extract_strided_slice %130 {offsets = [0, 0], sizes = [8, 30], strides = [1, 1]} : vector<8x120xf32> to vector<8x30xf32>
    %132 = vector.extract_strided_slice %130 {offsets = [0, 30], sizes = [8, 30], strides = [1, 1]} : vector<8x120xf32> to vector<8x30xf32>
    %133 = vector.extract_strided_slice %130 {offsets = [0, 60], sizes = [8, 30], strides = [1, 1]} : vector<8x120xf32> to vector<8x30xf32>
    %134 = vector.extract_strided_slice %130 {offsets = [0, 90], sizes = [8, 30], strides = [1, 1]} : vector<8x120xf32> to vector<8x30xf32>
    %135 = vector.extract_strided_slice %10 {offsets = [0, 704], sizes = [8, 64], strides = [1, 1]} : vector<8x2048xf32> to vector<8x64xf32>
    %cst_34 = arith.constant dense<0.000000e+00> : vector<8x120xf32>
    %136 = tpu.matmul %135, %12, %cst_34 {dimension_numbers = #tpu.dot_dimension_numbers<[1], [0], [0], [1], [0, 0, 1, 1], [], []>} : vector<8x64xf32>, vector<64x120xf32>, vector<8x120xf32> -> vector<8x120xf32>
    %137 = vector.extract_strided_slice %136 {offsets = [0, 0], sizes = [8, 30], strides = [1, 1]} : vector<8x120xf32> to vector<8x30xf32>
    %138 = vector.extract_strided_slice %136 {offsets = [0, 30], sizes = [8, 30], strides = [1, 1]} : vector<8x120xf32> to vector<8x30xf32>
    %139 = vector.extract_strided_slice %136 {offsets = [0, 60], sizes = [8, 30], strides = [1, 1]} : vector<8x120xf32> to vector<8x30xf32>
    %140 = vector.extract_strided_slice %136 {offsets = [0, 90], sizes = [8, 30], strides = [1, 1]} : vector<8x120xf32> to vector<8x30xf32>
    %141 = tpu.concatenate %119, %120, %121, %122, %125, %126, %127, %128, %131, %132, %133, %134, %137, %138, %139, %140 in 0 : vector<8x30xf32>, vector<8x30xf32>, vector<8x30xf32>, vector<8x30xf32>, vector<8x30xf32>, vector<8x30xf32>, vector<8x30xf32>, vector<8x30xf32>, vector<8x30xf32>, vector<8x30xf32>, vector<8x30xf32>, vector<8x30xf32>, vector<8x30xf32>, vector<8x30xf32>, vector<8x30xf32>, vector<8x30xf32> -> vector<128x30xf32>
    %cst_35 = arith.constant dense<0.000000e+00> : vector<16x30xf32>
    %142 = tpu.matmul %11, %141, %cst_35 {dimension_numbers = #tpu.dot_dimension_numbers<[1], [0], [0], [1], [0, 0, 1, 1], [], []>} : vector<16x128xf32>, vector<128x30xf32>, vector<16x30xf32> -> vector<16x30xf32>
    %143 = vector.extract_strided_slice %10 {offsets = [0, 640], sizes = [8, 64], strides = [1, 1]} : vector<8x2048xf32> to vector<8x64xf32>
    %cst_36 = arith.constant dense<0.000000e+00> : vector<8x120xf32>
    %144 = tpu.matmul %143, %12, %cst_36 {dimension_numbers = #tpu.dot_dimension_numbers<[1], [0], [0], [1], [0, 0, 1, 1], [], []>} : vector<8x64xf32>, vector<64x120xf32>, vector<8x120xf32> -> vector<8x120xf32>
    %145 = vector.extract_strided_slice %144 {offsets = [0, 0], sizes = [8, 30], strides = [1, 1]} : vector<8x120xf32> to vector<8x30xf32>
    %146 = vector.extract_strided_slice %144 {offsets = [0, 30], sizes = [8, 30], strides = [1, 1]} : vector<8x120xf32> to vector<8x30xf32>
    %147 = vector.extract_strided_slice %144 {offsets = [0, 60], sizes = [8, 30], strides = [1, 1]} : vector<8x120xf32> to vector<8x30xf32>
    %148 = vector.extract_strided_slice %144 {offsets = [0, 90], sizes = [8, 30], strides = [1, 1]} : vector<8x120xf32> to vector<8x30xf32>
    %149 = vector.extract_strided_slice %10 {offsets = [0, 704], sizes = [8, 64], strides = [1, 1]} : vector<8x2048xf32> to vector<8x64xf32>
    %cst_37 = arith.constant dense<0.000000e+00> : vector<8x120xf32>
    %150 = tpu.matmul %149, %12, %cst_37 {dimension_numbers = #tpu.dot_dimension_numbers<[1], [0], [0], [1], [0, 0, 1, 1], [], []>} : vector<8x64xf32>, vector<64x120xf32>, vector<8x120xf32> -> vector<8x120xf32>
    %151 = vector.extract_strided_slice %150 {offsets = [0, 0], sizes = [8, 30], strides = [1, 1]} : vector<8x120xf32> to vector<8x30xf32>
    %152 = vector.extract_strided_slice %150 {offsets = [0, 30], sizes = [8, 30], strides = [1, 1]} : vector<8x120xf32> to vector<8x30xf32>
    %153 = vector.extract_strided_slice %150 {offsets = [0, 60], sizes = [8, 30], strides = [1, 1]} : vector<8x120xf32> to vector<8x30xf32>
    %154 = vector.extract_strided_slice %150 {offsets = [0, 90], sizes = [8, 30], strides = [1, 1]} : vector<8x120xf32> to vector<8x30xf32>
    %155 = vector.extract_strided_slice %10 {offsets = [0, 768], sizes = [8, 64], strides = [1, 1]} : vector<8x2048xf32> to vector<8x64xf32>
    %cst_38 = arith.constant dense<0.000000e+00> : vector<8x120xf32>
    %156 = tpu.matmul %155, %12, %cst_38 {dimension_numbers = #tpu.dot_dimension_numbers<[1], [0], [0], [1], [0, 0, 1, 1], [], []>} : vector<8x64xf32>, vector<64x120xf32>, vector<8x120xf32> -> vector<8x120xf32>
    %157 = vector.extract_strided_slice %156 {offsets = [0, 0], sizes = [8, 30], strides = [1, 1]} : vector<8x120xf32> to vector<8x30xf32>
    %158 = vector.extract_strided_slice %156 {offsets = [0, 30], sizes = [8, 30], strides = [1, 1]} : vector<8x120xf32> to vector<8x30xf32>
    %159 = vector.extract_strided_slice %156 {offsets = [0, 60], sizes = [8, 30], strides = [1, 1]} : vector<8x120xf32> to vector<8x30xf32>
    %160 = vector.extract_strided_slice %156 {offsets = [0, 90], sizes = [8, 30], strides = [1, 1]} : vector<8x120xf32> to vector<8x30xf32>
    %161 = vector.extract_strided_slice %10 {offsets = [0, 832], sizes = [8, 64], strides = [1, 1]} : vector<8x2048xf32> to vector<8x64xf32>
    %cst_39 = arith.constant dense<0.000000e+00> : vector<8x120xf32>
    %162 = tpu.matmul %161, %12, %cst_39 {dimension_numbers = #tpu.dot_dimension_numbers<[1], [0], [0], [1], [0, 0, 1, 1], [], []>} : vector<8x64xf32>, vector<64x120xf32>, vector<8x120xf32> -> vector<8x120xf32>
    %163 = vector.extract_strided_slice %162 {offsets = [0, 0], sizes = [8, 30], strides = [1, 1]} : vector<8x120xf32> to vector<8x30xf32>
    %164 = vector.extract_strided_slice %162 {offsets = [0, 30], sizes = [8, 30], strides = [1, 1]} : vector<8x120xf32> to vector<8x30xf32>
    %165 = vector.extract_strided_slice %162 {offsets = [0, 60], sizes = [8, 30], strides = [1, 1]} : vector<8x120xf32> to vector<8x30xf32>
    %166 = vector.extract_strided_slice %162 {offsets = [0, 90], sizes = [8, 30], strides = [1, 1]} : vector<8x120xf32> to vector<8x30xf32>
    %167 = tpu.concatenate %145, %146, %147, %148, %151, %152, %153, %154, %157, %158, %159, %160, %163, %164, %165, %166 in 0 : vector<8x30xf32>, vector<8x30xf32>, vector<8x30xf32>, vector<8x30xf32>, vector<8x30xf32>, vector<8x30xf32>, vector<8x30xf32>, vector<8x30xf32>, vector<8x30xf32>, vector<8x30xf32>, vector<8x30xf32>, vector<8x30xf32>, vector<8x30xf32>, vector<8x30xf32>, vector<8x30xf32>, vector<8x30xf32> -> vector<128x30xf32>
    %cst_40 = arith.constant dense<0.000000e+00> : vector<16x30xf32>
    %168 = tpu.matmul %11, %167, %cst_40 {dimension_numbers = #tpu.dot_dimension_numbers<[1], [0], [0], [1], [0, 0, 1, 1], [], []>} : vector<16x128xf32>, vector<128x30xf32>, vector<16x30xf32> -> vector<16x30xf32>
    %169 = vector.extract_strided_slice %10 {offsets = [0, 768], sizes = [8, 64], strides = [1, 1]} : vector<8x2048xf32> to vector<8x64xf32>
    %cst_41 = arith.constant dense<0.000000e+00> : vector<8x120xf32>
    %170 = tpu.matmul %169, %12, %cst_41 {dimension_numbers = #tpu.dot_dimension_numbers<[1], [0], [0], [1], [0, 0, 1, 1], [], []>} : vector<8x64xf32>, vector<64x120xf32>, vector<8x120xf32> -> vector<8x120xf32>
    %171 = vector.extract_strided_slice %170 {offsets = [0, 0], sizes = [8, 30], strides = [1, 1]} : vector<8x120xf32> to vector<8x30xf32>
    %172 = vector.extract_strided_slice %170 {offsets = [0, 30], sizes = [8, 30], strides = [1, 1]} : vector<8x120xf32> to vector<8x30xf32>
    %173 = vector.extract_strided_slice %170 {offsets = [0, 60], sizes = [8, 30], strides = [1, 1]} : vector<8x120xf32> to vector<8x30xf32>
    %174 = vector.extract_strided_slice %170 {offsets = [0, 90], sizes = [8, 30], strides = [1, 1]} : vector<8x120xf32> to vector<8x30xf32>
    %175 = vector.extract_strided_slice %10 {offsets = [0, 832], sizes = [8, 64], strides = [1, 1]} : vector<8x2048xf32> to vector<8x64xf32>
    %cst_42 = arith.constant dense<0.000000e+00> : vector<8x120xf32>
    %176 = tpu.matmul %175, %12, %cst_42 {dimension_numbers = #tpu.dot_dimension_numbers<[1], [0], [0], [1], [0, 0, 1, 1], [], []>} : vector<8x64xf32>, vector<64x120xf32>, vector<8x120xf32> -> vector<8x120xf32>
    %177 = vector.extract_strided_slice %176 {offsets = [0, 0], sizes = [8, 30], strides = [1, 1]} : vector<8x120xf32> to vector<8x30xf32>
    %178 = vector.extract_strided_slice %176 {offsets = [0, 30], sizes = [8, 30], strides = [1, 1]} : vector<8x120xf32> to vector<8x30xf32>
    %179 = vector.extract_strided_slice %176 {offsets = [0, 60], sizes = [8, 30], strides = [1, 1]} : vector<8x120xf32> to vector<8x30xf32>
    %180 = vector.extract_strided_slice %176 {offsets = [0, 90], sizes = [8, 30], strides = [1, 1]} : vector<8x120xf32> to vector<8x30xf32>
    %181 = vector.extract_strided_slice %10 {offsets = [0, 896], sizes = [8, 64], strides = [1, 1]} : vector<8x2048xf32> to vector<8x64xf32>
    %cst_43 = arith.constant dense<0.000000e+00> : vector<8x120xf32>
    %182 = tpu.matmul %181, %12, %cst_43 {dimension_numbers = #tpu.dot_dimension_numbers<[1], [0], [0], [1], [0, 0, 1, 1], [], []>} : vector<8x64xf32>, vector<64x120xf32>, vector<8x120xf32> -> vector<8x120xf32>
    %183 = vector.extract_strided_slice %182 {offsets = [0, 0], sizes = [8, 30], strides = [1, 1]} : vector<8x120xf32> to vector<8x30xf32>
    %184 = vector.extract_strided_slice %182 {offsets = [0, 30], sizes = [8, 30], strides = [1, 1]} : vector<8x120xf32> to vector<8x30xf32>
    %185 = vector.extract_strided_slice %182 {offsets = [0, 60], sizes = [8, 30], strides = [1, 1]} : vector<8x120xf32> to vector<8x30xf32>
    %186 = vector.extract_strided_slice %182 {offsets = [0, 90], sizes = [8, 30], strides = [1, 1]} : vector<8x120xf32> to vector<8x30xf32>
    %187 = vector.extract_strided_slice %10 {offsets = [0, 960], sizes = [8, 64], strides = [1, 1]} : vector<8x2048xf32> to vector<8x64xf32>
    %cst_44 = arith.constant dense<0.000000e+00> : vector<8x120xf32>
    %188 = tpu.matmul %187, %12, %cst_44 {dimension_numbers = #tpu.dot_dimension_numbers<[1], [0], [0], [1], [0, 0, 1, 1], [], []>} : vector<8x64xf32>, vector<64x120xf32>, vector<8x120xf32> -> vector<8x120xf32>
    %189 = vector.extract_strided_slice %188 {offsets = [0, 0], sizes = [8, 30], strides = [1, 1]} : vector<8x120xf32> to vector<8x30xf32>
    %190 = vector.extract_strided_slice %188 {offsets = [0, 30], sizes = [8, 30], strides = [1, 1]} : vector<8x120xf32> to vector<8x30xf32>
    %191 = vector.extract_strided_slice %188 {offsets = [0, 60], sizes = [8, 30], strides = [1, 1]} : vector<8x120xf32> to vector<8x30xf32>
    %192 = vector.extract_strided_slice %188 {offsets = [0, 90], sizes = [8, 30], strides = [1, 1]} : vector<8x120xf32> to vector<8x30xf32>
    %193 = tpu.concatenate %171, %172, %173, %174, %177, %178, %179, %180, %183, %184, %185, %186, %189, %190, %191, %192 in 0 : vector<8x30xf32>, vector<8x30xf32>, vector<8x30xf32>, vector<8x30xf32>, vector<8x30xf32>, vector<8x30xf32>, vector<8x30xf32>, vector<8x30xf32>, vector<8x30xf32>, vector<8x30xf32>, vector<8x30xf32>, vector<8x30xf32>, vector<8x30xf32>, vector<8x30xf32>, vector<8x30xf32>, vector<8x30xf32> -> vector<128x30xf32>
    %cst_45 = arith.constant dense<0.000000e+00> : vector<16x30xf32>
    %194 = tpu.matmul %11, %193, %cst_45 {dimension_numbers = #tpu.dot_dimension_numbers<[1], [0], [0], [1], [0, 0, 1, 1], [], []>} : vector<16x128xf32>, vector<128x30xf32>, vector<16x30xf32> -> vector<16x30xf32>
    %195 = vector.extract_strided_slice %10 {offsets = [0, 896], sizes = [8, 64], strides = [1, 1]} : vector<8x2048xf32> to vector<8x64xf32>
    %cst_46 = arith.constant dense<0.000000e+00> : vector<8x120xf32>
    %196 = tpu.matmul %195, %12, %cst_46 {dimension_numbers = #tpu.dot_dimension_numbers<[1], [0], [0], [1], [0, 0, 1, 1], [], []>} : vector<8x64xf32>, vector<64x120xf32>, vector<8x120xf32> -> vector<8x120xf32>
    %197 = vector.extract_strided_slice %196 {offsets = [0, 0], sizes = [8, 30], strides = [1, 1]} : vector<8x120xf32> to vector<8x30xf32>
    %198 = vector.extract_strided_slice %196 {offsets = [0, 30], sizes = [8, 30], strides = [1, 1]} : vector<8x120xf32> to vector<8x30xf32>
    %199 = vector.extract_strided_slice %196 {offsets = [0, 60], sizes = [8, 30], strides = [1, 1]} : vector<8x120xf32> to vector<8x30xf32>
    %200 = vector.extract_strided_slice %196 {offsets = [0, 90], sizes = [8, 30], strides = [1, 1]} : vector<8x120xf32> to vector<8x30xf32>
    %201 = vector.extract_strided_slice %10 {offsets = [0, 960], sizes = [8, 64], strides = [1, 1]} : vector<8x2048xf32> to vector<8x64xf32>
    %cst_47 = arith.constant dense<0.000000e+00> : vector<8x120xf32>
    %202 = tpu.matmul %201, %12, %cst_47 {dimension_numbers = #tpu.dot_dimension_numbers<[1], [0], [0], [1], [0, 0, 1, 1], [], []>} : vector<8x64xf32>, vector<64x120xf32>, vector<8x120xf32> -> vector<8x120xf32>
    %203 = vector.extract_strided_slice %202 {offsets = [0, 0], sizes = [8, 30], strides = [1, 1]} : vector<8x120xf32> to vector<8x30xf32>
    %204 = vector.extract_strided_slice %202 {offsets = [0, 30], sizes = [8, 30], strides = [1, 1]} : vector<8x120xf32> to vector<8x30xf32>
    %205 = vector.extract_strided_slice %202 {offsets = [0, 60], sizes = [8, 30], strides = [1, 1]} : vector<8x120xf32> to vector<8x30xf32>
    %206 = vector.extract_strided_slice %202 {offsets = [0, 90], sizes = [8, 30], strides = [1, 1]} : vector<8x120xf32> to vector<8x30xf32>
    %207 = vector.extract_strided_slice %10 {offsets = [0, 1024], sizes = [8, 64], strides = [1, 1]} : vector<8x2048xf32> to vector<8x64xf32>
    %cst_48 = arith.constant dense<0.000000e+00> : vector<8x120xf32>
    %208 = tpu.matmul %207, %12, %cst_48 {dimension_numbers = #tpu.dot_dimension_numbers<[1], [0], [0], [1], [0, 0, 1, 1], [], []>} : vector<8x64xf32>, vector<64x120xf32>, vector<8x120xf32> -> vector<8x120xf32>
    %209 = vector.extract_strided_slice %208 {offsets = [0, 0], sizes = [8, 30], strides = [1, 1]} : vector<8x120xf32> to vector<8x30xf32>
    %210 = vector.extract_strided_slice %208 {offsets = [0, 30], sizes = [8, 30], strides = [1, 1]} : vector<8x120xf32> to vector<8x30xf32>
    %211 = vector.extract_strided_slice %208 {offsets = [0, 60], sizes = [8, 30], strides = [1, 1]} : vector<8x120xf32> to vector<8x30xf32>
    %212 = vector.extract_strided_slice %208 {offsets = [0, 90], sizes = [8, 30], strides = [1, 1]} : vector<8x120xf32> to vector<8x30xf32>
    %213 = vector.extract_strided_slice %10 {offsets = [0, 1088], sizes = [8, 64], strides = [1, 1]} : vector<8x2048xf32> to vector<8x64xf32>
    %cst_49 = arith.constant dense<0.000000e+00> : vector<8x120xf32>
    %214 = tpu.matmul %213, %12, %cst_49 {dimension_numbers = #tpu.dot_dimension_numbers<[1], [0], [0], [1], [0, 0, 1, 1], [], []>} : vector<8x64xf32>, vector<64x120xf32>, vector<8x120xf32> -> vector<8x120xf32>
    %215 = vector.extract_strided_slice %214 {offsets = [0, 0], sizes = [8, 30], strides = [1, 1]} : vector<8x120xf32> to vector<8x30xf32>
    %216 = vector.extract_strided_slice %214 {offsets = [0, 30], sizes = [8, 30], strides = [1, 1]} : vector<8x120xf32> to vector<8x30xf32>
    %217 = vector.extract_strided_slice %214 {offsets = [0, 60], sizes = [8, 30], strides = [1, 1]} : vector<8x120xf32> to vector<8x30xf32>
    %218 = vector.extract_strided_slice %214 {offsets = [0, 90], sizes = [8, 30], strides = [1, 1]} : vector<8x120xf32> to vector<8x30xf32>
    %219 = tpu.concatenate %197, %198, %199, %200, %203, %204, %205, %206, %209, %210, %211, %212, %215, %216, %217, %218 in 0 : vector<8x30xf32>, vector<8x30xf32>, vector<8x30xf32>, vector<8x30xf32>, vector<8x30xf32>, vector<8x30xf32>, vector<8x30xf32>, vector<8x30xf32>, vector<8x30xf32>, vector<8x30xf32>, vector<8x30xf32>, vector<8x30xf32>, vector<8x30xf32>, vector<8x30xf32>, vector<8x30xf32>, vector<8x30xf32> -> vector<128x30xf32>
    %cst_50 = arith.constant dense<0.000000e+00> : vector<16x30xf32>
    %220 = tpu.matmul %11, %219, %cst_50 {dimension_numbers = #tpu.dot_dimension_numbers<[1], [0], [0], [1], [0, 0, 1, 1], [], []>} : vector<16x128xf32>, vector<128x30xf32>, vector<16x30xf32> -> vector<16x30xf32>
    %221 = vector.extract_strided_slice %10 {offsets = [0, 1024], sizes = [8, 64], strides = [1, 1]} : vector<8x2048xf32> to vector<8x64xf32>
    %cst_51 = arith.constant dense<0.000000e+00> : vector<8x120xf32>
    %222 = tpu.matmul %221, %12, %cst_51 {dimension_numbers = #tpu.dot_dimension_numbers<[1], [0], [0], [1], [0, 0, 1, 1], [], []>} : vector<8x64xf32>, vector<64x120xf32>, vector<8x120xf32> -> vector<8x120xf32>
    %223 = vector.extract_strided_slice %222 {offsets = [0, 0], sizes = [8, 30], strides = [1, 1]} : vector<8x120xf32> to vector<8x30xf32>
    %224 = vector.extract_strided_slice %222 {offsets = [0, 30], sizes = [8, 30], strides = [1, 1]} : vector<8x120xf32> to vector<8x30xf32>
    %225 = vector.extract_strided_slice %222 {offsets = [0, 60], sizes = [8, 30], strides = [1, 1]} : vector<8x120xf32> to vector<8x30xf32>
    %226 = vector.extract_strided_slice %222 {offsets = [0, 90], sizes = [8, 30], strides = [1, 1]} : vector<8x120xf32> to vector<8x30xf32>
    %227 = vector.extract_strided_slice %10 {offsets = [0, 1088], sizes = [8, 64], strides = [1, 1]} : vector<8x2048xf32> to vector<8x64xf32>
    %cst_52 = arith.constant dense<0.000000e+00> : vector<8x120xf32>
    %228 = tpu.matmul %227, %12, %cst_52 {dimension_numbers = #tpu.dot_dimension_numbers<[1], [0], [0], [1], [0, 0, 1, 1], [], []>} : vector<8x64xf32>, vector<64x120xf32>, vector<8x120xf32> -> vector<8x120xf32>
    %229 = vector.extract_strided_slice %228 {offsets = [0, 0], sizes = [8, 30], strides = [1, 1]} : vector<8x120xf32> to vector<8x30xf32>
    %230 = vector.extract_strided_slice %228 {offsets = [0, 30], sizes = [8, 30], strides = [1, 1]} : vector<8x120xf32> to vector<8x30xf32>
    %231 = vector.extract_strided_slice %228 {offsets = [0, 60], sizes = [8, 30], strides = [1, 1]} : vector<8x120xf32> to vector<8x30xf32>
    %232 = vector.extract_strided_slice %228 {offsets = [0, 90], sizes = [8, 30], strides = [1, 1]} : vector<8x120xf32> to vector<8x30xf32>
    %233 = vector.extract_strided_slice %10 {offsets = [0, 1152], sizes = [8, 64], strides = [1, 1]} : vector<8x2048xf32> to vector<8x64xf32>
    %cst_53 = arith.constant dense<0.000000e+00> : vector<8x120xf32>
    %234 = tpu.matmul %233, %12, %cst_53 {dimension_numbers = #tpu.dot_dimension_numbers<[1], [0], [0], [1], [0, 0, 1, 1], [], []>} : vector<8x64xf32>, vector<64x120xf32>, vector<8x120xf32> -> vector<8x120xf32>
    %235 = vector.extract_strided_slice %234 {offsets = [0, 0], sizes = [8, 30], strides = [1, 1]} : vector<8x120xf32> to vector<8x30xf32>
    %236 = vector.extract_strided_slice %234 {offsets = [0, 30], sizes = [8, 30], strides = [1, 1]} : vector<8x120xf32> to vector<8x30xf32>
    %237 = vector.extract_strided_slice %234 {offsets = [0, 60], sizes = [8, 30], strides = [1, 1]} : vector<8x120xf32> to vector<8x30xf32>
    %238 = vector.extract_strided_slice %234 {offsets = [0, 90], sizes = [8, 30], strides = [1, 1]} : vector<8x120xf32> to vector<8x30xf32>
    %239 = vector.extract_strided_slice %10 {offsets = [0, 1216], sizes = [8, 64], strides = [1, 1]} : vector<8x2048xf32> to vector<8x64xf32>
    %cst_54 = arith.constant dense<0.000000e+00> : vector<8x120xf32>
    %240 = tpu.matmul %239, %12, %cst_54 {dimension_numbers = #tpu.dot_dimension_numbers<[1], [0], [0], [1], [0, 0, 1, 1], [], []>} : vector<8x64xf32>, vector<64x120xf32>, vector<8x120xf32> -> vector<8x120xf32>
    %241 = vector.extract_strided_slice %240 {offsets = [0, 0], sizes = [8, 30], strides = [1, 1]} : vector<8x120xf32> to vector<8x30xf32>
    %242 = vector.extract_strided_slice %240 {offsets = [0, 30], sizes = [8, 30], strides = [1, 1]} : vector<8x120xf32> to vector<8x30xf32>
    %243 = vector.extract_strided_slice %240 {offsets = [0, 60], sizes = [8, 30], strides = [1, 1]} : vector<8x120xf32> to vector<8x30xf32>
    %244 = vector.extract_strided_slice %240 {offsets = [0, 90], sizes = [8, 30], strides = [1, 1]} : vector<8x120xf32> to vector<8x30xf32>
    %245 = tpu.concatenate %223, %224, %225, %226, %229, %230, %231, %232, %235, %236, %237, %238, %241, %242, %243, %244 in 0 : vector<8x30xf32>, vector<8x30xf32>, vector<8x30xf32>, vector<8x30xf32>, vector<8x30xf32>, vector<8x30xf32>, vector<8x30xf32>, vector<8x30xf32>, vector<8x30xf32>, vector<8x30xf32>, vector<8x30xf32>, vector<8x30xf32>, vector<8x30xf32>, vector<8x30xf32>, vector<8x30xf32>, vector<8x30xf32> -> vector<128x30xf32>
    %cst_55 = arith.constant dense<0.000000e+00> : vector<16x30xf32>
    %246 = tpu.matmul %11, %245, %cst_55 {dimension_numbers = #tpu.dot_dimension_numbers<[1], [0], [0], [1], [0, 0, 1, 1], [], []>} : vector<16x128xf32>, vector<128x30xf32>, vector<16x30xf32> -> vector<16x30xf32>
    %247 = vector.extract_strided_slice %10 {offsets = [0, 1152], sizes = [8, 64], strides = [1, 1]} : vector<8x2048xf32> to vector<8x64xf32>
    %cst_56 = arith.constant dense<0.000000e+00> : vector<8x120xf32>
    %248 = tpu.matmul %247, %12, %cst_56 {dimension_numbers = #tpu.dot_dimension_numbers<[1], [0], [0], [1], [0, 0, 1, 1], [], []>} : vector<8x64xf32>, vector<64x120xf32>, vector<8x120xf32> -> vector<8x120xf32>
    %249 = vector.extract_strided_slice %248 {offsets = [0, 0], sizes = [8, 30], strides = [1, 1]} : vector<8x120xf32> to vector<8x30xf32>
    %250 = vector.extract_strided_slice %248 {offsets = [0, 30], sizes = [8, 30], strides = [1, 1]} : vector<8x120xf32> to vector<8x30xf32>
    %251 = vector.extract_strided_slice %248 {offsets = [0, 60], sizes = [8, 30], strides = [1, 1]} : vector<8x120xf32> to vector<8x30xf32>
    %252 = vector.extract_strided_slice %248 {offsets = [0, 90], sizes = [8, 30], strides = [1, 1]} : vector<8x120xf32> to vector<8x30xf32>
    %253 = vector.extract_strided_slice %10 {offsets = [0, 1216], sizes = [8, 64], strides = [1, 1]} : vector<8x2048xf32> to vector<8x64xf32>
    %cst_57 = arith.constant dense<0.000000e+00> : vector<8x120xf32>
    %254 = tpu.matmul %253, %12, %cst_57 {dimension_numbers = #tpu.dot_dimension_numbers<[1], [0], [0], [1], [0, 0, 1, 1], [], []>} : vector<8x64xf32>, vector<64x120xf32>, vector<8x120xf32> -> vector<8x120xf32>
    %255 = vector.extract_strided_slice %254 {offsets = [0, 0], sizes = [8, 30], strides = [1, 1]} : vector<8x120xf32> to vector<8x30xf32>
    %256 = vector.extract_strided_slice %254 {offsets = [0, 30], sizes = [8, 30], strides = [1, 1]} : vector<8x120xf32> to vector<8x30xf32>
    %257 = vector.extract_strided_slice %254 {offsets = [0, 60], sizes = [8, 30], strides = [1, 1]} : vector<8x120xf32> to vector<8x30xf32>
    %258 = vector.extract_strided_slice %254 {offsets = [0, 90], sizes = [8, 30], strides = [1, 1]} : vector<8x120xf32> to vector<8x30xf32>
    %259 = vector.extract_strided_slice %10 {offsets = [0, 1280], sizes = [8, 64], strides = [1, 1]} : vector<8x2048xf32> to vector<8x64xf32>
    %cst_58 = arith.constant dense<0.000000e+00> : vector<8x120xf32>
    %260 = tpu.matmul %259, %12, %cst_58 {dimension_numbers = #tpu.dot_dimension_numbers<[1], [0], [0], [1], [0, 0, 1, 1], [], []>} : vector<8x64xf32>, vector<64x120xf32>, vector<8x120xf32> -> vector<8x120xf32>
    %261 = vector.extract_strided_slice %260 {offsets = [0, 0], sizes = [8, 30], strides = [1, 1]} : vector<8x120xf32> to vector<8x30xf32>
    %262 = vector.extract_strided_slice %260 {offsets = [0, 30], sizes = [8, 30], strides = [1, 1]} : vector<8x120xf32> to vector<8x30xf32>
    %263 = vector.extract_strided_slice %260 {offsets = [0, 60], sizes = [8, 30], strides = [1, 1]} : vector<8x120xf32> to vector<8x30xf32>
    %264 = vector.extract_strided_slice %260 {offsets = [0, 90], sizes = [8, 30], strides = [1, 1]} : vector<8x120xf32> to vector<8x30xf32>
    %265 = vector.extract_strided_slice %10 {offsets = [0, 1344], sizes = [8, 64], strides = [1, 1]} : vector<8x2048xf32> to vector<8x64xf32>
    %cst_59 = arith.constant dense<0.000000e+00> : vector<8x120xf32>
    %266 = tpu.matmul %265, %12, %cst_59 {dimension_numbers = #tpu.dot_dimension_numbers<[1], [0], [0], [1], [0, 0, 1, 1], [], []>} : vector<8x64xf32>, vector<64x120xf32>, vector<8x120xf32> -> vector<8x120xf32>
    %267 = vector.extract_strided_slice %266 {offsets = [0, 0], sizes = [8, 30], strides = [1, 1]} : vector<8x120xf32> to vector<8x30xf32>
    %268 = vector.extract_strided_slice %266 {offsets = [0, 30], sizes = [8, 30], strides = [1, 1]} : vector<8x120xf32> to vector<8x30xf32>
    %269 = vector.extract_strided_slice %266 {offsets = [0, 60], sizes = [8, 30], strides = [1, 1]} : vector<8x120xf32> to vector<8x30xf32>
    %270 = vector.extract_strided_slice %266 {offsets = [0, 90], sizes = [8, 30], strides = [1, 1]} : vector<8x120xf32> to vector<8x30xf32>
    %271 = tpu.concatenate %249, %250, %251, %252, %255, %256, %257, %258, %261, %262, %263, %264, %267, %268, %269, %270 in 0 : vector<8x30xf32>, vector<8x30xf32>, vector<8x30xf32>, vector<8x30xf32>, vector<8x30xf32>, vector<8x30xf32>, vector<8x30xf32>, vector<8x30xf32>, vector<8x30xf32>, vector<8x30xf32>, vector<8x30xf32>, vector<8x30xf32>, vector<8x30xf32>, vector<8x30xf32>, vector<8x30xf32>, vector<8x30xf32> -> vector<128x30xf32>
    %cst_60 = arith.constant dense<0.000000e+00> : vector<16x30xf32>
    %272 = tpu.matmul %11, %271, %cst_60 {dimension_numbers = #tpu.dot_dimension_numbers<[1], [0], [0], [1], [0, 0, 1, 1], [], []>} : vector<16x128xf32>, vector<128x30xf32>, vector<16x30xf32> -> vector<16x30xf32>
    %273 = vector.extract_strided_slice %10 {offsets = [0, 1280], sizes = [8, 64], strides = [1, 1]} : vector<8x2048xf32> to vector<8x64xf32>
    %cst_61 = arith.constant dense<0.000000e+00> : vector<8x120xf32>
    %274 = tpu.matmul %273, %12, %cst_61 {dimension_numbers = #tpu.dot_dimension_numbers<[1], [0], [0], [1], [0, 0, 1, 1], [], []>} : vector<8x64xf32>, vector<64x120xf32>, vector<8x120xf32> -> vector<8x120xf32>
    %275 = vector.extract_strided_slice %274 {offsets = [0, 0], sizes = [8, 30], strides = [1, 1]} : vector<8x120xf32> to vector<8x30xf32>
    %276 = vector.extract_strided_slice %274 {offsets = [0, 30], sizes = [8, 30], strides = [1, 1]} : vector<8x120xf32> to vector<8x30xf32>
    %277 = vector.extract_strided_slice %274 {offsets = [0, 60], sizes = [8, 30], strides = [1, 1]} : vector<8x120xf32> to vector<8x30xf32>
    %278 = vector.extract_strided_slice %274 {offsets = [0, 90], sizes = [8, 30], strides = [1, 1]} : vector<8x120xf32> to vector<8x30xf32>
    %279 = vector.extract_strided_slice %10 {offsets = [0, 1344], sizes = [8, 64], strides = [1, 1]} : vector<8x2048xf32> to vector<8x64xf32>
    %cst_62 = arith.constant dense<0.000000e+00> : vector<8x120xf32>
    %280 = tpu.matmul %279, %12, %cst_62 {dimension_numbers = #tpu.dot_dimension_numbers<[1], [0], [0], [1], [0, 0, 1, 1], [], []>} : vector<8x64xf32>, vector<64x120xf32>, vector<8x120xf32> -> vector<8x120xf32>
    %281 = vector.extract_strided_slice %280 {offsets = [0, 0], sizes = [8, 30], strides = [1, 1]} : vector<8x120xf32> to vector<8x30xf32>
    %282 = vector.extract_strided_slice %280 {offsets = [0, 30], sizes = [8, 30], strides = [1, 1]} : vector<8x120xf32> to vector<8x30xf32>
    %283 = vector.extract_strided_slice %280 {offsets = [0, 60], sizes = [8, 30], strides = [1, 1]} : vector<8x120xf32> to vector<8x30xf32>
    %284 = vector.extract_strided_slice %280 {offsets = [0, 90], sizes = [8, 30], strides = [1, 1]} : vector<8x120xf32> to vector<8x30xf32>
    %285 = vector.extract_strided_slice %10 {offsets = [0, 1408], sizes = [8, 64], strides = [1, 1]} : vector<8x2048xf32> to vector<8x64xf32>
    %cst_63 = arith.constant dense<0.000000e+00> : vector<8x120xf32>
    %286 = tpu.matmul %285, %12, %cst_63 {dimension_numbers = #tpu.dot_dimension_numbers<[1], [0], [0], [1], [0, 0, 1, 1], [], []>} : vector<8x64xf32>, vector<64x120xf32>, vector<8x120xf32> -> vector<8x120xf32>
    %287 = vector.extract_strided_slice %286 {offsets = [0, 0], sizes = [8, 30], strides = [1, 1]} : vector<8x120xf32> to vector<8x30xf32>
    %288 = vector.extract_strided_slice %286 {offsets = [0, 30], sizes = [8, 30], strides = [1, 1]} : vector<8x120xf32> to vector<8x30xf32>
    %289 = vector.extract_strided_slice %286 {offsets = [0, 60], sizes = [8, 30], strides = [1, 1]} : vector<8x120xf32> to vector<8x30xf32>
    %290 = vector.extract_strided_slice %286 {offsets = [0, 90], sizes = [8, 30], strides = [1, 1]} : vector<8x120xf32> to vector<8x30xf32>
    %291 = vector.extract_strided_slice %10 {offsets = [0, 1472], sizes = [8, 64], strides = [1, 1]} : vector<8x2048xf32> to vector<8x64xf32>
    %cst_64 = arith.constant dense<0.000000e+00> : vector<8x120xf32>
    %292 = tpu.matmul %291, %12, %cst_64 {dimension_numbers = #tpu.dot_dimension_numbers<[1], [0], [0], [1], [0, 0, 1, 1], [], []>} : vector<8x64xf32>, vector<64x120xf32>, vector<8x120xf32> -> vector<8x120xf32>
    %293 = vector.extract_strided_slice %292 {offsets = [0, 0], sizes = [8, 30], strides = [1, 1]} : vector<8x120xf32> to vector<8x30xf32>
    %294 = vector.extract_strided_slice %292 {offsets = [0, 30], sizes = [8, 30], strides = [1, 1]} : vector<8x120xf32> to vector<8x30xf32>
    %295 = vector.extract_strided_slice %292 {offsets = [0, 60], sizes = [8, 30], strides = [1, 1]} : vector<8x120xf32> to vector<8x30xf32>
    %296 = vector.extract_strided_slice %292 {offsets = [0, 90], sizes = [8, 30], strides = [1, 1]} : vector<8x120xf32> to vector<8x30xf32>
    %297 = tpu.concatenate %275, %276, %277, %278, %281, %282, %283, %284, %287, %288, %289, %290, %293, %294, %295, %296 in 0 : vector<8x30xf32>, vector<8x30xf32>, vector<8x30xf32>, vector<8x30xf32>, vector<8x30xf32>, vector<8x30xf32>, vector<8x30xf32>, vector<8x30xf32>, vector<8x30xf32>, vector<8x30xf32>, vector<8x30xf32>, vector<8x30xf32>, vector<8x30xf32>, vector<8x30xf32>, vector<8x30xf32>, vector<8x30xf32> -> vector<128x30xf32>
    %cst_65 = arith.constant dense<0.000000e+00> : vector<16x30xf32>
    %298 = tpu.matmul %11, %297, %cst_65 {dimension_numbers = #tpu.dot_dimension_numbers<[1], [0], [0], [1], [0, 0, 1, 1], [], []>} : vector<16x128xf32>, vector<128x30xf32>, vector<16x30xf32> -> vector<16x30xf32>
    %299 = vector.extract_strided_slice %10 {offsets = [0, 1408], sizes = [8, 64], strides = [1, 1]} : vector<8x2048xf32> to vector<8x64xf32>
    %cst_66 = arith.constant dense<0.000000e+00> : vector<8x120xf32>
    %300 = tpu.matmul %299, %12, %cst_66 {dimension_numbers = #tpu.dot_dimension_numbers<[1], [0], [0], [1], [0, 0, 1, 1], [], []>} : vector<8x64xf32>, vector<64x120xf32>, vector<8x120xf32> -> vector<8x120xf32>
    %301 = vector.extract_strided_slice %300 {offsets = [0, 0], sizes = [8, 30], strides = [1, 1]} : vector<8x120xf32> to vector<8x30xf32>
    %302 = vector.extract_strided_slice %300 {offsets = [0, 30], sizes = [8, 30], strides = [1, 1]} : vector<8x120xf32> to vector<8x30xf32>
    %303 = vector.extract_strided_slice %300 {offsets = [0, 60], sizes = [8, 30], strides = [1, 1]} : vector<8x120xf32> to vector<8x30xf32>
    %304 = vector.extract_strided_slice %300 {offsets = [0, 90], sizes = [8, 30], strides = [1, 1]} : vector<8x120xf32> to vector<8x30xf32>
    %305 = vector.extract_strided_slice %10 {offsets = [0, 1472], sizes = [8, 64], strides = [1, 1]} : vector<8x2048xf32> to vector<8x64xf32>
    %cst_67 = arith.constant dense<0.000000e+00> : vector<8x120xf32>
    %306 = tpu.matmul %305, %12, %cst_67 {dimension_numbers = #tpu.dot_dimension_numbers<[1], [0], [0], [1], [0, 0, 1, 1], [], []>} : vector<8x64xf32>, vector<64x120xf32>, vector<8x120xf32> -> vector<8x120xf32>
    %307 = vector.extract_strided_slice %306 {offsets = [0, 0], sizes = [8, 30], strides = [1, 1]} : vector<8x120xf32> to vector<8x30xf32>
    %308 = vector.extract_strided_slice %306 {offsets = [0, 30], sizes = [8, 30], strides = [1, 1]} : vector<8x120xf32> to vector<8x30xf32>
    %309 = vector.extract_strided_slice %306 {offsets = [0, 60], sizes = [8, 30], strides = [1, 1]} : vector<8x120xf32> to vector<8x30xf32>
    %310 = vector.extract_strided_slice %306 {offsets = [0, 90], sizes = [8, 30], strides = [1, 1]} : vector<8x120xf32> to vector<8x30xf32>
    %311 = vector.extract_strided_slice %10 {offsets = [0, 1536], sizes = [8, 64], strides = [1, 1]} : vector<8x2048xf32> to vector<8x64xf32>
    %cst_68 = arith.constant dense<0.000000e+00> : vector<8x120xf32>
    %312 = tpu.matmul %311, %12, %cst_68 {dimension_numbers = #tpu.dot_dimension_numbers<[1], [0], [0], [1], [0, 0, 1, 1], [], []>} : vector<8x64xf32>, vector<64x120xf32>, vector<8x120xf32> -> vector<8x120xf32>
    %313 = vector.extract_strided_slice %312 {offsets = [0, 0], sizes = [8, 30], strides = [1, 1]} : vector<8x120xf32> to vector<8x30xf32>
    %314 = vector.extract_strided_slice %312 {offsets = [0, 30], sizes = [8, 30], strides = [1, 1]} : vector<8x120xf32> to vector<8x30xf32>
    %315 = vector.extract_strided_slice %312 {offsets = [0, 60], sizes = [8, 30], strides = [1, 1]} : vector<8x120xf32> to vector<8x30xf32>
    %316 = vector.extract_strided_slice %312 {offsets = [0, 90], sizes = [8, 30], strides = [1, 1]} : vector<8x120xf32> to vector<8x30xf32>
    %317 = vector.extract_strided_slice %10 {offsets = [0, 1600], sizes = [8, 64], strides = [1, 1]} : vector<8x2048xf32> to vector<8x64xf32>
    %cst_69 = arith.constant dense<0.000000e+00> : vector<8x120xf32>
    %318 = tpu.matmul %317, %12, %cst_69 {dimension_numbers = #tpu.dot_dimension_numbers<[1], [0], [0], [1], [0, 0, 1, 1], [], []>} : vector<8x64xf32>, vector<64x120xf32>, vector<8x120xf32> -> vector<8x120xf32>
    %319 = vector.extract_strided_slice %318 {offsets = [0, 0], sizes = [8, 30], strides = [1, 1]} : vector<8x120xf32> to vector<8x30xf32>
    %320 = vector.extract_strided_slice %318 {offsets = [0, 30], sizes = [8, 30], strides = [1, 1]} : vector<8x120xf32> to vector<8x30xf32>
    %321 = vector.extract_strided_slice %318 {offsets = [0, 60], sizes = [8, 30], strides = [1, 1]} : vector<8x120xf32> to vector<8x30xf32>
    %322 = vector.extract_strided_slice %318 {offsets = [0, 90], sizes = [8, 30], strides = [1, 1]} : vector<8x120xf32> to vector<8x30xf32>
    %323 = tpu.concatenate %301, %302, %303, %304, %307, %308, %309, %310, %313, %314, %315, %316, %319, %320, %321, %322 in 0 : vector<8x30xf32>, vector<8x30xf32>, vector<8x30xf32>, vector<8x30xf32>, vector<8x30xf32>, vector<8x30xf32>, vector<8x30xf32>, vector<8x30xf32>, vector<8x30xf32>, vector<8x30xf32>, vector<8x30xf32>, vector<8x30xf32>, vector<8x30xf32>, vector<8x30xf32>, vector<8x30xf32>, vector<8x30xf32> -> vector<128x30xf32>
    %cst_70 = arith.constant dense<0.000000e+00> : vector<16x30xf32>
    %324 = tpu.matmul %11, %323, %cst_70 {dimension_numbers = #tpu.dot_dimension_numbers<[1], [0], [0], [1], [0, 0, 1, 1], [], []>} : vector<16x128xf32>, vector<128x30xf32>, vector<16x30xf32> -> vector<16x30xf32>
    %325 = vector.extract_strided_slice %10 {offsets = [0, 1536], sizes = [8, 64], strides = [1, 1]} : vector<8x2048xf32> to vector<8x64xf32>
    %cst_71 = arith.constant dense<0.000000e+00> : vector<8x120xf32>
    %326 = tpu.matmul %325, %12, %cst_71 {dimension_numbers = #tpu.dot_dimension_numbers<[1], [0], [0], [1], [0, 0, 1, 1], [], []>} : vector<8x64xf32>, vector<64x120xf32>, vector<8x120xf32> -> vector<8x120xf32>
    %327 = vector.extract_strided_slice %326 {offsets = [0, 0], sizes = [8, 30], strides = [1, 1]} : vector<8x120xf32> to vector<8x30xf32>
    %328 = vector.extract_strided_slice %326 {offsets = [0, 30], sizes = [8, 30], strides = [1, 1]} : vector<8x120xf32> to vector<8x30xf32>
    %329 = vector.extract_strided_slice %326 {offsets = [0, 60], sizes = [8, 30], strides = [1, 1]} : vector<8x120xf32> to vector<8x30xf32>
    %330 = vector.extract_strided_slice %326 {offsets = [0, 90], sizes = [8, 30], strides = [1, 1]} : vector<8x120xf32> to vector<8x30xf32>
    %331 = vector.extract_strided_slice %10 {offsets = [0, 1600], sizes = [8, 64], strides = [1, 1]} : vector<8x2048xf32> to vector<8x64xf32>
    %cst_72 = arith.constant dense<0.000000e+00> : vector<8x120xf32>
    %332 = tpu.matmul %331, %12, %cst_72 {dimension_numbers = #tpu.dot_dimension_numbers<[1], [0], [0], [1], [0, 0, 1, 1], [], []>} : vector<8x64xf32>, vector<64x120xf32>, vector<8x120xf32> -> vector<8x120xf32>
    %333 = vector.extract_strided_slice %332 {offsets = [0, 0], sizes = [8, 30], strides = [1, 1]} : vector<8x120xf32> to vector<8x30xf32>
    %334 = vector.extract_strided_slice %332 {offsets = [0, 30], sizes = [8, 30], strides = [1, 1]} : vector<8x120xf32> to vector<8x30xf32>
    %335 = vector.extract_strided_slice %332 {offsets = [0, 60], sizes = [8, 30], strides = [1, 1]} : vector<8x120xf32> to vector<8x30xf32>
    %336 = vector.extract_strided_slice %332 {offsets = [0, 90], sizes = [8, 30], strides = [1, 1]} : vector<8x120xf32> to vector<8x30xf32>
    %337 = vector.extract_strided_slice %10 {offsets = [0, 1664], sizes = [8, 64], strides = [1, 1]} : vector<8x2048xf32> to vector<8x64xf32>
    %cst_73 = arith.constant dense<0.000000e+00> : vector<8x120xf32>
    %338 = tpu.matmul %337, %12, %cst_73 {dimension_numbers = #tpu.dot_dimension_numbers<[1], [0], [0], [1], [0, 0, 1, 1], [], []>} : vector<8x64xf32>, vector<64x120xf32>, vector<8x120xf32> -> vector<8x120xf32>
    %339 = vector.extract_strided_slice %338 {offsets = [0, 0], sizes = [8, 30], strides = [1, 1]} : vector<8x120xf32> to vector<8x30xf32>
    %340 = vector.extract_strided_slice %338 {offsets = [0, 30], sizes = [8, 30], strides = [1, 1]} : vector<8x120xf32> to vector<8x30xf32>
    %341 = vector.extract_strided_slice %338 {offsets = [0, 60], sizes = [8, 30], strides = [1, 1]} : vector<8x120xf32> to vector<8x30xf32>
    %342 = vector.extract_strided_slice %338 {offsets = [0, 90], sizes = [8, 30], strides = [1, 1]} : vector<8x120xf32> to vector<8x30xf32>
    %343 = vector.extract_strided_slice %10 {offsets = [0, 1728], sizes = [8, 64], strides = [1, 1]} : vector<8x2048xf32> to vector<8x64xf32>
    %cst_74 = arith.constant dense<0.000000e+00> : vector<8x120xf32>
    %344 = tpu.matmul %343, %12, %cst_74 {dimension_numbers = #tpu.dot_dimension_numbers<[1], [0], [0], [1], [0, 0, 1, 1], [], []>} : vector<8x64xf32>, vector<64x120xf32>, vector<8x120xf32> -> vector<8x120xf32>
    %345 = vector.extract_strided_slice %344 {offsets = [0, 0], sizes = [8, 30], strides = [1, 1]} : vector<8x120xf32> to vector<8x30xf32>
    %346 = vector.extract_strided_slice %344 {offsets = [0, 30], sizes = [8, 30], strides = [1, 1]} : vector<8x120xf32> to vector<8x30xf32>
    %347 = vector.extract_strided_slice %344 {offsets = [0, 60], sizes = [8, 30], strides = [1, 1]} : vector<8x120xf32> to vector<8x30xf32>
    %348 = vector.extract_strided_slice %344 {offsets = [0, 90], sizes = [8, 30], strides = [1, 1]} : vector<8x120xf32> to vector<8x30xf32>
    %349 = tpu.concatenate %327, %328, %329, %330, %333, %334, %335, %336, %339, %340, %341, %342, %345, %346, %347, %348 in 0 : vector<8x30xf32>, vector<8x30xf32>, vector<8x30xf32>, vector<8x30xf32>, vector<8x30xf32>, vector<8x30xf32>, vector<8x30xf32>, vector<8x30xf32>, vector<8x30xf32>, vector<8x30xf32>, vector<8x30xf32>, vector<8x30xf32>, vector<8x30xf32>, vector<8x30xf32>, vector<8x30xf32>, vector<8x30xf32> -> vector<128x30xf32>
    %cst_75 = arith.constant dense<0.000000e+00> : vector<16x30xf32>
    %350 = tpu.matmul %11, %349, %cst_75 {dimension_numbers = #tpu.dot_dimension_numbers<[1], [0], [0], [1], [0, 0, 1, 1], [], []>} : vector<16x128xf32>, vector<128x30xf32>, vector<16x30xf32> -> vector<16x30xf32>
    %351 = vector.extract_strided_slice %10 {offsets = [0, 1664], sizes = [8, 64], strides = [1, 1]} : vector<8x2048xf32> to vector<8x64xf32>
    %cst_76 = arith.constant dense<0.000000e+00> : vector<8x120xf32>
    %352 = tpu.matmul %351, %12, %cst_76 {dimension_numbers = #tpu.dot_dimension_numbers<[1], [0], [0], [1], [0, 0, 1, 1], [], []>} : vector<8x64xf32>, vector<64x120xf32>, vector<8x120xf32> -> vector<8x120xf32>
    %353 = vector.extract_strided_slice %352 {offsets = [0, 0], sizes = [8, 30], strides = [1, 1]} : vector<8x120xf32> to vector<8x30xf32>
    %354 = vector.extract_strided_slice %352 {offsets = [0, 30], sizes = [8, 30], strides = [1, 1]} : vector<8x120xf32> to vector<8x30xf32>
    %355 = vector.extract_strided_slice %352 {offsets = [0, 60], sizes = [8, 30], strides = [1, 1]} : vector<8x120xf32> to vector<8x30xf32>
    %356 = vector.extract_strided_slice %352 {offsets = [0, 90], sizes = [8, 30], strides = [1, 1]} : vector<8x120xf32> to vector<8x30xf32>
    %357 = vector.extract_strided_slice %10 {offsets = [0, 1728], sizes = [8, 64], strides = [1, 1]} : vector<8x2048xf32> to vector<8x64xf32>
    %cst_77 = arith.constant dense<0.000000e+00> : vector<8x120xf32>
    %358 = tpu.matmul %357, %12, %cst_77 {dimension_numbers = #tpu.dot_dimension_numbers<[1], [0], [0], [1], [0, 0, 1, 1], [], []>} : vector<8x64xf32>, vector<64x120xf32>, vector<8x120xf32> -> vector<8x120xf32>
    %359 = vector.extract_strided_slice %358 {offsets = [0, 0], sizes = [8, 30], strides = [1, 1]} : vector<8x120xf32> to vector<8x30xf32>
    %360 = vector.extract_strided_slice %358 {offsets = [0, 30], sizes = [8, 30], strides = [1, 1]} : vector<8x120xf32> to vector<8x30xf32>
    %361 = vector.extract_strided_slice %358 {offsets = [0, 60], sizes = [8, 30], strides = [1, 1]} : vector<8x120xf32> to vector<8x30xf32>
    %362 = vector.extract_strided_slice %358 {offsets = [0, 90], sizes = [8, 30], strides = [1, 1]} : vector<8x120xf32> to vector<8x30xf32>
    %363 = vector.extract_strided_slice %10 {offsets = [0, 1792], sizes = [8, 64], strides = [1, 1]} : vector<8x2048xf32> to vector<8x64xf32>
    %cst_78 = arith.constant dense<0.000000e+00> : vector<8x120xf32>
    %364 = tpu.matmul %363, %12, %cst_78 {dimension_numbers = #tpu.dot_dimension_numbers<[1], [0], [0], [1], [0, 0, 1, 1], [], []>} : vector<8x64xf32>, vector<64x120xf32>, vector<8x120xf32> -> vector<8x120xf32>
    %365 = vector.extract_strided_slice %364 {offsets = [0, 0], sizes = [8, 30], strides = [1, 1]} : vector<8x120xf32> to vector<8x30xf32>
    %366 = vector.extract_strided_slice %364 {offsets = [0, 30], sizes = [8, 30], strides = [1, 1]} : vector<8x120xf32> to vector<8x30xf32>
    %367 = vector.extract_strided_slice %364 {offsets = [0, 60], sizes = [8, 30], strides = [1, 1]} : vector<8x120xf32> to vector<8x30xf32>
    %368 = vector.extract_strided_slice %364 {offsets = [0, 90], sizes = [8, 30], strides = [1, 1]} : vector<8x120xf32> to vector<8x30xf32>
    %369 = vector.extract_strided_slice %10 {offsets = [0, 1856], sizes = [8, 64], strides = [1, 1]} : vector<8x2048xf32> to vector<8x64xf32>
    %cst_79 = arith.constant dense<0.000000e+00> : vector<8x120xf32>
    %370 = tpu.matmul %369, %12, %cst_79 {dimension_numbers = #tpu.dot_dimension_numbers<[1], [0], [0], [1], [0, 0, 1, 1], [], []>} : vector<8x64xf32>, vector<64x120xf32>, vector<8x120xf32> -> vector<8x120xf32>
    %371 = vector.extract_strided_slice %370 {offsets = [0, 0], sizes = [8, 30], strides = [1, 1]} : vector<8x120xf32> to vector<8x30xf32>
    %372 = vector.extract_strided_slice %370 {offsets = [0, 30], sizes = [8, 30], strides = [1, 1]} : vector<8x120xf32> to vector<8x30xf32>
    %373 = vector.extract_strided_slice %370 {offsets = [0, 60], sizes = [8, 30], strides = [1, 1]} : vector<8x120xf32> to vector<8x30xf32>
    %374 = vector.extract_strided_slice %370 {offsets = [0, 90], sizes = [8, 30], strides = [1, 1]} : vector<8x120xf32> to vector<8x30xf32>
    %375 = tpu.concatenate %353, %354, %355, %356, %359, %360, %361, %362, %365, %366, %367, %368, %371, %372, %373, %374 in 0 : vector<8x30xf32>, vector<8x30xf32>, vector<8x30xf32>, vector<8x30xf32>, vector<8x30xf32>, vector<8x30xf32>, vector<8x30xf32>, vector<8x30xf32>, vector<8x30xf32>, vector<8x30xf32>, vector<8x30xf32>, vector<8x30xf32>, vector<8x30xf32>, vector<8x30xf32>, vector<8x30xf32>, vector<8x30xf32> -> vector<128x30xf32>
    %cst_80 = arith.constant dense<0.000000e+00> : vector<16x30xf32>
    %376 = tpu.matmul %11, %375, %cst_80 {dimension_numbers = #tpu.dot_dimension_numbers<[1], [0], [0], [1], [0, 0, 1, 1], [], []>} : vector<16x128xf32>, vector<128x30xf32>, vector<16x30xf32> -> vector<16x30xf32>
    %377 = vector.extract_strided_slice %10 {offsets = [0, 1792], sizes = [8, 64], strides = [1, 1]} : vector<8x2048xf32> to vector<8x64xf32>
    %cst_81 = arith.constant dense<0.000000e+00> : vector<8x120xf32>
    %378 = tpu.matmul %377, %12, %cst_81 {dimension_numbers = #tpu.dot_dimension_numbers<[1], [0], [0], [1], [0, 0, 1, 1], [], []>} : vector<8x64xf32>, vector<64x120xf32>, vector<8x120xf32> -> vector<8x120xf32>
    %379 = vector.extract_strided_slice %378 {offsets = [0, 0], sizes = [8, 30], strides = [1, 1]} : vector<8x120xf32> to vector<8x30xf32>
    %380 = vector.extract_strided_slice %378 {offsets = [0, 30], sizes = [8, 30], strides = [1, 1]} : vector<8x120xf32> to vector<8x30xf32>
    %381 = vector.extract_strided_slice %378 {offsets = [0, 60], sizes = [8, 30], strides = [1, 1]} : vector<8x120xf32> to vector<8x30xf32>
    %382 = vector.extract_strided_slice %378 {offsets = [0, 90], sizes = [8, 30], strides = [1, 1]} : vector<8x120xf32> to vector<8x30xf32>
    %383 = vector.extract_strided_slice %10 {offsets = [0, 1856], sizes = [8, 64], strides = [1, 1]} : vector<8x2048xf32> to vector<8x64xf32>
    %cst_82 = arith.constant dense<0.000000e+00> : vector<8x120xf32>
    %384 = tpu.matmul %383, %12, %cst_82 {dimension_numbers = #tpu.dot_dimension_numbers<[1], [0], [0], [1], [0, 0, 1, 1], [], []>} : vector<8x64xf32>, vector<64x120xf32>, vector<8x120xf32> -> vector<8x120xf32>
    %385 = vector.extract_strided_slice %384 {offsets = [0, 0], sizes = [8, 30], strides = [1, 1]} : vector<8x120xf32> to vector<8x30xf32>
    %386 = vector.extract_strided_slice %384 {offsets = [0, 30], sizes = [8, 30], strides = [1, 1]} : vector<8x120xf32> to vector<8x30xf32>
    %387 = vector.extract_strided_slice %384 {offsets = [0, 60], sizes = [8, 30], strides = [1, 1]} : vector<8x120xf32> to vector<8x30xf32>
    %388 = vector.extract_strided_slice %384 {offsets = [0, 90], sizes = [8, 30], strides = [1, 1]} : vector<8x120xf32> to vector<8x30xf32>
    %389 = vector.extract_strided_slice %10 {offsets = [0, 1920], sizes = [8, 64], strides = [1, 1]} : vector<8x2048xf32> to vector<8x64xf32>
    %cst_83 = arith.constant dense<0.000000e+00> : vector<8x120xf32>
    %390 = tpu.matmul %389, %12, %cst_83 {dimension_numbers = #tpu.dot_dimension_numbers<[1], [0], [0], [1], [0, 0, 1, 1], [], []>} : vector<8x64xf32>, vector<64x120xf32>, vector<8x120xf32> -> vector<8x120xf32>
    %391 = vector.extract_strided_slice %390 {offsets = [0, 0], sizes = [8, 30], strides = [1, 1]} : vector<8x120xf32> to vector<8x30xf32>
    %392 = vector.extract_strided_slice %390 {offsets = [0, 30], sizes = [8, 30], strides = [1, 1]} : vector<8x120xf32> to vector<8x30xf32>
    %393 = vector.extract_strided_slice %390 {offsets = [0, 60], sizes = [8, 30], strides = [1, 1]} : vector<8x120xf32> to vector<8x30xf32>
    %394 = vector.extract_strided_slice %390 {offsets = [0, 90], sizes = [8, 30], strides = [1, 1]} : vector<8x120xf32> to vector<8x30xf32>
    %395 = vector.extract_strided_slice %10 {offsets = [0, 1984], sizes = [8, 64], strides = [1, 1]} : vector<8x2048xf32> to vector<8x64xf32>
    %cst_84 = arith.constant dense<0.000000e+00> : vector<8x120xf32>
    %396 = tpu.matmul %395, %12, %cst_84 {dimension_numbers = #tpu.dot_dimension_numbers<[1], [0], [0], [1], [0, 0, 1, 1], [], []>} : vector<8x64xf32>, vector<64x120xf32>, vector<8x120xf32> -> vector<8x120xf32>
    %397 = vector.extract_strided_slice %396 {offsets = [0, 0], sizes = [8, 30], strides = [1, 1]} : vector<8x120xf32> to vector<8x30xf32>
    %398 = vector.extract_strided_slice %396 {offsets = [0, 30], sizes = [8, 30], strides = [1, 1]} : vector<8x120xf32> to vector<8x30xf32>
    %399 = vector.extract_strided_slice %396 {offsets = [0, 60], sizes = [8, 30], strides = [1, 1]} : vector<8x120xf32> to vector<8x30xf32>
    %400 = vector.extract_strided_slice %396 {offsets = [0, 90], sizes = [8, 30], strides = [1, 1]} : vector<8x120xf32> to vector<8x30xf32>
    %401 = tpu.concatenate %379, %380, %381, %382, %385, %386, %387, %388, %391, %392, %393, %394, %397, %398, %399, %400 in 0 : vector<8x30xf32>, vector<8x30xf32>, vector<8x30xf32>, vector<8x30xf32>, vector<8x30xf32>, vector<8x30xf32>, vector<8x30xf32>, vector<8x30xf32>, vector<8x30xf32>, vector<8x30xf32>, vector<8x30xf32>, vector<8x30xf32>, vector<8x30xf32>, vector<8x30xf32>, vector<8x30xf32>, vector<8x30xf32> -> vector<128x30xf32>
    %cst_85 = arith.constant dense<0.000000e+00> : vector<16x30xf32>
    %402 = tpu.matmul %11, %401, %cst_85 {dimension_numbers = #tpu.dot_dimension_numbers<[1], [0], [0], [1], [0, 0, 1, 1], [], []>} : vector<16x128xf32>, vector<128x30xf32>, vector<16x30xf32> -> vector<16x30xf32>
    %403 = tpu.concatenate %38, %64, %90, %116, %142, %168, %194, %220, %246, %272, %298, %324, %350, %376, %402 in 1 : vector<16x30xf32>, vector<16x30xf32>, vector<16x30xf32>, vector<16x30xf32>, vector<16x30xf32>, vector<16x30xf32>, vector<16x30xf32>, vector<16x30xf32>, vector<16x30xf32>, vector<16x30xf32>, vector<16x30xf32>, vector<16x30xf32>, vector<16x30xf32>, vector<16x30xf32>, vector<16x30xf32> -> vector<16x450xf32>
    %c0_86 = arith.constant 0 : index
    %c0_87 = arith.constant 0 : index
    %404 = vector.load %arg5[%c0_86, %c0_87] : memref<16x2xf32, #tpu.memory_space<vmem>>, vector<16x2xf32>
    %cst_88 = arith.constant dense<0.000000e+00> : vector<16xf32>
    %405 = vector.multi_reduction <add>, %403, %cst_88 [1] : vector<16x450xf32> to vector<16xf32>
    %406 = vector.shape_cast %405 : vector<16xf32> to vector<16x1xf32>
    %cst_89 = arith.constant 0.00222222228 : f32
    %407 = vector.broadcast %cst_89 : f32 to vector<16x1xf32>
    %408 = arith.mulf %406, %407 : vector<16x1xf32>
    %409 = arith.mulf %403, %403 : vector<16x450xf32>
    %cst_90 = arith.constant dense<0.000000e+00> : vector<16xf32>
    %410 = vector.multi_reduction <add>, %409, %cst_90 [1] : vector<16x450xf32> to vector<16xf32>
    %411 = vector.shape_cast %410 : vector<16xf32> to vector<16x1xf32>
    %cst_91 = arith.constant 0.00222222228 : f32
    %412 = vector.broadcast %cst_91 : f32 to vector<16x1xf32>
    %413 = arith.mulf %411, %412 : vector<16x1xf32>
    %414 = arith.mulf %408, %408 : vector<16x1xf32>
    %415 = arith.subf %413, %414 : vector<16x1xf32>
    %cst_92 = arith.constant 0.000000e+00 : f32
    %416 = vector.broadcast %cst_92 : f32 to vector<16x1xf32>
    %417 = arith.maximumf %415, %416 : vector<16x1xf32>
    %418 = vector.extract_strided_slice %404 {offsets = [0, 0], sizes = [16, 1], strides = [1, 1]} : vector<16x2xf32> to vector<16x1xf32>
    %cst_93 = arith.constant 9.99999974E-6 : f32
    %419 = vector.broadcast %cst_93 : f32 to vector<16x1xf32>
    %420 = arith.addf %417, %419 : vector<16x1xf32>
    %421 = math.rsqrt %420 : vector<16x1xf32>
    %422 = arith.mulf %418, %421 : vector<16x1xf32>
    %423 = vector.extract_strided_slice %404 {offsets = [0, 1], sizes = [16, 1], strides = [1, 1]} : vector<16x2xf32> to vector<16x1xf32>
    %424 = arith.mulf %408, %422 : vector<16x1xf32>
    %425 = arith.subf %423, %424 : vector<16x1xf32>
    %426 = vector.broadcast %422 : vector<16x1xf32> to vector<16x450xf32>
    %427 = arith.mulf %403, %426 : vector<16x450xf32>
    %428 = vector.broadcast %425 : vector<16x1xf32> to vector<16x450xf32>
    %429 = arith.addf %427, %428 : vector<16x450xf32>
    %cst_94 = arith.constant 0.000000e+00 : f32
    %430 = vector.broadcast %cst_94 : f32 to vector<16x450xf32>
    %431 = arith.cmpf oge, %429, %430 : vector<16x450xf32>
    %cst_95 = arith.constant 2.000000e-01 : f32
    %432 = vector.broadcast %cst_95 : f32 to vector<16x450xf32>
    %433 = arith.mulf %432, %429 : vector<16x450xf32>
    %434 = arith.select %431, %429, %433 : vector<16x450xi1>, vector<16x450xf32>
    %c0_96 = arith.constant 0 : index
    %c0_97 = arith.constant 0 : index
    %435 = vector.load %arg7[%c0_96, %c0_97] : memref<32x256xf32, #tpu.memory_space<vmem>>, vector<32x256xf32>
    %c0_98 = arith.constant 0 : index
    %c0_99 = arith.constant 0 : index
    %436 = vector.load %arg9[%c0_98, %c0_99] : memref<30x48xf32, #tpu.memory_space<vmem>>, vector<30x48xf32>
    %437 = vector.extract_strided_slice %434 {offsets = [0, 0], sizes = [16, 30], strides = [1, 1]} : vector<16x450xf32> to vector<16x30xf32>
    %cst_100 = arith.constant dense<0.000000e+00> : vector<16x48xf32>
    %438 = tpu.matmul %437, %436, %cst_100 {dimension_numbers = #tpu.dot_dimension_numbers<[1], [0], [0], [1], [0, 0, 1, 1], [], []>} : vector<16x30xf32>, vector<30x48xf32>, vector<16x48xf32> -> vector<16x48xf32>
    %439 = vector.extract_strided_slice %438 {offsets = [0, 0], sizes = [16, 12], strides = [1, 1]} : vector<16x48xf32> to vector<16x12xf32>
    %440 = vector.extract_strided_slice %438 {offsets = [0, 12], sizes = [16, 12], strides = [1, 1]} : vector<16x48xf32> to vector<16x12xf32>
    %441 = vector.extract_strided_slice %438 {offsets = [0, 24], sizes = [16, 12], strides = [1, 1]} : vector<16x48xf32> to vector<16x12xf32>
    %442 = vector.extract_strided_slice %438 {offsets = [0, 36], sizes = [16, 12], strides = [1, 1]} : vector<16x48xf32> to vector<16x12xf32>
    %443 = vector.extract_strided_slice %434 {offsets = [0, 30], sizes = [16, 30], strides = [1, 1]} : vector<16x450xf32> to vector<16x30xf32>
    %cst_101 = arith.constant dense<0.000000e+00> : vector<16x48xf32>
    %444 = tpu.matmul %443, %436, %cst_101 {dimension_numbers = #tpu.dot_dimension_numbers<[1], [0], [0], [1], [0, 0, 1, 1], [], []>} : vector<16x30xf32>, vector<30x48xf32>, vector<16x48xf32> -> vector<16x48xf32>
    %445 = vector.extract_strided_slice %444 {offsets = [0, 0], sizes = [16, 12], strides = [1, 1]} : vector<16x48xf32> to vector<16x12xf32>
    %446 = vector.extract_strided_slice %444 {offsets = [0, 12], sizes = [16, 12], strides = [1, 1]} : vector<16x48xf32> to vector<16x12xf32>
    %447 = vector.extract_strided_slice %444 {offsets = [0, 24], sizes = [16, 12], strides = [1, 1]} : vector<16x48xf32> to vector<16x12xf32>
    %448 = vector.extract_strided_slice %444 {offsets = [0, 36], sizes = [16, 12], strides = [1, 1]} : vector<16x48xf32> to vector<16x12xf32>
    %449 = vector.extract_strided_slice %434 {offsets = [0, 60], sizes = [16, 30], strides = [1, 1]} : vector<16x450xf32> to vector<16x30xf32>
    %cst_102 = arith.constant dense<0.000000e+00> : vector<16x48xf32>
    %450 = tpu.matmul %449, %436, %cst_102 {dimension_numbers = #tpu.dot_dimension_numbers<[1], [0], [0], [1], [0, 0, 1, 1], [], []>} : vector<16x30xf32>, vector<30x48xf32>, vector<16x48xf32> -> vector<16x48xf32>
    %451 = vector.extract_strided_slice %450 {offsets = [0, 0], sizes = [16, 12], strides = [1, 1]} : vector<16x48xf32> to vector<16x12xf32>
    %452 = vector.extract_strided_slice %450 {offsets = [0, 12], sizes = [16, 12], strides = [1, 1]} : vector<16x48xf32> to vector<16x12xf32>
    %453 = vector.extract_strided_slice %450 {offsets = [0, 24], sizes = [16, 12], strides = [1, 1]} : vector<16x48xf32> to vector<16x12xf32>
    %454 = vector.extract_strided_slice %450 {offsets = [0, 36], sizes = [16, 12], strides = [1, 1]} : vector<16x48xf32> to vector<16x12xf32>
    %455 = vector.extract_strided_slice %434 {offsets = [0, 90], sizes = [16, 30], strides = [1, 1]} : vector<16x450xf32> to vector<16x30xf32>
    %cst_103 = arith.constant dense<0.000000e+00> : vector<16x48xf32>
    %456 = tpu.matmul %455, %436, %cst_103 {dimension_numbers = #tpu.dot_dimension_numbers<[1], [0], [0], [1], [0, 0, 1, 1], [], []>} : vector<16x30xf32>, vector<30x48xf32>, vector<16x48xf32> -> vector<16x48xf32>
    %457 = vector.extract_strided_slice %456 {offsets = [0, 0], sizes = [16, 12], strides = [1, 1]} : vector<16x48xf32> to vector<16x12xf32>
    %458 = vector.extract_strided_slice %456 {offsets = [0, 12], sizes = [16, 12], strides = [1, 1]} : vector<16x48xf32> to vector<16x12xf32>
    %459 = vector.extract_strided_slice %456 {offsets = [0, 24], sizes = [16, 12], strides = [1, 1]} : vector<16x48xf32> to vector<16x12xf32>
    %460 = vector.extract_strided_slice %456 {offsets = [0, 36], sizes = [16, 12], strides = [1, 1]} : vector<16x48xf32> to vector<16x12xf32>
    %461 = tpu.concatenate %439, %440, %441, %442, %445, %446, %447, %448, %451, %452, %453, %454, %457, %458, %459, %460 in 0 : vector<16x12xf32>, vector<16x12xf32>, vector<16x12xf32>, vector<16x12xf32>, vector<16x12xf32>, vector<16x12xf32>, vector<16x12xf32>, vector<16x12xf32>, vector<16x12xf32>, vector<16x12xf32>, vector<16x12xf32>, vector<16x12xf32>, vector<16x12xf32>, vector<16x12xf32>, vector<16x12xf32>, vector<16x12xf32> -> vector<256x12xf32>
    %cst_104 = arith.constant dense<0.000000e+00> : vector<32x12xf32>
    %462 = tpu.matmul %435, %461, %cst_104 {dimension_numbers = #tpu.dot_dimension_numbers<[1], [0], [0], [1], [0, 0, 1, 1], [], []>} : vector<32x256xf32>, vector<256x12xf32>, vector<32x12xf32> -> vector<32x12xf32>
    %463 = vector.extract_strided_slice %434 {offsets = [0, 60], sizes = [16, 30], strides = [1, 1]} : vector<16x450xf32> to vector<16x30xf32>
    %cst_105 = arith.constant dense<0.000000e+00> : vector<16x48xf32>
    %464 = tpu.matmul %463, %436, %cst_105 {dimension_numbers = #tpu.dot_dimension_numbers<[1], [0], [0], [1], [0, 0, 1, 1], [], []>} : vector<16x30xf32>, vector<30x48xf32>, vector<16x48xf32> -> vector<16x48xf32>
    %465 = vector.extract_strided_slice %464 {offsets = [0, 0], sizes = [16, 12], strides = [1, 1]} : vector<16x48xf32> to vector<16x12xf32>
    %466 = vector.extract_strided_slice %464 {offsets = [0, 12], sizes = [16, 12], strides = [1, 1]} : vector<16x48xf32> to vector<16x12xf32>
    %467 = vector.extract_strided_slice %464 {offsets = [0, 24], sizes = [16, 12], strides = [1, 1]} : vector<16x48xf32> to vector<16x12xf32>
    %468 = vector.extract_strided_slice %464 {offsets = [0, 36], sizes = [16, 12], strides = [1, 1]} : vector<16x48xf32> to vector<16x12xf32>
    %469 = vector.extract_strided_slice %434 {offsets = [0, 90], sizes = [16, 30], strides = [1, 1]} : vector<16x450xf32> to vector<16x30xf32>
    %cst_106 = arith.constant dense<0.000000e+00> : vector<16x48xf32>
    %470 = tpu.matmul %469, %436, %cst_106 {dimension_numbers = #tpu.dot_dimension_numbers<[1], [0], [0], [1], [0, 0, 1, 1], [], []>} : vector<16x30xf32>, vector<30x48xf32>, vector<16x48xf32> -> vector<16x48xf32>
    %471 = vector.extract_strided_slice %470 {offsets = [0, 0], sizes = [16, 12], strides = [1, 1]} : vector<16x48xf32> to vector<16x12xf32>
    %472 = vector.extract_strided_slice %470 {offsets = [0, 12], sizes = [16, 12], strides = [1, 1]} : vector<16x48xf32> to vector<16x12xf32>
    %473 = vector.extract_strided_slice %470 {offsets = [0, 24], sizes = [16, 12], strides = [1, 1]} : vector<16x48xf32> to vector<16x12xf32>
    %474 = vector.extract_strided_slice %470 {offsets = [0, 36], sizes = [16, 12], strides = [1, 1]} : vector<16x48xf32> to vector<16x12xf32>
    %475 = vector.extract_strided_slice %434 {offsets = [0, 120], sizes = [16, 30], strides = [1, 1]} : vector<16x450xf32> to vector<16x30xf32>
    %cst_107 = arith.constant dense<0.000000e+00> : vector<16x48xf32>
    %476 = tpu.matmul %475, %436, %cst_107 {dimension_numbers = #tpu.dot_dimension_numbers<[1], [0], [0], [1], [0, 0, 1, 1], [], []>} : vector<16x30xf32>, vector<30x48xf32>, vector<16x48xf32> -> vector<16x48xf32>
    %477 = vector.extract_strided_slice %476 {offsets = [0, 0], sizes = [16, 12], strides = [1, 1]} : vector<16x48xf32> to vector<16x12xf32>
    %478 = vector.extract_strided_slice %476 {offsets = [0, 12], sizes = [16, 12], strides = [1, 1]} : vector<16x48xf32> to vector<16x12xf32>
    %479 = vector.extract_strided_slice %476 {offsets = [0, 24], sizes = [16, 12], strides = [1, 1]} : vector<16x48xf32> to vector<16x12xf32>
    %480 = vector.extract_strided_slice %476 {offsets = [0, 36], sizes = [16, 12], strides = [1, 1]} : vector<16x48xf32> to vector<16x12xf32>
    %481 = vector.extract_strided_slice %434 {offsets = [0, 150], sizes = [16, 30], strides = [1, 1]} : vector<16x450xf32> to vector<16x30xf32>
    %cst_108 = arith.constant dense<0.000000e+00> : vector<16x48xf32>
    %482 = tpu.matmul %481, %436, %cst_108 {dimension_numbers = #tpu.dot_dimension_numbers<[1], [0], [0], [1], [0, 0, 1, 1], [], []>} : vector<16x30xf32>, vector<30x48xf32>, vector<16x48xf32> -> vector<16x48xf32>
    %483 = vector.extract_strided_slice %482 {offsets = [0, 0], sizes = [16, 12], strides = [1, 1]} : vector<16x48xf32> to vector<16x12xf32>
    %484 = vector.extract_strided_slice %482 {offsets = [0, 12], sizes = [16, 12], strides = [1, 1]} : vector<16x48xf32> to vector<16x12xf32>
    %485 = vector.extract_strided_slice %482 {offsets = [0, 24], sizes = [16, 12], strides = [1, 1]} : vector<16x48xf32> to vector<16x12xf32>
    %486 = vector.extract_strided_slice %482 {offsets = [0, 36], sizes = [16, 12], strides = [1, 1]} : vector<16x48xf32> to vector<16x12xf32>
    %487 = tpu.concatenate %465, %466, %467, %468, %471, %472, %473, %474, %477, %478, %479, %480, %483, %484, %485, %486 in 0 : vector<16x12xf32>, vector<16x12xf32>, vector<16x12xf32>, vector<16x12xf32>, vector<16x12xf32>, vector<16x12xf32>, vector<16x12xf32>, vector<16x12xf32>, vector<16x12xf32>, vector<16x12xf32>, vector<16x12xf32>, vector<16x12xf32>, vector<16x12xf32>, vector<16x12xf32>, vector<16x12xf32>, vector<16x12xf32> -> vector<256x12xf32>
    %cst_109 = arith.constant dense<0.000000e+00> : vector<32x12xf32>
    %488 = tpu.matmul %435, %487, %cst_109 {dimension_numbers = #tpu.dot_dimension_numbers<[1], [0], [0], [1], [0, 0, 1, 1], [], []>} : vector<32x256xf32>, vector<256x12xf32>, vector<32x12xf32> -> vector<32x12xf32>
    %489 = vector.extract_strided_slice %434 {offsets = [0, 120], sizes = [16, 30], strides = [1, 1]} : vector<16x450xf32> to vector<16x30xf32>
    %cst_110 = arith.constant dense<0.000000e+00> : vector<16x48xf32>
    %490 = tpu.matmul %489, %436, %cst_110 {dimension_numbers = #tpu.dot_dimension_numbers<[1], [0], [0], [1], [0, 0, 1, 1], [], []>} : vector<16x30xf32>, vector<30x48xf32>, vector<16x48xf32> -> vector<16x48xf32>
    %491 = vector.extract_strided_slice %490 {offsets = [0, 0], sizes = [16, 12], strides = [1, 1]} : vector<16x48xf32> to vector<16x12xf32>
    %492 = vector.extract_strided_slice %490 {offsets = [0, 12], sizes = [16, 12], strides = [1, 1]} : vector<16x48xf32> to vector<16x12xf32>
    %493 = vector.extract_strided_slice %490 {offsets = [0, 24], sizes = [16, 12], strides = [1, 1]} : vector<16x48xf32> to vector<16x12xf32>
    %494 = vector.extract_strided_slice %490 {offsets = [0, 36], sizes = [16, 12], strides = [1, 1]} : vector<16x48xf32> to vector<16x12xf32>
    %495 = vector.extract_strided_slice %434 {offsets = [0, 150], sizes = [16, 30], strides = [1, 1]} : vector<16x450xf32> to vector<16x30xf32>
    %cst_111 = arith.constant dense<0.000000e+00> : vector<16x48xf32>
    %496 = tpu.matmul %495, %436, %cst_111 {dimension_numbers = #tpu.dot_dimension_numbers<[1], [0], [0], [1], [0, 0, 1, 1], [], []>} : vector<16x30xf32>, vector<30x48xf32>, vector<16x48xf32> -> vector<16x48xf32>
    %497 = vector.extract_strided_slice %496 {offsets = [0, 0], sizes = [16, 12], strides = [1, 1]} : vector<16x48xf32> to vector<16x12xf32>
    %498 = vector.extract_strided_slice %496 {offsets = [0, 12], sizes = [16, 12], strides = [1, 1]} : vector<16x48xf32> to vector<16x12xf32>
    %499 = vector.extract_strided_slice %496 {offsets = [0, 24], sizes = [16, 12], strides = [1, 1]} : vector<16x48xf32> to vector<16x12xf32>
    %500 = vector.extract_strided_slice %496 {offsets = [0, 36], sizes = [16, 12], strides = [1, 1]} : vector<16x48xf32> to vector<16x12xf32>
    %501 = vector.extract_strided_slice %434 {offsets = [0, 180], sizes = [16, 30], strides = [1, 1]} : vector<16x450xf32> to vector<16x30xf32>
    %cst_112 = arith.constant dense<0.000000e+00> : vector<16x48xf32>
    %502 = tpu.matmul %501, %436, %cst_112 {dimension_numbers = #tpu.dot_dimension_numbers<[1], [0], [0], [1], [0, 0, 1, 1], [], []>} : vector<16x30xf32>, vector<30x48xf32>, vector<16x48xf32> -> vector<16x48xf32>
    %503 = vector.extract_strided_slice %502 {offsets = [0, 0], sizes = [16, 12], strides = [1, 1]} : vector<16x48xf32> to vector<16x12xf32>
    %504 = vector.extract_strided_slice %502 {offsets = [0, 12], sizes = [16, 12], strides = [1, 1]} : vector<16x48xf32> to vector<16x12xf32>
    %505 = vector.extract_strided_slice %502 {offsets = [0, 24], sizes = [16, 12], strides = [1, 1]} : vector<16x48xf32> to vector<16x12xf32>
    %506 = vector.extract_strided_slice %502 {offsets = [0, 36], sizes = [16, 12], strides = [1, 1]} : vector<16x48xf32> to vector<16x12xf32>
    %507 = vector.extract_strided_slice %434 {offsets = [0, 210], sizes = [16, 30], strides = [1, 1]} : vector<16x450xf32> to vector<16x30xf32>
    %cst_113 = arith.constant dense<0.000000e+00> : vector<16x48xf32>
    %508 = tpu.matmul %507, %436, %cst_113 {dimension_numbers = #tpu.dot_dimension_numbers<[1], [0], [0], [1], [0, 0, 1, 1], [], []>} : vector<16x30xf32>, vector<30x48xf32>, vector<16x48xf32> -> vector<16x48xf32>
    %509 = vector.extract_strided_slice %508 {offsets = [0, 0], sizes = [16, 12], strides = [1, 1]} : vector<16x48xf32> to vector<16x12xf32>
    %510 = vector.extract_strided_slice %508 {offsets = [0, 12], sizes = [16, 12], strides = [1, 1]} : vector<16x48xf32> to vector<16x12xf32>
    %511 = vector.extract_strided_slice %508 {offsets = [0, 24], sizes = [16, 12], strides = [1, 1]} : vector<16x48xf32> to vector<16x12xf32>
    %512 = vector.extract_strided_slice %508 {offsets = [0, 36], sizes = [16, 12], strides = [1, 1]} : vector<16x48xf32> to vector<16x12xf32>
    %513 = tpu.concatenate %491, %492, %493, %494, %497, %498, %499, %500, %503, %504, %505, %506, %509, %510, %511, %512 in 0 : vector<16x12xf32>, vector<16x12xf32>, vector<16x12xf32>, vector<16x12xf32>, vector<16x12xf32>, vector<16x12xf32>, vector<16x12xf32>, vector<16x12xf32>, vector<16x12xf32>, vector<16x12xf32>, vector<16x12xf32>, vector<16x12xf32>, vector<16x12xf32>, vector<16x12xf32>, vector<16x12xf32>, vector<16x12xf32> -> vector<256x12xf32>
    %cst_114 = arith.constant dense<0.000000e+00> : vector<32x12xf32>
    %514 = tpu.matmul %435, %513, %cst_114 {dimension_numbers = #tpu.dot_dimension_numbers<[1], [0], [0], [1], [0, 0, 1, 1], [], []>} : vector<32x256xf32>, vector<256x12xf32>, vector<32x12xf32> -> vector<32x12xf32>
    %515 = vector.extract_strided_slice %434 {offsets = [0, 180], sizes = [16, 30], strides = [1, 1]} : vector<16x450xf32> to vector<16x30xf32>
    %cst_115 = arith.constant dense<0.000000e+00> : vector<16x48xf32>
    %516 = tpu.matmul %515, %436, %cst_115 {dimension_numbers = #tpu.dot_dimension_numbers<[1], [0], [0], [1], [0, 0, 1, 1], [], []>} : vector<16x30xf32>, vector<30x48xf32>, vector<16x48xf32> -> vector<16x48xf32>
    %517 = vector.extract_strided_slice %516 {offsets = [0, 0], sizes = [16, 12], strides = [1, 1]} : vector<16x48xf32> to vector<16x12xf32>
    %518 = vector.extract_strided_slice %516 {offsets = [0, 12], sizes = [16, 12], strides = [1, 1]} : vector<16x48xf32> to vector<16x12xf32>
    %519 = vector.extract_strided_slice %516 {offsets = [0, 24], sizes = [16, 12], strides = [1, 1]} : vector<16x48xf32> to vector<16x12xf32>
    %520 = vector.extract_strided_slice %516 {offsets = [0, 36], sizes = [16, 12], strides = [1, 1]} : vector<16x48xf32> to vector<16x12xf32>
    %521 = vector.extract_strided_slice %434 {offsets = [0, 210], sizes = [16, 30], strides = [1, 1]} : vector<16x450xf32> to vector<16x30xf32>
    %cst_116 = arith.constant dense<0.000000e+00> : vector<16x48xf32>
    %522 = tpu.matmul %521, %436, %cst_116 {dimension_numbers = #tpu.dot_dimension_numbers<[1], [0], [0], [1], [0, 0, 1, 1], [], []>} : vector<16x30xf32>, vector<30x48xf32>, vector<16x48xf32> -> vector<16x48xf32>
    %523 = vector.extract_strided_slice %522 {offsets = [0, 0], sizes = [16, 12], strides = [1, 1]} : vector<16x48xf32> to vector<16x12xf32>
    %524 = vector.extract_strided_slice %522 {offsets = [0, 12], sizes = [16, 12], strides = [1, 1]} : vector<16x48xf32> to vector<16x12xf32>
    %525 = vector.extract_strided_slice %522 {offsets = [0, 24], sizes = [16, 12], strides = [1, 1]} : vector<16x48xf32> to vector<16x12xf32>
    %526 = vector.extract_strided_slice %522 {offsets = [0, 36], sizes = [16, 12], strides = [1, 1]} : vector<16x48xf32> to vector<16x12xf32>
    %527 = vector.extract_strided_slice %434 {offsets = [0, 240], sizes = [16, 30], strides = [1, 1]} : vector<16x450xf32> to vector<16x30xf32>
    %cst_117 = arith.constant dense<0.000000e+00> : vector<16x48xf32>
    %528 = tpu.matmul %527, %436, %cst_117 {dimension_numbers = #tpu.dot_dimension_numbers<[1], [0], [0], [1], [0, 0, 1, 1], [], []>} : vector<16x30xf32>, vector<30x48xf32>, vector<16x48xf32> -> vector<16x48xf32>
    %529 = vector.extract_strided_slice %528 {offsets = [0, 0], sizes = [16, 12], strides = [1, 1]} : vector<16x48xf32> to vector<16x12xf32>
    %530 = vector.extract_strided_slice %528 {offsets = [0, 12], sizes = [16, 12], strides = [1, 1]} : vector<16x48xf32> to vector<16x12xf32>
    %531 = vector.extract_strided_slice %528 {offsets = [0, 24], sizes = [16, 12], strides = [1, 1]} : vector<16x48xf32> to vector<16x12xf32>
    %532 = vector.extract_strided_slice %528 {offsets = [0, 36], sizes = [16, 12], strides = [1, 1]} : vector<16x48xf32> to vector<16x12xf32>
    %533 = vector.extract_strided_slice %434 {offsets = [0, 270], sizes = [16, 30], strides = [1, 1]} : vector<16x450xf32> to vector<16x30xf32>
    %cst_118 = arith.constant dense<0.000000e+00> : vector<16x48xf32>
    %534 = tpu.matmul %533, %436, %cst_118 {dimension_numbers = #tpu.dot_dimension_numbers<[1], [0], [0], [1], [0, 0, 1, 1], [], []>} : vector<16x30xf32>, vector<30x48xf32>, vector<16x48xf32> -> vector<16x48xf32>
    %535 = vector.extract_strided_slice %534 {offsets = [0, 0], sizes = [16, 12], strides = [1, 1]} : vector<16x48xf32> to vector<16x12xf32>
    %536 = vector.extract_strided_slice %534 {offsets = [0, 12], sizes = [16, 12], strides = [1, 1]} : vector<16x48xf32> to vector<16x12xf32>
    %537 = vector.extract_strided_slice %534 {offsets = [0, 24], sizes = [16, 12], strides = [1, 1]} : vector<16x48xf32> to vector<16x12xf32>
    %538 = vector.extract_strided_slice %534 {offsets = [0, 36], sizes = [16, 12], strides = [1, 1]} : vector<16x48xf32> to vector<16x12xf32>
    %539 = tpu.concatenate %517, %518, %519, %520, %523, %524, %525, %526, %529, %530, %531, %532, %535, %536, %537, %538 in 0 : vector<16x12xf32>, vector<16x12xf32>, vector<16x12xf32>, vector<16x12xf32>, vector<16x12xf32>, vector<16x12xf32>, vector<16x12xf32>, vector<16x12xf32>, vector<16x12xf32>, vector<16x12xf32>, vector<16x12xf32>, vector<16x12xf32>, vector<16x12xf32>, vector<16x12xf32>, vector<16x12xf32>, vector<16x12xf32> -> vector<256x12xf32>
    %cst_119 = arith.constant dense<0.000000e+00> : vector<32x12xf32>
    %540 = tpu.matmul %435, %539, %cst_119 {dimension_numbers = #tpu.dot_dimension_numbers<[1], [0], [0], [1], [0, 0, 1, 1], [], []>} : vector<32x256xf32>, vector<256x12xf32>, vector<32x12xf32> -> vector<32x12xf32>
    %541 = vector.extract_strided_slice %434 {offsets = [0, 240], sizes = [16, 30], strides = [1, 1]} : vector<16x450xf32> to vector<16x30xf32>
    %cst_120 = arith.constant dense<0.000000e+00> : vector<16x48xf32>
    %542 = tpu.matmul %541, %436, %cst_120 {dimension_numbers = #tpu.dot_dimension_numbers<[1], [0], [0], [1], [0, 0, 1, 1], [], []>} : vector<16x30xf32>, vector<30x48xf32>, vector<16x48xf32> -> vector<16x48xf32>
    %543 = vector.extract_strided_slice %542 {offsets = [0, 0], sizes = [16, 12], strides = [1, 1]} : vector<16x48xf32> to vector<16x12xf32>
    %544 = vector.extract_strided_slice %542 {offsets = [0, 12], sizes = [16, 12], strides = [1, 1]} : vector<16x48xf32> to vector<16x12xf32>
    %545 = vector.extract_strided_slice %542 {offsets = [0, 24], sizes = [16, 12], strides = [1, 1]} : vector<16x48xf32> to vector<16x12xf32>
    %546 = vector.extract_strided_slice %542 {offsets = [0, 36], sizes = [16, 12], strides = [1, 1]} : vector<16x48xf32> to vector<16x12xf32>
    %547 = vector.extract_strided_slice %434 {offsets = [0, 270], sizes = [16, 30], strides = [1, 1]} : vector<16x450xf32> to vector<16x30xf32>
    %cst_121 = arith.constant dense<0.000000e+00> : vector<16x48xf32>
    %548 = tpu.matmul %547, %436, %cst_121 {dimension_numbers = #tpu.dot_dimension_numbers<[1], [0], [0], [1], [0, 0, 1, 1], [], []>} : vector<16x30xf32>, vector<30x48xf32>, vector<16x48xf32> -> vector<16x48xf32>
    %549 = vector.extract_strided_slice %548 {offsets = [0, 0], sizes = [16, 12], strides = [1, 1]} : vector<16x48xf32> to vector<16x12xf32>
    %550 = vector.extract_strided_slice %548 {offsets = [0, 12], sizes = [16, 12], strides = [1, 1]} : vector<16x48xf32> to vector<16x12xf32>
    %551 = vector.extract_strided_slice %548 {offsets = [0, 24], sizes = [16, 12], strides = [1, 1]} : vector<16x48xf32> to vector<16x12xf32>
    %552 = vector.extract_strided_slice %548 {offsets = [0, 36], sizes = [16, 12], strides = [1, 1]} : vector<16x48xf32> to vector<16x12xf32>
    %553 = vector.extract_strided_slice %434 {offsets = [0, 300], sizes = [16, 30], strides = [1, 1]} : vector<16x450xf32> to vector<16x30xf32>
    %cst_122 = arith.constant dense<0.000000e+00> : vector<16x48xf32>
    %554 = tpu.matmul %553, %436, %cst_122 {dimension_numbers = #tpu.dot_dimension_numbers<[1], [0], [0], [1], [0, 0, 1, 1], [], []>} : vector<16x30xf32>, vector<30x48xf32>, vector<16x48xf32> -> vector<16x48xf32>
    %555 = vector.extract_strided_slice %554 {offsets = [0, 0], sizes = [16, 12], strides = [1, 1]} : vector<16x48xf32> to vector<16x12xf32>
    %556 = vector.extract_strided_slice %554 {offsets = [0, 12], sizes = [16, 12], strides = [1, 1]} : vector<16x48xf32> to vector<16x12xf32>
    %557 = vector.extract_strided_slice %554 {offsets = [0, 24], sizes = [16, 12], strides = [1, 1]} : vector<16x48xf32> to vector<16x12xf32>
    %558 = vector.extract_strided_slice %554 {offsets = [0, 36], sizes = [16, 12], strides = [1, 1]} : vector<16x48xf32> to vector<16x12xf32>
    %559 = vector.extract_strided_slice %434 {offsets = [0, 330], sizes = [16, 30], strides = [1, 1]} : vector<16x450xf32> to vector<16x30xf32>
    %cst_123 = arith.constant dense<0.000000e+00> : vector<16x48xf32>
    %560 = tpu.matmul %559, %436, %cst_123 {dimension_numbers = #tpu.dot_dimension_numbers<[1], [0], [0], [1], [0, 0, 1, 1], [], []>} : vector<16x30xf32>, vector<30x48xf32>, vector<16x48xf32> -> vector<16x48xf32>
    %561 = vector.extract_strided_slice %560 {offsets = [0, 0], sizes = [16, 12], strides = [1, 1]} : vector<16x48xf32> to vector<16x12xf32>
    %562 = vector.extract_strided_slice %560 {offsets = [0, 12], sizes = [16, 12], strides = [1, 1]} : vector<16x48xf32> to vector<16x12xf32>
    %563 = vector.extract_strided_slice %560 {offsets = [0, 24], sizes = [16, 12], strides = [1, 1]} : vector<16x48xf32> to vector<16x12xf32>
    %564 = vector.extract_strided_slice %560 {offsets = [0, 36], sizes = [16, 12], strides = [1, 1]} : vector<16x48xf32> to vector<16x12xf32>
    %565 = tpu.concatenate %543, %544, %545, %546, %549, %550, %551, %552, %555, %556, %557, %558, %561, %562, %563, %564 in 0 : vector<16x12xf32>, vector<16x12xf32>, vector<16x12xf32>, vector<16x12xf32>, vector<16x12xf32>, vector<16x12xf32>, vector<16x12xf32>, vector<16x12xf32>, vector<16x12xf32>, vector<16x12xf32>, vector<16x12xf32>, vector<16x12xf32>, vector<16x12xf32>, vector<16x12xf32>, vector<16x12xf32>, vector<16x12xf32> -> vector<256x12xf32>
    %cst_124 = arith.constant dense<0.000000e+00> : vector<32x12xf32>
    %566 = tpu.matmul %435, %565, %cst_124 {dimension_numbers = #tpu.dot_dimension_numbers<[1], [0], [0], [1], [0, 0, 1, 1], [], []>} : vector<32x256xf32>, vector<256x12xf32>, vector<32x12xf32> -> vector<32x12xf32>
    %567 = vector.extract_strided_slice %434 {offsets = [0, 300], sizes = [16, 30], strides = [1, 1]} : vector<16x450xf32> to vector<16x30xf32>
    %cst_125 = arith.constant dense<0.000000e+00> : vector<16x48xf32>
    %568 = tpu.matmul %567, %436, %cst_125 {dimension_numbers = #tpu.dot_dimension_numbers<[1], [0], [0], [1], [0, 0, 1, 1], [], []>} : vector<16x30xf32>, vector<30x48xf32>, vector<16x48xf32> -> vector<16x48xf32>
    %569 = vector.extract_strided_slice %568 {offsets = [0, 0], sizes = [16, 12], strides = [1, 1]} : vector<16x48xf32> to vector<16x12xf32>
    %570 = vector.extract_strided_slice %568 {offsets = [0, 12], sizes = [16, 12], strides = [1, 1]} : vector<16x48xf32> to vector<16x12xf32>
    %571 = vector.extract_strided_slice %568 {offsets = [0, 24], sizes = [16, 12], strides = [1, 1]} : vector<16x48xf32> to vector<16x12xf32>
    %572 = vector.extract_strided_slice %568 {offsets = [0, 36], sizes = [16, 12], strides = [1, 1]} : vector<16x48xf32> to vector<16x12xf32>
    %573 = vector.extract_strided_slice %434 {offsets = [0, 330], sizes = [16, 30], strides = [1, 1]} : vector<16x450xf32> to vector<16x30xf32>
    %cst_126 = arith.constant dense<0.000000e+00> : vector<16x48xf32>
    %574 = tpu.matmul %573, %436, %cst_126 {dimension_numbers = #tpu.dot_dimension_numbers<[1], [0], [0], [1], [0, 0, 1, 1], [], []>} : vector<16x30xf32>, vector<30x48xf32>, vector<16x48xf32> -> vector<16x48xf32>
    %575 = vector.extract_strided_slice %574 {offsets = [0, 0], sizes = [16, 12], strides = [1, 1]} : vector<16x48xf32> to vector<16x12xf32>
    %576 = vector.extract_strided_slice %574 {offsets = [0, 12], sizes = [16, 12], strides = [1, 1]} : vector<16x48xf32> to vector<16x12xf32>
    %577 = vector.extract_strided_slice %574 {offsets = [0, 24], sizes = [16, 12], strides = [1, 1]} : vector<16x48xf32> to vector<16x12xf32>
    %578 = vector.extract_strided_slice %574 {offsets = [0, 36], sizes = [16, 12], strides = [1, 1]} : vector<16x48xf32> to vector<16x12xf32>
    %579 = vector.extract_strided_slice %434 {offsets = [0, 360], sizes = [16, 30], strides = [1, 1]} : vector<16x450xf32> to vector<16x30xf32>
    %cst_127 = arith.constant dense<0.000000e+00> : vector<16x48xf32>
    %580 = tpu.matmul %579, %436, %cst_127 {dimension_numbers = #tpu.dot_dimension_numbers<[1], [0], [0], [1], [0, 0, 1, 1], [], []>} : vector<16x30xf32>, vector<30x48xf32>, vector<16x48xf32> -> vector<16x48xf32>
    %581 = vector.extract_strided_slice %580 {offsets = [0, 0], sizes = [16, 12], strides = [1, 1]} : vector<16x48xf32> to vector<16x12xf32>
    %582 = vector.extract_strided_slice %580 {offsets = [0, 12], sizes = [16, 12], strides = [1, 1]} : vector<16x48xf32> to vector<16x12xf32>
    %583 = vector.extract_strided_slice %580 {offsets = [0, 24], sizes = [16, 12], strides = [1, 1]} : vector<16x48xf32> to vector<16x12xf32>
    %584 = vector.extract_strided_slice %580 {offsets = [0, 36], sizes = [16, 12], strides = [1, 1]} : vector<16x48xf32> to vector<16x12xf32>
    %585 = vector.extract_strided_slice %434 {offsets = [0, 390], sizes = [16, 30], strides = [1, 1]} : vector<16x450xf32> to vector<16x30xf32>
    %cst_128 = arith.constant dense<0.000000e+00> : vector<16x48xf32>
    %586 = tpu.matmul %585, %436, %cst_128 {dimension_numbers = #tpu.dot_dimension_numbers<[1], [0], [0], [1], [0, 0, 1, 1], [], []>} : vector<16x30xf32>, vector<30x48xf32>, vector<16x48xf32> -> vector<16x48xf32>
    %587 = vector.extract_strided_slice %586 {offsets = [0, 0], sizes = [16, 12], strides = [1, 1]} : vector<16x48xf32> to vector<16x12xf32>
    %588 = vector.extract_strided_slice %586 {offsets = [0, 12], sizes = [16, 12], strides = [1, 1]} : vector<16x48xf32> to vector<16x12xf32>
    %589 = vector.extract_strided_slice %586 {offsets = [0, 24], sizes = [16, 12], strides = [1, 1]} : vector<16x48xf32> to vector<16x12xf32>
    %590 = vector.extract_strided_slice %586 {offsets = [0, 36], sizes = [16, 12], strides = [1, 1]} : vector<16x48xf32> to vector<16x12xf32>
    %591 = tpu.concatenate %569, %570, %571, %572, %575, %576, %577, %578, %581, %582, %583, %584, %587, %588, %589, %590 in 0 : vector<16x12xf32>, vector<16x12xf32>, vector<16x12xf32>, vector<16x12xf32>, vector<16x12xf32>, vector<16x12xf32>, vector<16x12xf32>, vector<16x12xf32>, vector<16x12xf32>, vector<16x12xf32>, vector<16x12xf32>, vector<16x12xf32>, vector<16x12xf32>, vector<16x12xf32>, vector<16x12xf32>, vector<16x12xf32> -> vector<256x12xf32>
    %cst_129 = arith.constant dense<0.000000e+00> : vector<32x12xf32>
    %592 = tpu.matmul %435, %591, %cst_129 {dimension_numbers = #tpu.dot_dimension_numbers<[1], [0], [0], [1], [0, 0, 1, 1], [], []>} : vector<32x256xf32>, vector<256x12xf32>, vector<32x12xf32> -> vector<32x12xf32>
    %593 = tpu.concatenate %462, %488, %514, %540, %566, %592 in 1 : vector<32x12xf32>, vector<32x12xf32>, vector<32x12xf32>, vector<32x12xf32>, vector<32x12xf32>, vector<32x12xf32> -> vector<32x72xf32>
    %c0_130 = arith.constant 0 : index
    %c0_131 = arith.constant 0 : index
    %594 = vector.load %arg8[%c0_130, %c0_131] : memref<32x2xf32, #tpu.memory_space<vmem>>, vector<32x2xf32>
    %cst_132 = arith.constant dense<0.000000e+00> : vector<32xf32>
    %595 = vector.multi_reduction <add>, %593, %cst_132 [1] : vector<32x72xf32> to vector<32xf32>
    %596 = vector.shape_cast %595 : vector<32xf32> to vector<32x1xf32>
    %cst_133 = arith.constant 0.013888889 : f32
    %597 = vector.broadcast %cst_133 : f32 to vector<32x1xf32>
    %598 = arith.mulf %596, %597 : vector<32x1xf32>
    %599 = arith.mulf %593, %593 : vector<32x72xf32>
    %cst_134 = arith.constant dense<0.000000e+00> : vector<32xf32>
    %600 = vector.multi_reduction <add>, %599, %cst_134 [1] : vector<32x72xf32> to vector<32xf32>
    %601 = vector.shape_cast %600 : vector<32xf32> to vector<32x1xf32>
    %cst_135 = arith.constant 0.013888889 : f32
    %602 = vector.broadcast %cst_135 : f32 to vector<32x1xf32>
    %603 = arith.mulf %601, %602 : vector<32x1xf32>
    %604 = arith.mulf %598, %598 : vector<32x1xf32>
    %605 = arith.subf %603, %604 : vector<32x1xf32>
    %cst_136 = arith.constant 0.000000e+00 : f32
    %606 = vector.broadcast %cst_136 : f32 to vector<32x1xf32>
    %607 = arith.maximumf %605, %606 : vector<32x1xf32>
    %608 = vector.extract_strided_slice %594 {offsets = [0, 0], sizes = [32, 1], strides = [1, 1]} : vector<32x2xf32> to vector<32x1xf32>
    %cst_137 = arith.constant 9.99999974E-6 : f32
    %609 = vector.broadcast %cst_137 : f32 to vector<32x1xf32>
    %610 = arith.addf %607, %609 : vector<32x1xf32>
    %611 = math.rsqrt %610 : vector<32x1xf32>
    %612 = arith.mulf %608, %611 : vector<32x1xf32>
    %613 = vector.extract_strided_slice %594 {offsets = [0, 1], sizes = [32, 1], strides = [1, 1]} : vector<32x2xf32> to vector<32x1xf32>
    %614 = arith.mulf %598, %612 : vector<32x1xf32>
    %615 = arith.subf %613, %614 : vector<32x1xf32>
    %616 = vector.broadcast %612 : vector<32x1xf32> to vector<32x72xf32>
    %617 = arith.mulf %593, %616 : vector<32x72xf32>
    %618 = vector.broadcast %615 : vector<32x1xf32> to vector<32x72xf32>
    %619 = arith.addf %617, %618 : vector<32x72xf32>
    %cst_138 = arith.constant 0.000000e+00 : f32
    %620 = vector.broadcast %cst_138 : f32 to vector<32x72xf32>
    %621 = arith.cmpf oge, %619, %620 : vector<32x72xf32>
    %cst_139 = arith.constant 2.000000e-01 : f32
    %622 = vector.broadcast %cst_139 : f32 to vector<32x72xf32>
    %623 = arith.mulf %622, %619 : vector<32x72xf32>
    %624 = arith.select %621, %619, %623 : vector<32x72xi1>, vector<32x72xf32>
    %c0_140 = arith.constant 0 : index
    %c0_141 = arith.constant 0 : index
    %625 = vector.load %arg10[%c0_140, %c0_141] : memref<64x512xf32, #tpu.memory_space<vmem>>, vector<64x512xf32>
    %c0_142 = arith.constant 0 : index
    %c0_143 = arith.constant 0 : index
    %626 = vector.load %arg12[%c0_142, %c0_143] : memref<12x24xf32, #tpu.memory_space<vmem>>, vector<12x24xf32>
    %627 = vector.extract_strided_slice %624 {offsets = [0, 0], sizes = [32, 12], strides = [1, 1]} : vector<32x72xf32> to vector<32x12xf32>
    %cst_144 = arith.constant dense<0.000000e+00> : vector<32x24xf32>
    %628 = tpu.matmul %627, %626, %cst_144 {dimension_numbers = #tpu.dot_dimension_numbers<[1], [0], [0], [1], [0, 0, 1, 1], [], []>} : vector<32x12xf32>, vector<12x24xf32>, vector<32x24xf32> -> vector<32x24xf32>
    %629 = vector.extract_strided_slice %628 {offsets = [0, 0], sizes = [32, 6], strides = [1, 1]} : vector<32x24xf32> to vector<32x6xf32>
    %630 = vector.extract_strided_slice %628 {offsets = [0, 6], sizes = [32, 6], strides = [1, 1]} : vector<32x24xf32> to vector<32x6xf32>
    %631 = vector.extract_strided_slice %628 {offsets = [0, 12], sizes = [32, 6], strides = [1, 1]} : vector<32x24xf32> to vector<32x6xf32>
    %632 = vector.extract_strided_slice %628 {offsets = [0, 18], sizes = [32, 6], strides = [1, 1]} : vector<32x24xf32> to vector<32x6xf32>
    %633 = vector.extract_strided_slice %624 {offsets = [0, 12], sizes = [32, 12], strides = [1, 1]} : vector<32x72xf32> to vector<32x12xf32>
    %cst_145 = arith.constant dense<0.000000e+00> : vector<32x24xf32>
    %634 = tpu.matmul %633, %626, %cst_145 {dimension_numbers = #tpu.dot_dimension_numbers<[1], [0], [0], [1], [0, 0, 1, 1], [], []>} : vector<32x12xf32>, vector<12x24xf32>, vector<32x24xf32> -> vector<32x24xf32>
    %635 = vector.extract_strided_slice %634 {offsets = [0, 0], sizes = [32, 6], strides = [1, 1]} : vector<32x24xf32> to vector<32x6xf32>
    %636 = vector.extract_strided_slice %634 {offsets = [0, 6], sizes = [32, 6], strides = [1, 1]} : vector<32x24xf32> to vector<32x6xf32>
    %637 = vector.extract_strided_slice %634 {offsets = [0, 12], sizes = [32, 6], strides = [1, 1]} : vector<32x24xf32> to vector<32x6xf32>
    %638 = vector.extract_strided_slice %634 {offsets = [0, 18], sizes = [32, 6], strides = [1, 1]} : vector<32x24xf32> to vector<32x6xf32>
    %639 = vector.extract_strided_slice %624 {offsets = [0, 24], sizes = [32, 12], strides = [1, 1]} : vector<32x72xf32> to vector<32x12xf32>
    %cst_146 = arith.constant dense<0.000000e+00> : vector<32x24xf32>
    %640 = tpu.matmul %639, %626, %cst_146 {dimension_numbers = #tpu.dot_dimension_numbers<[1], [0], [0], [1], [0, 0, 1, 1], [], []>} : vector<32x12xf32>, vector<12x24xf32>, vector<32x24xf32> -> vector<32x24xf32>
    %641 = vector.extract_strided_slice %640 {offsets = [0, 0], sizes = [32, 6], strides = [1, 1]} : vector<32x24xf32> to vector<32x6xf32>
    %642 = vector.extract_strided_slice %640 {offsets = [0, 6], sizes = [32, 6], strides = [1, 1]} : vector<32x24xf32> to vector<32x6xf32>
    %643 = vector.extract_strided_slice %640 {offsets = [0, 12], sizes = [32, 6], strides = [1, 1]} : vector<32x24xf32> to vector<32x6xf32>
    %644 = vector.extract_strided_slice %640 {offsets = [0, 18], sizes = [32, 6], strides = [1, 1]} : vector<32x24xf32> to vector<32x6xf32>
    %645 = vector.extract_strided_slice %624 {offsets = [0, 36], sizes = [32, 12], strides = [1, 1]} : vector<32x72xf32> to vector<32x12xf32>
    %cst_147 = arith.constant dense<0.000000e+00> : vector<32x24xf32>
    %646 = tpu.matmul %645, %626, %cst_147 {dimension_numbers = #tpu.dot_dimension_numbers<[1], [0], [0], [1], [0, 0, 1, 1], [], []>} : vector<32x12xf32>, vector<12x24xf32>, vector<32x24xf32> -> vector<32x24xf32>
    %647 = vector.extract_strided_slice %646 {offsets = [0, 0], sizes = [32, 6], strides = [1, 1]} : vector<32x24xf32> to vector<32x6xf32>
    %648 = vector.extract_strided_slice %646 {offsets = [0, 6], sizes = [32, 6], strides = [1, 1]} : vector<32x24xf32> to vector<32x6xf32>
    %649 = vector.extract_strided_slice %646 {offsets = [0, 12], sizes = [32, 6], strides = [1, 1]} : vector<32x24xf32> to vector<32x6xf32>
    %650 = vector.extract_strided_slice %646 {offsets = [0, 18], sizes = [32, 6], strides = [1, 1]} : vector<32x24xf32> to vector<32x6xf32>
    %651 = tpu.concatenate %629, %630, %631, %632, %635, %636, %637, %638, %641, %642, %643, %644, %647, %648, %649, %650 in 0 : vector<32x6xf32>, vector<32x6xf32>, vector<32x6xf32>, vector<32x6xf32>, vector<32x6xf32>, vector<32x6xf32>, vector<32x6xf32>, vector<32x6xf32>, vector<32x6xf32>, vector<32x6xf32>, vector<32x6xf32>, vector<32x6xf32>, vector<32x6xf32>, vector<32x6xf32>, vector<32x6xf32>, vector<32x6xf32> -> vector<512x6xf32>
    %cst_148 = arith.constant dense<0.000000e+00> : vector<64x6xf32>
    %652 = tpu.matmul %625, %651, %cst_148 {dimension_numbers = #tpu.dot_dimension_numbers<[1], [0], [0], [1], [0, 0, 1, 1], [], []>} : vector<64x512xf32>, vector<512x6xf32>, vector<64x6xf32> -> vector<64x6xf32>
    %653 = vector.extract_strided_slice %624 {offsets = [0, 12], sizes = [32, 12], strides = [1, 1]} : vector<32x72xf32> to vector<32x12xf32>
    %cst_149 = arith.constant dense<0.000000e+00> : vector<32x24xf32>
    %654 = tpu.matmul %653, %626, %cst_149 {dimension_numbers = #tpu.dot_dimension_numbers<[1], [0], [0], [1], [0, 0, 1, 1], [], []>} : vector<32x12xf32>, vector<12x24xf32>, vector<32x24xf32> -> vector<32x24xf32>
    %655 = vector.extract_strided_slice %654 {offsets = [0, 0], sizes = [32, 6], strides = [1, 1]} : vector<32x24xf32> to vector<32x6xf32>
    %656 = vector.extract_strided_slice %654 {offsets = [0, 6], sizes = [32, 6], strides = [1, 1]} : vector<32x24xf32> to vector<32x6xf32>
    %657 = vector.extract_strided_slice %654 {offsets = [0, 12], sizes = [32, 6], strides = [1, 1]} : vector<32x24xf32> to vector<32x6xf32>
    %658 = vector.extract_strided_slice %654 {offsets = [0, 18], sizes = [32, 6], strides = [1, 1]} : vector<32x24xf32> to vector<32x6xf32>
    %659 = vector.extract_strided_slice %624 {offsets = [0, 24], sizes = [32, 12], strides = [1, 1]} : vector<32x72xf32> to vector<32x12xf32>
    %cst_150 = arith.constant dense<0.000000e+00> : vector<32x24xf32>
    %660 = tpu.matmul %659, %626, %cst_150 {dimension_numbers = #tpu.dot_dimension_numbers<[1], [0], [0], [1], [0, 0, 1, 1], [], []>} : vector<32x12xf32>, vector<12x24xf32>, vector<32x24xf32> -> vector<32x24xf32>
    %661 = vector.extract_strided_slice %660 {offsets = [0, 0], sizes = [32, 6], strides = [1, 1]} : vector<32x24xf32> to vector<32x6xf32>
    %662 = vector.extract_strided_slice %660 {offsets = [0, 6], sizes = [32, 6], strides = [1, 1]} : vector<32x24xf32> to vector<32x6xf32>
    %663 = vector.extract_strided_slice %660 {offsets = [0, 12], sizes = [32, 6], strides = [1, 1]} : vector<32x24xf32> to vector<32x6xf32>
    %664 = vector.extract_strided_slice %660 {offsets = [0, 18], sizes = [32, 6], strides = [1, 1]} : vector<32x24xf32> to vector<32x6xf32>
    %665 = vector.extract_strided_slice %624 {offsets = [0, 36], sizes = [32, 12], strides = [1, 1]} : vector<32x72xf32> to vector<32x12xf32>
    %cst_151 = arith.constant dense<0.000000e+00> : vector<32x24xf32>
    %666 = tpu.matmul %665, %626, %cst_151 {dimension_numbers = #tpu.dot_dimension_numbers<[1], [0], [0], [1], [0, 0, 1, 1], [], []>} : vector<32x12xf32>, vector<12x24xf32>, vector<32x24xf32> -> vector<32x24xf32>
    %667 = vector.extract_strided_slice %666 {offsets = [0, 0], sizes = [32, 6], strides = [1, 1]} : vector<32x24xf32> to vector<32x6xf32>
    %668 = vector.extract_strided_slice %666 {offsets = [0, 6], sizes = [32, 6], strides = [1, 1]} : vector<32x24xf32> to vector<32x6xf32>
    %669 = vector.extract_strided_slice %666 {offsets = [0, 12], sizes = [32, 6], strides = [1, 1]} : vector<32x24xf32> to vector<32x6xf32>
    %670 = vector.extract_strided_slice %666 {offsets = [0, 18], sizes = [32, 6], strides = [1, 1]} : vector<32x24xf32> to vector<32x6xf32>
    %671 = vector.extract_strided_slice %624 {offsets = [0, 48], sizes = [32, 12], strides = [1, 1]} : vector<32x72xf32> to vector<32x12xf32>
    %cst_152 = arith.constant dense<0.000000e+00> : vector<32x24xf32>
    %672 = tpu.matmul %671, %626, %cst_152 {dimension_numbers = #tpu.dot_dimension_numbers<[1], [0], [0], [1], [0, 0, 1, 1], [], []>} : vector<32x12xf32>, vector<12x24xf32>, vector<32x24xf32> -> vector<32x24xf32>
    %673 = vector.extract_strided_slice %672 {offsets = [0, 0], sizes = [32, 6], strides = [1, 1]} : vector<32x24xf32> to vector<32x6xf32>
    %674 = vector.extract_strided_slice %672 {offsets = [0, 6], sizes = [32, 6], strides = [1, 1]} : vector<32x24xf32> to vector<32x6xf32>
    %675 = vector.extract_strided_slice %672 {offsets = [0, 12], sizes = [32, 6], strides = [1, 1]} : vector<32x24xf32> to vector<32x6xf32>
    %676 = vector.extract_strided_slice %672 {offsets = [0, 18], sizes = [32, 6], strides = [1, 1]} : vector<32x24xf32> to vector<32x6xf32>
    %677 = tpu.concatenate %655, %656, %657, %658, %661, %662, %663, %664, %667, %668, %669, %670, %673, %674, %675, %676 in 0 : vector<32x6xf32>, vector<32x6xf32>, vector<32x6xf32>, vector<32x6xf32>, vector<32x6xf32>, vector<32x6xf32>, vector<32x6xf32>, vector<32x6xf32>, vector<32x6xf32>, vector<32x6xf32>, vector<32x6xf32>, vector<32x6xf32>, vector<32x6xf32>, vector<32x6xf32>, vector<32x6xf32>, vector<32x6xf32> -> vector<512x6xf32>
    %cst_153 = arith.constant dense<0.000000e+00> : vector<64x6xf32>
    %678 = tpu.matmul %625, %677, %cst_153 {dimension_numbers = #tpu.dot_dimension_numbers<[1], [0], [0], [1], [0, 0, 1, 1], [], []>} : vector<64x512xf32>, vector<512x6xf32>, vector<64x6xf32> -> vector<64x6xf32>
    %679 = vector.extract_strided_slice %624 {offsets = [0, 24], sizes = [32, 12], strides = [1, 1]} : vector<32x72xf32> to vector<32x12xf32>
    %cst_154 = arith.constant dense<0.000000e+00> : vector<32x24xf32>
    %680 = tpu.matmul %679, %626, %cst_154 {dimension_numbers = #tpu.dot_dimension_numbers<[1], [0], [0], [1], [0, 0, 1, 1], [], []>} : vector<32x12xf32>, vector<12x24xf32>, vector<32x24xf32> -> vector<32x24xf32>
    %681 = vector.extract_strided_slice %680 {offsets = [0, 0], sizes = [32, 6], strides = [1, 1]} : vector<32x24xf32> to vector<32x6xf32>
    %682 = vector.extract_strided_slice %680 {offsets = [0, 6], sizes = [32, 6], strides = [1, 1]} : vector<32x24xf32> to vector<32x6xf32>
    %683 = vector.extract_strided_slice %680 {offsets = [0, 12], sizes = [32, 6], strides = [1, 1]} : vector<32x24xf32> to vector<32x6xf32>
    %684 = vector.extract_strided_slice %680 {offsets = [0, 18], sizes = [32, 6], strides = [1, 1]} : vector<32x24xf32> to vector<32x6xf32>
    %685 = vector.extract_strided_slice %624 {offsets = [0, 36], sizes = [32, 12], strides = [1, 1]} : vector<32x72xf32> to vector<32x12xf32>
    %cst_155 = arith.constant dense<0.000000e+00> : vector<32x24xf32>
    %686 = tpu.matmul %685, %626, %cst_155 {dimension_numbers = #tpu.dot_dimension_numbers<[1], [0], [0], [1], [0, 0, 1, 1], [], []>} : vector<32x12xf32>, vector<12x24xf32>, vector<32x24xf32> -> vector<32x24xf32>
    %687 = vector.extract_strided_slice %686 {offsets = [0, 0], sizes = [32, 6], strides = [1, 1]} : vector<32x24xf32> to vector<32x6xf32>
    %688 = vector.extract_strided_slice %686 {offsets = [0, 6], sizes = [32, 6], strides = [1, 1]} : vector<32x24xf32> to vector<32x6xf32>
    %689 = vector.extract_strided_slice %686 {offsets = [0, 12], sizes = [32, 6], strides = [1, 1]} : vector<32x24xf32> to vector<32x6xf32>
    %690 = vector.extract_strided_slice %686 {offsets = [0, 18], sizes = [32, 6], strides = [1, 1]} : vector<32x24xf32> to vector<32x6xf32>
    %691 = vector.extract_strided_slice %624 {offsets = [0, 48], sizes = [32, 12], strides = [1, 1]} : vector<32x72xf32> to vector<32x12xf32>
    %cst_156 = arith.constant dense<0.000000e+00> : vector<32x24xf32>
    %692 = tpu.matmul %691, %626, %cst_156 {dimension_numbers = #tpu.dot_dimension_numbers<[1], [0], [0], [1], [0, 0, 1, 1], [], []>} : vector<32x12xf32>, vector<12x24xf32>, vector<32x24xf32> -> vector<32x24xf32>
    %693 = vector.extract_strided_slice %692 {offsets = [0, 0], sizes = [32, 6], strides = [1, 1]} : vector<32x24xf32> to vector<32x6xf32>
    %694 = vector.extract_strided_slice %692 {offsets = [0, 6], sizes = [32, 6], strides = [1, 1]} : vector<32x24xf32> to vector<32x6xf32>
    %695 = vector.extract_strided_slice %692 {offsets = [0, 12], sizes = [32, 6], strides = [1, 1]} : vector<32x24xf32> to vector<32x6xf32>
    %696 = vector.extract_strided_slice %692 {offsets = [0, 18], sizes = [32, 6], strides = [1, 1]} : vector<32x24xf32> to vector<32x6xf32>
    %697 = vector.extract_strided_slice %624 {offsets = [0, 60], sizes = [32, 12], strides = [1, 1]} : vector<32x72xf32> to vector<32x12xf32>
    %cst_157 = arith.constant dense<0.000000e+00> : vector<32x24xf32>
    %698 = tpu.matmul %697, %626, %cst_157 {dimension_numbers = #tpu.dot_dimension_numbers<[1], [0], [0], [1], [0, 0, 1, 1], [], []>} : vector<32x12xf32>, vector<12x24xf32>, vector<32x24xf32> -> vector<32x24xf32>
    %699 = vector.extract_strided_slice %698 {offsets = [0, 0], sizes = [32, 6], strides = [1, 1]} : vector<32x24xf32> to vector<32x6xf32>
    %700 = vector.extract_strided_slice %698 {offsets = [0, 6], sizes = [32, 6], strides = [1, 1]} : vector<32x24xf32> to vector<32x6xf32>
    %701 = vector.extract_strided_slice %698 {offsets = [0, 12], sizes = [32, 6], strides = [1, 1]} : vector<32x24xf32> to vector<32x6xf32>
    %702 = vector.extract_strided_slice %698 {offsets = [0, 18], sizes = [32, 6], strides = [1, 1]} : vector<32x24xf32> to vector<32x6xf32>
    %703 = tpu.concatenate %681, %682, %683, %684, %687, %688, %689, %690, %693, %694, %695, %696, %699, %700, %701, %702 in 0 : vector<32x6xf32>, vector<32x6xf32>, vector<32x6xf32>, vector<32x6xf32>, vector<32x6xf32>, vector<32x6xf32>, vector<32x6xf32>, vector<32x6xf32>, vector<32x6xf32>, vector<32x6xf32>, vector<32x6xf32>, vector<32x6xf32>, vector<32x6xf32>, vector<32x6xf32>, vector<32x6xf32>, vector<32x6xf32> -> vector<512x6xf32>
    %cst_158 = arith.constant dense<0.000000e+00> : vector<64x6xf32>
    %704 = tpu.matmul %625, %703, %cst_158 {dimension_numbers = #tpu.dot_dimension_numbers<[1], [0], [0], [1], [0, 0, 1, 1], [], []>} : vector<64x512xf32>, vector<512x6xf32>, vector<64x6xf32> -> vector<64x6xf32>
    %705 = tpu.concatenate %652, %678, %704 in 1 : vector<64x6xf32>, vector<64x6xf32>, vector<64x6xf32> -> vector<64x18xf32>
    %c0_159 = arith.constant 0 : index
    %c0_160 = arith.constant 0 : index
    %706 = vector.load %arg11[%c0_159, %c0_160] : memref<64x2xf32, #tpu.memory_space<vmem>>, vector<64x2xf32>
    %cst_161 = arith.constant dense<0.000000e+00> : vector<64xf32>
    %707 = vector.multi_reduction <add>, %705, %cst_161 [1] : vector<64x18xf32> to vector<64xf32>
    %708 = vector.shape_cast %707 : vector<64xf32> to vector<64x1xf32>
    %cst_162 = arith.constant 0.055555556 : f32
    %709 = vector.broadcast %cst_162 : f32 to vector<64x1xf32>
    %710 = arith.mulf %708, %709 : vector<64x1xf32>
    %711 = arith.mulf %705, %705 : vector<64x18xf32>
    %cst_163 = arith.constant dense<0.000000e+00> : vector<64xf32>
    %712 = vector.multi_reduction <add>, %711, %cst_163 [1] : vector<64x18xf32> to vector<64xf32>
    %713 = vector.shape_cast %712 : vector<64xf32> to vector<64x1xf32>
    %cst_164 = arith.constant 0.055555556 : f32
    %714 = vector.broadcast %cst_164 : f32 to vector<64x1xf32>
    %715 = arith.mulf %713, %714 : vector<64x1xf32>
    %716 = arith.mulf %710, %710 : vector<64x1xf32>
    %717 = arith.subf %715, %716 : vector<64x1xf32>
    %cst_165 = arith.constant 0.000000e+00 : f32
    %718 = vector.broadcast %cst_165 : f32 to vector<64x1xf32>
    %719 = arith.maximumf %717, %718 : vector<64x1xf32>
    %720 = vector.extract_strided_slice %706 {offsets = [0, 0], sizes = [64, 1], strides = [1, 1]} : vector<64x2xf32> to vector<64x1xf32>
    %cst_166 = arith.constant 9.99999974E-6 : f32
    %721 = vector.broadcast %cst_166 : f32 to vector<64x1xf32>
    %722 = arith.addf %719, %721 : vector<64x1xf32>
    %723 = math.rsqrt %722 : vector<64x1xf32>
    %724 = arith.mulf %720, %723 : vector<64x1xf32>
    %725 = vector.extract_strided_slice %706 {offsets = [0, 1], sizes = [64, 1], strides = [1, 1]} : vector<64x2xf32> to vector<64x1xf32>
    %726 = arith.mulf %710, %724 : vector<64x1xf32>
    %727 = arith.subf %725, %726 : vector<64x1xf32>
    %728 = vector.broadcast %724 : vector<64x1xf32> to vector<64x18xf32>
    %729 = arith.mulf %705, %728 : vector<64x18xf32>
    %730 = vector.broadcast %727 : vector<64x1xf32> to vector<64x18xf32>
    %731 = arith.addf %729, %730 : vector<64x18xf32>
    %cst_167 = arith.constant 0.000000e+00 : f32
    %732 = vector.broadcast %cst_167 : f32 to vector<64x18xf32>
    %733 = arith.cmpf oge, %731, %732 : vector<64x18xf32>
    %cst_168 = arith.constant 2.000000e-01 : f32
    %734 = vector.broadcast %cst_168 : f32 to vector<64x18xf32>
    %735 = arith.mulf %734, %731 : vector<64x18xf32>
    %736 = arith.select %733, %731, %735 : vector<64x18xi1>, vector<64x18xf32>
    %c0_169 = arith.constant 0 : index
    %c0_170 = arith.constant 0 : index
    %737 = vector.load %arg16[%c0_169, %c0_170] : memref<18x50xf32, #tpu.memory_space<vmem>>, vector<18x50xf32>
    %cst_171 = arith.constant dense<0.000000e+00> : vector<64x50xf32>
    %738 = tpu.matmul %736, %737, %cst_171 {dimension_numbers = #tpu.dot_dimension_numbers<[1], [0], [0], [1], [0, 0, 1, 1], [], []>} : vector<64x18xf32>, vector<18x50xf32>, vector<64x50xf32> -> vector<64x50xf32>
    %c0_172 = arith.constant 0 : index
    %c0_173 = arith.constant 0 : index
    %739 = vector.load %arg13[%c0_172, %c0_173] : memref<1x1024xf32, #tpu.memory_space<vmem>>, vector<1x1024xf32>
    %c0_174 = arith.constant 0 : index
    %c0_175 = arith.constant 0 : index
    %740 = vector.load %arg15[%c0_174, %c0_175] : memref<10x16xf32, #tpu.memory_space<vmem>>, vector<10x16xf32>
    %741 = vector.extract_strided_slice %738 {offsets = [0, 0], sizes = [64, 10], strides = [1, 1]} : vector<64x50xf32> to vector<64x10xf32>
    %cst_176 = arith.constant dense<0.000000e+00> : vector<64x16xf32>
    %742 = tpu.matmul %741, %740, %cst_176 {dimension_numbers = #tpu.dot_dimension_numbers<[1], [0], [0], [1], [0, 0, 1, 1], [], []>} : vector<64x10xf32>, vector<10x16xf32>, vector<64x16xf32> -> vector<64x16xf32>
    %743 = vector.extract_strided_slice %742 {offsets = [0, 0], sizes = [64, 4], strides = [1, 1]} : vector<64x16xf32> to vector<64x4xf32>
    %744 = vector.extract_strided_slice %742 {offsets = [0, 4], sizes = [64, 4], strides = [1, 1]} : vector<64x16xf32> to vector<64x4xf32>
    %745 = vector.extract_strided_slice %742 {offsets = [0, 8], sizes = [64, 4], strides = [1, 1]} : vector<64x16xf32> to vector<64x4xf32>
    %746 = vector.extract_strided_slice %742 {offsets = [0, 12], sizes = [64, 4], strides = [1, 1]} : vector<64x16xf32> to vector<64x4xf32>
    %747 = vector.extract_strided_slice %738 {offsets = [0, 10], sizes = [64, 10], strides = [1, 1]} : vector<64x50xf32> to vector<64x10xf32>
    %cst_177 = arith.constant dense<0.000000e+00> : vector<64x16xf32>
    %748 = tpu.matmul %747, %740, %cst_177 {dimension_numbers = #tpu.dot_dimension_numbers<[1], [0], [0], [1], [0, 0, 1, 1], [], []>} : vector<64x10xf32>, vector<10x16xf32>, vector<64x16xf32> -> vector<64x16xf32>
    %749 = vector.extract_strided_slice %748 {offsets = [0, 0], sizes = [64, 4], strides = [1, 1]} : vector<64x16xf32> to vector<64x4xf32>
    %750 = vector.extract_strided_slice %748 {offsets = [0, 4], sizes = [64, 4], strides = [1, 1]} : vector<64x16xf32> to vector<64x4xf32>
    %751 = vector.extract_strided_slice %748 {offsets = [0, 8], sizes = [64, 4], strides = [1, 1]} : vector<64x16xf32> to vector<64x4xf32>
    %752 = vector.extract_strided_slice %748 {offsets = [0, 12], sizes = [64, 4], strides = [1, 1]} : vector<64x16xf32> to vector<64x4xf32>
    %753 = vector.extract_strided_slice %738 {offsets = [0, 20], sizes = [64, 10], strides = [1, 1]} : vector<64x50xf32> to vector<64x10xf32>
    %cst_178 = arith.constant dense<0.000000e+00> : vector<64x16xf32>
    %754 = tpu.matmul %753, %740, %cst_178 {dimension_numbers = #tpu.dot_dimension_numbers<[1], [0], [0], [1], [0, 0, 1, 1], [], []>} : vector<64x10xf32>, vector<10x16xf32>, vector<64x16xf32> -> vector<64x16xf32>
    %755 = vector.extract_strided_slice %754 {offsets = [0, 0], sizes = [64, 4], strides = [1, 1]} : vector<64x16xf32> to vector<64x4xf32>
    %756 = vector.extract_strided_slice %754 {offsets = [0, 4], sizes = [64, 4], strides = [1, 1]} : vector<64x16xf32> to vector<64x4xf32>
    %757 = vector.extract_strided_slice %754 {offsets = [0, 8], sizes = [64, 4], strides = [1, 1]} : vector<64x16xf32> to vector<64x4xf32>
    %758 = vector.extract_strided_slice %754 {offsets = [0, 12], sizes = [64, 4], strides = [1, 1]} : vector<64x16xf32> to vector<64x4xf32>
    %759 = vector.extract_strided_slice %738 {offsets = [0, 30], sizes = [64, 10], strides = [1, 1]} : vector<64x50xf32> to vector<64x10xf32>
    %cst_179 = arith.constant dense<0.000000e+00> : vector<64x16xf32>
    %760 = tpu.matmul %759, %740, %cst_179 {dimension_numbers = #tpu.dot_dimension_numbers<[1], [0], [0], [1], [0, 0, 1, 1], [], []>} : vector<64x10xf32>, vector<10x16xf32>, vector<64x16xf32> -> vector<64x16xf32>
    %761 = vector.extract_strided_slice %760 {offsets = [0, 0], sizes = [64, 4], strides = [1, 1]} : vector<64x16xf32> to vector<64x4xf32>
    %762 = vector.extract_strided_slice %760 {offsets = [0, 4], sizes = [64, 4], strides = [1, 1]} : vector<64x16xf32> to vector<64x4xf32>
    %763 = vector.extract_strided_slice %760 {offsets = [0, 8], sizes = [64, 4], strides = [1, 1]} : vector<64x16xf32> to vector<64x4xf32>
    %764 = vector.extract_strided_slice %760 {offsets = [0, 12], sizes = [64, 4], strides = [1, 1]} : vector<64x16xf32> to vector<64x4xf32>
    %765 = tpu.concatenate %743, %744, %745, %746, %749, %750, %751, %752, %755, %756, %757, %758, %761, %762, %763, %764 in 0 : vector<64x4xf32>, vector<64x4xf32>, vector<64x4xf32>, vector<64x4xf32>, vector<64x4xf32>, vector<64x4xf32>, vector<64x4xf32>, vector<64x4xf32>, vector<64x4xf32>, vector<64x4xf32>, vector<64x4xf32>, vector<64x4xf32>, vector<64x4xf32>, vector<64x4xf32>, vector<64x4xf32>, vector<64x4xf32> -> vector<1024x4xf32>
    %cst_180 = arith.constant dense<0.000000e+00> : vector<1x4xf32>
    %766 = tpu.matmul %739, %765, %cst_180 {dimension_numbers = #tpu.dot_dimension_numbers<[1], [0], [0], [1], [0, 0, 1, 1], [], []>} : vector<1x1024xf32>, vector<1024x4xf32>, vector<1x4xf32> -> vector<1x4xf32>
    %767 = vector.extract_strided_slice %738 {offsets = [0, 10], sizes = [64, 10], strides = [1, 1]} : vector<64x50xf32> to vector<64x10xf32>
    %cst_181 = arith.constant dense<0.000000e+00> : vector<64x16xf32>
    %768 = tpu.matmul %767, %740, %cst_181 {dimension_numbers = #tpu.dot_dimension_numbers<[1], [0], [0], [1], [0, 0, 1, 1], [], []>} : vector<64x10xf32>, vector<10x16xf32>, vector<64x16xf32> -> vector<64x16xf32>
    %769 = vector.extract_strided_slice %768 {offsets = [0, 0], sizes = [64, 4], strides = [1, 1]} : vector<64x16xf32> to vector<64x4xf32>
    %770 = vector.extract_strided_slice %768 {offsets = [0, 4], sizes = [64, 4], strides = [1, 1]} : vector<64x16xf32> to vector<64x4xf32>
    %771 = vector.extract_strided_slice %768 {offsets = [0, 8], sizes = [64, 4], strides = [1, 1]} : vector<64x16xf32> to vector<64x4xf32>
    %772 = vector.extract_strided_slice %768 {offsets = [0, 12], sizes = [64, 4], strides = [1, 1]} : vector<64x16xf32> to vector<64x4xf32>
    %773 = vector.extract_strided_slice %738 {offsets = [0, 20], sizes = [64, 10], strides = [1, 1]} : vector<64x50xf32> to vector<64x10xf32>
    %cst_182 = arith.constant dense<0.000000e+00> : vector<64x16xf32>
    %774 = tpu.matmul %773, %740, %cst_182 {dimension_numbers = #tpu.dot_dimension_numbers<[1], [0], [0], [1], [0, 0, 1, 1], [], []>} : vector<64x10xf32>, vector<10x16xf32>, vector<64x16xf32> -> vector<64x16xf32>
    %775 = vector.extract_strided_slice %774 {offsets = [0, 0], sizes = [64, 4], strides = [1, 1]} : vector<64x16xf32> to vector<64x4xf32>
    %776 = vector.extract_strided_slice %774 {offsets = [0, 4], sizes = [64, 4], strides = [1, 1]} : vector<64x16xf32> to vector<64x4xf32>
    %777 = vector.extract_strided_slice %774 {offsets = [0, 8], sizes = [64, 4], strides = [1, 1]} : vector<64x16xf32> to vector<64x4xf32>
    %778 = vector.extract_strided_slice %774 {offsets = [0, 12], sizes = [64, 4], strides = [1, 1]} : vector<64x16xf32> to vector<64x4xf32>
    %779 = vector.extract_strided_slice %738 {offsets = [0, 30], sizes = [64, 10], strides = [1, 1]} : vector<64x50xf32> to vector<64x10xf32>
    %cst_183 = arith.constant dense<0.000000e+00> : vector<64x16xf32>
    %780 = tpu.matmul %779, %740, %cst_183 {dimension_numbers = #tpu.dot_dimension_numbers<[1], [0], [0], [1], [0, 0, 1, 1], [], []>} : vector<64x10xf32>, vector<10x16xf32>, vector<64x16xf32> -> vector<64x16xf32>
    %781 = vector.extract_strided_slice %780 {offsets = [0, 0], sizes = [64, 4], strides = [1, 1]} : vector<64x16xf32> to vector<64x4xf32>
    %782 = vector.extract_strided_slice %780 {offsets = [0, 4], sizes = [64, 4], strides = [1, 1]} : vector<64x16xf32> to vector<64x4xf32>
    %783 = vector.extract_strided_slice %780 {offsets = [0, 8], sizes = [64, 4], strides = [1, 1]} : vector<64x16xf32> to vector<64x4xf32>
    %784 = vector.extract_strided_slice %780 {offsets = [0, 12], sizes = [64, 4], strides = [1, 1]} : vector<64x16xf32> to vector<64x4xf32>
    %785 = vector.extract_strided_slice %738 {offsets = [0, 40], sizes = [64, 10], strides = [1, 1]} : vector<64x50xf32> to vector<64x10xf32>
    %cst_184 = arith.constant dense<0.000000e+00> : vector<64x16xf32>
    %786 = tpu.matmul %785, %740, %cst_184 {dimension_numbers = #tpu.dot_dimension_numbers<[1], [0], [0], [1], [0, 0, 1, 1], [], []>} : vector<64x10xf32>, vector<10x16xf32>, vector<64x16xf32> -> vector<64x16xf32>
    %787 = vector.extract_strided_slice %786 {offsets = [0, 0], sizes = [64, 4], strides = [1, 1]} : vector<64x16xf32> to vector<64x4xf32>
    %788 = vector.extract_strided_slice %786 {offsets = [0, 4], sizes = [64, 4], strides = [1, 1]} : vector<64x16xf32> to vector<64x4xf32>
    %789 = vector.extract_strided_slice %786 {offsets = [0, 8], sizes = [64, 4], strides = [1, 1]} : vector<64x16xf32> to vector<64x4xf32>
    %790 = vector.extract_strided_slice %786 {offsets = [0, 12], sizes = [64, 4], strides = [1, 1]} : vector<64x16xf32> to vector<64x4xf32>
    %791 = tpu.concatenate %769, %770, %771, %772, %775, %776, %777, %778, %781, %782, %783, %784, %787, %788, %789, %790 in 0 : vector<64x4xf32>, vector<64x4xf32>, vector<64x4xf32>, vector<64x4xf32>, vector<64x4xf32>, vector<64x4xf32>, vector<64x4xf32>, vector<64x4xf32>, vector<64x4xf32>, vector<64x4xf32>, vector<64x4xf32>, vector<64x4xf32>, vector<64x4xf32>, vector<64x4xf32>, vector<64x4xf32>, vector<64x4xf32> -> vector<1024x4xf32>
    %cst_185 = arith.constant dense<0.000000e+00> : vector<1x4xf32>
    %792 = tpu.matmul %739, %791, %cst_185 {dimension_numbers = #tpu.dot_dimension_numbers<[1], [0], [0], [1], [0, 0, 1, 1], [], []>} : vector<1x1024xf32>, vector<1024x4xf32>, vector<1x4xf32> -> vector<1x4xf32>
    %793 = tpu.concatenate %766, %792 in 1 : vector<1x4xf32>, vector<1x4xf32> -> vector<1x8xf32>
    %c0_186 = arith.constant 0 : index
    %c0_187 = arith.constant 0 : index
    %794 = vector.load %arg14[%c0_186, %c0_187] : memref<1x1xf32, #tpu.memory_space<vmem>>, vector<1x1xf32>
    %795 = vector.broadcast %794 : vector<1x1xf32> to vector<1x8xf32>
    %796 = arith.addf %793, %795 : vector<1x8xf32>
    %797 = vector.extract_strided_slice %796 {offsets = [0, 0], sizes = [1, 2], strides = [1, 1]} : vector<1x8xf32> to vector<1x2xf32>
    %798 = vector.shape_cast %797 : vector<1x2xf32> to vector<1x1x1x2xf32>
    %c0_188 = arith.constant 0 : index
    %c0_189 = arith.constant 0 : index
    %c0_190 = arith.constant 0 : index
    %c0_191 = arith.constant 0 : index
    %799 = vector.load %arg17[%c0_188, %c0_189, %c0_190, %c0_191] : memref<2x1x2x2xf32, #tpu.memory_space<vmem>>, vector<1x1x1x2xf32>
    tpu.vector_store %arg17[%c0_188, %c0_189, %c0_190, %c0_191], %798 {strides = array<i32>} : memref<2x1x2x2xf32, #tpu.memory_space<vmem>>, vector<1x1x1x2xf32>,
    %800 = vector.extract_strided_slice %796 {offsets = [0, 2], sizes = [1, 2], strides = [1, 1]} : vector<1x8xf32> to vector<1x2xf32>
    %801 = vector.shape_cast %800 : vector<1x2xf32> to vector<1x1x1x2xf32>
    %c1 = arith.constant 1 : index
    %c0_192 = arith.constant 0 : index
    %c0_193 = arith.constant 0 : index
    %c0_194 = arith.constant 0 : index
    %802 = vector.load %arg17[%c1, %c0_192, %c0_193, %c0_194] : memref<2x1x2x2xf32, #tpu.memory_space<vmem>>, vector<1x1x1x2xf32>
    tpu.vector_store %arg17[%c1, %c0_192, %c0_193, %c0_194], %801 {strides = array<i32>} : memref<2x1x2x2xf32, #tpu.memory_space<vmem>>, vector<1x1x1x2xf32>,
    %803 = vector.extract_strided_slice %796 {offsets = [0, 4], sizes = [1, 2], strides = [1, 1]} : vector<1x8xf32> to vector<1x2xf32>
    %804 = vector.shape_cast %803 : vector<1x2xf32> to vector<1x1x1x2xf32>
    %c0_195 = arith.constant 0 : index
    %c0_196 = arith.constant 0 : index
    %c1_197 = arith.constant 1 : index
    %c0_198 = arith.constant 0 : index
    %805 = vector.load %arg17[%c0_195, %c0_196, %c1_197, %c0_198] : memref<2x1x2x2xf32, #tpu.memory_space<vmem>>, vector<1x1x1x2xf32>
    tpu.vector_store %arg17[%c0_195, %c0_196, %c1_197, %c0_198], %804 {strides = array<i32>} : memref<2x1x2x2xf32, #tpu.memory_space<vmem>>, vector<1x1x1x2xf32>,
    %806 = vector.extract_strided_slice %796 {offsets = [0, 6], sizes = [1, 2], strides = [1, 1]} : vector<1x8xf32> to vector<1x2xf32>
    %807 = vector.shape_cast %806 : vector<1x2xf32> to vector<1x1x1x2xf32>
    %c1_199 = arith.constant 1 : index
    %c0_200 = arith.constant 0 : index
    %c1_201 = arith.constant 1 : index
    %c0_202 = arith.constant 0 : index
    %808 = vector.load %arg17[%c1_199, %c0_200, %c1_201, %c0_202] : memref<2x1x2x2xf32, #tpu.memory_space<vmem>>, vector<1x1x1x2xf32>
    tpu.vector_store %arg17[%c1_199, %c0_200, %c1_201, %c0_202], %807 {strides = array<i32>} : memref<2x1x2x2xf32, #tpu.memory_space<vmem>>, vector<1x1x1x2xf32>,
    return
  }
  func.func @transform_0(%arg0: i32) -> (i32, i32) {
    %c0_i32 = arith.constant 0 : i32
    %c0_i32_0 = arith.constant 0 : i32
    %c0_i32_1 = arith.constant 0 : i32
    return %c0_i32, %c0_i32_0 : i32, i32
  }
  func.func @transform_1(%arg0: i32) -> (i32, i32) {
    %c0_i32 = arith.constant 0 : i32
    %c0_i32_0 = arith.constant 0 : i32
    %c0_i32_1 = arith.constant 0 : i32
    return %c0_i32, %c0_i32_0 : i32, i32
  }
  func.func @transform_2(%arg0: i32) -> (i32, i32) {
    %c0_i32 = arith.constant 0 : i32
    %c0_i32_0 = arith.constant 0 : i32
    %c0_i32_1 = arith.constant 0 : i32
    return %c0_i32, %c0_i32_0 : i32, i32
  }
  func.func @transform_3(%arg0: i32) -> (i32, i32) {
    %c0_i32 = arith.constant 0 : i32
    %c0_i32_0 = arith.constant 0 : i32
    %c0_i32_1 = arith.constant 0 : i32
    return %c0_i32, %c0_i32_0 : i32, i32
  }
  func.func @transform_4(%arg0: i32) -> (i32, i32) {
    %c0_i32 = arith.constant 0 : i32
    %c0_i32_0 = arith.constant 0 : i32
    %c0_i32_1 = arith.constant 0 : i32
    return %c0_i32, %c0_i32_0 : i32, i32
  }
  func.func @transform_5(%arg0: i32) -> (i32, i32) {
    %c0_i32 = arith.constant 0 : i32
    %c0_i32_0 = arith.constant 0 : i32
    %c0_i32_1 = arith.constant 0 : i32
    return %c0_i32, %c0_i32_0 : i32, i32
  }
  func.func @transform_6(%arg0: i32) -> (i32, i32) {
    %c0_i32 = arith.constant 0 : i32
    %c0_i32_0 = arith.constant 0 : i32
    %c0_i32_1 = arith.constant 0 : i32
    return %c0_i32, %c0_i32_0 : i32, i32
  }
  func.func @transform_7(%arg0: i32) -> (i32, i32) {
    %c0_i32 = arith.constant 0 : i32
    %c0_i32_0 = arith.constant 0 : i32
    %c0_i32_1 = arith.constant 0 : i32
    return %c0_i32, %c0_i32_0 : i32, i32
  }
  func.func @transform_8(%arg0: i32) -> (i32, i32) {
    %c0_i32 = arith.constant 0 : i32
    %c0_i32_0 = arith.constant 0 : i32
    %c0_i32_1 = arith.constant 0 : i32
    return %c0_i32, %c0_i32_0 : i32, i32
  }
  func.func @transform_9(%arg0: i32) -> (i32, i32) {
    %c0_i32 = arith.constant 0 : i32
    %c0_i32_0 = arith.constant 0 : i32
    %c0_i32_1 = arith.constant 0 : i32
    return %c0_i32, %c0_i32_0 : i32, i32
  }
  func.func @transform_10(%arg0: i32) -> (i32, i32) {
    %c0_i32 = arith.constant 0 : i32
    %c0_i32_0 = arith.constant 0 : i32
    %c0_i32_1 = arith.constant 0 : i32
    return %c0_i32, %c0_i32_0 : i32, i32
  }
  func.func @transform_11(%arg0: i32) -> (i32, i32) {
    %c0_i32 = arith.constant 0 : i32
    %c0_i32_0 = arith.constant 0 : i32
    %c0_i32_1 = arith.constant 0 : i32
    return %c0_i32, %c0_i32_0 : i32, i32
  }
  func.func @transform_12(%arg0: i32) -> (i32, i32) {
    %c0_i32 = arith.constant 0 : i32
    %c0_i32_0 = arith.constant 0 : i32
    %c0_i32_1 = arith.constant 0 : i32
    return %c0_i32, %c0_i32_0 : i32, i32
  }
  func.func @transform_13(%arg0: i32) -> (i32, i32) {
    %c0_i32 = arith.constant 0 : i32
    %c0_i32_0 = arith.constant 0 : i32
    %c0_i32_1 = arith.constant 0 : i32
    return %c0_i32, %c0_i32_0 : i32, i32
  }
  func.func @transform_14(%arg0: i32) -> (i32, i32) {
    %c0_i32 = arith.constant 0 : i32
    %c0_i32_0 = arith.constant 0 : i32
    %c0_i32_1 = arith.constant 0 : i32
    return %c0_i32, %c0_i32_0 : i32, i32
  }
  func.func @transform_15(%arg0: i32) -> (i32, i32) {
    %c0_i32 = arith.constant 0 : i32
    %c0_i32_0 = arith.constant 0 : i32
    %c0_i32_1 = arith.constant 0 : i32
    return %c0_i32, %c0_i32_0 : i32, i32
  }
  func.func @transform_16(%arg0: i32) -> (i32, i32, i32, i32) {
    %c0_i32 = arith.constant 0 : i32
    %c0_i32_0 = arith.constant 0 : i32
    %c0_i32_1 = arith.constant 0 : i32
    %c0_i32_2 = arith.constant 0 : i32
    %c0_i32_3 = arith.constant 0 : i32
    return %c0_i32, %c0_i32_0, %c0_i32_1, %c0_i32_2 : i32, i32, i32, i32
  }
}

</mosaic_0001>

<bundles_post_ra>
// kernel: _lambda_.1
= control target key start
LH: loop header
LB: loop body
LE: loop exit
PB: predicated region body
PF: predicated region fallthrough
CT: control target
= control target key end

     0   :  { %s19505_s0 = inlined_call_operand.vmem [shape: bf16[96,2048], index: 0, kind: input, shape index: {}]   ;;  %s19506_s1 = inlined_call_operand.vmem [shape: bf16[8,96], index: 1, kind: input, shape index: {}]   ;;  %s19507_s2 = inlined_call_operand.vmem [shape: f32[8,1], index: 2, kind: input, shape index: {}]   ;;  %s19508_s3 = inlined_call_operand.vmem [shape: f32[16,128], index: 3, kind: input, shape index: {}]   ;;  %s19509_s4 = inlined_call_operand.vmem [shape: f32[16,2], index: 4, kind: input, shape index: {}]   ;;  %s19510_s5 = inlined_call_operand.vmem [shape: f32[64,120], index: 5, kind: input, shape index: {}]   ;;  %s19511_s6 = inlined_call_operand.vmem [shape: f32[32,256], index: 6, kind: input, shape index: {}]   ;;  %s19512_s7 = inlined_call_operand.vmem [shape: f32[32,2], index: 7, kind: input, shape index: {}]   ;;  %s19513_s8 = inlined_call_operand.vmem [shape: f32[30,48], index: 8, kind: input, shape index: {}]   ;;  %s19514_s9 = inlined_call_operand.vmem [shape: f32[64,512], index: 9, kind: input, shape index: {}]   ;;  %s19515_s10 = inlined_call_operand.vmem [shape: f32[64,2], index: 10, kind: input, shape index: {}]   ;;  %s19516_s11 = inlined_call_operand.vmem [shape: f32[12,24], index: 11, kind: input, shape index: {}]   ;;  %s19517_s12 = inlined_call_operand.vmem [shape: f32[1,1024], index: 12, kind: input, shape index: {}]   ;;  %s19518_s13 = inlined_call_operand.<no memory space> [shape: f32[1,1], index: 13, kind: input, shape index: {}]   ;;  %s19519_s14 = inlined_call_operand.vmem [shape: f32[10,16], index: 14, kind: input, shape index: {}]   ;;  %s19520_s15 = inlined_call_operand.vmem [shape: f32[18,50], index: 15, kind: input, shape index: {}]   ;;  %s19521_s16 = inlined_call_operand.hbm [shape: f32[2,1,2,2], index: 16, kind: output, shape index: {}]  }
   0x1   :  { %19573 = sst [smem:[#allocation49_spill]] %s19505_s0  ;;  %v21_v0 = vstv %s19518_s13 }
   0x2   :  { %22 = vst [vmem:[#allocation2] sm:$0x1] %v21_v0 }
   0x3   :  { %s19574_s25 = sld [smem:[#allocation49_spill]]  ;;  %v19523_v9 = vmov 0   ;;  %v14808_v60 = vld [vmem:[%s19506_s1] sm:$0xf]  ;;  %vm640_vm0 = vcmask 785408  }
   0x4   :  { %676 = vmatprep.mubr.bf16.mxu0 %v19523_v9  ;;  %717 = vmatprep.mubr.bf16.mxu1 %v19523_v9 }
   0x5   :  { %14480 = vset.pattern.permute.xlu0 %v19523_v9  ;;  %14481 = vset.pattern.permute.xlu1 %v19523_v9 }
   0x9   :  { %v138_v1 = vld [vmem:[%s19574_s25 + $0x280] sm:$0xff]  ;;  %v139_v3 = vld [vmem:[%s19574_s25 + $0x288] sm:$0xff]  ;;  %v140_v48 = vld [vmem:[%s19574_s25 + $0x290] sm:$0xff] }
   0xa   :  { %v146_v2 = vld [vmem:[%s19574_s25 + $0x2c0] sm:$0xff]  ;;  %v147_v5 = vld [vmem:[%s19574_s25 + $0x2c8] sm:$0xff]  ;;  %v148_v49 = vld [vmem:[%s19574_s25 + $0x2d0] sm:$0xff] }
   0xb   :  { %v11187_v4 = vcombine.high %v138_v1, %v146_v2  ;;  %v11186_v6 = vcombine.low %v138_v1, %v146_v2  ;;  %v122_v7 = vld [vmem:[%s19574_s25 + $0x200] sm:$0xff]  ;;  %v11189_v10 = vcombine.high %v139_v3, %v147_v5  ;;  %v11188_v11 = vcombine.low %v139_v3, %v147_v5  ;;  %v123_v13 = vld [vmem:[%s19574_s25 + $0x208] sm:$0xff]  ;;  %v141_v50 = vld [vmem:[%s19574_s25 + $0x298] sm:$0xff] }
   0xc   :  { %v130_v8 = vld [vmem:[%s19574_s25 + $0x240] sm:$0xff]  ;;  %v131_v14 = vld [vmem:[%s19574_s25 + $0x248] sm:$0xff]  ;;  %v149_v51 = vld [vmem:[%s19574_s25 + $0x2d8] sm:$0xff]  ;;  %v11191_v54 = vcombine.high %v140_v48, %v148_v49  ;;  %v11190_v61 = vcombine.low %v140_v48, %v148_v49 }
   0xd   :  { %v11171_v12 = vcombine.high %v122_v7, %v130_v8  ;;  %v106_v15 = vld [vmem:[%s19574_s25 + $0x180] sm:$0xff]  ;;  %648 = vmatprep.subr.bf16.mxu0 %v11187_v4  ;;  %v11173_v16 = vcombine.high %v123_v13, %v131_v14  ;;  %v107_v18 = vld [vmem:[%s19574_s25 + $0x188] sm:$0xff]  ;;  %689 = vmatprep.subr.bf16.mxu1 %v11189_v10  ;;  %v11170_v20 = vcombine.low %v122_v7, %v130_v8  ;;  %v124_v56 = vld [vmem:[%s19574_s25 + $0x210] sm:$0xff] }
   0xe   :  { %v114_v17 = vld [vmem:[%s19574_s25 + $0x1c0] sm:$0xff]  ;;  %v115_v19 = vld [vmem:[%s19574_s25 + $0x1c8] sm:$0xff]  ;;  %649 = vmatpush1.bf16.msra.mxu0 %v11186_v6  ;;  %690 = vmatpush1.bf16.msra.mxu1 %v11188_v11  ;;  %v11172_v21 = vcombine.low %v123_v13, %v131_v14  ;;  %v11193_v55 = vcombine.high %v141_v50, %v149_v51  ;;  %v132_v57 = vld [vmem:[%s19574_s25 + $0x250] sm:$0xff]  ;;  %v11192_v62 = vcombine.low %v141_v50, %v149_v51 }
   0xf   :  { %650 = vmatprep.subr.bf16.mxu0 %v11171_v12  ;;  %v11155_v22 = vcombine.high %v106_v15, %v114_v17  ;;  %691 = vmatprep.subr.bf16.mxu1 %v11173_v16  ;;  %v11157_v23 = vcombine.high %v107_v18, %v115_v19  ;;  %v90_v24 = vld [vmem:[%s19574_s25 + $0x100] sm:$0xff]  ;;  %v91_v26 = vld [vmem:[%s19574_s25 + $0x108] sm:$0xff]  ;;  %v11154_v28 = vcombine.low %v106_v15, %v114_v17  ;;  %v125_v58 = vld [vmem:[%s19574_s25 + $0x218] sm:$0xff] }
  0x10   :  { %v98_v25 = vld [vmem:[%s19574_s25 + $0x140] sm:$0xff]  ;;  %v99_v27 = vld [vmem:[%s19574_s25 + $0x148] sm:$0xff]  ;;  %v11156_v29 = vcombine.low %v107_v18, %v115_v19  ;;  %v133_v59 = vld [vmem:[%s19574_s25 + $0x258] sm:$0xff]  ;;  %v11175_v63 = vcombine.high %v124_v56, %v132_v57  ;;  %v11174_v5 = vcombine.low %v124_v56, %v132_v57 }
  0x11   :  { %v11139_v30 = vcombine.high %v90_v24, %v98_v25  ;;  %v11141_v31 = vcombine.high %v91_v26, %v99_v27  ;;  %v74_v32 = vld [vmem:[%s19574_s25 + $0x80] sm:$0xff]  ;;  %v75_v34 = vld [vmem:[%s19574_s25 + $0x88] sm:$0xff]  ;;  %v11138_v36 = vcombine.low %v90_v24, %v98_v25  ;;  %v11140_v37 = vcombine.low %v91_v26, %v99_v27  ;;  %v108_v1 = vld [vmem:[%s19574_s25 + $0x190] sm:$0xff] }
  0x12   :  { %651 = vmatpush1.bf16.msra.mxu0 %v11170_v20  ;;  %692 = vmatpush1.bf16.msra.mxu1 %v11172_v21  ;;  %v82_v33 = vld [vmem:[%s19574_s25 + $0xc0] sm:$0xff]  ;;  %v83_v35 = vld [vmem:[%s19574_s25 + $0xc8] sm:$0xff]  ;;  %v11177_v0 = vcombine.high %v125_v58, %v133_v59  ;;  %v116_v2 = vld [vmem:[%s19574_s25 + $0x1d0] sm:$0xff]  ;;  %v11176_v6 = vcombine.low %v125_v58, %v133_v59 }
  0x13   :  { %652 = vmatprep.subr.bf16.mxu0 %v11155_v22  ;;  %693 = vmatprep.subr.bf16.mxu1 %v11157_v23  ;;  %v11123_v38 = vcombine.high %v74_v32, %v82_v33  ;;  %v11125_v39 = vcombine.high %v75_v34, %v83_v35  ;;  %v58_v40 = vld [vmem:[%s19574_s25] sm:$0xff]  ;;  %v59_v42 = vld [vmem:[%s19574_s25 + $0x8] sm:$0xff]  ;;  %v11122_v44 = vcombine.low %v74_v32, %v82_v33  ;;  %v109_v3 = vld [vmem:[%s19574_s25 + $0x198] sm:$0xff] }
  0x14   :  { %v66_v41 = vld [vmem:[%s19574_s25 + $0x40] sm:$0xff]  ;;  %v67_v43 = vld [vmem:[%s19574_s25 + $0x48] sm:$0xff]  ;;  %v11124_v45 = vcombine.low %v75_v34, %v83_v35  ;;  %v117_v4 = vld [vmem:[%s19574_s25 + $0x1d8] sm:$0xff]  ;;  %v11159_v7 = vcombine.high %v108_v1, %v116_v2  ;;  %v11158_v14 = vcombine.low %v108_v1, %v116_v2 }
  0x15   :  { %v11107_v46 = vcombine.high %v58_v40, %v66_v41  ;;  %v11109_v47 = vcombine.high %v59_v42, %v67_v43  ;;  %v11106_v52 = vcombine.low %v58_v40, %v66_v41  ;;  %v11108_v53 = vcombine.low %v59_v42, %v67_v43  ;;  %v92_v10 = vld [vmem:[%s19574_s25 + $0x110] sm:$0xff]  ;;  %v93_v12 = vld [vmem:[%s19574_s25 + $0x118] sm:$0xff]  ;;  %v154_v15 = vld [vmem:[%s19507_s2] sm:$0xff] }
  0x16   :  { %653 = vmatpush1.bf16.msra.mxu0 %v11154_v28  ;;  %694 = vmatpush1.bf16.msra.mxu1 %v11156_v29  ;;  %v11161_v8 = vcombine.high %v109_v3, %v117_v4  ;;  %v100_v11 = vld [vmem:[%s19574_s25 + $0x150] sm:$0xff]  ;;  %v101_v13 = vld [vmem:[%s19574_s25 + $0x158] sm:$0xff]  ;;  %v11160_v16 = vcombine.low %v109_v3, %v117_v4 }
  0x17   :  { %654 = vmatprep.subr.bf16.mxu0 %v11139_v30  ;;  %695 = vmatprep.subr.bf16.mxu1 %v11141_v31  ;;  %v11143_v17 = vcombine.high %v92_v10, %v100_v11  ;;  %v11145_v18 = vcombine.high %v93_v12, %v101_v13  ;;  %v76_v19 = vld [vmem:[%s19574_s25 + $0x90] sm:$0xff] }
  0x18   :  { %v84_v20 = vld [vmem:[%s19574_s25 + $0xd0] sm:$0xff]  ;;  %157 = vperm.xlu0 %14480, %v154_v15  }
  0x1a   :  { %655 = vmatpush1.bf16.msra.mxu0 %v11138_v36  ;;  %696 = vmatpush1.bf16.msra.mxu1 %v11140_v37 }
  0x1b   :  { %656 = vmatprep.subr.bf16.mxu0 %v11123_v38  ;;  %697 = vmatprep.subr.bf16.mxu1 %v11125_v39 }
  0x1e   :  { %657 = vmatpush1.bf16.msra.mxu0 %v11122_v44  ;;  %698 = vmatpush1.bf16.msra.mxu1 %v11124_v45 }
  0x1f   :  { %658 = vmatprep.subr.bf16.mxu0 %v11107_v46  ;;  %699 = vmatprep.subr.bf16.mxu1 %v11109_v47 }
  0x22   :  { %659 = vmatpush1.bf16.msra.mxu0 %v11106_v52  ;;  %700 = vmatpush1.bf16.msra.mxu1 %v11108_v53 }
  0x23   :  { %730 = vmatprep.subr.bf16.mxu0 %v11191_v54  ;;  %771 = vmatprep.subr.bf16.mxu1 %v11193_v55 }
  0x25   :  { %11202 = vmatmul.mubr.msk.bf16.vlgmr.msra.gmra.mxu0 %vm640_vm0, %v14808_v60  ;;  %11203 = vmatmul.mubr.msk.bf16.vlgmr.msra.gmra.mxu1 %vm640_vm0, %v14808_v60 }
  0x26   :  { %731 = vmatpush1.bf16.msra.mxu0 %v11190_v61  ;;  %772 = vmatpush1.bf16.msra.mxu1 %v11192_v62 }
  0x27   :  { %732 = vmatprep.subr.bf16.mxu0 %v11175_v63  ;;  %773 = vmatprep.subr.bf16.mxu1 %v11177_v0 }
  0x28   :  { %758 = vmatprep.mubr.bf16.mxu0 %v19523_v9  ;;  %799 = vmatprep.mubr.bf16.mxu1 %v19523_v9 }
  0x2a   :  { %733 = vmatpush1.bf16.msra.mxu0 %v11174_v5  ;;  %774 = vmatpush1.bf16.msra.mxu1 %v11176_v6 }
  0x2b   :  { %734 = vmatprep.subr.bf16.mxu0 %v11159_v7  ;;  %775 = vmatprep.subr.bf16.mxu1 %v11161_v8 }
  0x2c   :  { %23 = vsyncpa [#allocation4], 0  ;;  %v77_v21 = vld [vmem:[%s19574_s25 + $0x98] sm:$0xff]  ;;  %v11142_v23 = vcombine.low %v92_v10, %v100_v11  ;;  %v11144_v24 = vcombine.low %v93_v12, %v101_v13  ;;  %v11127_v25 = vcombine.high %v76_v19, %v84_v20  ;;  %v60_v27 = vld [vmem:[%s19574_s25 + $0x10] sm:$0xff]  ;;  %v11126_v31 = vcombine.low %v76_v19, %v84_v20  ;;  %s14572_s22 = smov 64   ;;  %s14573_s23 = smov 68  }
  0x2d   :  { %v85_v22 = vld [vmem:[%s19574_s25 + $0xd8] sm:$0xff]  ;;  %v68_v28 = vld [vmem:[%s19574_s25 + $0x50] sm:$0xff]  ;;  %v142_v35 = vld [vmem:[%s19574_s25 + $0x2a0] sm:$0xff]  ;;  %vm14571_vm1 = vmmov 0   ;;  %vm1030_vm2 = vcmask 523264   ;;  %s14575_s24 = smov 98  }
  0x2e   :  { %735 = vmatpush1.bf16.msra.mxu0 %v11158_v14  ;;  %776 = vmatpush1.bf16.msra.mxu1 %v11160_v16  ;;  %v11129_v26 = vcombine.high %v77_v21, %v85_v22  ;;  %v61_v29 = vld [vmem:[%s19574_s25 + $0x18] sm:$0xff]  ;;  %v11128_v32 = vcombine.low %v77_v21, %v85_v22  ;;  %v11111_v33 = vcombine.high %v60_v27, %v68_v28  ;;  %v150_v36 = vld [vmem:[%s19574_s25 + $0x2e0] sm:$0xff]  ;;  %v143_v37 = vld [vmem:[%s19574_s25 + $0x2a8] sm:$0xff]  ;;  %s14577_s1 = smov 90   ;;  %s14578_s18 = smov 60  }
  0x2f   :  { %736 = vmatprep.subr.bf16.mxu0 %v11143_v17  ;;  %777 = vmatprep.subr.bf16.mxu1 %v11145_v18  ;;  %v69_v30 = vld [vmem:[%s19574_s25 + $0x58] sm:$0xff]  ;;  %v151_v38 = vld [vmem:[%s19574_s25 + $0x2e8] sm:$0xff]  ;;  %v11110_v39 = vcombine.low %v60_v27, %v68_v28  ;;  %v11195_v41 = vcombine.high %v142_v35, %v150_v36  ;;  %v126_v43 = vld [vmem:[%s19574_s25 + $0x220] sm:$0xff]  ;;  %v11194_v47 = vcombine.low %v142_v35, %v150_v36  ;;  %s14579_s19 = smov 120   ;;  %s14580_s20 = smov 22  }
  0x30   :  { %v11113_v34 = vcombine.high %v61_v29, %v69_v30  ;;  %v11112_v40 = vcombine.low %v61_v29, %v69_v30  ;;  %v11197_v42 = vcombine.high %v143_v37, %v151_v38  ;;  %v134_v44 = vld [vmem:[%s19574_s25 + $0x260] sm:$0xff]  ;;  %v127_v45 = vld [vmem:[%s19574_s25 + $0x228] sm:$0xff]  ;;  %v11196_v48 = vcombine.low %v143_v37, %v151_v38  ;;  %v144_v21 = vld [vmem:[%s19574_s25 + $0x2b0] sm:$0xff]  ;;  %s14581_s2 = smov 52   ;;  %s14582_s21 = smov 82  }
  0x31   :  { %v135_v46 = vld [vmem:[%s19574_s25 + $0x268] sm:$0xff]  ;;  %v11179_v49 = vcombine.high %v126_v43, %v134_v44  ;;  %v110_v51 = vld [vmem:[%s19574_s25 + $0x1a0] sm:$0xff]  ;;  %v11178_v55 = vcombine.low %v126_v43, %v134_v44  ;;  %v152_v22 = vld [vmem:[%s19574_s25 + $0x2f0] sm:$0xff]  ;;  %s14583_s26 = smov 112   ;;  %s14584_s27 = smov 14  }
  0x32   :  { %737 = vmatpush1.bf16.msra.mxu0 %v11142_v23  ;;  %778 = vmatpush1.bf16.msra.mxu1 %v11144_v24  ;;  %v11181_v50 = vcombine.high %v127_v45, %v135_v46  ;;  %v118_v52 = vld [vmem:[%s19574_s25 + $0x1e0] sm:$0xff]  ;;  %v111_v53 = vld [vmem:[%s19574_s25 + $0x1a8] sm:$0xff]  ;;  %v11180_v56 = vcombine.low %v127_v45, %v135_v46  ;;  %v145_v23 = vld [vmem:[%s19574_s25 + $0x2b8] sm:$0xff]  ;;  %v11199_v27 = vcombine.high %v144_v21, %v152_v22  ;;  %s14585_s28 = smov 44   ;;  %s14586_s29 = smov 74  }
  0x33   :  { %738 = vmatprep.subr.bf16.mxu0 %v11127_v25  ;;  %779 = vmatprep.subr.bf16.mxu1 %v11129_v26  ;;  %v119_v54 = vld [vmem:[%s19574_s25 + $0x1e8] sm:$0xff]  ;;  %v11163_v57 = vcombine.high %v110_v51, %v118_v52  ;;  %v94_v59 = vld [vmem:[%s19574_s25 + $0x120] sm:$0xff]  ;;  %v11162_v0 = vcombine.low %v110_v51, %v118_v52  ;;  %v153_v24 = vld [vmem:[%s19574_s25 + $0x2f8] sm:$0xff]  ;;  %s14588_s30 = smov 6   ;;  %s14592_s0 = smov 8  }
  0x34   :  { %v11165_v58 = vcombine.high %v111_v53, %v119_v54  ;;  %v102_v61 = vld [vmem:[%s19574_s25 + $0x160] sm:$0xff]  ;;  %v95_v62 = vld [vmem:[%s19574_s25 + $0x128] sm:$0xff]  ;;  %v11164_v1 = vcombine.low %v111_v53, %v119_v54  ;;  %v11201_v28 = vcombine.high %v145_v23, %v153_v24  ;;  %v128_v29 = vld [vmem:[%s19574_s25 + $0x230] sm:$0xff]  ;;  %s14594_s13 = smov 116   ;;  %s14595_s17 = smov 106  }
  0x35   :  { %v103_v63 = vld [vmem:[%s19574_s25 + $0x168] sm:$0xff]  ;;  %v11147_v2 = vcombine.high %v94_v59, %v102_v61  ;;  %v78_v4 = vld [vmem:[%s19574_s25 + $0xa0] sm:$0xff]  ;;  %v11146_v8 = vcombine.low %v94_v59, %v102_v61  ;;  %v136_v30 = vld [vmem:[%s19574_s25 + $0x270] sm:$0xff] }
  0x36   :  { %739 = vmatpush1.bf16.msra.mxu0 %v11126_v31  ;;  %780 = vmatpush1.bf16.msra.mxu1 %v11128_v32  ;;  %v11149_v3 = vcombine.high %v95_v62, %v103_v63  ;;  %v86_v5 = vld [vmem:[%s19574_s25 + $0xe0] sm:$0xff]  ;;  %v79_v6 = vld [vmem:[%s19574_s25 + $0xa8] sm:$0xff]  ;;  %v11148_v10 = vcombine.low %v95_v62, %v103_v63  ;;  %v129_v31 = vld [vmem:[%s19574_s25 + $0x238] sm:$0xff]  ;;  %v11183_v35 = vcombine.high %v128_v29, %v136_v30 }
  0x37   :  { %740 = vmatprep.subr.bf16.mxu0 %v11111_v33  ;;  %781 = vmatprep.subr.bf16.mxu1 %v11113_v34  ;;  %v87_v7 = vld [vmem:[%s19574_s25 + $0xe8] sm:$0xff]  ;;  %v11131_v11 = vcombine.high %v78_v4, %v86_v5  ;;  %v62_v13 = vld [vmem:[%s19574_s25 + $0x20] sm:$0xff]  ;;  %v11130_v17 = vcombine.low %v78_v4, %v86_v5  ;;  %v137_v32 = vld [vmem:[%s19574_s25 + $0x278] sm:$0xff]  ;;  %v11198_v33 = vcombine.low %v144_v21, %v152_v22 }
  0x38   :  { %v11133_v12 = vcombine.high %v79_v6, %v87_v7  ;;  %v70_v14 = vld [vmem:[%s19574_s25 + $0x60] sm:$0xff]  ;;  %v63_v15 = vld [vmem:[%s19574_s25 + $0x28] sm:$0xff]  ;;  %v11132_v18 = vcombine.low %v79_v6, %v87_v7  ;;  %v11200_v34 = vcombine.low %v145_v23, %v153_v24  ;;  %v11185_v36 = vcombine.high %v129_v31, %v137_v32  ;;  %v112_v37 = vld [vmem:[%s19574_s25 + $0x1b0] sm:$0xff] }
  0x39   :  { %v71_v16 = vld [vmem:[%s19574_s25 + $0x68] sm:$0xff]  ;;  %v11115_v19 = vcombine.high %v62_v13, %v70_v14  ;;  %v11114_v25 = vcombine.low %v62_v13, %v70_v14  ;;  %v120_v38 = vld [vmem:[%s19574_s25 + $0x1f0] sm:$0xff]  ;;  %v15063_v13 = vld [vmem:[%s19510_s5 + $0x18] sm:$0xff] }
  0x3a   :  { %741 = vmatpush1.bf16.msra.mxu0 %v11110_v39  ;;  %782 = vmatpush1.bf16.msra.mxu1 %v11112_v40  ;;  %v11117_v20 = vcombine.high %v63_v15, %v71_v16  ;;  %v11116_v26 = vcombine.low %v63_v15, %v71_v16  ;;  %v113_v39 = vld [vmem:[%s19574_s25 + $0x1b8] sm:$0xff]  ;;  %v11167_v43 = vcombine.high %v112_v37, %v120_v38  ;;  %v96_v45 = vld [vmem:[%s19574_s25 + $0x130] sm:$0xff]  ;;  %v15081_v15 = vld [vmem:[%s19510_s5 + $0x8] sm:$0xff] }
  0x3b   :  { %812 = vmatprep.subr.bf16.mxu0 %v11195_v41  ;;  %853 = vmatprep.subr.bf16.mxu1 %v11197_v42  ;;  %v121_v40 = vld [vmem:[%s19574_s25 + $0x1f8] sm:$0xff]  ;;  %v11182_v41 = vcombine.low %v128_v29, %v136_v30  ;;  %v11184_v42 = vcombine.low %v129_v31, %v137_v32  ;;  %v104_v46 = vld [vmem:[%s19574_s25 + $0x170] sm:$0xff]  ;;  %v15090_v16 = vld [vmem:[%s19510_s5] sm:$0xff] }
  0x3c   :  { %v11169_v44 = vcombine.high %v113_v39, %v121_v40  ;;  %v11151_v51 = vcombine.high %v96_v45, %v104_v46  ;;  %v80_v53 = vld [vmem:[%s19574_s25 + $0xb0] sm:$0xff] }
  0x3d   :  { %11204 = vmatmul.mubr.msk.bf16.vlgmr.msra.gmra.mxu0 %vm640_vm0, %v14808_v60  ;;  %11205 = vmatmul.mubr.msk.bf16.vlgmr.msra.gmra.mxu1 %vm640_vm0, %v14808_v60  ;;  %v88_v54 = vld [vmem:[%s19574_s25 + $0xf0] sm:$0xff] }
  0x3e   :  { %813 = vmatpush1.bf16.msra.mxu0 %v11194_v47  ;;  %854 = vmatpush1.bf16.msra.mxu1 %v11196_v48  ;;  %v97_v47 = vld [vmem:[%s19574_s25 + $0x138] sm:$0xff]  ;;  %v11135_v59 = vcombine.high %v80_v53, %v88_v54  ;;  %v64_v62 = vld [vmem:[%s19574_s25 + $0x30] sm:$0xff] }
  0x3f   :  { %814 = vmatprep.subr.bf16.mxu0 %v11179_v49  ;;  %855 = vmatprep.subr.bf16.mxu1 %v11181_v50  ;;  %v105_v48 = vld [vmem:[%s19574_s25 + $0x178] sm:$0xff]  ;;  %v11166_v49 = vcombine.low %v112_v37, %v120_v38  ;;  %v11168_v50 = vcombine.low %v113_v39, %v121_v40  ;;  %v72_v63 = vld [vmem:[%s19574_s25 + $0x70] sm:$0xff] }
  0x40   :  { %840 = vmatprep.mubr.bf16.mxu0 %v19523_v9  ;;  %881 = vmatprep.mubr.bf16.mxu1 %v19523_v9  ;;  %v11153_v52 = vcombine.high %v97_v47, %v105_v48  ;;  %v11119_v4 = vcombine.high %v64_v62, %v72_v63  ;;  %v11118_v6 = vcombine.low %v64_v62, %v72_v63  ;;  %v15072_v14 = vld [vmem:[%s19510_s5 + $0x10] sm:$0xff] }
  0x42   :  { %815 = vmatpush1.bf16.msra.mxu0 %v11178_v55  ;;  %856 = vmatpush1.bf16.msra.mxu1 %v11180_v56  ;;  %v81_v55 = vld [vmem:[%s19574_s25 + $0xb8] sm:$0xff] }
  0x43   :  { %816 = vmatprep.subr.bf16.mxu0 %v11163_v57  ;;  %857 = vmatprep.subr.bf16.mxu1 %v11165_v58  ;;  %v89_v56 = vld [vmem:[%s19574_s25 + $0xf8] sm:$0xff]  ;;  %v11150_v57 = vcombine.low %v96_v45, %v104_v46  ;;  %v11152_v58 = vcombine.low %v97_v47, %v105_v48 }
  0x44   :  { %v11137_v61 = vcombine.high %v81_v55, %v89_v56 }
  0x46   :  { %817 = vmatpush1.bf16.msra.mxu0 %v11162_v0  ;;  %858 = vmatpush1.bf16.msra.mxu1 %v11164_v1  ;;  %v65_v0 = vld [vmem:[%s19574_s25 + $0x38] sm:$0xff] }
  0x47   :  { %818 = vmatprep.subr.bf16.mxu0 %v11147_v2  ;;  %859 = vmatprep.subr.bf16.mxu1 %v11149_v3  ;;  %v73_v1 = vld [vmem:[%s19574_s25 + $0x78] sm:$0xff]  ;;  %v11134_v2 = vcombine.low %v80_v53, %v88_v54  ;;  %v11136_v3 = vcombine.low %v81_v55, %v89_v56  ;;  %s14574_s25 = smov 38  }
  0x48   :  { %v11121_v5 = vcombine.high %v65_v0, %v73_v1  ;;  %v11120_v7 = vcombine.low %v65_v0, %v73_v1 }
  0x4a   :  { %819 = vmatpush1.bf16.msra.mxu0 %v11146_v8  ;;  %860 = vmatpush1.bf16.msra.mxu1 %v11148_v10  ;;  %v14570_v8 = vmov 0.0   ;;  %v15027_v10 = vld [vmem:[%s19510_s5 + $0x38] sm:$0xff] }
  0x4b   :  { %820 = vmatprep.subr.bf16.mxu0 %v11131_v11  ;;  %861 = vmatprep.subr.bf16.mxu1 %v11133_v12  ;;  %v15035_v11 = vld [vmem:[%s19510_s5 + $0x30] sm:$0xff]  ;;  %v15044_v12 = vld [vmem:[%s19510_s5 + $0x28] sm:$0xff] }
  0x4e   :  { %821 = vmatpush1.bf16.msra.mxu0 %v11130_v17  ;;  %862 = vmatpush1.bf16.msra.mxu1 %v11132_v18 }
  0x4f   :  { %822 = vmatprep.subr.bf16.mxu0 %v11115_v19  ;;  %863 = vmatprep.subr.bf16.mxu1 %v11117_v20 }
  0x52   :  { %823 = vmatpush1.bf16.msra.mxu0 %v11114_v25  ;;  %864 = vmatpush1.bf16.msra.mxu1 %v11116_v26 }
  0x53   :  { %894 = vmatprep.subr.bf16.mxu0 %v11199_v27  ;;  %935 = vmatprep.subr.bf16.mxu1 %v11201_v28 }
  0x55   :  { %11206 = vmatmul.mubr.msk.bf16.vlgmr.msra.gmra.mxu0 %vm640_vm0, %v14808_v60  ;;  %11207 = vmatmul.mubr.msk.bf16.vlgmr.msra.gmra.mxu1 %vm640_vm0, %v14808_v60 }
  0x56   :  { %895 = vmatpush1.bf16.msra.mxu0 %v11198_v33  ;;  %936 = vmatpush1.bf16.msra.mxu1 %v11200_v34 }
  0x57   :  { %896 = vmatprep.subr.bf16.mxu0 %v11183_v35  ;;  %937 = vmatprep.subr.bf16.mxu1 %v11185_v36 }
  0x58   :  { %922 = vmatprep.mubr.bf16.mxu0 %v19523_v9  ;;  %963 = vmatprep.mubr.bf16.mxu1 %v19523_v9 }
  0x5a   :  { %897 = vmatpush1.bf16.msra.mxu0 %v11182_v41  ;;  %938 = vmatpush1.bf16.msra.mxu1 %v11184_v42 }
  0x5b   :  { %898 = vmatprep.subr.bf16.mxu0 %v11167_v43  ;;  %939 = vmatprep.subr.bf16.mxu1 %v11169_v44 }
  0x5e   :  { %899 = vmatpush1.bf16.msra.mxu0 %v11166_v49  ;;  %940 = vmatpush1.bf16.msra.mxu1 %v11168_v50 }
  0x5f   :  { %900 = vmatprep.subr.bf16.mxu0 %v11151_v51  ;;  %941 = vmatprep.subr.bf16.mxu1 %v11153_v52 }
  0x62   :  { %901 = vmatpush1.bf16.msra.mxu0 %v11150_v57  ;;  %942 = vmatpush1.bf16.msra.mxu1 %v11152_v58 }
  0x63   :  { %902 = vmatprep.subr.bf16.mxu0 %v11135_v59  ;;  %943 = vmatprep.subr.bf16.mxu1 %v11137_v61 }
  0x66   :  { %903 = vmatpush1.bf16.msra.mxu0 %v11134_v2  ;;  %944 = vmatpush1.bf16.msra.mxu1 %v11136_v3 }
  0x67   :  { %904 = vmatprep.subr.bf16.mxu0 %v11119_v4  ;;  %945 = vmatprep.subr.bf16.mxu1 %v11121_v5 }
  0x6a   :  { %905 = vmatpush1.bf16.msra.mxu0 %v11118_v6  ;;  %946 = vmatpush1.bf16.msra.mxu1 %v11120_v7 }
  0x6b   :  { %12987 = vmatprep.subr.mxu0 %v14570_v8  ;;  %13006 = vmatprep.subr.mxu1 %v14570_v8 }
  0x6d   :  { %11208 = vmatmul.mubr.msk.bf16.vlgmr.msra.gmra.mxu0 %vm640_vm0, %v14808_v60  ;;  %11209 = vmatmul.mubr.msk.bf16.vlgmr.msra.gmra.mxu1 %vm640_vm0, %v14808_v60  ;;  %v15054_v60 = vld [vmem:[%s19510_s5 + $0x20] sm:$0xff] }
  0x6e   :  { %12988 = vmatpush3.msra.mxu0 %v15027_v10  ;;  %13003 = vmatprep.mubr.msk.f32.mxu0 %vm14571_vm1, %v14570_v8 }
  0x6f   :  { %12989 = vmatprep.subr.mxu0 %v14570_v8  ;;  %13007 = vmatpush3.msra.mxu1 %v15027_v10 }
  0x70   :  { %12990 = vmatpush3.msra.mxu0 %v15035_v11  ;;  %13008 = vmatprep.subr.mxu1 %v14570_v8 }
  0x71   :  { %12991 = vmatprep.subr.mxu0 %v14570_v8  ;;  %13009 = vmatpush3.msra.mxu1 %v15035_v11 }
  0x72   :  { %12992 = vmatpush3.msra.mxu0 %v15044_v12  ;;  %13010 = vmatprep.subr.mxu1 %v14570_v8 }
  0x73   :  { %12993 = vmatprep.subr.mxu0 %v14570_v8  ;;  %13011 = vmatpush3.msra.mxu1 %v15044_v12 }
  0x74   :  { %12994 = vmatpush3.msra.mxu0 %v15054_v60  ;;  %13012 = vmatprep.subr.mxu1 %v14570_v8 }
  0x75   :  { %12995 = vmatprep.subr.mxu0 %v14570_v8  ;;  %13013 = vmatpush3.msra.mxu1 %v15054_v60 }
  0x76   :  { %12996 = vmatpush3.msra.mxu0 %v15063_v13  ;;  %13014 = vmatprep.subr.mxu1 %v14570_v8 }
  0x77   :  { %12997 = vmatprep.subr.mxu0 %v14570_v8  ;;  %13015 = vmatpush3.msra.mxu1 %v15063_v13 }
  0x78   :  { %12998 = vmatpush3.msra.mxu0 %v15072_v14  ;;  %13016 = vmatprep.subr.mxu1 %v14570_v8 }
  0x79   :  { %12999 = vmatprep.subr.mxu0 %v14570_v8  ;;  %13017 = vmatpush3.msra.mxu1 %v15072_v14 }
  0x7a   :  { %13000 = vmatpush3.msra.mxu0 %v15081_v15  ;;  %13018 = vmatprep.subr.mxu1 %v14570_v8 }
  0x7b   :  { %13001 = vmatprep.subr.mxu0 %v14570_v8  ;;  %13019 = vmatpush3.msra.mxu1 %v15081_v15 }
  0x7c   :  { %13002 = vmatpush3.msra.mxu0 %v15090_v16  ;;  %13020 = vmatprep.subr.mxu1 %v14570_v8 }
  0x7d   :  { %13025 = vmatprep.subr.mxu0 %v14570_v8  ;;  %13021 = vmatpush3.msra.mxu1 %v15090_v16 }
  0x7e   :  { %13022 = vmatprep.mubr.msk.f32.mxu1 %vm14571_vm1, %v14570_v8  ;;  %13044 = vmatprep.subr.mxu1 %v14570_v8 }
  0x93   :  { %v15105_v17 = vpop.permute.xlu0 %157 }
  0xe5   :  { %v678_v18 = vpop.f32.mrf.mxu0  ;;  %v719_v20 = vpop.f32.mrf.mxu1 }
  0xe6   :  { %v679_v19 = vadd.f32 %v678_v18, %v15105_v17  ;;  %v720_v23 = vadd.f32 %v719_v20, %v15105_v17 }
  0xe7   :  { %v680_v21 = vpop.f32.mrf.mxu0  ;;  %v721_v25 = vpop.f32.mrf.mxu1 }
  0xe8   :  { %v988_v22 = vmul.f32 0.2, %v679_v19  ;;  %v681_v24 = vadd.f32 %v680_v21, %v15105_v17  ;;  %vm972_vm3 = vcmp.ge.f32.partialorder %v679_v19, 0.0  ;;  %v722_v26 = vadd.f32 %v721_v25, %v15105_v17 }
  0xe9   :  { %v682_v27 = vpop.f32.mrf.mxu0  ;;  %v723_v30 = vpop.f32.mrf.mxu1  ;;  %v990_v33 = vmul.f32 0.2, %v720_v23  ;;  %vm974_vm6 = vcmp.ge.f32.partialorder %v720_v23, 0.0 }
  0xea   :  { %v1004_v28 = vsel %vm972_vm3, %v679_v19, %v988_v22  ;;  %vm973_vm4 = vcmp.ge.f32.partialorder %v681_v24, 0.0  ;;  %v989_v29 = vmul.f32 0.2, %v681_v24  ;;  %vm975_vm5 = vcmp.ge.f32.partialorder %v722_v26, 0.0 }
  0xeb   :  { %v683_v31 = vpop.f32.mrf.mxu0  ;;  %1104 = vrot.lane.b32.xlu0 %v1004_v28, %s14572_s22  ;;  %13004 = vmatmul.mubr.msk.f32.vlgmr.msra.gmra.mxu0 %vm1030_vm2, %v1004_v28  ;;  %v991_v32 = vmul.f32 0.2, %v722_v26  ;;  %v724_v35 = vpop.f32.mrf.mxu1  ;;  %v15125_v37 = vsel %vm974_vm6, %v720_v23, %v990_v33  ;;  %vm4946_vm6 = vcmask 736256  }
  0xec   :  { %13026 = vmatpush3.msra.mxu0 %v15027_v10  ;;  %v1005_v34 = vsel %vm973_vm4, %v681_v24, %v989_v29  ;;  %13041 = vmatprep.mubr.msk.f32.mxu0 %vm14571_vm1, %v14570_v8 }
  0xed   :  { %13027 = vmatprep.subr.mxu0 %v14570_v8  ;;  %1251 = vrot.lane.b32.xlu1 %v1005_v34, %s14572_s22  ;;  %v15119_v36 = vsel %vm975_vm5, %v722_v26, %v991_v32  ;;  %vm4952_vm5 = vcmask 179200  }
  0xee   :  { %13028 = vmatpush3.msra.mxu0 %v15035_v11 }
  0xef   :  { %13029 = vmatprep.subr.mxu0 %v14570_v8  ;;  %1755 = vrot.lane.b32.xlu0 %v15119_v36, %s14572_s22 }
  0xf0   :  { %13030 = vmatpush3.msra.mxu0 %v15044_v12 }
  0xf1   :  { %13031 = vmatprep.subr.mxu0 %v14570_v8  ;;  %1513 = vrot.lane.b32.xlu1 %v15125_v37, %s14572_s22 }
  0xf2   :  { %13032 = vmatpush3.msra.mxu0 %v15054_v60 }
  0xf3   :  { %13033 = vmatprep.subr.mxu0 %v14570_v8 }
  0xf4   :  { %13034 = vmatpush3.msra.mxu0 %v15063_v13 }
  0xf5   :  { %13035 = vmatprep.subr.mxu0 %v14570_v8 }
  0xf6   :  { %13036 = vmatpush3.msra.mxu0 %v15072_v14 }
  0xf7   :  { %13037 = vmatprep.subr.mxu0 %v14570_v8 }
  0xf8   :  { %13038 = vmatpush3.msra.mxu0 %v15081_v15 }
  0xf9   :  { %13039 = vmatprep.subr.mxu0 %v14570_v8 }
  0xfa   :  { %13040 = vmatpush3.msra.mxu0 %v15090_v16 }
  0xfb   :  { %13042 = vmatmul.mubr.msk.f32.vlgmr.msra.gmra.mxu0 %vm1030_vm2, %v1005_v34 }
  0xfd   :  { %v760_v38 = vpop.f32.mrf.mxu0  ;;  %v801_v40 = vpop.f32.mrf.mxu1 }
  0xfe   :  { %v761_v39 = vadd.f32 %v760_v38, %v15105_v17  ;;  %v802_v41 = vadd.f32 %v801_v40, %v15105_v17 }
  0xff   :  { %v762_v42 = vpop.f32.mrf.mxu0  ;;  %v803_v45 = vpop.f32.mrf.mxu1 }
 0x100   :  { %v992_v43 = vmul.f32 0.2, %v761_v39  ;;  %v763_v44 = vadd.f32 %v762_v42, %v15105_v17  ;;  %vm976_vm7 = vcmp.ge.f32.partialorder %v761_v39, 0.0  ;;  %v804_v46 = vadd.f32 %v803_v45, %v15105_v17  ;;  %v15504_v45 = vld [vmem:[%s19508_s3] sm:$0xff] }
 0x101   :  { %v764_v47 = vpop.f32.mrf.mxu0  ;;  %v994_v48 = vmul.f32 0.2, %v802_v41  ;;  %v805_v51 = vpop.f32.mrf.mxu1  ;;  %vm978_vm9 = vcmp.ge.f32.partialorder %v802_v41, 0.0  ;;  %13095 = vmatprep.mubr.f32.mxu0 %v15504_v45 }
 0x102   :  { %v15144_v49 = vsel %vm976_vm7, %v761_v39, %v992_v43  ;;  %vm977_vm8 = vcmp.ge.f32.partialorder %v763_v44, 0.0  ;;  %v993_v50 = vmul.f32 0.2, %v763_v44  ;;  %v995_v54 = vmul.f32 0.2, %v804_v46 }
 0x103   :  { %1997 = vrot.lane.b32.xlu1 %v15144_v49, %s14572_s22  ;;  %v765_v52 = vpop.f32.mrf.mxu0  ;;  %v806_v55 = vpop.f32.mrf.mxu1  ;;  %vm979_vm10 = vcmp.ge.f32.partialorder %v804_v46, 0.0  ;;  %v15152_v56 = vsel %vm978_vm9, %v802_v41, %v994_v48  ;;  %vm4955_vm7 = vcmask 424960   ;;  %vm4958_vm9 = vcmask 670720  }
 0x104   :  { %v15148_v53 = vsel %vm977_vm8, %v763_v44, %v993_v50  ;;  %v15156_v57 = vsel %vm979_vm10, %v804_v46, %v995_v54  ;;  %vm4949_vm8 = vcmask 982016   ;;  %vm4961_vm10 = vcmask 916480  }
 0x105   :  { %2239 = vrot.lane.b32.xlu0 %v15148_v53, %s14572_s22 }
 0x107   :  { %2481 = vrot.lane.b32.xlu1 %v15152_v56, %s14572_s22 }
 0x109   :  { %2723 = vrot.lane.b32.xlu0 %v15156_v57, %s14572_s22 }
 0x115   :  { %v842_v58 = vpop.f32.mrf.mxu0  ;;  %v15161_v61 = vpop.f32.mrf.mxu1 }
 0x116   :  { %v843_v59 = vadd.f32 %v842_v58, %v15105_v17  ;;  %v884_v46 = vadd.f32 %v15161_v61, %v15105_v17 }
 0x117   :  { %v15163_v62 = vpop.f32.mrf.mxu0  ;;  %v15165_v0 = vpop.f32.mrf.mxu1 }
 0x118   :  { %v996_v63 = vmul.f32 0.2, %v843_v59  ;;  %vm980_vm11 = vcmp.ge.f32.partialorder %v843_v59, 0.0  ;;  %vm982_vm13 = vcmp.ge.f32.partialorder %v884_v46, 0.0 }
 0x119   :  { %v846_v1 = vpop.f32.mrf.mxu0  ;;  %v887_v3 = vpop.f32.mrf.mxu1 }
 0x11a   :  { %v15167_v2 = vsel %vm980_vm11, %v843_v59, %v996_v63  ;;  %v15637_v1 = vld [vmem:[%s19510_s5 + $0x38] sm:$0xff]  ;;  %vm4964_vm11 = vcmask 113664  }
 0x11b   :  { %2965 = vrot.lane.b32.xlu1 %v15167_v2, %s14572_s22  ;;  %v847_v4 = vpop.f32.mrf.mxu0  ;;  %v888_v5 = vpop.f32.mrf.mxu1 }
 0x11c   :  { %v15657_v4 = vld [vmem:[%s19510_s5 + $0x28] sm:$0xff] }
 0x12d   :  { %v15171_v6 = vpop.f32.mrf.mxu0  ;;  %v15173_v7 = vpop.f32.mrf.mxu1 }
 0x12f   :  { %v15175_v18 = vpop.f32.mrf.mxu0  ;;  %v15177_v19 = vpop.f32.mrf.mxu1 }
 0x130   :  { %v927_v5 = vadd.f32 %v15175_v18, %v15105_v17 }
 0x131   :  { %v928_v20 = vpop.f32.mrf.mxu0  ;;  %v969_v21 = vpop.f32.mrf.mxu1 }
 0x132   :  { %v15670_v20 = vld [vmem:[%s19510_s5 + $0x20] sm:$0xff]  ;;  %vm985_vm0 = vcmp.ge.f32.partialorder %v927_v5, 0.0 }
 0x133   :  { %v929_v22 = vpop.f32.mrf.mxu0  ;;  %v970_v23 = vpop.f32.mrf.mxu1 }
 0x134   :  { %v15683_v22 = vld [vmem:[%s19510_s5 + $0x18] sm:$0xff] }
 0x15d   :  { %v1105_v24 = vpop.permute.xlu0 %1104 }
 0x15e   :  { %13023 = vmatmul.mubr.msk.f32.vlgmr.msra.gmra.mxu1 %vm1030_vm2, %v1105_v24  ;;  %v1001_v24 = vmul.f32 0.2, %v927_v5 }
 0x15f   :  { %13045 = vmatpush3.msra.mxu1 %v15027_v10  ;;  %13060 = vmatprep.mubr.msk.f32.mxu1 %vm14571_vm1, %v14570_v8  ;;  %v1252_v25 = vpop.permute.xlu1 %1251 }
 0x160   :  { %13046 = vmatprep.subr.mxu1 %v14570_v8 }
 0x161   :  { %13047 = vmatpush3.msra.mxu1 %v15035_v11  ;;  %v1756_v28 = vpop.permute.xlu0 %1755 }
 0x162   :  { %13048 = vmatprep.subr.mxu1 %v14570_v8 }
 0x163   :  { %13049 = vmatpush3.msra.mxu1 %v15044_v12  ;;  %v1514_v26 = vpop.permute.xlu1 %1513 }
 0x164   :  { %13050 = vmatprep.subr.mxu1 %v14570_v8 }
 0x165   :  { %13051 = vmatpush3.msra.mxu1 %v15054_v60 }
 0x166   :  { %13052 = vmatprep.subr.mxu1 %v14570_v8 }
 0x167   :  { %13053 = vmatpush3.msra.mxu1 %v15063_v13 }
 0x168   :  { %13054 = vmatprep.subr.mxu1 %v14570_v8 }
 0x169   :  { %13055 = vmatpush3.msra.mxu1 %v15072_v14 }
 0x16a   :  { %13056 = vmatprep.subr.mxu1 %v14570_v8 }
 0x16b   :  { %13057 = vmatpush3.msra.mxu1 %v15081_v15 }
 0x16c   :  { %13058 = vmatprep.subr.mxu1 %v14570_v8 }
 0x16d   :  { %13059 = vmatpush3.msra.mxu1 %v15090_v16 }
 0x16e   :  { %13061 = vmatmul.mubr.msk.f32.vlgmr.msra.gmra.mxu1 %vm1030_vm2, %v1252_v25  ;;  %13098 = vmatprep.subr.mxu1 %v14570_v8 }
 0x16f   :  { %13099 = vmatpush3.msra.mxu1 %v15027_v10  ;;  %13114 = vmatprep.mubr.msk.f32.mxu1 %vm14571_vm1, %v14570_v8 }
 0x170   :  { %13100 = vmatprep.subr.mxu1 %v14570_v8 }
 0x171   :  { %13101 = vmatpush3.msra.mxu1 %v15035_v11 }
 0x172   :  { %13102 = vmatprep.subr.mxu1 %v14570_v8 }
 0x173   :  { %13103 = vmatpush3.msra.mxu1 %v15044_v12 }
 0x174   :  { %13104 = vmatprep.subr.mxu1 %v14570_v8 }
 0x175   :  { %13105 = vmatpush3.msra.mxu1 %v15054_v60  ;;  %v1998_v32 = vpop.permute.xlu1 %1997 }
 0x176   :  { %13106 = vmatprep.subr.mxu1 %v14570_v8 }
 0x177   :  { %13107 = vmatpush3.msra.mxu1 %v15063_v13  ;;  %v2240_v33 = vpop.permute.xlu0 %2239 }
 0x178   :  { %13108 = vmatprep.subr.mxu1 %v14570_v8 }
 0x179   :  { %13109 = vmatpush3.msra.mxu1 %v15072_v14  ;;  %v2482_v34 = vpop.permute.xlu1 %2481 }
 0x17a   :  { %13110 = vmatprep.subr.mxu1 %v14570_v8 }
 0x17b   :  { %13111 = vmatpush3.msra.mxu1 %v15081_v15  ;;  %v2724_v38 = vpop.permute.xlu0 %2723 }
 0x17c   :  { %13112 = vmatprep.subr.mxu1 %v14570_v8 }
 0x17d   :  { %13113 = vmatpush3.msra.mxu1 %v15090_v16 }
 0x17e   :  { %13115 = vmatmul.mubr.msk.f32.vlgmr.msra.gmra.mxu1 %vm1030_vm2, %v15125_v37  ;;  %13117 = vmatprep.subr.mxu1 %v14570_v8  ;;  %v845_v37 = vadd.f32 %v15163_v62, %v15105_v17 }
 0x17f   :  { %13118 = vmatpush3.msra.mxu1 %v15027_v10  ;;  %13133 = vmatprep.mubr.msk.f32.mxu1 %vm14571_vm1, %v14570_v8 }
 0x180   :  { %13119 = vmatprep.subr.mxu1 %v14570_v8  ;;  %v997_v40 = vmul.f32 0.2, %v845_v37  ;;  %vm981_vm12 = vcmp.ge.f32.partialorder %v845_v37, 0.0 }
 0x181   :  { %13120 = vmatpush3.msra.mxu1 %v15035_v11 }
 0x182   :  { %13121 = vmatprep.subr.mxu1 %v14570_v8  ;;  %v15452_v42 = vsel %vm981_vm12, %v845_v37, %v997_v40  ;;  %vm4967_vm12 = vcmask 359424  }
 0x183   :  { %13122 = vmatpush3.msra.mxu1 %v15044_v12 }
 0x184   :  { %13123 = vmatprep.subr.mxu1 %v14570_v8 }
 0x185   :  { %13124 = vmatpush3.msra.mxu1 %v15054_v60 }
 0x186   :  { %13125 = vmatprep.subr.mxu1 %v14570_v8 }
 0x187   :  { %13126 = vmatpush3.msra.mxu1 %v15063_v13 }
 0x188   :  { %13127 = vmatprep.subr.mxu1 %v14570_v8 }
 0x189   :  { %13128 = vmatpush3.msra.mxu1 %v15072_v14 }
 0x18a   :  { %13129 = vmatprep.subr.mxu1 %v14570_v8 }
 0x18b   :  { %13130 = vmatpush3.msra.mxu1 %v15081_v15 }
 0x18c   :  { %13131 = vmatprep.subr.mxu1 %v14570_v8 }
 0x18d   :  { %13132 = vmatpush3.msra.mxu1 %v15090_v16  ;;  %v2966_v47 = vpop.permute.xlu1 %2965 }
 0x18e   :  { %13134 = vmatmul.mubr.msk.f32.vlgmr.msra.gmra.mxu1 %vm1030_vm2, %v1514_v26  ;;  %13171 = vmatprep.subr.mxu1 %v14570_v8  ;;  %v15696_v26 = vld [vmem:[%s19510_s5 + $0x10] sm:$0xff] }
 0x18f   :  { %13172 = vmatpush3.msra.mxu1 %v15027_v10  ;;  %13187 = vmatprep.mubr.msk.f32.mxu1 %vm14571_vm1, %v14570_v8 }
 0x190   :  { %13173 = vmatprep.subr.mxu1 %v14570_v8 }
 0x191   :  { %13174 = vmatpush3.msra.mxu1 %v15035_v11 }
 0x192   :  { %13175 = vmatprep.subr.mxu1 %v14570_v8 }
 0x193   :  { %13176 = vmatpush3.msra.mxu1 %v15044_v12 }
 0x194   :  { %13177 = vmatprep.subr.mxu1 %v14570_v8 }
 0x195   :  { %13178 = vmatpush3.msra.mxu1 %v15054_v60 }
 0x196   :  { %13179 = vmatprep.subr.mxu1 %v14570_v8 }
 0x197   :  { %13180 = vmatpush3.msra.mxu1 %v15063_v13 }
 0x198   :  { %13181 = vmatprep.subr.mxu1 %v14570_v8 }
 0x199   :  { %13182 = vmatpush3.msra.mxu1 %v15072_v14 }
 0x19a   :  { %13183 = vmatprep.subr.mxu1 %v14570_v8 }
 0x19b   :  { %13184 = vmatpush3.msra.mxu1 %v15081_v15 }
 0x19c   :  { %13185 = vmatprep.subr.mxu1 %v14570_v8 }
 0x19d   :  { %13186 = vmatpush3.msra.mxu1 %v15090_v16 }
 0x19e   :  { %13188 = vmatmul.mubr.msk.f32.vlgmr.msra.gmra.mxu1 %vm1030_vm2, %v15119_v36  ;;  %13190 = vmatprep.subr.mxu1 %v14570_v8 }
 0x19f   :  { %13191 = vmatpush3.msra.mxu1 %v15027_v10  ;;  %13206 = vmatprep.mubr.msk.f32.mxu1 %vm14571_vm1, %v14570_v8 }
 0x1a0   :  { %13192 = vmatprep.subr.mxu1 %v14570_v8 }
 0x1a1   :  { %13193 = vmatpush3.msra.mxu1 %v15035_v11 }
 0x1a2   :  { %13194 = vmatprep.subr.mxu1 %v14570_v8 }
 0x1a3   :  { %13195 = vmatpush3.msra.mxu1 %v15044_v12 }
 0x1a4   :  { %13196 = vmatprep.subr.mxu1 %v14570_v8 }
 0x1a5   :  { %13197 = vmatpush3.msra.mxu1 %v15054_v60 }
 0x1a6   :  { %13198 = vmatprep.subr.mxu1 %v14570_v8 }
 0x1a7   :  { %13199 = vmatpush3.msra.mxu1 %v15063_v13 }
 0x1a8   :  { %13200 = vmatprep.subr.mxu1 %v14570_v8 }
 0x1a9   :  { %13201 = vmatpush3.msra.mxu1 %v15072_v14 }
 0x1aa   :  { %13202 = vmatprep.subr.mxu1 %v14570_v8 }
 0x1ab   :  { %13203 = vmatpush3.msra.mxu1 %v15081_v15  ;;  %v15273_v27 = vpop.f32.mrf.mxu0 }
 0x1ac   :  { %13204 = vmatprep.subr.mxu1 %v14570_v8 }
 0x1ad   :  { %13205 = vmatpush3.msra.mxu1 %v15090_v16  ;;  %v13005_v29 = vpop.f32.mrf.mxu0 }
 0x1ae   :  { %13207 = vmatmul.mubr.msk.f32.vlgmr.msra.gmra.mxu1 %vm1030_vm2, %v1756_v28  ;;  %13244 = vmatprep.subr.mxu1 %v14570_v8  ;;  %v15704_v29 = vld [vmem:[%s19510_s5 + $0x8] sm:$0xff] }
 0x1af   :  { %13245 = vmatpush3.msra.mxu1 %v15027_v10  ;;  %13260 = vmatprep.mubr.msk.f32.mxu1 %vm14571_vm1, %v14570_v8 }
 0x1b0   :  { %13246 = vmatprep.subr.mxu1 %v14570_v8 }
 0x1b1   :  { %13247 = vmatpush3.msra.mxu1 %v15035_v11 }
 0x1b2   :  { %13248 = vmatprep.subr.mxu1 %v14570_v8 }
 0x1b3   :  { %13249 = vmatpush3.msra.mxu1 %v15044_v12 }
 0x1b4   :  { %13250 = vmatprep.subr.mxu1 %v14570_v8 }
 0x1b5   :  { %13251 = vmatpush3.msra.mxu1 %v15054_v60 }
 0x1b6   :  { %13252 = vmatprep.subr.mxu1 %v14570_v8 }
 0x1b7   :  { %13253 = vmatpush3.msra.mxu1 %v15063_v13 }
 0x1b8   :  { %13254 = vmatprep.subr.mxu1 %v14570_v8 }
 0x1b9   :  { %13255 = vmatpush3.msra.mxu1 %v15072_v14 }
 0x1ba   :  { %13256 = vmatprep.subr.mxu1 %v14570_v8 }
 0x1bb   :  { %v15293_v30 = vpop.f32.mrf.mxu0  ;;  %13257 = vmatpush3.msra.mxu1 %v15081_v15 }
 0x1bc   :  { %13258 = vmatprep.subr.mxu1 %v14570_v8 }
 0x1bd   :  { %v13043_v31 = vpop.f32.mrf.mxu0  ;;  %13259 = vmatpush3.msra.mxu1 %v15090_v16 }
 0x1be   :  { %13261 = vmatmul.mubr.msk.f32.vlgmr.msra.gmra.mxu1 %vm1030_vm2, %v15144_v49  ;;  %13263 = vmatprep.subr.mxu1 %v14570_v8  ;;  %v998_v49 = vmul.f32 0.2, %v884_v46  ;;  %v15707_v31 = vsel %vm985_vm0, %v927_v5, %v1001_v24  ;;  %vm4979_vm0 = vcmask 293888  }
 0x1bf   :  { %13264 = vmatpush3.msra.mxu1 %v15027_v10  ;;  %13279 = vmatprep.mubr.msk.f32.mxu1 %vm14571_vm1, %v14570_v8 }
 0x1c0   :  { %13265 = vmatprep.subr.mxu1 %v14570_v8  ;;  %v15535_v51 = vsel %vm982_vm13, %v884_v46, %v998_v49  ;;  %vm4970_vm13 = vcmask 605184  }
 0x1c1   :  { %13266 = vmatpush3.msra.mxu1 %v15035_v11 }
 0x1c2   :  { %13267 = vmatprep.subr.mxu1 %v14570_v8 }
 0x1c3   :  { %13268 = vmatpush3.msra.mxu1 %v15044_v12 }
 0x1c4   :  { %13269 = vmatprep.subr.mxu1 %v14570_v8 }
 0x1c5   :  { %13270 = vmatpush3.msra.mxu1 %v15054_v60 }
 0x1c6   :  { %13271 = vmatprep.subr.mxu1 %v14570_v8 }
 0x1c7   :  { %13272 = vmatpush3.msra.mxu1 %v15063_v13 }
 0x1c8   :  { %13273 = vmatprep.subr.mxu1 %v14570_v8 }
 0x1c9   :  { %13274 = vmatpush3.msra.mxu1 %v15072_v14 }
 0x1ca   :  { %13275 = vmatprep.subr.mxu1 %v14570_v8 }
 0x1cb   :  { %13276 = vmatpush3.msra.mxu1 %v15081_v15 }
 0x1cc   :  { %13277 = vmatprep.subr.mxu1 %v14570_v8 }
 0x1cd   :  { %13278 = vmatpush3.msra.mxu1 %v15090_v16 }
 0x1ce   :  { %13280 = vmatmul.mubr.msk.f32.vlgmr.msra.gmra.mxu1 %vm1030_vm2, %v1998_v32  ;;  %13317 = vmatprep.subr.mxu1 %v14570_v8  ;;  %v15717_v32 = vld [vmem:[%s19510_s5] sm:$0xff] }
 0x1cf   :  { %13318 = vmatpush3.msra.mxu1 %v15027_v10  ;;  %13333 = vmatprep.mubr.msk.f32.mxu1 %vm14571_vm1, %v14570_v8 }
 0x1d0   :  { %13319 = vmatprep.subr.mxu1 %v14570_v8 }
 0x1d1   :  { %13320 = vmatpush3.msra.mxu1 %v15035_v11 }
 0x1d2   :  { %13321 = vmatprep.subr.mxu1 %v14570_v8 }
 0x1d3   :  { %13322 = vmatpush3.msra.mxu1 %v15044_v12 }
 0x1d4   :  { %13323 = vmatprep.subr.mxu1 %v14570_v8 }
 0x1d5   :  { %13324 = vmatpush3.msra.mxu1 %v15054_v60 }
 0x1d6   :  { %13325 = vmatprep.subr.mxu1 %v14570_v8 }
 0x1d7   :  { %13326 = vmatpush3.msra.mxu1 %v15063_v13 }
 0x1d8   :  { %13327 = vmatprep.subr.mxu1 %v14570_v8 }
 0x1d9   :  { %13328 = vmatpush3.msra.mxu1 %v15072_v14 }
 0x1da   :  { %13329 = vmatprep.subr.mxu1 %v14570_v8 }
 0x1db   :  { %13330 = vmatpush3.msra.mxu1 %v15081_v15 }
 0x1dc   :  { %13331 = vmatprep.subr.mxu1 %v14570_v8 }
 0x1dd   :  { %13332 = vmatpush3.msra.mxu1 %v15090_v16 }
 0x1de   :  { %13334 = vmatmul.mubr.msk.f32.vlgmr.msra.gmra.mxu1 %vm1030_vm2, %v15148_v53  ;;  %13336 = vmatprep.subr.mxu1 %v14570_v8 }
 0x1df   :  { %13337 = vmatpush3.msra.mxu1 %v15027_v10  ;;  %13352 = vmatprep.mubr.msk.f32.mxu1 %vm14571_vm1, %v14570_v8 }
 0x1e0   :  { %13338 = vmatprep.subr.mxu1 %v14570_v8 }
 0x1e1   :  { %13339 = vmatpush3.msra.mxu1 %v15035_v11 }
 0x1e2   :  { %13340 = vmatprep.subr.mxu1 %v14570_v8 }
 0x1e3   :  { %13341 = vmatpush3.msra.mxu1 %v15044_v12 }
 0x1e4   :  { %13342 = vmatprep.subr.mxu1 %v14570_v8 }
 0x1e5   :  { %13343 = vmatpush3.msra.mxu1 %v15054_v60 }
 0x1e6   :  { %13344 = vmatprep.subr.mxu1 %v14570_v8 }
 0x1e7   :  { %13345 = vmatpush3.msra.mxu1 %v15063_v13 }
 0x1e8   :  { %13346 = vmatprep.subr.mxu1 %v14570_v8 }
 0x1e9   :  { %13347 = vmatpush3.msra.mxu1 %v15072_v14 }
 0x1ea   :  { %13348 = vmatprep.subr.mxu1 %v14570_v8 }
 0x1eb   :  { %13349 = vmatpush3.msra.mxu1 %v15081_v15 }
 0x1ec   :  { %13350 = vmatprep.subr.mxu1 %v14570_v8 }
 0x1ed   :  { %13351 = vmatpush3.msra.mxu1 %v15090_v16 }
 0x1ee   :  { %13353 = vmatmul.mubr.msk.f32.vlgmr.msra.gmra.mxu1 %vm1030_vm2, %v2240_v33  ;;  %13390 = vmatprep.subr.mxu1 %v14570_v8 }
 0x1ef   :  { %13391 = vmatpush3.msra.mxu1 %v15027_v10  ;;  %13406 = vmatprep.mubr.msk.f32.mxu1 %vm14571_vm1, %v14570_v8 }
 0x1f0   :  { %13392 = vmatprep.subr.mxu1 %v14570_v8 }
 0x1f1   :  { %13393 = vmatpush3.msra.mxu1 %v15035_v11 }
 0x1f2   :  { %13394 = vmatprep.subr.mxu1 %v14570_v8 }
 0x1f3   :  { %13395 = vmatpush3.msra.mxu1 %v15044_v12 }
 0x1f4   :  { %13396 = vmatprep.subr.mxu1 %v14570_v8 }
 0x1f5   :  { %13397 = vmatpush3.msra.mxu1 %v15054_v60 }
 0x1f6   :  { %13398 = vmatprep.subr.mxu1 %v14570_v8 }
 0x1f7   :  { %13399 = vmatpush3.msra.mxu1 %v15063_v13 }
 0x1f8   :  { %13400 = vmatprep.subr.mxu1 %v14570_v8 }
 0x1f9   :  { %13401 = vmatpush3.msra.mxu1 %v15072_v14 }
 0x1fa   :  { %13402 = vmatprep.subr.mxu1 %v14570_v8 }
 0x1fb   :  { %13403 = vmatpush3.msra.mxu1 %v15081_v15 }
 0x1fc   :  { %13404 = vmatprep.subr.mxu1 %v14570_v8 }
 0x1fd   :  { %13405 = vmatpush3.msra.mxu1 %v15090_v16 }
 0x1fe   :  { %13407 = vmatmul.mubr.msk.f32.vlgmr.msra.gmra.mxu1 %vm1030_vm2, %v15152_v56  ;;  %13409 = vmatprep.subr.mxu1 %v14570_v8 }
 0x1ff   :  { %13410 = vmatpush3.msra.mxu1 %v15027_v10  ;;  %13425 = vmatprep.mubr.msk.f32.mxu1 %vm14571_vm1, %v14570_v8 }
 0x200   :  { %13411 = vmatprep.subr.mxu1 %v14570_v8 }
 0x201   :  { %13412 = vmatpush3.msra.mxu1 %v15035_v11 }
 0x202   :  { %13413 = vmatprep.subr.mxu1 %v14570_v8 }
 0x203   :  { %13414 = vmatpush3.msra.mxu1 %v15044_v12 }
 0x204   :  { %13415 = vmatprep.subr.mxu1 %v14570_v8 }
 0x205   :  { %13416 = vmatpush3.msra.mxu1 %v15054_v60 }
 0x206   :  { %13417 = vmatprep.subr.mxu1 %v14570_v8 }
 0x207   :  { %13418 = vmatpush3.msra.mxu1 %v15063_v13 }
 0x208   :  { %13419 = vmatprep.subr.mxu1 %v14570_v8 }
 0x209   :  { %13420 = vmatpush3.msra.mxu1 %v15072_v14 }
 0x20a   :  { %13421 = vmatprep.subr.mxu1 %v14570_v8 }
 0x20b   :  { %13422 = vmatpush3.msra.mxu1 %v15081_v15 }
 0x20c   :  { %13423 = vmatprep.subr.mxu1 %v14570_v8 }
 0x20d   :  { %13424 = vmatpush3.msra.mxu1 %v15090_v16 }
 0x20e   :  { %13426 = vmatmul.mubr.msk.f32.vlgmr.msra.gmra.mxu1 %vm1030_vm2, %v2482_v34  ;;  %13463 = vmatprep.subr.mxu1 %v14570_v8 }
 0x20f   :  { %13464 = vmatpush3.msra.mxu1 %v15027_v10  ;;  %13479 = vmatprep.mubr.msk.f32.mxu1 %vm14571_vm1, %v14570_v8 }
 0x210   :  { %13465 = vmatprep.subr.mxu1 %v14570_v8 }
 0x211   :  { %13466 = vmatpush3.msra.mxu1 %v15035_v11 }
 0x212   :  { %13467 = vmatprep.subr.mxu1 %v14570_v8 }
 0x213   :  { %13468 = vmatpush3.msra.mxu1 %v15044_v12 }
 0x214   :  { %13469 = vmatprep.subr.mxu1 %v14570_v8 }
 0x215   :  { %13470 = vmatpush3.msra.mxu1 %v15054_v60 }
 0x216   :  { %13471 = vmatprep.subr.mxu1 %v14570_v8 }
 0x217   :  { %13472 = vmatpush3.msra.mxu1 %v15063_v13 }
 0x218   :  { %13473 = vmatprep.subr.mxu1 %v14570_v8 }
 0x219   :  { %13474 = vmatpush3.msra.mxu1 %v15072_v14 }
 0x21a   :  { %13475 = vmatprep.subr.mxu1 %v14570_v8 }
 0x21b   :  { %13476 = vmatpush3.msra.mxu1 %v15081_v15 }
 0x21c   :  { %13477 = vmatprep.subr.mxu1 %v14570_v8 }
 0x21d   :  { %13478 = vmatpush3.msra.mxu1 %v15090_v16 }
 0x21e   :  { %13480 = vmatmul.mubr.msk.f32.vlgmr.msra.gmra.mxu1 %vm1030_vm2, %v15156_v57  ;;  %13482 = vmatprep.subr.mxu1 %v14570_v8  ;;  %v15418_v35 = vpop.f32.mrf.mxu1 }
 0x21f   :  { %13483 = vmatpush3.msra.mxu1 %v15027_v10  ;;  %13498 = vmatprep.mubr.msk.f32.mxu1 %vm14571_vm1, %v14570_v8 }
 0x220   :  { %13484 = vmatprep.subr.mxu1 %v14570_v8  ;;  %v13024_v36 = vpop.f32.mrf.mxu1 }
 0x221   :  { %13485 = vmatpush3.msra.mxu1 %v15035_v11 }
 0x222   :  { %13486 = vmatprep.subr.mxu1 %v14570_v8 }
 0x223   :  { %13487 = vmatpush3.msra.mxu1 %v15044_v12 }
 0x224   :  { %13488 = vmatprep.subr.mxu1 %v14570_v8 }
 0x225   :  { %13489 = vmatpush3.msra.mxu1 %v15054_v60 }
 0x226   :  { %13490 = vmatprep.subr.mxu1 %v14570_v8 }
 0x227   :  { %13491 = vmatpush3.msra.mxu1 %v15063_v13 }
 0x228   :  { %13492 = vmatprep.subr.mxu1 %v14570_v8 }
 0x229   :  { %13493 = vmatpush3.msra.mxu1 %v15072_v14 }
 0x22a   :  { %13494 = vmatprep.subr.mxu1 %v14570_v8 }
 0x22b   :  { %13495 = vmatpush3.msra.mxu1 %v15081_v15 }
 0x22c   :  { %13496 = vmatprep.subr.mxu1 %v14570_v8 }
 0x22d   :  { %13497 = vmatpush3.msra.mxu1 %v15090_v16 }
 0x22e   :  { %v15439_v39 = vpop.f32.mrf.mxu1  ;;  %13499 = vmatmul.mubr.msk.f32.vlgmr.msra.gmra.mxu1 %vm1030_vm2, %v2724_v38  ;;  %13536 = vmatprep.subr.mxu1 %v14570_v8 }
 0x22f   :  { %1359 = vrot.lane.b32.xlu1 %v15439_v39, %s14573_s23  ;;  %1362 = vrot.lane.b32.xlu0 %v15439_v39, %s14574_s25 }
 0x230   :  { %13537 = vmatpush3.msra.mxu1 %v15027_v10  ;;  %v13062_v41 = vpop.f32.mrf.mxu1  ;;  %13552 = vmatprep.mubr.msk.f32.mxu1 %vm14571_vm1, %v14570_v8 }
 0x231   :  { %13538 = vmatprep.subr.mxu1 %v14570_v8 }
 0x232   :  { %13539 = vmatpush3.msra.mxu1 %v15035_v11 }
 0x233   :  { %13540 = vmatprep.subr.mxu1 %v14570_v8  ;;  %3207 = vrot.lane.b32.xlu1 %v15452_v42, %s14572_s22 }
 0x234   :  { %1356 = vrot.lane.b32.xlu0 %v15439_v39, %s14575_s24  ;;  %13541 = vmatpush3.msra.mxu1 %v15044_v12 }
 0x235   :  { %13542 = vmatprep.subr.mxu1 %v14570_v8 }
 0x236   :  { %13543 = vmatpush3.msra.mxu1 %v15054_v60 }
 0x237   :  { %13544 = vmatprep.subr.mxu1 %v14570_v8  ;;  %1349 = vrot.lane.b32.xlu1 %v15293_v30, %s14573_s23 }
 0x238   :  { %13545 = vmatpush3.msra.mxu1 %v15063_v13  ;;  %1352 = vrot.lane.b32.xlu0 %v15293_v30, %s14574_s25 }
 0x239   :  { %13546 = vmatprep.subr.mxu1 %v14570_v8 }
 0x23a   :  { %13547 = vmatpush3.msra.mxu1 %v15072_v14 }
 0x23b   :  { %13548 = vmatprep.subr.mxu1 %v14570_v8  ;;  %1342 = vrot.lane.b32.xlu1 %v15418_v35, %s14574_s25 }
 0x23c   :  { %13549 = vmatpush3.msra.mxu1 %v15081_v15  ;;  %1346 = vrot.lane.b32.xlu0 %v15293_v30, %s14575_s24 }
 0x23d   :  { %13550 = vmatprep.subr.mxu1 %v14570_v8 }
 0x23e   :  { %13551 = vmatpush3.msra.mxu1 %v15090_v16  ;;  %v15478_v43 = vpop.f32.mrf.mxu1 }
 0x23f   :  { %13553 = vmatmul.mubr.msk.f32.vlgmr.msra.gmra.mxu1 %vm1030_vm2, %v15167_v2  ;;  %13555 = vmatprep.subr.mxu1 %v14570_v8  ;;  %v15646_v2 = vld [vmem:[%s19510_s5 + $0x30] sm:$0xff]  ;;  %s14587_s5 = smov 104  }
 0x240   :  { %13556 = vmatpush3.msra.mxu1 %v15027_v10  ;;  %1336 = vrot.lane.b32.xlu1 %v15418_v35, %s14575_s24  ;;  %v13116_v44 = vpop.f32.mrf.mxu1 }
 0x241   :  { %1339 = vrot.lane.b32.xlu0 %v15418_v35, %s14573_s23  ;;  %13557 = vmatprep.subr.mxu1 %v14570_v8 }
 0x242   :  { %13558 = vmatpush3.msra.mxu1 %v15035_v11  ;;  %13571 = vmatprep.mubr.msk.f32.mxu1 %vm14571_vm1, %v14570_v8 }
 0x243   :  { %13559 = vmatprep.subr.mxu1 %v14570_v8 }
 0x244   :  { %13560 = vmatpush3.msra.mxu1 %v15044_v12  ;;  %1329 = vrot.lane.b32.xlu1 %v15273_v27, %s14573_s23 }
 0x245   :  { %1332 = vrot.lane.b32.xlu0 %v15273_v27, %s14574_s25  ;;  %13561 = vmatprep.subr.mxu1 %v14570_v8 }
 0x246   :  { %13562 = vmatpush3.msra.mxu1 %v15054_v60 }
 0x247   :  { %13563 = vmatprep.subr.mxu1 %v14570_v8 }
 0x248   :  { %13564 = vmatpush3.msra.mxu1 %v15063_v13 }
 0x249   :  { %1326 = vrot.lane.b32.xlu0 %v15273_v27, %s14575_s24  ;;  %13565 = vmatprep.subr.mxu1 %v14570_v8 }
 0x24a   :  { %13566 = vmatpush3.msra.mxu1 %v15072_v14 }
 0x24b   :  { %13567 = vmatprep.subr.mxu1 %v14570_v8 }
 0x24c   :  { %13568 = vmatpush3.msra.mxu1 %v15081_v15 }
 0x24d   :  { %13569 = vmatprep.subr.mxu1 %v14570_v8 }
 0x24e   :  { %13570 = vmatpush3.msra.mxu1 %v15090_v16  ;;  %v15518_v48 = vpop.f32.mrf.mxu1 }
 0x24f   :  { %13572 = vmatmul.mubr.msk.f32.vlgmr.msra.gmra.mxu1 %vm1030_vm2, %v2966_v47  ;;  %13609 = vmatprep.subr.mxu1 %v14570_v8 }
 0x250   :  { %13610 = vmatpush3.msra.mxu1 %v15027_v10  ;;  %1604 = vrot.lane.b32.xlu1 %v15518_v48, %s14574_s25  ;;  %v13135_v50 = vpop.f32.mrf.mxu1 }
 0x251   :  { %1601 = vrot.lane.b32.xlu0 %v15518_v48, %s14573_s23  ;;  %13611 = vmatprep.subr.mxu1 %v14570_v8  ;;  %v966_v50 = vadd.f32 %v15173_v7, %v15105_v17 }
 0x252   :  { %13612 = vmatpush3.msra.mxu1 %v15035_v11  ;;  %13625 = vmatprep.mubr.msk.f32.mxu1 %vm14571_vm1, %v14570_v8 }
 0x253   :  { %13613 = vmatprep.subr.mxu1 %v14570_v8  ;;  %v1002_v7 = vmul.f32 0.2, %v966_v50  ;;  %vm986_vm3 = vcmp.ge.f32.partialorder %v966_v50, 0.0 }
 0x254   :  { %13614 = vmatpush3.msra.mxu1 %v15044_v12  ;;  %1598 = vrot.lane.b32.xlu1 %v15518_v48, %s14575_s24 }
 0x255   :  { %3449 = vrot.lane.b32.xlu0 %v15535_v51, %s14572_s22  ;;  %13615 = vmatprep.subr.mxu1 %v14570_v8 }
 0x256   :  { %13616 = vmatpush3.msra.mxu1 %v15054_v60 }
 0x257   :  { %13617 = vmatprep.subr.mxu1 %v14570_v8 }
 0x258   :  { %13618 = vmatpush3.msra.mxu1 %v15063_v13  ;;  %1594 = vrot.lane.b32.xlu1 %v15478_v43, %s14574_s25 }
 0x259   :  { %1591 = vrot.lane.b32.xlu0 %v15478_v43, %s14573_s23  ;;  %13619 = vmatprep.subr.mxu1 %v14570_v8 }
 0x25a   :  { %13620 = vmatpush3.msra.mxu1 %v15072_v14 }
 0x25b   :  { %13621 = vmatprep.subr.mxu1 %v14570_v8 }
 0x25c   :  { %13622 = vmatpush3.msra.mxu1 %v15081_v15  ;;  %1588 = vrot.lane.b32.xlu1 %v15478_v43, %s14575_s24 }
 0x25d   :  { %13623 = vmatprep.subr.mxu1 %v14570_v8 }
 0x25e   :  { %13624 = vmatpush3.msra.mxu1 %v15090_v16  ;;  %v15555_v52 = vpop.f32.mrf.mxu1 }
 0x25f   :  { %13626 = vmatmul.mubr.msk.f32.vlgmr.msra.gmra.mxu1 %vm1030_vm2, %v15452_v42  ;;  %13628 = vmatprep.subr.mxu1 %v14570_v8  ;;  %v15753_v42 = vld [vmem:[%s19508_s3 + $0x8] sm:$0xff] }
 0x260   :  { %v13189_v53 = vpop.f32.mrf.mxu1  ;;  %13629 = vmatpush3.msra.mxu1 %v15027_v10  ;;  %13644 = vmatprep.mubr.msk.f32.mxu1 %vm14571_vm1, %v14570_v8  ;;  %v886_v10 = vadd.f32 %v15165_v0, %v15105_v17 }
 0x261   :  { %13630 = vmatprep.subr.mxu1 %v14570_v8 }
 0x262   :  { %13631 = vmatpush3.msra.mxu1 %v15035_v11  ;;  %vm983_vm14 = vcmp.ge.f32.partialorder %v886_v10, 0.0 }
 0x263   :  { %13632 = vmatprep.subr.mxu1 %v14570_v8 }
 0x264   :  { %13633 = vmatpush3.msra.mxu1 %v15044_v12  ;;  %v999_v12 = vmul.f32 0.2, %v886_v10 }
 0x265   :  { %13634 = vmatprep.subr.mxu1 %v14570_v8 }
 0x266   :  { %13635 = vmatpush3.msra.mxu1 %v15054_v60 }
 0x267   :  { %13636 = vmatprep.subr.mxu1 %v14570_v8 }
 0x268   :  { %13637 = vmatpush3.msra.mxu1 %v15063_v13  ;;  %v15586_v13 = vsel %vm983_vm14, %v886_v10, %v999_v12  ;;  %v15812_v10 = vsel %vm986_vm3, %v966_v50, %v1002_v7  ;;  %vm4973_vm14 = vcmask 850944   ;;  %vm4986_vm3 = vcmask 539648  }
 0x269   :  { %13638 = vmatprep.subr.mxu1 %v14570_v8 }
 0x26a   :  { %13639 = vmatpush3.msra.mxu1 %v15072_v14 }
 0x26b   :  { %13640 = vmatprep.subr.mxu1 %v14570_v8 }
 0x26c   :  { %13641 = vmatpush3.msra.mxu1 %v15081_v15 }
 0x26d   :  { %13642 = vmatprep.subr.mxu1 %v14570_v8 }
 0x26e   :  { %v15578_v11 = vpop.f32.mrf.mxu1  ;;  %13643 = vmatpush3.msra.mxu1 %v15090_v16  ;;  %v925_v16 = vadd.f32 %v15171_v6, %v15105_v17 }
 0x26f   :  { %1843 = vrot.lane.b32.xlu1 %v15578_v11, %s14573_s23  ;;  %1846 = vrot.lane.b32.xlu0 %v15578_v11, %s14574_s25 }
 0x270   :  { %v13208_v60 = vpop.f32.mrf.mxu1  ;;  %13682 = vmatprep.subr.mxu1 %v14570_v8  ;;  %v1000_v54 = vmul.f32 0.2, %v925_v16  ;;  %vm984_vm15 = vcmp.ge.f32.partialorder %v925_v16, 0.0 }
 0x272   :  { %v15608_v57 = vsel %vm984_vm15, %v925_v16, %v1000_v54  ;;  %vm4976_vm15 = vcmask 48128  }
 0x273   :  { %3691 = vrot.lane.b32.xlu1 %v15586_v13, %s14572_s22  ;;  %1840 = vrot.lane.b32.xlu0 %v15578_v11, %s14575_s24 }
 0x277   :  { %1833 = vrot.lane.b32.xlu1 %v15555_v52, %s14573_s23  ;;  %1836 = vrot.lane.b32.xlu0 %v15555_v52, %s14574_s25 }
 0x27b   :  { %1830 = vrot.lane.b32.xlu0 %v15555_v52, %s14575_s24 }
 0x27e   :  { %v15598_v14 = vpop.f32.mrf.mxu1 }
 0x280   :  { %v13262_v15 = vpop.f32.mrf.mxu1 }
 0x28e   :  { %v15602_v55 = vpop.f32.mrf.mxu1 }
 0x28f   :  { %2088 = vrot.lane.b32.xlu1 %v15602_v55, %s14574_s25  ;;  %2085 = vrot.lane.b32.xlu0 %v15602_v55, %s14573_s23 }
 0x290   :  { %v13281_v56 = vpop.f32.mrf.mxu1 }
 0x293   :  { %2082 = vrot.lane.b32.xlu1 %v15602_v55, %s14575_s24  ;;  %3933 = vrot.lane.b32.xlu0 %v15608_v57, %s14572_s22 }
 0x297   :  { %2078 = vrot.lane.b32.xlu1 %v15598_v14, %s14574_s25  ;;  %2075 = vrot.lane.b32.xlu0 %v15598_v14, %s14573_s23 }
 0x29b   :  { %2072 = vrot.lane.b32.xlu1 %v15598_v14, %s14575_s24 }
 0x29e   :  { %v15620_v58 = vpop.f32.mrf.mxu1 }
 0x2a0   :  { %v13335_v59 = vpop.f32.mrf.mxu1 }
 0x2a1   :  { %v15622_v61 = vpop.permute.xlu1 %1359  ;;  %v15624_v62 = vpop.permute.xlu0 %1362  ;;  %v968_v59 = vadd.f32 %v15177_v19, %v15105_v17 }
 0x2a2   :  { %13063 = vmatprep.subr.mxu0 %v15624_v62 }
 0x2a3   :  { %13064 = vmatpush3.msra.mxu0 %v15624_v62  ;;  %v1003_v17 = vmul.f32 0.2, %v968_v59  ;;  %vm987_vm4 = vcmp.ge.f32.partialorder %v968_v59, 0.0 }
 0x2a4   :  { %13065 = vmatprep.subr.mxu0 %v15622_v61 }
 0x2a5   :  { %v3208_v63 = vpop.permute.xlu1 %3207  ;;  %13066 = vmatpush3.msra.mxu0 %v15622_v61 }
 0x2a6   :  { %v15630_v0 = vpop.permute.xlu0 %1356  ;;  %13645 = vmatmul.mubr.msk.f32.vlgmr.msra.gmra.mxu1 %vm1030_vm2, %v3208_v63  ;;  %v15920_v63 = vsel %vm987_vm4, %v968_v59, %v1003_v17  ;;  %vm5123_vm4 = vcmask 1045504  }
 0x2a7   :  { %13067 = vmatprep.subr.mxu0 %v15630_v0  ;;  %13683 = vmatpush3.msra.mxu1 %v15637_v1 }
 0x2a8   :  { %13068 = vmatpush3.msra.mxu0 %v15630_v0  ;;  %13684 = vmatprep.subr.mxu1 %v14570_v8 }
 0x2a9   :  { %13069 = vmatprep.subr.mxu0 %v15439_v39  ;;  %13685 = vmatpush3.msra.mxu1 %v15646_v2  ;;  %v15662_v6 = vpop.permute.xlu1 %1349 }
 0x2aa   :  { %13070 = vmatpush3.msra.mxu0 %v15439_v39  ;;  %13686 = vmatprep.subr.mxu1 %v14570_v8  ;;  %v15651_v3 = vpop.permute.xlu0 %1352 }
 0x2ab   :  { %13071 = vmatprep.subr.mxu0 %v15651_v3  ;;  %13687 = vmatpush3.msra.mxu1 %v15657_v4 }
 0x2ac   :  { %13072 = vmatpush3.msra.mxu0 %v15651_v3  ;;  %13688 = vmatprep.subr.mxu1 %v14570_v8 }
 0x2ad   :  { %13073 = vmatprep.subr.mxu0 %v15662_v6  ;;  %13689 = vmatpush3.msra.mxu1 %v15670_v20  ;;  %v1343_v25 = vpop.permute.xlu1 %1342 }
 0x2ae   :  { %13690 = vmatprep.subr.mxu1 %v14570_v8  ;;  %13074 = vmatpush3.msra.mxu0 %v15662_v6  ;;  %v15675_v18 = vpop.permute.xlu0 %1346  ;;  %v15677_v21 = vpop.f32.mrf.mxu1 }
 0x2af   :  { %13075 = vmatprep.subr.mxu0 %v15675_v18  ;;  %13691 = vmatpush3.msra.mxu1 %v15683_v22 }
 0x2b0   :  { %13692 = vmatprep.subr.mxu1 %v14570_v8  ;;  %2327 = vrot.lane.b32.xlu1 %v15677_v21, %s14573_s23  ;;  %v13354_v23 = vpop.f32.mrf.mxu1 }
 0x2b1   :  { %2330 = vrot.lane.b32.xlu0 %v15677_v21, %s14574_s25  ;;  %13076 = vmatpush3.msra.mxu0 %v15675_v18 }
 0x2b2   :  { %13077 = vmatprep.subr.mxu0 %v15293_v30  ;;  %13693 = vmatpush3.msra.mxu1 %v15696_v26  ;;  %v1337_v33 = vpop.permute.xlu1 %1336 }
 0x2b3   :  { %13694 = vmatprep.subr.mxu1 %v14570_v8  ;;  %13078 = vmatpush3.msra.mxu0 %v15293_v30  ;;  %v1340_v28 = vpop.permute.xlu0 %1339 }
 0x2b4   :  { %13079 = vmatprep.subr.mxu0 %v1343_v25  ;;  %13695 = vmatpush3.msra.mxu1 %v15704_v29 }
 0x2b5   :  { %13696 = vmatprep.subr.mxu1 %v14570_v8  ;;  %4175 = vrot.lane.b32.xlu1 %v15707_v31, %s14572_s22 }
 0x2b6   :  { %2324 = vrot.lane.b32.xlu0 %v15677_v21, %s14575_s24  ;;  %13080 = vmatpush3.msra.mxu0 %v1343_v25  ;;  %v1330_v36 = vpop.permute.xlu1 %1329 }
 0x2b7   :  { %13081 = vmatprep.subr.mxu0 %v1340_v28  ;;  %13697 = vmatpush3.msra.mxu1 %v15717_v32  ;;  %v1333_v34 = vpop.permute.xlu0 %1332 }
 0x2b8   :  { %13698 = vmatprep.mubr.msk.f32.mxu1 %vm14571_vm1, %v14570_v8  ;;  %13701 = vmatprep.subr.mxu1 %v14570_v8 }
 0x2b9   :  { %13699 = vmatmul.mubr.msk.f32.vlgmr.msra.gmra.mxu1 %vm1030_vm2, %v15535_v51  ;;  %13082 = vmatpush3.msra.mxu0 %v1340_v28 }
 0x2ba   :  { %13083 = vmatprep.subr.mxu0 %v1337_v33  ;;  %13702 = vmatpush3.msra.mxu1 %v15637_v1 }
 0x2bb   :  { %13703 = vmatprep.subr.mxu1 %v14570_v8  ;;  %2317 = vrot.lane.b32.xlu1 %v15620_v58, %s14573_s23  ;;  %v1327_v38 = vpop.permute.xlu0 %1326 }
 0x2bc   :  { %2320 = vrot.lane.b32.xlu0 %v15620_v58, %s14574_s25  ;;  %13084 = vmatpush3.msra.mxu0 %v1337_v33 }
 0x2bd   :  { %13085 = vmatprep.subr.mxu0 %v15418_v35  ;;  %13704 = vmatpush3.msra.mxu1 %v15646_v2 }
 0x2be   :  { %13086 = vmatpush3.msra.mxu0 %v15418_v35  ;;  %13705 = vmatprep.subr.mxu1 %v14570_v8  ;;  %v15735_v37 = vpop.f32.mrf.mxu1 }
 0x2bf   :  { %13087 = vmatprep.subr.mxu0 %v1333_v34  ;;  %13706 = vmatpush3.msra.mxu1 %v15657_v4 }
 0x2c0   :  { %13707 = vmatprep.subr.mxu1 %v14570_v8  ;;  %2314 = vrot.lane.b32.xlu0 %v15620_v58, %s14575_s24  ;;  %v13408_v40 = vpop.f32.mrf.mxu1 }
 0x2c1   :  { %13088 = vmatpush3.msra.mxu0 %v1333_v34  ;;  %13708 = vmatpush3.msra.mxu1 %v15670_v20 }
 0x2c2   :  { %13089 = vmatprep.subr.mxu0 %v1330_v36  ;;  %13709 = vmatprep.subr.mxu1 %v14570_v8  ;;  %v15743_v35 = vpop.permute.xlu1 %1604 }
 0x2c3   :  { %13090 = vmatpush3.msra.mxu0 %v1330_v36  ;;  %13710 = vmatpush3.msra.mxu1 %v15683_v22  ;;  %v15746_v41 = vpop.permute.xlu0 %1601 }
 0x2c4   :  { %13091 = vmatprep.subr.mxu0 %v1327_v38  ;;  %13711 = vmatprep.subr.mxu1 %v14570_v8 }
 0x2c5   :  { %13092 = vmatpush3.msra.mxu0 %v1327_v38  ;;  %13712 = vmatpush3.msra.mxu1 %v15696_v26 }
 0x2c6   :  { %13093 = vmatprep.subr.mxu0 %v15273_v27  ;;  %13713 = vmatprep.subr.mxu1 %v14570_v8  ;;  %v15757_v44 = vpop.permute.xlu1 %1598 }
 0x2c7   :  { %13094 = vmatpush3.msra.mxu0 %v15273_v27  ;;  %13714 = vmatpush3.msra.mxu1 %v15704_v29  ;;  %v3450_v46 = vpop.permute.xlu0 %3449 }
 0x2c8   :  { %13136 = vmatprep.subr.mxu0 %v15743_v35  ;;  %13096 = vmatmul.mubr.f32.vlgmr.msra.gmra.mxu0 %v15753_v42 }
 0x2c9   :  { %13137 = vmatpush3.msra.mxu0 %v15743_v35  ;;  %13715 = vmatprep.subr.mxu1 %v14570_v8 }
 0x2ca   :  { %13138 = vmatprep.subr.mxu0 %v15746_v41  ;;  %13716 = vmatpush3.msra.mxu1 %v15717_v32  ;;  %v15772_v27 = vpop.permute.xlu1 %1594 }
 0x2cb   :  { %13717 = vmatprep.mubr.msk.f32.mxu1 %vm14571_vm1, %v14570_v8  ;;  %13755 = vmatprep.subr.mxu1 %v14570_v8  ;;  %v15788_v51 = vpop.permute.xlu0 %1591 }
 0x2cc   :  { %13139 = vmatpush3.msra.mxu0 %v15746_v41  ;;  %13718 = vmatmul.mubr.msk.f32.vlgmr.msra.gmra.mxu1 %vm1030_vm2, %v3450_v46 }
 0x2cd   :  { %13140 = vmatprep.subr.mxu0 %v15757_v44  ;;  %13756 = vmatpush3.msra.mxu1 %v15637_v1 }
 0x2ce   :  { %13141 = vmatpush3.msra.mxu0 %v15757_v44  ;;  %13757 = vmatprep.subr.mxu1 %v14570_v8  ;;  %v15778_v47 = vpop.f32.mrf.mxu1  ;;  %v15792_v53 = vpop.permute.xlu1 %1588 }
 0x2cf   :  { %13142 = vmatprep.subr.mxu0 %v15518_v48  ;;  %13758 = vmatpush3.msra.mxu1 %v15646_v2 }
 0x2d0   :  { %13143 = vmatpush3.msra.mxu0 %v15518_v48  ;;  %13759 = vmatprep.subr.mxu1 %v14570_v8  ;;  %v13427_v49 = vpop.f32.mrf.mxu1 }
 0x2d1   :  { %13144 = vmatprep.subr.mxu0 %v15772_v27  ;;  %13760 = vmatpush3.msra.mxu1 %v15657_v4 }
 0x2d2   :  { %13145 = vmatpush3.msra.mxu0 %v15772_v27  ;;  %13761 = vmatprep.subr.mxu1 %v14570_v8 }
 0x2d3   :  { %13146 = vmatprep.subr.mxu0 %v15788_v51  ;;  %13762 = vmatpush3.msra.mxu1 %v15670_v20 }
 0x2d4   :  { %13147 = vmatpush3.msra.mxu0 %v15788_v51  ;;  %13763 = vmatprep.subr.mxu1 %v14570_v8 }
 0x2d5   :  { %13148 = vmatprep.subr.mxu0 %v15792_v53  ;;  %13764 = vmatpush3.msra.mxu1 %v15683_v22 }
 0x2d6   :  { %2572 = vrot.lane.b32.xlu1 %v15778_v47, %s14574_s25  ;;  %2569 = vrot.lane.b32.xlu0 %v15778_v47, %s14573_s23 }
 0x2d7   :  { %13149 = vmatpush3.msra.mxu0 %v15792_v53  ;;  %13765 = vmatprep.subr.mxu1 %v14570_v8 }
 0x2d8   :  { %13150 = vmatprep.subr.mxu0 %v15478_v43  ;;  %13766 = vmatpush3.msra.mxu1 %v15696_v26 }
 0x2d9   :  { %13151 = vmatpush3.msra.mxu0 %v15478_v43  ;;  %13767 = vmatprep.subr.mxu1 %v14570_v8 }
 0x2da   :  { %13152 = vmatprep.subr.mxu0 %v15624_v62  ;;  %13768 = vmatpush3.msra.mxu1 %v15704_v29 }
 0x2db   :  { %2566 = vrot.lane.b32.xlu1 %v15778_v47, %s14575_s24  ;;  %4417 = vrot.lane.b32.xlu0 %v15812_v10, %s14572_s22 }
 0x2dc   :  { %13153 = vmatpush3.msra.mxu0 %v15624_v62  ;;  %13769 = vmatprep.subr.mxu1 %v14570_v8 }
 0x2dd   :  { %13154 = vmatprep.subr.mxu0 %v15622_v61  ;;  %13770 = vmatpush3.msra.mxu1 %v15717_v32 }
 0x2de   :  { %13771 = vmatprep.mubr.msk.f32.mxu1 %vm14571_vm1, %v14570_v8  ;;  %13155 = vmatpush3.msra.mxu0 %v15622_v61  ;;  %v15825_v12 = vpop.f32.mrf.mxu1 }
 0x2df   :  { %13772 = vmatmul.mubr.msk.f32.vlgmr.msra.gmra.mxu1 %vm1030_vm2, %v15586_v13  ;;  %13774 = vmatprep.subr.mxu1 %v14570_v8 }
 0x2e0   :  { %13156 = vmatprep.subr.mxu0 %v15630_v0  ;;  %13775 = vmatpush3.msra.mxu1 %v15637_v1  ;;  %v13481_v60 = vpop.f32.mrf.mxu1 }
 0x2e1   :  { %2562 = vrot.lane.b32.xlu1 %v15735_v37, %s14574_s25  ;;  %2559 = vrot.lane.b32.xlu0 %v15735_v37, %s14573_s23  ;;  %v15847_v13 = vpop.permute.xlu0 %1846 }
 0x2e2   :  { %13157 = vmatpush3.msra.mxu0 %v15630_v0  ;;  %13776 = vmatprep.subr.mxu1 %v14570_v8 }
 0x2e3   :  { %13158 = vmatprep.subr.mxu0 %v15439_v39  ;;  %13777 = vmatpush3.msra.mxu1 %v15646_v2 }
 0x2e4   :  { %13159 = vmatpush3.msra.mxu0 %v15439_v39  ;;  %13778 = vmatprep.subr.mxu1 %v14570_v8  ;;  %v15857_v39 = vpop.permute.xlu1 %1843 }
 0x2e5   :  { %13160 = vmatprep.subr.mxu0 %v15651_v3  ;;  %13779 = vmatpush3.msra.mxu1 %v15657_v4  ;;  %v15863_v15 = vpop.permute.xlu0 %1840 }
 0x2e6   :  { %2556 = vrot.lane.b32.xlu1 %v15735_v37, %s14575_s24  ;;  %13161 = vmatpush3.msra.mxu0 %v15651_v3 }
 0x2e7   :  { %13780 = vmatprep.subr.mxu1 %v14570_v8  ;;  %13162 = vmatprep.subr.mxu0 %v15662_v6 }
 0x2e8   :  { %13781 = vmatpush3.msra.mxu1 %v15670_v20  ;;  %13163 = vmatpush3.msra.mxu0 %v15662_v6 }
 0x2e9   :  { %13782 = vmatprep.subr.mxu1 %v14570_v8  ;;  %13164 = vmatprep.subr.mxu0 %v15675_v18  ;;  %v15880_v56 = vpop.permute.xlu0 %1836 }
 0x2ea   :  { %13783 = vmatpush3.msra.mxu1 %v15683_v22  ;;  %13165 = vmatpush3.msra.mxu0 %v15675_v18 }
 0x2eb   :  { %13784 = vmatprep.subr.mxu1 %v14570_v8  ;;  %13166 = vmatprep.subr.mxu0 %v15293_v30 }
 0x2ec   :  { %13785 = vmatpush3.msra.mxu1 %v15696_v26  ;;  %13167 = vmatpush3.msra.mxu0 %v15293_v30  ;;  %v3692_v30 = vpop.permute.xlu1 %3691 }
 0x2ed   :  { %13786 = vmatprep.subr.mxu1 %v14570_v8  ;;  %13168 = vmatprep.mubr.f32.mxu0 %v15504_v45  ;;  %v15898_v62 = vpop.permute.xlu0 %1830 }
 0x2ee   :  { %13209 = vmatprep.subr.mxu0 %v15847_v13  ;;  %13787 = vmatpush3.msra.mxu1 %v15704_v29  ;;  %v15869_v16 = vpop.f32.mrf.mxu1 }
 0x2ef   :  { %13169 = vmatmul.mubr.f32.vlgmr.msra.gmra.mxu0 %v15753_v42  ;;  %13788 = vmatprep.subr.mxu1 %v14570_v8 }
 0x2f0   :  { %13210 = vmatpush3.msra.mxu0 %v15847_v13  ;;  %13789 = vmatpush3.msra.mxu1 %v15717_v32  ;;  %v13500_v54 = vpop.f32.mrf.mxu1  ;;  %v15894_v61 = vpop.permute.xlu1 %1833 }
 0x2f1   :  { %13211 = vmatprep.subr.mxu0 %v15857_v39  ;;  %13790 = vmatprep.mubr.msk.f32.mxu1 %vm14571_vm1, %v14570_v8 }
 0x2f2   :  { %13212 = vmatpush3.msra.mxu0 %v15857_v39  ;;  %13828 = vmatprep.subr.mxu1 %v14570_v8 }
 0x2f3   :  { %13213 = vmatprep.subr.mxu0 %v15863_v15  ;;  %13791 = vmatmul.mubr.msk.f32.vlgmr.msra.gmra.mxu1 %vm1030_vm2, %v3692_v30 }
 0x2f4   :  { %13829 = vmatpush3.msra.mxu1 %v15637_v1  ;;  %13214 = vmatpush3.msra.mxu0 %v15863_v15 }
 0x2f5   :  { %13830 = vmatprep.subr.mxu1 %v14570_v8  ;;  %13215 = vmatprep.subr.mxu0 %v15578_v11 }
 0x2f6   :  { %13831 = vmatpush3.msra.mxu1 %v15646_v2  ;;  %13216 = vmatpush3.msra.mxu0 %v15578_v11 }
 0x2f7   :  { %13832 = vmatprep.subr.mxu1 %v14570_v8  ;;  %13217 = vmatprep.subr.mxu0 %v15880_v56 }
 0x2f8   :  { %13833 = vmatpush3.msra.mxu1 %v15657_v4  ;;  %13218 = vmatpush3.msra.mxu0 %v15880_v56 }
 0x2f9   :  { %13834 = vmatprep.subr.mxu1 %v14570_v8  ;;  %13219 = vmatprep.subr.mxu0 %v15894_v61 }
 0x2fa   :  { %13835 = vmatpush3.msra.mxu1 %v15670_v20  ;;  %13220 = vmatpush3.msra.mxu0 %v15894_v61 }
 0x2fb   :  { %13836 = vmatprep.subr.mxu1 %v14570_v8  ;;  %13221 = vmatprep.subr.mxu0 %v15898_v62 }
 0x2fc   :  { %13837 = vmatpush3.msra.mxu1 %v15683_v22  ;;  %2811 = vrot.lane.b32.xlu1 %v15869_v16, %s14573_s23 }
 0x2fd   :  { %2814 = vrot.lane.b32.xlu0 %v15869_v16, %s14574_s25  ;;  %13222 = vmatpush3.msra.mxu0 %v15898_v62 }
 0x2fe   :  { %13838 = vmatprep.subr.mxu1 %v14570_v8  ;;  %13223 = vmatprep.subr.mxu0 %v15555_v52 }
 0x2ff   :  { %13839 = vmatpush3.msra.mxu1 %v15696_v26  ;;  %13224 = vmatpush3.msra.mxu0 %v15555_v52  ;;  %v15916_v19 = vpop.f32.mrf.mxu1 }
 0x300   :  { %13840 = vmatprep.subr.mxu1 %v14570_v8  ;;  %13225 = vmatprep.subr.mxu0 %v15743_v35 }
 0x301   :  { %13841 = vmatpush3.msra.mxu1 %v15704_v29  ;;  %4659 = vrot.lane.b32.xlu1 %v15920_v63, %s14572_s22  ;;  %v13554_v0 = vpop.f32.mrf.mxu1  ;;  %v15967_v3 = vpop.permute.xlu0 %2085  ;;  %s14589_s22 = smov 36  }
 0x302   :  { %2808 = vrot.lane.b32.xlu0 %v15869_v16, %s14575_s24  ;;  %13226 = vmatpush3.msra.mxu0 %v15743_v35  ;;  %v16162_v35 = vld [vmem:[%s19508_s3] sm:$0xff] }
 0x303   :  { %13842 = vmatprep.subr.mxu1 %v14570_v8  ;;  %13227 = vmatprep.subr.mxu0 %v15746_v41 }
 0x304   :  { %13843 = vmatpush3.msra.mxu1 %v15717_v32  ;;  %13844 = vmatprep.mubr.msk.f32.mxu1 %vm14571_vm1, %v14570_v8 }
 0x305   :  { %13228 = vmatpush3.msra.mxu0 %v15746_v41  ;;  %13845 = vmatmul.mubr.msk.f32.vlgmr.msra.gmra.mxu1 %vm1030_vm2, %v15608_v57  ;;  %v15953_v57 = vpop.permute.xlu1 %2088  ;;  %v3934_v18 = vpop.permute.xlu0 %3933 }
 0x306   :  { %13847 = vmatprep.subr.mxu1 %v14570_v8  ;;  %13229 = vmatprep.subr.mxu0 %v15757_v44 }
 0x307   :  { %13848 = vmatpush3.msra.mxu1 %v15637_v1  ;;  %2801 = vrot.lane.b32.xlu1 %v15825_v12, %s14573_s23 }
 0x308   :  { %2804 = vrot.lane.b32.xlu0 %v15825_v12, %s14574_s25  ;;  %13230 = vmatpush3.msra.mxu0 %v15757_v44 }
 0x309   :  { %13849 = vmatprep.subr.mxu1 %v14570_v8  ;;  %13231 = vmatprep.subr.mxu0 %v15518_v48  ;;  %v15971_v6 = vpop.permute.xlu1 %2082  ;;  %v15999_v23 = vpop.permute.xlu0 %2075 }
 0x30a   :  { %13850 = vmatpush3.msra.mxu1 %v15646_v2  ;;  %13232 = vmatpush3.msra.mxu0 %v15518_v48 }
 0x30b   :  { %13851 = vmatprep.subr.mxu1 %v14570_v8  ;;  %13233 = vmatprep.subr.mxu0 %v15772_v27 }
 0x30c   :  { %13852 = vmatpush3.msra.mxu1 %v15657_v4  ;;  %2798 = vrot.lane.b32.xlu0 %v15825_v12, %s14575_s24 }
 0x30d   :  { %13234 = vmatpush3.msra.mxu0 %v15772_v27  ;;  %13853 = vmatprep.subr.mxu1 %v14570_v8 }
 0x30e   :  { %13235 = vmatprep.subr.mxu0 %v15788_v51  ;;  %13854 = vmatpush3.msra.mxu1 %v15670_v20 }
 0x30f   :  { %13236 = vmatpush3.msra.mxu0 %v15788_v51  ;;  %13855 = vmatprep.subr.mxu1 %v14570_v8  ;;  %v15961_v48 = vpop.f32.mrf.mxu1 }
 0x310   :  { %13237 = vmatprep.subr.mxu0 %v15792_v53  ;;  %13856 = vmatpush3.msra.mxu1 %v15683_v22 }
 0x311   :  { %13238 = vmatpush3.msra.mxu0 %v15792_v53  ;;  %13857 = vmatprep.subr.mxu1 %v14570_v8  ;;  %v13573_v5 = vpop.f32.mrf.mxu1 }
 0x312   :  { %13239 = vmatprep.subr.mxu0 %v15478_v43  ;;  %13858 = vmatpush3.msra.mxu1 %v15696_v26 }
 0x313   :  { %13240 = vmatpush3.msra.mxu0 %v15478_v43  ;;  %13859 = vmatprep.subr.mxu1 %v14570_v8  ;;  %v15986_v43 = vpop.permute.xlu1 %2078 }
 0x314   :  { %13241 = vmatprep.mubr.f32.mxu0 %v15504_v45  ;;  %13282 = vmatprep.subr.mxu0 %v15953_v57 }
 0x315   :  { %13860 = vmatpush3.msra.mxu1 %v15704_v29  ;;  %13242 = vmatmul.mubr.f32.vlgmr.msra.gmra.mxu0 %v15753_v42 }
 0x316   :  { %13283 = vmatpush3.msra.mxu0 %v15953_v57  ;;  %13861 = vmatprep.subr.mxu1 %v14570_v8 }
 0x317   :  { %13284 = vmatprep.subr.mxu0 %v15967_v3  ;;  %13862 = vmatpush3.msra.mxu1 %v15717_v32  ;;  %v16002_v24 = vpop.permute.xlu1 %2072 }
 0x318   :  { %13285 = vmatpush3.msra.mxu0 %v15967_v3  ;;  %13863 = vmatprep.mubr.msk.f32.mxu1 %vm14571_vm1, %v14570_v8 }
 0x319   :  { %13901 = vmatprep.subr.mxu1 %v14570_v8  ;;  %13286 = vmatprep.subr.mxu0 %v15971_v6 }
 0x31a   :  { %13864 = vmatmul.mubr.msk.f32.vlgmr.msra.gmra.mxu1 %vm1030_vm2, %v3934_v18  ;;  %13287 = vmatpush3.msra.mxu0 %v15971_v6 }
 0x31b   :  { %13902 = vmatpush3.msra.mxu1 %v15637_v1  ;;  %13288 = vmatprep.subr.mxu0 %v15602_v55 }
 0x31c   :  { %13903 = vmatprep.subr.mxu1 %v14570_v8  ;;  %13289 = vmatpush3.msra.mxu0 %v15602_v55 }
 0x31d   :  { %13904 = vmatpush3.msra.mxu1 %v15646_v2  ;;  %13290 = vmatprep.subr.mxu0 %v15986_v43 }
 0x31e   :  { %13905 = vmatprep.subr.mxu1 %v14570_v8  ;;  %13291 = vmatpush3.msra.mxu0 %v15986_v43 }
 0x31f   :  { %13906 = vmatpush3.msra.mxu1 %v15657_v4  ;;  %13292 = vmatprep.subr.mxu0 %v15999_v23  ;;  %v16006_v25 = vpop.f32.mrf.mxu1 }
 0x320   :  { %13907 = vmatprep.subr.mxu1 %v14570_v8  ;;  %13293 = vmatpush3.msra.mxu0 %v15999_v23 }
 0x321   :  { %13908 = vmatpush3.msra.mxu1 %v15670_v20  ;;  %13294 = vmatprep.subr.mxu0 %v16002_v24  ;;  %v13627_v28 = vpop.f32.mrf.mxu1 }
 0x322   :  { %13909 = vmatprep.subr.mxu1 %v14570_v8  ;;  %3056 = vrot.lane.b32.xlu1 %v15961_v48, %s14574_s25 }
 0x323   :  { %13910 = vmatpush3.msra.mxu1 %v15683_v22  ;;  %3053 = vrot.lane.b32.xlu0 %v15961_v48, %s14573_s23 }
 0x324   :  { %13295 = vmatpush3.msra.mxu0 %v16002_v24  ;;  %13911 = vmatprep.subr.mxu1 %v14570_v8 }
 0x325   :  { %13296 = vmatprep.subr.mxu0 %v15598_v14  ;;  %13912 = vmatpush3.msra.mxu1 %v15696_v26 }
 0x326   :  { %13297 = vmatpush3.msra.mxu0 %v15598_v14  ;;  %13913 = vmatprep.subr.mxu1 %v14570_v8 }
 0x327   :  { %13298 = vmatprep.subr.mxu0 %v15847_v13  ;;  %13914 = vmatpush3.msra.mxu1 %v15704_v29 }
 0x328   :  { %3050 = vrot.lane.b32.xlu1 %v15961_v48, %s14575_s24  ;;  %3046 = vrot.lane.b32.xlu0 %v15916_v19, %s14574_s25 }
 0x329   :  { %13299 = vmatpush3.msra.mxu0 %v15847_v13  ;;  %13915 = vmatprep.subr.mxu1 %v14570_v8 }
 0x32a   :  { %13300 = vmatprep.subr.mxu0 %v15857_v39  ;;  %13916 = vmatpush3.msra.mxu1 %v15717_v32 }
 0x32b   :  { %13917 = vmatprep.mubr.msk.f32.mxu1 %vm14571_vm1, %v14570_v8  ;;  %13301 = vmatpush3.msra.mxu0 %v15857_v39  ;;  %v16391_v39 = vld [vmem:[%s19508_s3 + $0x8] sm:$0xff]  ;;  %s14576_s3 = smov 30  }
 0x32c   :  { %13918 = vmatmul.mubr.msk.f32.vlgmr.msra.gmra.mxu1 %vm1030_vm2, %v15707_v31  ;;  %13920 = vmatprep.subr.mxu1 %v14570_v8  ;;  %v16054_v31 = vpop.permute.xlu0 %2330 }
 0x32d   :  { %13302 = vmatprep.subr.mxu0 %v15863_v15  ;;  %13921 = vmatpush3.msra.mxu1 %v15637_v1 }
 0x32e   :  { %3043 = vrot.lane.b32.xlu1 %v15916_v19, %s14573_s23  ;;  %3040 = vrot.lane.b32.xlu0 %v15916_v19, %s14575_s24 }
 0x32f   :  { %13303 = vmatpush3.msra.mxu0 %v15863_v15  ;;  %13922 = vmatprep.subr.mxu1 %v14570_v8 }
 0x330   :  { %13304 = vmatprep.subr.mxu0 %v15578_v11  ;;  %13923 = vmatpush3.msra.mxu1 %v15646_v2  ;;  %v16070_v33 = vpop.permute.xlu0 %2324 }
 0x331   :  { %13305 = vmatpush3.msra.mxu0 %v15578_v11  ;;  %13924 = vmatprep.subr.mxu1 %v14570_v8  ;;  %v16066_v11 = vpop.permute.xlu1 %2327 }
 0x332   :  { %13306 = vmatprep.subr.mxu0 %v15880_v56  ;;  %13925 = vmatpush3.msra.mxu1 %v15657_v4 }
 0x333   :  { %13307 = vmatpush3.msra.mxu0 %v15880_v56  ;;  %13926 = vmatprep.subr.mxu1 %v14570_v8 }
 0x334   :  { %13308 = vmatprep.subr.mxu0 %v15894_v61  ;;  %13927 = vmatpush3.msra.mxu1 %v15670_v20 }
 0x335   :  { %13309 = vmatpush3.msra.mxu0 %v15894_v61  ;;  %13928 = vmatprep.subr.mxu1 %v14570_v8  ;;  %v4176_v34 = vpop.permute.xlu1 %4175 }
 0x336   :  { %13310 = vmatprep.subr.mxu0 %v15898_v62  ;;  %13929 = vmatpush3.msra.mxu1 %v15683_v22 }
 0x337   :  { %13311 = vmatpush3.msra.mxu0 %v15898_v62  ;;  %13930 = vmatprep.subr.mxu1 %v14570_v8 }
 0x338   :  { %13312 = vmatprep.subr.mxu0 %v15555_v52  ;;  %13931 = vmatpush3.msra.mxu1 %v15696_v26 }
 0x339   :  { %13313 = vmatpush3.msra.mxu0 %v15555_v52  ;;  %13932 = vmatprep.subr.mxu1 %v14570_v8  ;;  %v16097_v52 = vpop.permute.xlu1 %2317 }
 0x33a   :  { %13314 = vmatprep.mubr.f32.mxu0 %v15504_v45  ;;  %13355 = vmatprep.subr.mxu0 %v16054_v31  ;;  %v16085_v45 = vpop.permute.xlu0 %2320 }
 0x33b   :  { %13933 = vmatpush3.msra.mxu1 %v15704_v29  ;;  %13315 = vmatmul.mubr.f32.vlgmr.msra.gmra.mxu0 %v15753_v42 }
 0x33c   :  { %13356 = vmatpush3.msra.mxu0 %v16054_v31  ;;  %13934 = vmatprep.subr.mxu1 %v14570_v8 }
 0x33d   :  { %13357 = vmatprep.subr.mxu0 %v16066_v11  ;;  %13935 = vmatpush3.msra.mxu1 %v15717_v32 }
 0x33e   :  { %13358 = vmatpush3.msra.mxu0 %v16066_v11  ;;  %13936 = vmatprep.mubr.msk.f32.mxu1 %vm14571_vm1, %v14570_v8  ;;  %v16101_v36 = vpop.permute.xlu0 %2314 }
 0x33f   :  { %13974 = vmatprep.subr.mxu1 %v14570_v8  ;;  %13359 = vmatprep.subr.mxu0 %v16070_v33 }
 0x340   :  { %13937 = vmatmul.mubr.msk.f32.vlgmr.msra.gmra.mxu1 %vm1030_vm2, %v4176_v34  ;;  %13360 = vmatpush3.msra.mxu0 %v16070_v33 }
 0x341   :  { %13975 = vmatpush3.msra.mxu1 %v15637_v1  ;;  %13361 = vmatprep.subr.mxu0 %v15677_v21 }
 0x342   :  { %13976 = vmatprep.subr.mxu1 %v14570_v8  ;;  %13362 = vmatpush3.msra.mxu0 %v15677_v21 }
 0x343   :  { %13977 = vmatpush3.msra.mxu1 %v15646_v2  ;;  %13363 = vmatprep.subr.mxu0 %v16085_v45 }
 0x344   :  { %13978 = vmatprep.subr.mxu1 %v14570_v8  ;;  %13364 = vmatpush3.msra.mxu0 %v16085_v45 }
 0x345   :  { %13979 = vmatpush3.msra.mxu1 %v15657_v4  ;;  %13365 = vmatprep.subr.mxu0 %v16097_v52 }
 0x346   :  { %13980 = vmatprep.subr.mxu1 %v14570_v8  ;;  %13366 = vmatpush3.msra.mxu0 %v16097_v52 }
 0x347   :  { %13981 = vmatpush3.msra.mxu1 %v15670_v20  ;;  %13367 = vmatprep.subr.mxu0 %v16101_v36 }
 0x348   :  { %13982 = vmatprep.subr.mxu1 %v14570_v8  ;;  %13368 = vmatpush3.msra.mxu0 %v16101_v36  ;;  %v16139_v38 = vpop.permute.xlu1 %2572 }
 0x349   :  { %13983 = vmatpush3.msra.mxu1 %v15683_v22  ;;  %13369 = vmatprep.subr.mxu0 %v15620_v58 }
 0x34a   :  { %13984 = vmatprep.subr.mxu1 %v14570_v8  ;;  %13370 = vmatpush3.msra.mxu0 %v15620_v58 }
 0x34b   :  { %13985 = vmatpush3.msra.mxu1 %v15696_v26  ;;  %13371 = vmatprep.subr.mxu0 %v15953_v57 }
 0x34c   :  { %13986 = vmatprep.subr.mxu1 %v14570_v8  ;;  %13372 = vmatpush3.msra.mxu0 %v15953_v57 }
 0x34d   :  { %13987 = vmatpush3.msra.mxu1 %v15704_v29  ;;  %13373 = vmatprep.subr.mxu0 %v15967_v3  ;;  %v16155_v40 = vpop.permute.xlu1 %2566 }
 0x34e   :  { %13988 = vmatprep.subr.mxu1 %v14570_v8  ;;  %13990 = vmatprep.mubr.msk.f32.mxu1 %vm14571_vm1, %v14570_v8 }
 0x34f   :  { %13989 = vmatpush3.msra.mxu1 %v15717_v32  ;;  %13374 = vmatpush3.msra.mxu0 %v15967_v3 }
 0x350   :  { %13991 = vmatmul.mubr.msk.f32.vlgmr.msra.gmra.mxu1 %vm1030_vm2, %v15812_v10  ;;  %13993 = vmatprep.subr.mxu1 %v14570_v8 }
 0x351   :  { %13375 = vmatprep.subr.mxu0 %v15971_v6  ;;  %13994 = vmatpush3.msra.mxu1 %v15637_v1 }
 0x352   :  { %13376 = vmatpush3.msra.mxu0 %v15971_v6  ;;  %13995 = vmatprep.subr.mxu1 %v14570_v8 }
 0x353   :  { %13377 = vmatprep.subr.mxu0 %v15602_v55  ;;  %13996 = vmatpush3.msra.mxu1 %v15646_v2  ;;  %v16175_v41 = vpop.permute.xlu1 %2562 }
 0x354   :  { %13378 = vmatpush3.msra.mxu0 %v15602_v55  ;;  %13997 = vmatprep.subr.mxu1 %v14570_v8  ;;  %v16151_v55 = vpop.permute.xlu0 %2569 }
 0x355   :  { %13379 = vmatprep.subr.mxu0 %v15986_v43  ;;  %13998 = vmatpush3.msra.mxu1 %v15657_v4 }
 0x356   :  { %13380 = vmatpush3.msra.mxu0 %v15986_v43  ;;  %13999 = vmatprep.subr.mxu1 %v14570_v8 }
 0x357   :  { %13381 = vmatprep.subr.mxu0 %v15999_v23  ;;  %14000 = vmatpush3.msra.mxu1 %v15670_v20 }
 0x358   :  { %13382 = vmatpush3.msra.mxu0 %v15999_v23  ;;  %14001 = vmatprep.subr.mxu1 %v14570_v8  ;;  %v16193_v27 = vpop.permute.xlu1 %2556 }
 0x359   :  { %13383 = vmatprep.subr.mxu0 %v16002_v24  ;;  %14002 = vmatpush3.msra.mxu1 %v15683_v22 }
 0x35a   :  { %13384 = vmatpush3.msra.mxu0 %v16002_v24  ;;  %14003 = vmatprep.subr.mxu1 %v14570_v8 }
 0x35b   :  { %13385 = vmatprep.subr.mxu0 %v15598_v14  ;;  %14004 = vmatpush3.msra.mxu1 %v15696_v26 }
 0x35c   :  { %13386 = vmatpush3.msra.mxu0 %v15598_v14  ;;  %14005 = vmatprep.subr.mxu1 %v14570_v8  ;;  %v4418_v14 = vpop.permute.xlu0 %4417 }
 0x35d   :  { %13387 = vmatprep.mubr.f32.mxu0 %v16162_v35  ;;  %13428 = vmatprep.subr.mxu0 %v16139_v38 }
 0x35e   :  { %14006 = vmatpush3.msra.mxu1 %v15704_v29  ;;  %13388 = vmatmul.mubr.f32.vlgmr.msra.gmra.mxu0 %v15753_v42 }
 0x35f   :  { %13429 = vmatpush3.msra.mxu0 %v16139_v38  ;;  %14007 = vmatprep.subr.mxu1 %v14570_v8 }
 0x360   :  { %13430 = vmatprep.subr.mxu0 %v16151_v55  ;;  %14008 = vmatpush3.msra.mxu1 %v15717_v32  ;;  %v16190_v46 = vpop.permute.xlu0 %2559 }
 0x361   :  { %13431 = vmatpush3.msra.mxu0 %v16151_v55  ;;  %14009 = vmatprep.mubr.msk.f32.mxu1 %vm14571_vm1, %v14570_v8 }
 0x362   :  { %14047 = vmatprep.subr.mxu1 %v14570_v8  ;;  %13432 = vmatprep.subr.mxu0 %v16155_v40 }
 0x363   :  { %14010 = vmatmul.mubr.msk.f32.vlgmr.msra.gmra.mxu1 %vm1030_vm2, %v4418_v14  ;;  %13433 = vmatpush3.msra.mxu0 %v16155_v40 }
 0x364   :  { %14048 = vmatpush3.msra.mxu1 %v15637_v1  ;;  %13434 = vmatprep.subr.mxu0 %v15778_v47 }
 0x365   :  { %14049 = vmatprep.subr.mxu1 %v14570_v8  ;;  %13435 = vmatpush3.msra.mxu0 %v15778_v47 }
 0x366   :  { %14050 = vmatpush3.msra.mxu1 %v15646_v2  ;;  %13436 = vmatprep.subr.mxu0 %v16175_v41  ;;  %v16187_v44 = vpop.f32.mrf.mxu1 }
 0x367   :  { %14051 = vmatprep.subr.mxu1 %v14570_v8  ;;  %13437 = vmatpush3.msra.mxu0 %v16175_v41 }
 0x368   :  { %14052 = vmatpush3.msra.mxu1 %v15657_v4  ;;  %13438 = vmatprep.subr.mxu0 %v16190_v46  ;;  %v13646_v49 = vpop.f32.mrf.mxu1 }
 0x369   :  { %14053 = vmatprep.subr.mxu1 %v14570_v8  ;;  %13439 = vmatpush3.msra.mxu0 %v16190_v46 }
 0x36a   :  { %14054 = vmatpush3.msra.mxu1 %v15670_v20  ;;  %13440 = vmatprep.subr.mxu0 %v16193_v27 }
 0x36b   :  { %14055 = vmatprep.subr.mxu1 %v14570_v8  ;;  %13441 = vmatpush3.msra.mxu0 %v16193_v27 }
 0x36c   :  { %14056 = vmatpush3.msra.mxu1 %v15683_v22  ;;  %13442 = vmatprep.subr.mxu0 %v15735_v37 }
 0x36d   :  { %14057 = vmatprep.subr.mxu1 %v14570_v8  ;;  %13443 = vmatpush3.msra.mxu0 %v15735_v37 }
 0x36e   :  { %14058 = vmatpush3.msra.mxu1 %v15696_v26  ;;  %13444 = vmatprep.subr.mxu0 %v16054_v31 }
 0x36f   :  { %14059 = vmatprep.subr.mxu1 %v14570_v8  ;;  %13445 = vmatpush3.msra.mxu0 %v16054_v31  ;;  %v16233_v50 = vpop.permute.xlu0 %2814 }
 0x370   :  { %14060 = vmatpush3.msra.mxu1 %v15704_v29  ;;  %13446 = vmatprep.subr.mxu0 %v16066_v11 }
 0x371   :  { %14061 = vmatprep.subr.mxu1 %v14570_v8  ;;  %14063 = vmatprep.mubr.msk.f32.mxu1 %vm14571_vm1, %v14570_v8 }
 0x372   :  { %14062 = vmatpush3.msra.mxu1 %v15717_v32  ;;  %13447 = vmatpush3.msra.mxu0 %v16066_v11 }
 0x373   :  { %14064 = vmatmul.mubr.msk.f32.vlgmr.msra.gmra.mxu1 %vm1030_vm2, %v15920_v63  ;;  %13448 = vmatprep.subr.mxu0 %v16070_v33 }
 0x374   :  { %14066 = vmatprep.subr.mxu1 %v14570_v8  ;;  %13449 = vmatpush3.msra.mxu0 %v16070_v33 }
 0x375   :  { %14067 = vmatpush3.msra.mxu1 %v15637_v1  ;;  %13450 = vmatprep.subr.mxu0 %v15677_v21 }
 0x376   :  { %14068 = vmatprep.subr.mxu1 %v14570_v8  ;;  %13451 = vmatpush3.msra.mxu0 %v15677_v21 }
 0x377   :  { %14069 = vmatpush3.msra.mxu1 %v15646_v2  ;;  %13452 = vmatprep.subr.mxu0 %v16085_v45 }
 0x378   :  { %14070 = vmatprep.subr.mxu1 %v14570_v8  ;;  %13453 = vmatpush3.msra.mxu0 %v16085_v45 }
 0x379   :  { %14071 = vmatpush3.msra.mxu1 %v15657_v4  ;;  %13454 = vmatprep.subr.mxu0 %v16097_v52  ;;  %v16235_v1 = vpop.f32.mrf.mxu1  ;;  %v16243_v4 = vpop.permute.xlu1 %2811 }
 0x37a   :  { %14072 = vmatprep.subr.mxu1 %v14570_v8  ;;  %13455 = vmatpush3.msra.mxu0 %v16097_v52 }
 0x37b   :  { %14073 = vmatpush3.msra.mxu1 %v15670_v20  ;;  %13456 = vmatprep.subr.mxu0 %v16101_v36  ;;  %v13700_v2 = vpop.f32.mrf.mxu1  ;;  %v16251_v20 = vpop.permute.xlu0 %2808 }
 0x37c   :  { %14074 = vmatprep.subr.mxu1 %v14570_v8  ;;  %13457 = vmatpush3.msra.mxu0 %v16101_v36 }
 0x37d   :  { %14075 = vmatpush3.msra.mxu1 %v15683_v22  ;;  %13458 = vmatprep.subr.mxu0 %v15620_v58  ;;  %v4660_v21 = vpop.permute.xlu1 %4659 }
 0x37e   :  { %14076 = vmatprep.subr.mxu1 %v14570_v8  ;;  %13459 = vmatpush3.msra.mxu0 %v15620_v58 }
 0x37f   :  { %14077 = vmatpush3.msra.mxu1 %v15696_v26  ;;  %13460 = vmatprep.mubr.f32.mxu0 %v16162_v35  ;;  %v16266_v58 = vpop.permute.xlu0 %2804 }
 0x380   :  { %13501 = vmatprep.subr.mxu0 %v16233_v50  ;;  %14078 = vmatprep.subr.mxu1 %v14570_v8 }
 0x381   :  { %13461 = vmatmul.mubr.f32.vlgmr.msra.gmra.mxu0 %v15753_v42  ;;  %14079 = vmatpush3.msra.mxu1 %v15704_v29 }
 0x382   :  { %13502 = vmatpush3.msra.mxu0 %v16233_v50  ;;  %14080 = vmatprep.subr.mxu1 %v14570_v8 }
 0x383   :  { %13503 = vmatprep.subr.mxu0 %v16243_v4  ;;  %14081 = vmatpush3.msra.mxu1 %v15717_v32  ;;  %v16284_v22 = vpop.permute.xlu0 %2798 }
 0x384   :  { %13504 = vmatpush3.msra.mxu0 %v16243_v4  ;;  %14082 = vmatprep.mubr.msk.f32.mxu1 %vm14571_vm1, %v14570_v8  ;;  %v16279_v8 = vpop.permute.xlu1 %2801  ;;  %vm4940_vm1 = vcmask 244736  }
 0x385   :  { %13505 = vmatprep.subr.mxu0 %v16251_v20  ;;  %14083 = vmatmul.mubr.msk.f32.vlgmr.msra.gmra.mxu1 %vm1030_vm2, %v4660_v21  ;;  %vm4943_vm2 = vcmask 490496  }
 0x386   :  { %3298 = vrot.lane.b32.xlu1 %v16187_v44, %s14574_s25  ;;  %3295 = vrot.lane.b32.xlu0 %v16187_v44, %s14573_s23 }
 0x387   :  { %13506 = vmatpush3.msra.mxu0 %v16251_v20  ;;  %13533 = vmatprep.mubr.f32.mxu0 %v16162_v35 }
 0x388   :  { %13507 = vmatprep.subr.mxu0 %v15869_v16  ;;  %v16546_v36 = vpop.f32.mrf.mxu0 }
 0x389   :  { %13508 = vmatpush3.msra.mxu0 %v15869_v16 }
 0x38a   :  { %13509 = vmatprep.subr.mxu0 %v16266_v58  ;;  %3292 = vrot.lane.b32.xlu1 %v16187_v44, %s14575_s24 }
 0x38b   :  { %3288 = vrot.lane.b32.xlu0 %v16006_v25, %s14574_s25  ;;  %13510 = vmatpush3.msra.mxu0 %v16266_v58 }
 0x38c   :  { %13511 = vmatprep.subr.mxu0 %v16279_v8  ;;  %v16287_v26 = vpop.f32.mrf.mxu1 }
 0x38d   :  { %13512 = vmatpush3.msra.mxu0 %v16279_v8 }
 0x38e   :  { %13513 = vmatprep.subr.mxu0 %v16284_v22  ;;  %3285 = vrot.lane.b32.xlu1 %v16006_v25, %s14573_s23  ;;  %v13719_v29 = vpop.f32.mrf.mxu1 }
 0x38f   :  { %3282 = vrot.lane.b32.xlu0 %v16006_v25, %s14575_s24  ;;  %13514 = vmatpush3.msra.mxu0 %v16284_v22 }
 0x390   :  { %13515 = vmatprep.subr.mxu0 %v15825_v12 }
 0x391   :  { %13516 = vmatpush3.msra.mxu0 %v15825_v12 }
 0x392   :  { %13517 = vmatprep.subr.mxu0 %v16139_v38  ;;  %3540 = vrot.lane.b32.xlu1 %v16287_v26, %s14574_s25 }
 0x393   :  { %13518 = vmatpush3.msra.mxu0 %v16139_v38  ;;  %3537 = vrot.lane.b32.xlu0 %v16287_v26, %s14573_s23  ;;  %v16554_v38 = vpop.f32.mrf.mxu0 }
 0x394   :  { %13519 = vmatprep.subr.mxu0 %v16151_v55  ;;  %v16322_v32 = vpop.permute.xlu1 %3056 }
 0x395   :  { %13520 = vmatpush3.msra.mxu0 %v16151_v55  ;;  %v16330_v51 = vpop.permute.xlu0 %3053 }
 0x396   :  { %13521 = vmatprep.subr.mxu0 %v16155_v40  ;;  %3534 = vrot.lane.b32.xlu1 %v16287_v26, %s14575_s24 }
 0x397   :  { %13522 = vmatpush3.msra.mxu0 %v16155_v40  ;;  %3530 = vrot.lane.b32.xlu0 %v16235_v1, %s14574_s25 }
 0x398   :  { %13523 = vmatprep.subr.mxu0 %v15778_v47 }
 0x399   :  { %13524 = vmatpush3.msra.mxu0 %v15778_v47 }
 0x39a   :  { %13525 = vmatprep.subr.mxu0 %v16175_v41  ;;  %3527 = vrot.lane.b32.xlu1 %v16235_v1, %s14573_s23  ;;  %v16335_v7 = vpop.permute.xlu1 %3050 }
 0x39b   :  { %13526 = vmatpush3.msra.mxu0 %v16175_v41  ;;  %3524 = vrot.lane.b32.xlu0 %v16235_v1, %s14575_s24 }
 0x39c   :  { %13527 = vmatprep.subr.mxu0 %v16190_v46 }
 0x39d   :  { %13528 = vmatpush3.msra.mxu0 %v16190_v46 }
 0x39e   :  { %13529 = vmatprep.subr.mxu0 %v16193_v27 }
 0x39f   :  { %13530 = vmatpush3.msra.mxu0 %v16193_v27  ;;  %v16326_v47 = vpop.f32.mrf.mxu1 }
 0x3a0   :  { %13531 = vmatprep.subr.mxu0 %v15735_v37 }
 0x3a1   :  { %13532 = vmatpush3.msra.mxu0 %v15735_v37  ;;  %v13773_v53 = vpop.f32.mrf.mxu1  ;;  %v16341_v37 = vpop.permute.xlu0 %3046 }
 0x3a2   :  { %13574 = vmatprep.subr.mxu0 %v16322_v32  ;;  %13534 = vmatmul.mubr.f32.vlgmr.msra.gmra.mxu0 %v15753_v42  ;;  %v16347_v42 = vpop.permute.xlu1 %3043 }
 0x3a3   :  { %13575 = vmatpush3.msra.mxu0 %v16322_v32  ;;  %13606 = vmatprep.mubr.f32.mxu0 %v16162_v35 }
 0x3a4   :  { %13576 = vmatprep.subr.mxu0 %v16330_v51 }
 0x3a5   :  { %13577 = vmatpush3.msra.mxu0 %v16330_v51  ;;  %v16351_v10 = vpop.permute.xlu0 %3040 }
 0x3a6   :  { %13578 = vmatprep.subr.mxu0 %v16335_v7 }
 0x3a7   :  { %13579 = vmatpush3.msra.mxu0 %v16335_v7 }
 0x3a8   :  { %13580 = vmatprep.subr.mxu0 %v15961_v48 }
 0x3a9   :  { %13581 = vmatpush3.msra.mxu0 %v15961_v48 }
 0x3aa   :  { %13582 = vmatprep.subr.mxu0 %v16341_v37 }
 0x3ab   :  { %13583 = vmatpush3.msra.mxu0 %v16341_v37 }
 0x3ac   :  { %13584 = vmatprep.subr.mxu0 %v16347_v42 }
 0x3ad   :  { %13585 = vmatpush3.msra.mxu0 %v16347_v42 }
 0x3ae   :  { %13586 = vmatprep.subr.mxu0 %v16351_v10 }
 0x3af   :  { %13587 = vmatpush3.msra.mxu0 %v16351_v10  ;;  %v13170_v55 = vpop.f32.mrf.mxu0 }
 0x3b0   :  { %13588 = vmatprep.subr.mxu0 %v15916_v19 }
 0x3b1   :  { %13589 = vmatpush3.msra.mxu0 %v15916_v19 }
 0x3b2   :  { %13590 = vmatprep.subr.mxu0 %v16233_v50 }
 0x3b3   :  { %13591 = vmatpush3.msra.mxu0 %v16233_v50  ;;  %v16360_v60 = vpop.f32.mrf.mxu1 }
 0x3b4   :  { %13592 = vmatprep.subr.mxu0 %v16243_v4  ;;  %3779 = vrot.lane.b32.xlu0 %v16360_v60, %s14573_s23 }
 0x3b5   :  { %13593 = vmatpush3.msra.mxu0 %v16243_v4  ;;  %3782 = vrot.lane.b32.xlu1 %v16360_v60, %s14574_s25  ;;  %v13792_v13 = vpop.f32.mrf.mxu1 }
 0x3b6   :  { %13594 = vmatprep.subr.mxu0 %v16251_v20 }
 0x3b7   :  { %13595 = vmatpush3.msra.mxu0 %v16251_v20 }
 0x3b8   :  { %13596 = vmatprep.subr.mxu0 %v15869_v16  ;;  %3772 = vrot.lane.b32.xlu0 %v16326_v47, %s14574_s25 }
 0x3b9   :  { %13597 = vmatpush3.msra.mxu0 %v15869_v16  ;;  %3776 = vrot.lane.b32.xlu1 %v16360_v60, %s14575_s24 }
 0x3ba   :  { %13598 = vmatprep.subr.mxu0 %v16266_v58 }
 0x3bb   :  { %13599 = vmatpush3.msra.mxu0 %v16266_v58 }
 0x3bc   :  { %13600 = vmatprep.subr.mxu0 %v16279_v8  ;;  %3766 = vrot.lane.b32.xlu0 %v16326_v47, %s14575_s24 }
 0x3bd   :  { %13601 = vmatpush3.msra.mxu0 %v16279_v8  ;;  %3769 = vrot.lane.b32.xlu1 %v16326_v47, %s14573_s23 }
 0x3be   :  { %13602 = vmatprep.subr.mxu0 %v16284_v22 }
 0x3bf   :  { %13603 = vmatpush3.msra.mxu0 %v16284_v22 }
 0x3c0   :  { %13604 = vmatprep.subr.mxu0 %v15825_v12 }
 0x3c1   :  { %13605 = vmatpush3.msra.mxu0 %v15825_v12 }
 0x3c2   :  { %13607 = vmatmul.mubr.f32.vlgmr.msra.gmra.mxu0 %v16391_v39 }
 0x3c3   :  { %13679 = vmatprep.mubr.f32.mxu0 %v16162_v35 }
 0x3c5   :  { %v16395_v15 = vpop.f32.mrf.mxu1 }
 0x3c7   :  { %v13846_v16 = vpop.f32.mrf.mxu1 }
 0x3da   :  { %v16397_v30 = vpop.f32.mrf.mxu1 }
 0x3db   :  { %4021 = vrot.lane.b32.xlu0 %v16397_v30, %s14573_s23  ;;  %4024 = vrot.lane.b32.xlu1 %v16397_v30, %s14574_s25 }
 0x3dc   :  { %v13865_v12 = vpop.f32.mrf.mxu1 }
 0x3df   :  { %4014 = vrot.lane.b32.xlu0 %v16395_v15, %s14574_s25  ;;  %4018 = vrot.lane.b32.xlu1 %v16397_v30, %s14575_s24 }
 0x3e3   :  { %4008 = vrot.lane.b32.xlu0 %v16395_v15, %s14575_s24  ;;  %4011 = vrot.lane.b32.xlu1 %v16395_v15, %s14573_s23 }
 0x3ec   :  { %v16411_v54 = vpop.f32.mrf.mxu1 }
 0x3ee   :  { %v13919_v56 = vpop.f32.mrf.mxu1 }
 0x3f8   :  { %v16413_v59 = vpop.permute.xlu1 %3298  ;;  %v16415_v61 = vpop.permute.xlu0 %3295 }
 0x3f9   :  { %13647 = vmatprep.subr.mxu0 %v16413_v59 }
 0x3fa   :  { %13648 = vmatpush3.msra.mxu0 %v16413_v59 }
 0x3fb   :  { %13649 = vmatprep.subr.mxu0 %v16415_v61 }
 0x3fc   :  { %v16420_v62 = vpop.permute.xlu1 %3292  ;;  %13650 = vmatpush3.msra.mxu0 %v16415_v61 }
 0x3fd   :  { %13651 = vmatprep.subr.mxu0 %v16420_v62  ;;  %v16424_v17 = vpop.permute.xlu0 %3288 }
 0x3fe   :  { %13652 = vmatpush3.msra.mxu0 %v16420_v62 }
 0x3ff   :  { %13653 = vmatprep.subr.mxu0 %v16187_v44 }
 0x400   :  { %13654 = vmatpush3.msra.mxu0 %v16187_v44  ;;  %v16429_v63 = vpop.f32.mrf.mxu1  ;;  %v16434_v0 = vpop.permute.xlu1 %3285 }
 0x401   :  { %13655 = vmatprep.subr.mxu0 %v16424_v17  ;;  %4263 = vrot.lane.b32.xlu0 %v16429_v63, %s14573_s23  ;;  %v16440_v3 = vpop.permute.xlu0 %3282 }
 0x402   :  { %13656 = vmatpush3.msra.mxu0 %v16424_v17  ;;  %4266 = vrot.lane.b32.xlu1 %v16429_v63, %s14574_s25  ;;  %v13938_v57 = vpop.f32.mrf.mxu1 }
 0x403   :  { %13657 = vmatprep.subr.mxu0 %v16434_v0 }
 0x404   :  { %13658 = vmatpush3.msra.mxu0 %v16434_v0  ;;  %v16469_v18 = vpop.permute.xlu1 %3540 }
 0x405   :  { %13659 = vmatprep.subr.mxu0 %v16440_v3  ;;  %4256 = vrot.lane.b32.xlu0 %v16411_v54, %s14574_s25 }
 0x406   :  { %13660 = vmatpush3.msra.mxu0 %v16440_v3  ;;  %4260 = vrot.lane.b32.xlu1 %v16429_v63, %s14575_s24 }
 0x407   :  { %13661 = vmatprep.subr.mxu0 %v16006_v25 }
 0x408   :  { %13662 = vmatpush3.msra.mxu0 %v16006_v25  ;;  %v16480_v43 = vpop.permute.xlu1 %3534 }
 0x409   :  { %13663 = vmatprep.subr.mxu0 %v16322_v32  ;;  %4250 = vrot.lane.b32.xlu0 %v16411_v54, %s14575_s24 }
 0x40a   :  { %13664 = vmatpush3.msra.mxu0 %v16322_v32  ;;  %4253 = vrot.lane.b32.xlu1 %v16411_v54, %s14573_s23 }
 0x40b   :  { %13665 = vmatprep.subr.mxu0 %v16330_v51 }
 0x40c   :  { %13666 = vmatpush3.msra.mxu0 %v16330_v51 }
 0x40d   :  { %13667 = vmatprep.subr.mxu0 %v16335_v7 }
 0x40e   :  { %13668 = vmatpush3.msra.mxu0 %v16335_v7 }
 0x40f   :  { %13669 = vmatprep.subr.mxu0 %v15961_v48 }
 0x410   :  { %13670 = vmatpush3.msra.mxu0 %v15961_v48  ;;  %v16463_v5 = vpop.f32.mrf.mxu1  ;;  %v16475_v48 = vpop.permute.xlu0 %3537 }
 0x411   :  { %13671 = vmatprep.subr.mxu0 %v16341_v37 }
 0x412   :  { %13672 = vmatpush3.msra.mxu0 %v16341_v37  ;;  %v13992_v6 = vpop.f32.mrf.mxu1 }
 0x413   :  { %13673 = vmatprep.subr.mxu0 %v16347_v42 }
 0x414   :  { %13674 = vmatpush3.msra.mxu0 %v16347_v42  ;;  %v16486_v23 = vpop.permute.xlu0 %3530 }
 0x415   :  { %13675 = vmatprep.subr.mxu0 %v16351_v10 }
 0x416   :  { %13676 = vmatpush3.msra.mxu0 %v16351_v10 }
 0x417   :  { %13677 = vmatprep.subr.mxu0 %v15916_v19 }
 0x418   :  { %13678 = vmatpush3.msra.mxu0 %v15916_v19  ;;  %v16492_v19 = vpop.permute.xlu1 %3527  ;;  %v16498_v28 = vpop.permute.xlu0 %3524 }
 0x419   :  { %13680 = vmatmul.mubr.f32.vlgmr.msra.gmra.mxu0 %v16391_v39  ;;  %13720 = vmatprep.subr.mxu0 %v16469_v18 }
 0x41a   :  { %13721 = vmatpush3.msra.mxu0 %v16469_v18  ;;  %13752 = vmatprep.mubr.f32.mxu0 %v16162_v35 }
 0x41b   :  { %13722 = vmatprep.subr.mxu0 %v16475_v48 }
 0x41c   :  { %13723 = vmatpush3.msra.mxu0 %v16475_v48 }
 0x41d   :  { %13724 = vmatprep.subr.mxu0 %v16480_v43 }
 0x41e   :  { %13725 = vmatpush3.msra.mxu0 %v16480_v43 }
 0x41f   :  { %13726 = vmatprep.subr.mxu0 %v16287_v26 }
 0x420   :  { %13727 = vmatpush3.msra.mxu0 %v16287_v26 }
 0x421   :  { %13728 = vmatprep.subr.mxu0 %v16486_v23 }
 0x422   :  { %13729 = vmatpush3.msra.mxu0 %v16486_v23 }
 0x423   :  { %13730 = vmatprep.subr.mxu0 %v16492_v19  ;;  %v16496_v24 = vpop.f32.mrf.mxu1 }
 0x424   :  { %13731 = vmatpush3.msra.mxu0 %v16492_v19  ;;  %4505 = vrot.lane.b32.xlu0 %v16496_v24, %s14573_s23 }
 0x425   :  { %13732 = vmatprep.subr.mxu0 %v16498_v28  ;;  %4508 = vrot.lane.b32.xlu1 %v16496_v24, %s14574_s25  ;;  %v14011_v31 = vpop.f32.mrf.mxu1 }
 0x426   :  { %13733 = vmatpush3.msra.mxu0 %v16498_v28  ;;  %v16537_v45 = vpop.permute.xlu0 %3779 }
 0x427   :  { %13734 = vmatprep.subr.mxu0 %v16235_v1  ;;  %v16531_v33 = vpop.permute.xlu1 %3782 }
 0x428   :  { %13735 = vmatpush3.msra.mxu0 %v16235_v1  ;;  %4498 = vrot.lane.b32.xlu0 %v16463_v5, %s14574_s25 }
 0x429   :  { %13736 = vmatprep.subr.mxu0 %v16413_v59  ;;  %4502 = vrot.lane.b32.xlu1 %v16496_v24, %s14575_s24 }
 0x42a   :  { %13737 = vmatpush3.msra.mxu0 %v16413_v59 }
 0x42b   :  { %13738 = vmatprep.subr.mxu0 %v16415_v61  ;;  %v16542_v52 = vpop.permute.xlu1 %3776 }
 0x42c   :  { %13739 = vmatpush3.msra.mxu0 %v16415_v61  ;;  %4492 = vrot.lane.b32.xlu0 %v16463_v5, %s14575_s24 }
 0x42d   :  { %13740 = vmatprep.subr.mxu0 %v16420_v62  ;;  %4495 = vrot.lane.b32.xlu1 %v16463_v5, %s14573_s23 }
 0x42e   :  { %13741 = vmatpush3.msra.mxu0 %v16420_v62 }
 0x42f   :  { %13742 = vmatprep.subr.mxu0 %v16187_v44  ;;  %v16558_v40 = vpop.permute.xlu1 %3769 }
 0x430   :  { %13743 = vmatpush3.msra.mxu0 %v16187_v44  ;;  %v1673_v44 = vpop.f32.mrf.mxu0 }
 0x431   :  { %13744 = vmatprep.subr.mxu0 %v16424_v17 }
 0x432   :  { %13745 = vmatpush3.msra.mxu0 %v16424_v17  ;;  %v13243_v27 = vpop.f32.mrf.mxu0 }
 0x433   :  { %13746 = vmatprep.subr.mxu0 %v16434_v0  ;;  %v16528_v11 = vpop.f32.mrf.mxu1 }
 0x434   :  { %13747 = vmatpush3.msra.mxu0 %v16434_v0  ;;  %v1915_v49 = vpop.f32.mrf.mxu0 }
 0x435   :  { %13748 = vmatprep.subr.mxu0 %v16440_v3  ;;  %v14065_v34 = vpop.f32.mrf.mxu1 }
 0x436   :  { %13749 = vmatpush3.msra.mxu0 %v16440_v3  ;;  %v13316_v50 = vpop.f32.mrf.mxu0 }
 0x437   :  { %13750 = vmatprep.subr.mxu0 %v16006_v25 }
 0x438   :  { %13751 = vmatpush3.msra.mxu0 %v16006_v25  ;;  %v16550_v25 = vpop.permute.xlu0 %3772  ;;  %v2157_v2 = vpop.f32.mrf.mxu0 }
 0x439   :  { %13753 = vmatmul.mubr.f32.vlgmr.msra.gmra.mxu0 %v16391_v39  ;;  %13793 = vmatprep.subr.mxu0 %v16531_v33 }
 0x43a   :  { %13794 = vmatpush3.msra.mxu0 %v16531_v33  ;;  %13825 = vmatprep.mubr.f32.mxu0 %v16162_v35  ;;  %v13389_v4 = vpop.f32.mrf.mxu0 }
 0x43b   :  { %13795 = vmatprep.subr.mxu0 %v16537_v45 }
 0x43c   :  { %13796 = vmatpush3.msra.mxu0 %v16537_v45  ;;  %v16562_v14 = vpop.permute.xlu0 %3766  ;;  %v2399_v21 = vpop.f32.mrf.mxu0 }
 0x43d   :  { %13797 = vmatprep.subr.mxu0 %v16542_v52 }
 0x43e   :  { %13798 = vmatpush3.msra.mxu0 %v16542_v52 }
 0x43f   :  { %13799 = vmatprep.subr.mxu0 %v16360_v60 }
 0x440   :  { %13800 = vmatpush3.msra.mxu0 %v16360_v60 }
 0x441   :  { %13801 = vmatprep.subr.mxu0 %v16550_v25  ;;  %v13462_v8 = vpop.f32.mrf.mxu0 }
 0x442   :  { %13802 = vmatpush3.msra.mxu0 %v16550_v25 }
 0x443   :  { %13803 = vmatprep.subr.mxu0 %v16558_v40 }
 0x444   :  { %13804 = vmatpush3.msra.mxu0 %v16558_v40 }
 0x445   :  { %13805 = vmatprep.subr.mxu0 %v16562_v14  ;;  %v16566_v41 = vpop.f32.mrf.mxu1 }
 0x446   :  { %4747 = vrot.lane.b32.xlu0 %v16566_v41, %s14573_s23  ;;  %4750 = vrot.lane.b32.xlu1 %v16566_v41, %s14574_s25 }
 0x447   :  { %13806 = vmatpush3.msra.mxu0 %v16562_v14  ;;  %v14084_v46 = vpop.f32.mrf.mxu1 }
 0x448   :  { %13807 = vmatprep.subr.mxu0 %v16326_v47 }
 0x449   :  { %13808 = vmatpush3.msra.mxu0 %v16326_v47 }
 0x44a   :  { %13809 = vmatprep.subr.mxu0 %v16469_v18  ;;  %4740 = vrot.lane.b32.xlu0 %v16528_v11, %s14574_s25 }
 0x44b   :  { %4744 = vrot.lane.b32.xlu1 %v16566_v41, %s14575_s24  ;;  %13810 = vmatpush3.msra.mxu0 %v16469_v18 }
 0x44c   :  { %13811 = vmatprep.subr.mxu0 %v16475_v48 }
 0x44d   :  { %13812 = vmatpush3.msra.mxu0 %v16475_v48  ;;  %v16595_v20 = vpop.permute.xlu1 %4024  ;;  %v16602_v58 = vpop.permute.xlu0 %4021 }
 0x44e   :  { %13813 = vmatprep.subr.mxu0 %v16480_v43  ;;  %4734 = vrot.lane.b32.xlu0 %v16528_v11, %s14575_s24 }
 0x44f   :  { %4737 = vrot.lane.b32.xlu1 %v16528_v11, %s14573_s23  ;;  %13814 = vmatpush3.msra.mxu0 %v16480_v43 }
 0x450   :  { %13815 = vmatprep.subr.mxu0 %v16287_v26 }
 0x451   :  { %13816 = vmatpush3.msra.mxu0 %v16287_v26  ;;  %v16608_v22 = vpop.permute.xlu1 %4018  ;;  %v16615_v26 = vpop.permute.xlu0 %4014 }
 0x452   :  { %13817 = vmatprep.subr.mxu0 %v16486_v23  ;;  %4832 = vrot.lane.b32.xlu0 %v13170_v55, %s14576_s3 }
 0x453   :  { %13818 = vmatpush3.msra.mxu0 %v16486_v23  ;;  %4830 = vrot.lane.b32.xlu1 %v1673_v44, %s14576_s3  ;;  %s14596_s3 = smov 76  }
 0x454   :  { %13819 = vmatprep.subr.mxu0 %v16492_v19 }
 0x455   :  { %13820 = vmatpush3.msra.mxu0 %v16492_v19  ;;  %v16622_v32 = vpop.permute.xlu1 %4011  ;;  %v16626_v53 = vpop.permute.xlu0 %4008 }
 0x456   :  { %13821 = vmatprep.subr.mxu0 %v16498_v28  ;;  %4846 = vrot.lane.b32.xlu0 %v2157_v2, %s14577_s1 }
 0x457   :  { %13822 = vmatpush3.msra.mxu0 %v16498_v28  ;;  %4838 = vrot.lane.b32.xlu1 %v1915_v49, %s14578_s18 }
 0x458   :  { %13823 = vmatprep.subr.mxu0 %v16235_v1 }
 0x459   :  { %13824 = vmatpush3.msra.mxu0 %v16235_v1  ;;  %v2641_v1 = vpop.f32.mrf.mxu0 }
 0x45a   :  { %13826 = vmatmul.mubr.f32.vlgmr.msra.gmra.mxu0 %v16391_v39  ;;  %13866 = vmatprep.subr.mxu0 %v16595_v20 }
 0x45b   :  { %13867 = vmatpush3.msra.mxu0 %v16595_v20  ;;  %4840 = vrot.lane.b32.xlu1 %v13243_v27, %s14578_s18 }
 0x45c   :  { %4856 = vrot.lane.b32.xlu0 %v13389_v4, %s14579_s19  ;;  %13868 = vmatprep.subr.mxu0 %v16602_v58 }
 0x45d   :  { %13869 = vmatpush3.msra.mxu0 %v16602_v58  ;;  %13898 = vmatprep.mubr.f32.mxu0 %v16162_v35 }
 0x45e   :  { %13870 = vmatprep.subr.mxu0 %v16608_v22 }
 0x45f   :  { %13871 = vmatpush3.msra.mxu0 %v16608_v22  ;;  %4848 = vrot.lane.b32.xlu1 %v13316_v50, %s14577_s1  ;;  %s14590_s1 = smov 1  }
 0x460   :  { %4854 = vrot.lane.b32.xlu0 %v2399_v21, %s14579_s19  ;;  %13872 = vmatprep.subr.mxu0 %v16397_v30 }
 0x461   :  { %13873 = vmatpush3.msra.mxu0 %v16397_v30 }
 0x462   :  { %13874 = vmatprep.subr.mxu0 %v16615_v26  ;;  %v13535_v29 = vpop.f32.mrf.mxu0 }
 0x463   :  { %13875 = vmatpush3.msra.mxu0 %v16615_v26  ;;  %4864 = vrot.lane.b32.xlu1 %v13462_v8, %s14580_s20 }
 0x464   :  { %13876 = vmatprep.subr.mxu0 %v16622_v32  ;;  %v2883_v51 = vpop.f32.mrf.mxu0 }
 0x465   :  { %13877 = vmatpush3.msra.mxu0 %v16622_v32  ;;  %4870 = vrot.lane.b32.xlu0 %v2883_v51, %s14581_s2 }
 0x466   :  { %13878 = vmatprep.subr.mxu0 %v16626_v53 }
 0x467   :  { %13879 = vmatpush3.msra.mxu0 %v16626_v53  ;;  %4862 = vrot.lane.b32.xlu1 %v2641_v1, %s14580_s20  ;;  %s14597_s20 = smov 46  }
 0x468   :  { %13880 = vmatprep.subr.mxu0 %v16395_v15 }
 0x469   :  { %13881 = vmatpush3.msra.mxu0 %v16395_v15 }
 0x46a   :  { %13882 = vmatprep.subr.mxu0 %v16531_v33 }
 0x46b   :  { %13883 = vmatpush3.msra.mxu0 %v16531_v33  ;;  %4872 = vrot.lane.b32.xlu1 %v13535_v29, %s14581_s2 }
 0x46c   :  { %13884 = vmatprep.subr.mxu0 %v16537_v45 }
 0x46d   :  { %13885 = vmatpush3.msra.mxu0 %v16537_v45 }
 0x46e   :  { %13886 = vmatprep.subr.mxu0 %v16542_v52 }
 0x46f   :  { %13887 = vmatpush3.msra.mxu0 %v16542_v52 }
 0x470   :  { %13888 = vmatprep.subr.mxu0 %v16360_v60 }
 0x471   :  { %13889 = vmatpush3.msra.mxu0 %v16360_v60 }
 0x472   :  { %13890 = vmatprep.subr.mxu0 %v16550_v25 }
 0x473   :  { %13891 = vmatpush3.msra.mxu0 %v16550_v25  ;;  %v16651_v37 = vpop.permute.xlu0 %4263 }
 0x474   :  { %13892 = vmatprep.subr.mxu0 %v16558_v40  ;;  %v16645_v7 = vpop.permute.xlu1 %4266 }
 0x475   :  { %13893 = vmatpush3.msra.mxu0 %v16558_v40 }
 0x476   :  { %13894 = vmatprep.subr.mxu0 %v16562_v14 }
 0x477   :  { %13895 = vmatpush3.msra.mxu0 %v16562_v14  ;;  %v16662_v10 = vpop.permute.xlu0 %4256 }
 0x478   :  { %13896 = vmatprep.subr.mxu0 %v16326_v47  ;;  %v16656_v42 = vpop.permute.xlu1 %4260 }
 0x479   :  { %13897 = vmatpush3.msra.mxu0 %v16326_v47 }
 0x47a   :  { %13899 = vmatmul.mubr.f32.vlgmr.msra.gmra.mxu0 %v16391_v39  ;;  %13939 = vmatprep.subr.mxu0 %v16645_v7 }
 0x47b   :  { %13940 = vmatpush3.msra.mxu0 %v16645_v7  ;;  %13971 = vmatprep.mubr.f32.mxu0 %v16162_v35  ;;  %v4251_v16 = vpop.permute.xlu0 %4250 }
 0x47c   :  { %13941 = vmatprep.subr.mxu0 %v16651_v37  ;;  %v16668_v60 = vpop.permute.xlu1 %4253 }
 0x47d   :  { %13942 = vmatpush3.msra.mxu0 %v16651_v37 }
 0x47e   :  { %13943 = vmatprep.subr.mxu0 %v16656_v42 }
 0x47f   :  { %13944 = vmatpush3.msra.mxu0 %v16656_v42 }
 0x480   :  { %13945 = vmatprep.subr.mxu0 %v16429_v63 }
 0x481   :  { %13946 = vmatpush3.msra.mxu0 %v16429_v63 }
 0x482   :  { %v13608_v47 = vpop.f32.mrf.mxu0  ;;  %13947 = vmatprep.subr.mxu0 %v16662_v10 }
 0x483   :  { %13948 = vmatpush3.msra.mxu0 %v16662_v10  ;;  %4880 = vrot.lane.b32.xlu0 %v13608_v47, %s14582_s21 }
 0x484   :  { %13949 = vmatprep.subr.mxu0 %v16668_v60  ;;  %v3125_v13 = vpop.f32.mrf.mxu0 }
 0x485   :  { %13950 = vmatpush3.msra.mxu0 %v16668_v60 }
 0x486   :  { %13951 = vmatprep.subr.mxu0 %v4251_v16 }
 0x487   :  { %13952 = vmatpush3.msra.mxu0 %v4251_v16  ;;  %4878 = vrot.lane.b32.xlu0 %v3125_v13, %s14582_s21 }
 0x488   :  { %13953 = vmatprep.subr.mxu0 %v16411_v54 }
 0x489   :  { %13954 = vmatpush3.msra.mxu0 %v16411_v54 }
 0x48a   :  { %13955 = vmatprep.subr.mxu0 %v16595_v20 }
 0x48b   :  { %13956 = vmatpush3.msra.mxu0 %v16595_v20 }
 0x48c   :  { %13957 = vmatprep.subr.mxu0 %v16602_v58 }
 0x48d   :  { %13958 = vmatpush3.msra.mxu0 %v16602_v58 }
 0x48e   :  { %13959 = vmatprep.subr.mxu0 %v16608_v22 }
 0x48f   :  { %13960 = vmatpush3.msra.mxu0 %v16608_v22 }
 0x490   :  { %13961 = vmatprep.subr.mxu0 %v16397_v30 }
 0x491   :  { %13962 = vmatpush3.msra.mxu0 %v16397_v30 }
 0x492   :  { %13963 = vmatprep.subr.mxu0 %v16615_v26 }
 0x493   :  { %13964 = vmatpush3.msra.mxu0 %v16615_v26 }
 0x494   :  { %13965 = vmatprep.subr.mxu0 %v16622_v32 }
 0x495   :  { %13966 = vmatpush3.msra.mxu0 %v16622_v32 }
 0x496   :  { %13967 = vmatprep.subr.mxu0 %v16626_v53  ;;  %v16693_v56 = vpop.permute.xlu0 %4505 }
 0x497   :  { %13968 = vmatpush3.msra.mxu0 %v16626_v53  ;;  %v16689_v12 = vpop.permute.xlu1 %4508 }
 0x498   :  { %13969 = vmatprep.subr.mxu0 %v16395_v15 }
 0x499   :  { %13970 = vmatpush3.msra.mxu0 %v16395_v15 }
 0x49a   :  { %13972 = vmatmul.mubr.f32.vlgmr.msra.gmra.mxu0 %v16391_v39  ;;  %14012 = vmatprep.subr.mxu0 %v16689_v12  ;;  %v4499_v59 = vpop.permute.xlu0 %4498 }
 0x49b   :  { %14013 = vmatpush3.msra.mxu0 %v16689_v12  ;;  %v16698_v30 = vpop.permute.xlu1 %4502  ;;  %14044 = vmatprep.mubr.f32.mxu0 %v16162_v35 }
 0x49c   :  { %14014 = vmatprep.subr.mxu0 %v16693_v56 }
 0x49d   :  { %14015 = vmatpush3.msra.mxu0 %v16693_v56 }
 0x49e   :  { %14016 = vmatprep.subr.mxu0 %v16698_v30  ;;  %v4493_v61 = vpop.permute.xlu0 %4492 }
 0x49f   :  { %14017 = vmatpush3.msra.mxu0 %v16698_v30  ;;  %v4496_v15 = vpop.permute.xlu1 %4495 }
 0x4a0   :  { %14018 = vmatprep.subr.mxu0 %v16496_v24 }
 0x4a1   :  { %14019 = vmatpush3.msra.mxu0 %v16496_v24 }
 0x4a2   :  { %14020 = vmatprep.subr.mxu0 %v4499_v59 }
 0x4a3   :  { %14021 = vmatpush3.msra.mxu0 %v4499_v59 }
 0x4a4   :  { %14022 = vmatprep.subr.mxu0 %v4496_v15 }
 0x4a5   :  { %14023 = vmatpush3.msra.mxu0 %v4496_v15 }
 0x4a6   :  { %14024 = vmatprep.subr.mxu0 %v4493_v61 }
 0x4a7   :  { %14025 = vmatpush3.msra.mxu0 %v4493_v61 }
 0x4a8   :  { %14026 = vmatprep.subr.mxu0 %v16463_v5 }
 0x4a9   :  { %14027 = vmatpush3.msra.mxu0 %v16463_v5 }
 0x4aa   :  { %14028 = vmatprep.subr.mxu0 %v16645_v7 }
 0x4ab   :  { %14029 = vmatpush3.msra.mxu0 %v16645_v7 }
 0x4ac   :  { %14030 = vmatprep.subr.mxu0 %v16651_v37 }
 0x4ad   :  { %14031 = vmatpush3.msra.mxu0 %v16651_v37 }
 0x4ae   :  { %14032 = vmatprep.subr.mxu0 %v16656_v42 }
 0x4af   :  { %14033 = vmatpush3.msra.mxu0 %v16656_v42 }
 0x4b0   :  { %14034 = vmatprep.subr.mxu0 %v16429_v63 }
 0x4b1   :  { %14035 = vmatpush3.msra.mxu0 %v16429_v63 }
 0x4b2   :  { %14036 = vmatprep.subr.mxu0 %v16662_v10 }
 0x4b3   :  { %14037 = vmatpush3.msra.mxu0 %v16662_v10 }
 0x4b4   :  { %14038 = vmatprep.subr.mxu0 %v16668_v60 }
 0x4b5   :  { %14039 = vmatpush3.msra.mxu0 %v16668_v60 }
 0x4b6   :  { %14040 = vmatprep.subr.mxu0 %v4251_v16 }
 0x4b7   :  { %14041 = vmatpush3.msra.mxu0 %v4251_v16 }
 0x4b8   :  { %14042 = vmatprep.subr.mxu0 %v16411_v54  ;;  %v4751_v62 = vpop.permute.xlu1 %4750  ;;  %v4748_v17 = vpop.permute.xlu0 %4747 }
 0x4b9   :  { %14043 = vmatpush3.msra.mxu0 %v16411_v54 }
 0x4ba   :  { %14045 = vmatmul.mubr.f32.vlgmr.msra.gmra.mxu0 %v16391_v39  ;;  %14085 = vmatprep.subr.mxu0 %v4751_v62 }
 0x4bb   :  { %14086 = vmatpush3.msra.mxu0 %v4751_v62  ;;  %14117 = vmatprep.mubr.f32.mxu0 %v16162_v35 }
 0x4bc   :  { %14087 = vmatprep.subr.mxu0 %v4748_v17  ;;  %v4741_v0 = vpop.permute.xlu0 %4740 }
 0x4bd   :  { %v4745_v63 = vpop.permute.xlu1 %4744  ;;  %14088 = vmatpush3.msra.mxu0 %v4748_v17 }
 0x4be   :  { %14089 = vmatprep.subr.mxu0 %v4745_v63 }
 0x4bf   :  { %14090 = vmatpush3.msra.mxu0 %v4745_v63 }
 0x4c0   :  { %14091 = vmatprep.subr.mxu0 %v16566_v41  ;;  %v4735_v54 = vpop.permute.xlu0 %4734 }
 0x4c1   :  { %14092 = vmatpush3.msra.mxu0 %v16566_v41  ;;  %v4738_v57 = vpop.permute.xlu1 %4737 }
 0x4c2   :  { %14093 = vmatprep.subr.mxu0 %v4741_v0 }
 0x4c3   :  { %14094 = vmatpush3.msra.mxu0 %v4741_v0 }
 0x4c4   :  { %14095 = vmatprep.subr.mxu0 %v4738_v57  ;;  %v4833_v34 = vpop.permute.xlu0 %4832 }
 0x4c5   :  { %14096 = vmatpush3.msra.mxu0 %v4738_v57  ;;  %v4831_v33 = vpop.permute.xlu1 %4830  ;;  %v4942_v53 = vsel %vm4940_vm1, %v16546_v36, %v4833_v34 }
 0x4c6   :  { %14097 = vmatprep.subr.mxu0 %v4735_v54  ;;  %v4941_v29 = vsel %vm4940_vm1, %v16554_v38, %v4831_v33 }
 0x4c7   :  { %14098 = vmatpush3.msra.mxu0 %v4735_v54 }
 0x4c8   :  { %14099 = vmatprep.subr.mxu0 %v16528_v11  ;;  %v4847_v52 = vpop.permute.xlu0 %4846 }
 0x4c9   :  { %14100 = vmatpush3.msra.mxu0 %v16528_v11  ;;  %v4839_v45 = vpop.permute.xlu1 %4838 }
 0x4ca   :  { %14101 = vmatprep.subr.mxu0 %v16689_v12  ;;  %v4944_v7 = vsel %vm4943_vm2, %v4941_v29, %v4839_v45 }
 0x4cb   :  { %14102 = vmatpush3.msra.mxu0 %v16689_v12  ;;  %v4947_v60 = vsel %vm4946_vm6, %v4944_v7, %v4847_v52 }
 0x4cc   :  { %14103 = vmatprep.subr.mxu0 %v16693_v56 }
 0x4cd   :  { %14104 = vmatpush3.msra.mxu0 %v16693_v56  ;;  %v4841_v25 = vpop.permute.xlu1 %4840 }
 0x4ce   :  { %14105 = vmatprep.subr.mxu0 %v16698_v30  ;;  %v4857_v55 = vpop.permute.xlu0 %4856  ;;  %v4945_v37 = vsel %vm4943_vm2, %v4942_v53, %v4841_v25 }
 0x4cf   :  { %14106 = vmatpush3.msra.mxu0 %v16698_v30 }
 0x4d0   :  { %14107 = vmatprep.subr.mxu0 %v16496_v24 }
 0x4d1   :  { %14108 = vmatpush3.msra.mxu0 %v16496_v24  ;;  %v4849_v40 = vpop.permute.xlu1 %4848 }
 0x4d2   :  { %14109 = vmatprep.subr.mxu0 %v4499_v59  ;;  %v4855_v14 = vpop.permute.xlu0 %4854  ;;  %v4948_v10 = vsel %vm4946_vm6, %v4945_v37, %v4849_v40 }
 0x4d3   :  { %14110 = vmatpush3.msra.mxu0 %v4499_v59  ;;  %v16758_v59 = vsel %vm4949_vm8, %v4948_v10, %v4857_v55  ;;  %v16764_v63 = vsel %vm4949_vm8, %v4947_v60, %v4855_v14  ;;  %v4982_v60 = vld [vmem:[%s19509_s4] sm:$0xff] }
 0x4d4   :  { %14111 = vmatprep.subr.mxu0 %v4496_v15 }
 0x4d5   :  { %14112 = vmatpush3.msra.mxu0 %v4496_v15  ;;  %v4865_v41 = vpop.permute.xlu1 %4864 }
 0x4d6   :  { %14113 = vmatprep.subr.mxu0 %v4493_v61  ;;  %v4954_v42 = vsel %vm4952_vm5, %v4857_v55, %v4865_v41 }
 0x4d7   :  { %14114 = vmatpush3.msra.mxu0 %v4493_v61  ;;  %v4871_v44 = vpop.permute.xlu0 %4870 }
 0x4d8   :  { %14115 = vmatprep.subr.mxu0 %v16463_v5 }
 0x4d9   :  { %14116 = vmatpush3.msra.mxu0 %v16463_v5  ;;  %v13681_v35 = vpop.f32.mrf.mxu0  ;;  %v4863_v46 = vpop.permute.xlu1 %4862 }
 0x4da   :  { %14118 = vmatmul.mubr.f32.vlgmr.msra.gmra.mxu0 %v16391_v39  ;;  %4888 = vrot.lane.b32.xlu1 %v13681_v35, %s14583_s26  ;;  %v4953_v32 = vsel %vm4952_vm5, %v4855_v14, %v4863_v46 }
 0x4db   :  { %v3367_v3 = vpop.f32.mrf.mxu0  ;;  %v4956_v47 = vsel %vm4955_vm7, %v4953_v32, %v4871_v44 }
 0x4dd   :  { %v4873_v49 = vpop.permute.xlu1 %4872 }
 0x4de   :  { %4886 = vrot.lane.b32.xlu1 %v3367_v3, %s14583_s26  ;;  %v4957_v38 = vsel %vm4955_vm7, %v4954_v42, %v4873_v49  ;;  %s14607_s26 = smov 80  }
 0x4f5   :  { %v4881_v27 = vpop.permute.xlu0 %4880 }
 0x4f6   :  { %v4960_v13 = vsel %vm4958_vm9, %v4957_v38, %v4881_v27 }
 0x4f9   :  { %v13754_v6 = vpop.f32.mrf.mxu0  ;;  %v4879_v50 = vpop.permute.xlu0 %4878 }
 0x4fa   :  { %4896 = vrot.lane.b32.xlu0 %v13754_v6, %s14584_s27  ;;  %v4959_v16 = vsel %vm4958_vm9, %v4956_v47, %v4879_v50  ;;  %vm5626_vm9 = vcmask 64512  }
 0x4fb   :  { %v3609_v18 = vpop.f32.mrf.mxu0 }
 0x4fe   :  { %4894 = vrot.lane.b32.xlu0 %v3609_v18, %s14584_s27  ;;  %v5003_v18 = vmul.f32 %v16758_v59, %v16758_v59 }
 0x51a   :  { %v13827_v48 = vpop.f32.mrf.mxu0 }
 0x51b   :  { %4904 = vrot.lane.b32.xlu0 %v13827_v48, %s14585_s28  ;;  %v4999_v48 = vmul.f32 %v16764_v63, %v16764_v63 }
 0x51c   :  { %v3851_v43 = vpop.f32.mrf.mxu0 }
 0x51d   :  { %4902 = vrot.lane.b32.xlu1 %v3851_v43, %s14585_s28  ;;  %s14598_s28 = smov 114  }
 0x53a   :  { %v13900_v23 = vpop.f32.mrf.mxu0 }
 0x53b   :  { %4912 = vrot.lane.b32.xlu0 %v13900_v23, %s14586_s29 }
 0x53c   :  { %v4093_v5 = vpop.f32.mrf.mxu0 }
 0x53d   :  { %4910 = vrot.lane.b32.xlu1 %v4093_v5, %s14586_s29  ;;  %s14599_s29 = smov 16  }
 0x54c   :  { %v4889_v2 = vpop.permute.xlu1 %4888 }
 0x54d   :  { %v16761_v15 = vsel %vm4961_vm10, %v4960_v13, %v4889_v2 }
 0x54e   :  { %v4991_v6 = vadd.f32 %v16761_v15, %v16758_v59  ;;  %v5004_v43 = vmul.f32 %v16761_v15, %v16761_v15 }
 0x550   :  { %v4887_v20 = vpop.permute.xlu1 %4886  ;;  %v5013_v44 = vadd.f32 %v5004_v43, %v5003_v18  ;;  %v16835_v18 = vld [vmem:[%s19513_s8 + $0x8] sm:$0xff] }
 0x551   :  { %v16755_v36 = vsel %vm4961_vm10, %v4959_v16, %v4887_v20  ;;  %v4983_v16 = vld [vmem:[%s19509_s4 + $0x8] sm:$0xff]  ;;  %s14614_s4 = smov [#allocation3]  }
 0x552   :  { %v5000_v54 = vmul.f32 %v16755_v36, %v16755_v36  ;;  %s11095_s21 = sshll.u32 %s14614_s4, 4  ;;  %s11096_s21 = int_to_ptr.vmem [resolvable:$true] %s11095_s21 }
 0x553   :  { %p14552_p1 = scmp.lt.s32.totalorder %s11096_s21, %s11096_s21 }
 0x55a   :  { %v13973_v39 = vpop.f32.mrf.mxu0 }
 0x55b   :  { %4920 = vrot.lane.b32.xlu1 %v13973_v39, %s14587_s5  ;;  %v4984_v39 = vadd.f32 %v16755_v36, %v16764_v63 }
 0x55c   :  { %v4335_v19 = vpop.f32.mrf.mxu0 }
 0x55f   :  { %4918 = vrot.lane.b32.xlu1 %v4335_v19, %s14587_s5 }
 0x56c   :  { %v4897_v4 = vpop.permute.xlu0 %4896 }
 0x56d   :  { %v4966_v12 = vsel %vm4964_vm11, %v4889_v2, %v4897_v4 }
 0x570   :  { %v4895_v21 = vpop.permute.xlu0 %4894 }
 0x571   :  { %v4965_v56 = vsel %vm4964_vm11, %v4887_v20, %v4895_v21 }
 0x57a   :  { %v14046_v24 = vpop.f32.mrf.mxu0 }
 0x57b   :  { %4928 = vrot.lane.b32.xlu0 %v14046_v24, %s14588_s30 }
 0x57c   :  { %v4577_v28 = vpop.f32.mrf.mxu0 }
 0x57f   :  { %4926 = vrot.lane.b32.xlu0 %v4577_v28, %s14588_s30 }
 0x58d   :  { %v4905_v8 = vpop.permute.xlu0 %4904 }
 0x58e   :  { %v4969_v61 = vsel %vm4967_vm12, %v4966_v12, %v4905_v8 }
 0x58f   :  { %v4903_v58 = vpop.permute.xlu1 %4902 }
 0x590   :  { %v4968_v62 = vsel %vm4967_vm12, %v4965_v56, %v4903_v58 }
 0x59a   :  { %v14119_v31 = vpop.f32.mrf.mxu0 }
 0x59b   :  { %4936 = vrot.lane.b32.xlu0 %v14119_v31, %s14589_s22  ;;  %v5007_v31 = vadd.f32 %v5000_v54, %v4999_v48  ;;  %v16840_v48 = vld [vmem:[%s19513_s8] sm:$0xff] }
 0x59c   :  { %v4819_v11 = vpop.f32.mrf.mxu0 }
 0x59d   :  { %4934 = vrot.lane.b32.xlu1 %v4819_v11, %s14589_s22 }
 0x5ad   :  { %v4913_v1 = vpop.permute.xlu0 %4912 }
 0x5ae   :  { %v4972_v0 = vsel %vm4970_vm13, %v4969_v61, %v4913_v1 }
 0x5af   :  { %v4911_v22 = vpop.permute.xlu1 %4910 }
 0x5b0   :  { %v4971_v57 = vsel %vm4970_vm13, %v4968_v62, %v4911_v22 }
 0x5cd   :  { %v4921_v26 = vpop.permute.xlu1 %4920 }
 0x5ce   :  { %v16768_v35 = vsel %vm4973_vm14, %v4972_v0, %v4921_v26  ;;  %v19525_v0 = vmov 1  }
 0x5cf   :  { %v4992_v19 = vadd.f32 %v4991_v6, %v16768_v35  ;;  %v5005_v52 = vmul.f32 %v16768_v35, %v16768_v35 }
 0x5d1   :  { %v4919_v30 = vpop.permute.xlu1 %4918  ;;  %v5014_v4 = vadd.f32 %v5013_v44, %v5005_v52 }
 0x5d2   :  { %v16770_v3 = vsel %vm4973_vm14, %v4971_v57, %v4919_v30  ;;  %v16828_v57 = vld [vmem:[%s19513_s8 + $0x10] sm:$0xff]  ;;  %vm6217_vm14 = vcmask 130048  }
 0x5d3   :  { %v5001_v24 = vmul.f32 %v16770_v3, %v16770_v3  ;;  %v4985_v25 = vadd.f32 %v4984_v39, %v16770_v3 }
 0x5d5   :  { %v5008_v27 = vadd.f32 %v5007_v31, %v5001_v24 }
 0x5ed   :  { %v4929_v51 = vpop.permute.xlu0 %4928 }
 0x5ee   :  { %v4978_v23 = vsel %vm4976_vm15, %v4921_v26, %v4929_v51 }
 0x5f1   :  { %v4927_v17 = vpop.permute.xlu0 %4926 }
 0x5f2   :  { %v4977_v11 = vsel %vm4976_vm15, %v4919_v30, %v4927_v17  ;;  %v16817_v17 = vld [vmem:[%s19513_s8 + $0x18] sm:$0x3f] }
 0x5f3   :  { %14120 = vmatprep.subr.msk.mxu1 %vm5123_vm4, %v16817_v17 }
 0x5f4   :  { %14121 = vmatpush3.msk.msra.mxu1 %vm5123_vm4, %v16817_v17 }
 0x5f5   :  { %14122 = vmatprep.subr.mxu1 %v16828_v57 }
 0x5f6   :  { %14123 = vmatpush3.msra.mxu1 %v16828_v57 }
 0x5f7   :  { %14124 = vmatprep.subr.mxu1 %v16835_v18 }
 0x5f8   :  { %14125 = vmatpush3.msra.mxu1 %v16835_v18 }
 0x5f9   :  { %14126 = vmatprep.subr.mxu1 %v16840_v48 }
 0x5fa   :  { %14127 = vmatpush3.msra.mxu1 %v16840_v48 }
 0x5fb   :  { %14131 = vmatprep.subr.msk.mxu1 %vm5123_vm4, %v16817_v17 }
 0x60d   :  { %v4937_v5 = vpop.permute.xlu0 %4936 }
 0x60e   :  { %v16787_v28 = vsel %vm4979_vm0, %v4978_v23, %v4937_v5 }
 0x60f   :  { %v4993_v33 = vsel %vm4986_vm3, %v16787_v28, 0.0  ;;  %v5006_v34 = vmul.f32 %v16787_v28, %v16787_v28  ;;  %v4935_v45 = vpop.permute.xlu1 %4934 }
 0x610   :  { %v16798_v55 = vsel %vm4979_vm0, %v4977_v11, %v4935_v45  ;;  %v4994_v40 = vadd.f32 %v4993_v33, %v4992_v19 }
 0x611   :  { %v4987_v14 = vsel %vm4986_vm3, %v16798_v55, 0.0  ;;  %v5002_v41 = vmul.f32 %v16798_v55, %v16798_v55  ;;  %v5015_v50 = vsel %vm4986_vm3, %v5006_v34, 0.0 }
 0x612   :  { %4995 = vadd.xlane.f32.xlu0 %v4994_v40  ;;  %v4988_v46 = vadd.f32 %v4987_v14, %v4985_v25  ;;  %v5016_v20 = vadd.f32 %v5015_v50, %v5014_v4 }
 0x613   :  { %v5009_v49 = vsel %vm4986_vm3, %v5002_v41, 0.0  ;;  %vm6808_vm3 = vcmask 195584  }
 0x614   :  { %4989 = vadd.xlane.f32.xlu1 %v4988_v46  ;;  %v5010_v2 = vadd.f32 %v5009_v49, %v5008_v27 }
 0x616   :  { %5011 = vadd.xlane.f32.xlu0 %v5010_v2 }
 0x618   :  { %5017 = vadd.xlane.f32.xlu1 %v5016_v20 }
 0x69b   :  { %v4996_v21 = vpop.xlane.xlu0 %4995 }
 0x69c   :  { %v4998_v8 = vmul.f32 0.0022222223, %v4996_v21 }
 0x69d   :  { %v4990_v58 = vpop.xlane.xlu1 %4989 }
 0x69e   :  { %v4997_v22 = vmul.f32 0.0022222223, %v4990_v58  ;;  %v5022_v51 = vmul.f32 %v4998_v8, %v4998_v8 }
 0x69f   :  { %v5012_v1 = vpop.xlane.xlu0 %5011 }
 0x6a0   :  { %v5021_v26 = vmul.f32 %v4997_v22, %v4997_v22  ;;  %v5019_v29 = vmul.f32 0.0022222223, %v5012_v1 }
 0x6a1   :  { %v5018_v32 = vpop.xlane.xlu1 %5017 }
 0x6a2   :  { %v5023_v53 = vsub.f32 %v5019_v29, %v5021_v26  ;;  %v5020_v7 = vmul.f32 0.0022222223, %v5018_v32 }
 0x6a4   :  { %v5025_v37 = vmax.f32 %v5023_v53, 0.0  ;;  %v5024_v42 = vsub.f32 %v5020_v7, %v5022_v51 }
 0x6a6   :  { %v5027_v10 = vadd.f32 1e-05, %v5025_v37  ;;  %v5026_v47 = vmax.f32 %v5024_v42, 0.0 }
 0x6a8   :  { %14497 = vrsqrt.f32 %v5027_v10  ;;  %v5028_v38 = vadd.f32 1e-05, %v5026_v47  ;;  %v17005_v47 = vld [vmem:[%s19511_s6 + $0x8] sm:$0xff] }
 0x6a9   :  { %5595 = vmatprep.mubr.f32.mxu0 %v17005_v47 }
 0x6aa   :  { %14499 = vrsqrt.f32 %v5028_v38 }
 0x6b5   :  { %v14498_v13 = vpop.eup %14497 }
 0x6b6   :  { %v5031_v12 = vmul.f32 %v14498_v13, %v4982_v60 }
 0x6b7   :  { %v14500_v56 = vpop.eup %14499 }
 0x6b8   :  { %v5033_v30 = vmul.f32 %v5031_v12, %v4997_v22  ;;  %v5032_v61 = vmul.f32 %v14500_v56, %v4983_v16 }
 0x6ba   :  { %5037 = vrot.lane.b32.xlu0 %v5033_v30, %s14590_s1  ;;  %v5034_v62 = vmul.f32 %v5032_v61, %v4998_v8 }
 0x6bc   :  { %5039 = vrot.lane.b32.xlu1 %v5034_v62, %s14590_s1 }
 0x6be   :  { %5052 = vperm.xlu0 %14480, %v5032_v61  }
 0x6c0   :  { %5047 = vperm.xlu1 %14481, %v5031_v12  }
 0x6c2   :  { %14483 = vset.pattern.permute.xlu0 %v19525_v0 }
 0x6c4   :  { %14482 = vset.pattern.permute.xlu1 %v19525_v0 }
 0x72c   :  { %v5038_v54 = vpop.permute.xlu0 %5037 }
 0x72d   :  { %v5043_v6 = vsub.f32 %v4982_v60, %v5038_v54 }
 0x72e   :  { %v5040_v43 = vpop.permute.xlu1 %5039 }
 0x72f   :  { %v5044_v23 = vsub.f32 %v4983_v16, %v5040_v43  ;;  %5065 = vperm.xlu1 %14482, %v5043_v6  }
 0x731   :  { %5070 = vperm.xlu0 %14483, %v5044_v23  }
 0x733   :  { %14485 = vset.pattern.permute.xlu1 %v19523_v9 }
 0x735   :  { %14484 = vset.pattern.permute.xlu0 %v19523_v9 }
 0x739   :  { %v16852_v39 = vpop.permute.xlu0 %5052 }
 0x73a   :  { %v5059_v31 = vmul.f32 %v16852_v39, %v16758_v59  ;;  %v5060_v59 = vmul.f32 %v16852_v39, %v16761_v15 }
 0x73b   :  { %v16850_v5 = vpop.permute.xlu1 %5047 }
 0x73c   :  { %v5055_v19 = vmul.f32 %v16850_v5, %v16764_v63  ;;  %v5056_v14 = vmul.f32 %v16850_v5, %v16755_v36 }
 0x7aa   :  { %v16856_v24 = vpop.permute.xlu1 %5065 }
 0x7ab   :  { %v5073_v11 = vadd.f32 %v16856_v24, %v5055_v19  ;;  %v5074_v15 = vadd.f32 %v16856_v24, %v5056_v14 }
 0x7ac   :  { %v16861_v33 = vpop.permute.xlu0 %5070 }
 0x7ad   :  { %v5077_v34 = vadd.f32 %v16861_v33, %v5059_v31  ;;  %vm5081_vm5 = vcmp.ge.f32.partialorder %v5073_v11, 0.0  ;;  %v5089_v45 = vmul.f32 0.2, %v5073_v11  ;;  %v5078_v40 = vadd.f32 %v16861_v33, %v5060_v59 }
 0x7ae   :  { %v5090_v46 = vmul.f32 0.2, %v5074_v15  ;;  %vm5082_vm8 = vcmp.ge.f32.partialorder %v5074_v15, 0.0 }
 0x7af   :  { %vm5085_vm6 = vcmp.ge.f32.partialorder %v5077_v34, 0.0  ;;  %v5093_v52 = vmul.f32 0.2, %v5077_v34  ;;  %v5097_v25 = vsel %vm5081_vm5, %v5073_v11, %v5089_v45  ;;  %v5094_v41 = vmul.f32 0.2, %v5078_v40 }
 0x7b0   :  { %5285 = vrot.lane.b32.xlu0 %v5097_v25, %s14573_s23  ;;  %5202 = vrot.lane.b32.xlu1 %v5097_v25, %s14575_s24  ;;  %vm5086_vm7 = vcmp.ge.f32.partialorder %v5078_v40, 0.0  ;;  %v16891_v36 = vsel %vm5082_vm8, %v5074_v15, %v5090_v46  ;;  %v17064_v46 = vld [vmem:[%s19511_s6] sm:$0xff]  ;;  %vm7204_vm5 = vcmask 588800  }
 0x7b1   :  { %v5101_v63 = vsel %vm5085_vm6, %v5077_v34, %v5093_v52  ;;  %14128 = vmatprep.mubr.msk.f32.mxu1 %vm4940_vm1, %v5097_v25  ;;  %v16888_v44 = vsel %vm5086_vm7, %v5078_v40, %v5094_v41 }
 0x7b2   :  { %14129 = vmatmul.mubr.msk.f32.vlgmr.msra.gmra.mxu1 %vm4940_vm1, %v5101_v63 }
 0x7b3   :  { %14132 = vmatpush3.msk.msra.mxu1 %vm5123_vm4, %v16817_v17 }
 0x7b4   :  { %5368 = vrot.lane.b32.xlu0 %v5097_v25, %s14574_s25  ;;  %5204 = vrot.lane.b32.xlu1 %v5101_v63, %s14575_s24 }
 0x7b5   :  { %14133 = vmatprep.subr.mxu1 %v16828_v57 }
 0x7b6   :  { %14134 = vmatpush3.msra.mxu1 %v16828_v57 }
 0x7b7   :  { %14135 = vmatprep.subr.mxu1 %v16835_v18 }
 0x7b8   :  { %5622 = vrot.lane.b32.xlu0 %v5101_v63, %s14592_s0  ;;  %5287 = vrot.lane.b32.xlu1 %v5101_v63, %s14573_s23 }
 0x7b9   :  { %14136 = vmatpush3.msra.mxu1 %v16835_v18 }
 0x7ba   :  { %14137 = vmatprep.subr.mxu1 %v16840_v48 }
 0x7bb   :  { %14138 = vmatpush3.msra.mxu1 %v16840_v48 }
 0x7bc   :  { %5618 = vrot.lane.b32.xlu0 %v5097_v25, %s14592_s0  ;;  %5370 = vrot.lane.b32.xlu1 %v5101_v63, %s14574_s25  ;;  %s14593_s25 = smov 92  }
 0x7bd   :  { %14142 = vmatprep.subr.msk.mxu1 %vm5123_vm4, %v16817_v17 }
 0x7c0   :  { %5624 = vrot.lane.b32.xlu1 %v16888_v44, %s14592_s0 }
 0x7c4   :  { %5620 = vrot.lane.b32.xlu1 %v16891_v36, %s14592_s0  ;;  %s14600_s0 = smov 84  }
 0x822   :  { %v5203_v27 = vpop.permute.xlu1 %5202  ;;  %v5286_v49 = vpop.permute.xlu0 %5285 }
 0x823   :  { %14139 = vmatprep.mubr.msk.f32.mxu1 %vm4940_vm1, %v5203_v27  ;;  %v17070_v27 = vld [vmem:[%s19511_s6 + $0x18] sm:$0xff] }
 0x826   :  { %v5205_v50 = vpop.permute.xlu1 %5204  ;;  %v5369_v2 = vpop.permute.xlu0 %5368 }
 0x827   :  { %14140 = vmatmul.mubr.msk.f32.vlgmr.msra.gmra.mxu1 %vm4940_vm1, %v5205_v50  ;;  %v17088_v50 = vld [vmem:[%s19511_s6 + $0x28] sm:$0xff] }
 0x828   :  { %14143 = vmatpush3.msk.msra.mxu1 %vm5123_vm4, %v16817_v17  ;;  %14150 = vmatprep.mubr.msk.f32.mxu1 %vm4940_vm1, %v5286_v49  ;;  %v17082_v49 = vld [vmem:[%s19511_s6 + $0x10] sm:$0xff] }
 0x829   :  { %14144 = vmatprep.subr.mxu1 %v16828_v57 }
 0x82a   :  { %14145 = vmatpush3.msra.mxu1 %v16828_v57  ;;  %v5288_v4 = vpop.permute.xlu1 %5287  ;;  %v5623_v21 = vpop.permute.xlu0 %5622 }
 0x82b   :  { %14146 = vmatprep.subr.mxu1 %v16835_v18 }
 0x82c   :  { %14147 = vmatpush3.msra.mxu1 %v16835_v18 }
 0x82d   :  { %14148 = vmatprep.subr.mxu1 %v16840_v48 }
 0x82e   :  { %14149 = vmatpush3.msra.mxu1 %v16840_v48  ;;  %v5371_v20 = vpop.permute.xlu1 %5370  ;;  %v5619_v8 = vpop.permute.xlu0 %5618 }
 0x82f   :  { %14151 = vmatmul.mubr.msk.f32.vlgmr.msra.gmra.mxu1 %vm4940_vm1, %v5288_v4  ;;  %14153 = vmatprep.subr.msk.mxu1 %vm5123_vm4, %v16817_v17  ;;  %v17103_v4 = vld [vmem:[%s19511_s6 + $0x38] sm:$0xff] }
 0x830   :  { %14154 = vmatpush3.msk.msra.mxu1 %vm5123_vm4, %v16817_v17  ;;  %14161 = vmatprep.mubr.msk.f32.mxu1 %vm4940_vm1, %v5369_v2  ;;  %v17097_v2 = vld [vmem:[%s19511_s6 + $0x20] sm:$0xff] }
 0x831   :  { %14155 = vmatprep.subr.mxu1 %v16828_v57 }
 0x832   :  { %14156 = vmatpush3.msra.mxu1 %v16828_v57  ;;  %v5625_v58 = vpop.permute.xlu1 %5624 }
 0x833   :  { %14157 = vmatprep.subr.mxu1 %v16835_v18  ;;  %v5628_v26 = vsel %vm5626_vm9, %v5623_v21, %v5625_v58 }
 0x834   :  { %14158 = vmatpush3.msra.mxu1 %v16835_v18 }
 0x835   :  { %14159 = vmatprep.subr.mxu1 %v16840_v48 }
 0x836   :  { %14160 = vmatpush3.msra.mxu1 %v16840_v48  ;;  %v5621_v22 = vpop.permute.xlu1 %5620 }
 0x837   :  { %v5627_v1 = vsel %vm5626_vm9, %v5619_v8, %v5621_v22  ;;  %14162 = vmatmul.mubr.msk.f32.vlgmr.msra.gmra.mxu1 %vm4940_vm1, %v5371_v20  ;;  %14164 = vmatprep.subr.msk.mxu1 %vm5123_vm4, %v16817_v17  ;;  %v17114_v20 = vld [vmem:[%s19511_s6 + $0x30] sm:$0xff]  ;;  %vm8947_vm9 = vcmask 146432  }
 0x838   :  { %14165 = vmatpush3.msk.msra.mxu1 %vm5123_vm4, %v16817_v17  ;;  %14172 = vmatprep.mubr.msk.f32.mxu1 %vm4940_vm1, %v5627_v1 }
 0x839   :  { %14166 = vmatprep.subr.mxu1 %v16828_v57 }
 0x83a   :  { %14167 = vmatpush3.msra.mxu1 %v16828_v57 }
 0x83b   :  { %14168 = vmatprep.subr.mxu1 %v16835_v18 }
 0x83c   :  { %14169 = vmatpush3.msra.mxu1 %v16835_v18 }
 0x83d   :  { %14170 = vmatprep.subr.mxu1 %v16840_v48 }
 0x83e   :  { %14171 = vmatpush3.msra.mxu1 %v16840_v48 }
 0x83f   :  { %14173 = vmatmul.mubr.msk.f32.vlgmr.msra.gmra.mxu1 %vm4940_vm1, %v5628_v26  ;;  %14175 = vmatprep.subr.msk.mxu1 %vm5123_vm4, %v16817_v17 }
 0x840   :  { %14176 = vmatpush3.msk.msra.mxu1 %vm5123_vm4, %v16817_v17 }
 0x841   :  { %14177 = vmatprep.subr.mxu1 %v16828_v57 }
 0x842   :  { %14178 = vmatpush3.msra.mxu1 %v16828_v57 }
 0x843   :  { %14179 = vmatprep.subr.mxu1 %v16835_v18 }
 0x844   :  { %14180 = vmatpush3.msra.mxu1 %v16835_v18 }
 0x845   :  { %14181 = vmatprep.subr.mxu1 %v16840_v48 }
 0x846   :  { %14182 = vmatpush3.msra.mxu1 %v16840_v48 }
 0x872   :  { %v16940_v29 = vpop.f32.mrf.mxu1 }
 0x873   :  { %5467 = vrot.lane.b32.xlu1 %v16940_v29, %s14593_s25 }
 0x874   :  { %v16946_v32 = vpop.f32.mrf.mxu1 }
 0x877   :  { %5461 = vrot.lane.b32.xlu1 %v16940_v29, %s14587_s5 }
 0x87b   :  { %5465 = vrot.lane.b32.xlu1 %v16946_v32, %s14593_s25 }
 0x8e5   :  { %v5468_v38 = vpop.permute.xlu1 %5467 }
 0x8e7   :  { %v16950_v51 = vpop.f32.mrf.mxu1 }
 0x8e8   :  { %5487 = vrot.lane.b32.xlu1 %v16950_v51, %s14593_s25 }
 0x8e9   :  { %v16956_v53 = vpop.f32.mrf.mxu1  ;;  %v5462_v60 = vpop.permute.xlu1 %5461 }
 0x8ec   :  { %5481 = vrot.lane.b32.xlu1 %v16950_v51, %s14587_s5 }
 0x8ed   :  { %v5466_v13 = vpop.permute.xlu1 %5465 }
 0x8ef   :  { %v16958_v7 = vpop.f32.mrf.mxu1 }
 0x8f0   :  { %5507 = vrot.lane.b32.xlu0 %v16958_v7, %s14593_s25  ;;  %5475 = vrot.lane.b32.xlu1 %v16950_v51, %s14594_s13 }
 0x8f1   :  { %v16968_v37 = vpop.f32.mrf.mxu1 }
 0x8f4   :  { %5501 = vrot.lane.b32.xlu0 %v16958_v7, %s14587_s5  ;;  %5485 = vrot.lane.b32.xlu1 %v16956_v53, %s14593_s25 }
 0x8f7   :  { %v16974_v42 = vpop.f32.mrf.mxu1 }
 0x8f8   :  { %5505 = vrot.lane.b32.xlu0 %v16968_v37, %s14593_s25  ;;  %5479 = vrot.lane.b32.xlu1 %v16956_v53, %s14587_s5 }
 0x8f9   :  { %v16986_v10 = vpop.f32.mrf.mxu1 }
 0x8fc   :  { %5527 = vrot.lane.b32.xlu0 %v16974_v42, %s14593_s25  ;;  %5473 = vrot.lane.b32.xlu1 %v16956_v53, %s14594_s13 }
 0x8ff   :  { %v17139_v1 = vpop.f32.mrf.mxu1 }
 0x900   :  { %5521 = vrot.lane.b32.xlu0 %v16974_v42, %s14587_s5  ;;  %5708 = vrot.lane.b32.xlu1 %v16891_v36, %s14595_s17 }
 0x901   :  { %v17141_v26 = vpop.f32.mrf.mxu1 }
 0x904   :  { %5515 = vrot.lane.b32.xlu0 %v16974_v42, %s14594_s13  ;;  %5710 = vrot.lane.b32.xlu1 %v16888_v44, %s14595_s17  ;;  %s14601_s17 = smov 54  }
 0x908   :  { %5525 = vrot.lane.b32.xlu0 %v16986_v10, %s14593_s25  ;;  %5455 = vrot.lane.b32.xlu1 %v16940_v29, %s14594_s13 }
 0x90c   :  { %5519 = vrot.lane.b32.xlu0 %v16986_v10, %s14587_s5  ;;  %5453 = vrot.lane.b32.xlu1 %v16946_v32, %s14594_s13 }
 0x910   :  { %5513 = vrot.lane.b32.xlu0 %v16986_v10, %s14594_s13  ;;  %5918 = vrot.lane.b32.xlu1 %v16888_v44, %s14596_s3 }
 0x914   :  { %5499 = vrot.lane.b32.xlu0 %v16968_v37, %s14587_s5  ;;  %6001 = vrot.lane.b32.xlu1 %v16888_v44, %s14597_s20 }
 0x918   :  { %5459 = vrot.lane.b32.xlu0 %v16946_v32, %s14587_s5 }
 0x91c   :  { %5495 = vrot.lane.b32.xlu0 %v16958_v7, %s14594_s13 }
 0x920   :  { %5493 = vrot.lane.b32.xlu0 %v16968_v37, %s14594_s13 }
 0x924   :  { %5916 = vrot.lane.b32.xlu0 %v16891_v36, %s14596_s3  ;;  %s14602_s3 = smov 24  }
 0x928   :  { %5999 = vrot.lane.b32.xlu0 %v16891_v36, %s14597_s20  ;;  %s14603_s20 = smov 122  }
 0x95a   :  { %v5488_v16 = vpop.permute.xlu1 %5487 }
 0x95e   :  { %v5482_v12 = vpop.permute.xlu1 %5481 }
 0x962   :  { %v17016_v56 = vpop.permute.xlu0 %5507  ;;  %v5476_v30 = vpop.permute.xlu1 %5475 }
 0x966   :  { %v17018_v61 = vpop.permute.xlu0 %5501  ;;  %v5486_v62 = vpop.permute.xlu1 %5485 }
 0x96a   :  { %v17020_v54 = vpop.permute.xlu0 %5505  ;;  %v5480_v6 = vpop.permute.xlu1 %5479 }
 0x96e   :  { %v17022_v43 = vpop.permute.xlu0 %5527  ;;  %v5474_v23 = vpop.permute.xlu1 %5473 }
 0x96f   :  { %11950 = vmatprep.subr.mxu0 %v17022_v43 }
 0x970   :  { %11951 = vmatpush3.msra.mxu0 %v5488_v16 }
 0x972   :  { %v17025_v19 = vpop.permute.xlu0 %5521  ;;  %v5709_v31 = vpop.permute.xlu1 %5708 }
 0x973   :  { %14183 = vmatprep.mubr.msk.f32.mxu1 %vm4940_vm1, %v5709_v31 }
 0x976   :  { %v17028_v11 = vpop.permute.xlu0 %5515  ;;  %v5711_v34 = vpop.permute.xlu1 %5710 }
 0x977   :  { %14184 = vmatmul.mubr.msk.f32.vlgmr.msra.gmra.mxu1 %vm4940_vm1, %v5711_v34  ;;  %v5057_v34 = vmul.f32 %v16850_v5, %v16770_v3 }
 0x978   :  { %5895 = vmatprep.mubr.f32.mxu1 %v17005_v47 }
 0x97a   :  { %v17032_v45 = vpop.permute.xlu0 %5525  ;;  %v5456_v40 = vpop.permute.xlu1 %5455 }
 0x97b   :  { %11952 = vmatprep.subr.mxu0 %v17032_v45 }
 0x97c   :  { %11953 = vmatpush3.msra.mxu0 %v5486_v62 }
 0x97d   :  { %11954 = vmatprep.subr.mxu0 %v17025_v19 }
 0x97e   :  { %11955 = vmatpush3.msra.mxu0 %v5482_v12  ;;  %v17036_v52 = vpop.permute.xlu0 %5519  ;;  %v5454_v41 = vpop.permute.xlu1 %5453 }
 0x97f   :  { %11956 = vmatprep.subr.mxu0 %v17036_v52 }
 0x980   :  { %11957 = vmatpush3.msra.mxu0 %v5480_v6 }
 0x981   :  { %11958 = vmatprep.subr.mxu0 %v17028_v11 }
 0x982   :  { %11959 = vmatpush3.msra.mxu0 %v5476_v30  ;;  %v17040_v25 = vpop.permute.xlu0 %5513  ;;  %v5919_v58 = vpop.permute.xlu1 %5918 }
 0x983   :  { %11960 = vmatprep.subr.mxu0 %v17040_v25 }
 0x984   :  { %11961 = vmatpush3.msra.mxu0 %v5474_v23 }
 0x985   :  { %11962 = vmatprep.subr.mxu0 %v16974_v42 }
 0x986   :  { %11963 = vmatpush3.msra.mxu0 %v16950_v51  ;;  %v17045_v63 = vpop.permute.xlu0 %5499  ;;  %v6002_v22 = vpop.permute.xlu1 %6001 }
 0x987   :  { %11964 = vmatprep.subr.mxu0 %v16986_v10 }
 0x988   :  { %11965 = vmatpush3.msra.mxu0 %v16956_v53 }
 0x989   :  { %11966 = vmatprep.subr.mxu0 %v17016_v56 }
 0x98a   :  { %11967 = vmatpush3.msra.mxu0 %v5468_v38  ;;  %v5460_v59 = vpop.permute.xlu0 %5459 }
 0x98b   :  { %11968 = vmatprep.subr.mxu0 %v17020_v54 }
 0x98c   :  { %11969 = vmatpush3.msra.mxu0 %v5466_v13 }
 0x98d   :  { %11970 = vmatprep.subr.mxu0 %v17018_v61 }
 0x98e   :  { %11971 = vmatpush3.msra.mxu0 %v5462_v60  ;;  %v17052_v14 = vpop.permute.xlu0 %5495 }
 0x98f   :  { %11972 = vmatprep.subr.mxu0 %v17045_v63 }
 0x990   :  { %11973 = vmatpush3.msra.mxu0 %v5460_v59  ;;  %v5075_v59 = vadd.f32 %v16856_v24, %v5057_v34  ;;  %v5062_v34 = vmul.f32 %v16852_v39, %v16787_v28 }
 0x991   :  { %11974 = vmatprep.subr.mxu0 %v17052_v14 }
 0x992   :  { %11975 = vmatpush3.msra.mxu0 %v5456_v40  ;;  %v17056_v15 = vpop.permute.xlu0 %5493  ;;  %v5061_v40 = vmul.f32 %v16852_v39, %v16768_v35  ;;  %vm5083_vm10 = vcmp.ge.f32.partialorder %v5075_v59, 0.0 }
 0x993   :  { %11976 = vmatprep.subr.mxu0 %v17056_v15 }
 0x994   :  { %11977 = vmatpush3.msra.mxu0 %v5454_v41  ;;  %v5091_v41 = vmul.f32 0.2, %v5075_v59  ;;  %v5079_v3 = vadd.f32 %v16861_v33, %v5061_v40 }
 0x995   :  { %11978 = vmatprep.subr.mxu0 %v16958_v7 }
 0x996   :  { %11979 = vmatpush3.msra.mxu0 %v16940_v29  ;;  %v5917_v21 = vpop.permute.xlu0 %5916  ;;  %vm5087_vm11 = vcmp.ge.f32.partialorder %v5079_v3, 0.0 }
 0x997   :  { %11980 = vmatprep.subr.mxu0 %v16968_v37 }
 0x998   :  { %11981 = vmatpush3.msra.mxu0 %v16946_v32 }
 0x999   :  { %5596 = vmatmul.mubr.f32.vlgmr.msra.gmra.mxu0 %v17064_v46  ;;  %14186 = vmatprep.subr.msk.mxu0 %vm5123_vm4, %v16817_v17 }
 0x99a   :  { %14187 = vmatpush3.msk.msra.mxu0 %vm5123_vm4, %v16817_v17  ;;  %5600 = vmatprep.mubr.f32.mxu0 %v17070_v27  ;;  %v6000_v8 = vpop.permute.xlu0 %5999 }
 0x99b   :  { %14188 = vmatprep.subr.mxu0 %v16828_v57 }
 0x99c   :  { %14189 = vmatpush3.msra.mxu0 %v16828_v57 }
 0x99d   :  { %5601 = vmatmul.mubr.f32.gmra.mxu0 %v17082_v49  ;;  %14190 = vmatprep.subr.mxu0 %v16835_v18 }
 0x99e   :  { %5605 = vmatprep.mubr.f32.mxu0 %v17088_v50  ;;  %14191 = vmatpush3.msra.mxu0 %v16835_v18 }
 0x99f   :  { %14192 = vmatprep.subr.mxu0 %v16840_v48 }
 0x9a0   :  { %14193 = vmatpush3.msra.mxu0 %v16840_v48 }
 0x9a1   :  { %5606 = vmatmul.mubr.f32.gmra.mxu0 %v17097_v2  ;;  %14197 = vmatprep.subr.msk.mxu0 %vm5123_vm4, %v16817_v17 }
 0x9a2   :  { %5610 = vmatprep.mubr.f32.mxu0 %v17103_v4 }
 0x9a5   :  { %5611 = vmatmul.mubr.f32.gmra.mxu0 %v17114_v20 }
 0x9a6   :  { %14194 = vmatprep.mubr.msk.f32.mxu0 %vm4940_vm1, %v5917_v21  ;;  %v5099_v21 = vsel %vm5083_vm10, %v5075_v59, %v5091_v41  ;;  %v5080_v59 = vadd.f32 %v16861_v33, %v5062_v34 }
 0x9a8   :  { %vm5088_vm13 = vcmp.ge.f32.partialorder %v5080_v59, 0.0 }
 0x9a9   :  { %14195 = vmatmul.mubr.msk.f32.vlgmr.msra.gmra.mxu0 %vm4940_vm1, %v5919_v58  ;;  %v5095_v58 = vmul.f32 0.2, %v5079_v3 }
 0x9aa   :  { %14198 = vmatpush3.msk.msra.mxu0 %vm5123_vm4, %v16817_v17  ;;  %14205 = vmatprep.mubr.msk.f32.mxu0 %vm4940_vm1, %v6000_v8  ;;  %v5058_v8 = vmul.f32 %v16850_v5, %v16798_v55  ;;  %v5096_v55 = vmul.f32 0.2, %v5080_v59 }
 0x9ab   :  { %14199 = vmatprep.subr.mxu0 %v16828_v57  ;;  %v5103_v35 = vsel %vm5087_vm11, %v5079_v3, %v5095_v58 }
 0x9ac   :  { %14200 = vmatpush3.msra.mxu0 %v16828_v57  ;;  %v5104_v5 = vsel %vm5088_vm13, %v5080_v59, %v5096_v55 }
 0x9ad   :  { %14201 = vmatprep.subr.mxu0 %v16835_v18 }
 0x9ae   :  { %14202 = vmatpush3.msra.mxu0 %v16835_v18 }
 0x9af   :  { %14203 = vmatprep.subr.mxu0 %v16840_v48 }
 0x9b0   :  { %14204 = vmatpush3.msra.mxu0 %v16840_v48 }
 0x9b1   :  { %14206 = vmatmul.mubr.msk.f32.vlgmr.msra.gmra.mxu0 %vm4940_vm1, %v6002_v22  ;;  %14219 = vmatprep.subr.msk.mxu0 %vm5123_vm4, %v16817_v17  ;;  %v5076_v22 = vadd.f32 %v16856_v24, %v5058_v8 }
 0x9b2   :  { %14220 = vmatpush3.msk.msra.mxu0 %vm5123_vm4, %v16817_v17 }
 0x9b3   :  { %14221 = vmatprep.subr.mxu0 %v16828_v57  ;;  %vm5084_vm12 = vcmp.ge.f32.partialorder %v5076_v22, 0.0 }
 0x9b4   :  { %14222 = vmatpush3.msra.mxu0 %v16828_v57 }
 0x9b5   :  { %14223 = vmatprep.subr.mxu0 %v16835_v18 }
 0x9b6   :  { %14224 = vmatpush3.msra.mxu0 %v16835_v18 }
 0x9b7   :  { %14225 = vmatprep.subr.mxu0 %v16840_v48 }
 0x9b8   :  { %14226 = vmatpush3.msra.mxu0 %v16840_v48 }
 0xa37   :  { %v17143_v29 = vpop.f32.mrf.mxu1 }
 0xa38   :  { %5827 = vrot.lane.b32.xlu0 %v17143_v29, %s14593_s25 }
 0xa39   :  { %v17147_v32 = vpop.f32.mrf.mxu1 }
 0xa3a   :  { %5825 = vrot.lane.b32.xlu1 %v17147_v32, %s14593_s25 }
 0xa3c   :  { %5821 = vrot.lane.b32.xlu0 %v17143_v29, %s14587_s5 }
 0xa3e   :  { %5819 = vrot.lane.b32.xlu1 %v17147_v32, %s14587_s5 }
 0xa40   :  { %5815 = vrot.lane.b32.xlu0 %v17143_v29, %s14594_s13 }
 0xa42   :  { %5813 = vrot.lane.b32.xlu1 %v17147_v32, %s14594_s13 }
 0xa44   :  { %5807 = vrot.lane.b32.xlu0 %v17139_v1, %s14593_s25 }
 0xa46   :  { %5805 = vrot.lane.b32.xlu1 %v17141_v26, %s14593_s25 }
 0xa48   :  { %5801 = vrot.lane.b32.xlu0 %v17139_v1, %s14587_s5 }
 0xa4a   :  { %5799 = vrot.lane.b32.xlu1 %v17141_v26, %s14587_s5 }
 0xa4c   :  { %5795 = vrot.lane.b32.xlu0 %v17139_v1, %s14594_s13 }
 0xa4e   :  { %5793 = vrot.lane.b32.xlu1 %v17141_v26, %s14594_s13 }
 0xa59   :  { %v17171_v51 = vpop.f32.mrf.mxu0 }
 0xa5b   :  { %v17173_v53 = vpop.f32.mrf.mxu0 }
 0xa5d   :  { %v17175_v38 = vpop.f32.mrf.mxu0 }
 0xa5f   :  { %v17177_v60 = vpop.f32.mrf.mxu0 }
 0xa61   :  { %v17179_v13 = vpop.f32.mrf.mxu0 }
 0xa63   :  { %v17181_v16 = vpop.f32.mrf.mxu0 }
 0xa65   :  { %v17183_v12 = vpop.f32.mrf.mxu0 }
 0xa67   :  { %v17185_v30 = vpop.f32.mrf.mxu0 }
 0xa69   :  { %v17187_v62 = vpop.f32.mrf.mxu0 }
 0xa6b   :  { %v17189_v6 = vpop.f32.mrf.mxu0 }
 0xa71   :  { %v17191_v23 = vpop.f32.mrf.mxu0 }
 0xa72   :  { %6118 = vrot.lane.b32.xlu0 %v17191_v23, %s14593_s25 }
 0xa73   :  { %v17195_v31 = vpop.f32.mrf.mxu0 }
 0xa74   :  { %6116 = vrot.lane.b32.xlu1 %v17195_v31, %s14593_s25 }
 0xa76   :  { %6112 = vrot.lane.b32.xlu0 %v17191_v23, %s14587_s5 }
 0xa78   :  { %6110 = vrot.lane.b32.xlu1 %v17195_v31, %s14587_s5 }
 0xa7a   :  { %6106 = vrot.lane.b32.xlu0 %v17191_v23, %s14594_s13 }
 0xa7c   :  { %6104 = vrot.lane.b32.xlu1 %v17195_v31, %s14594_s13 }
 0xa7e   :  { %6098 = vrot.lane.b32.xlu0 %v17187_v62, %s14593_s25 }
 0xa80   :  { %6096 = vrot.lane.b32.xlu1 %v17189_v6, %s14593_s25 }
 0xa82   :  { %6092 = vrot.lane.b32.xlu0 %v17187_v62, %s14587_s5 }
 0xa84   :  { %6090 = vrot.lane.b32.xlu1 %v17189_v6, %s14587_s5 }
 0xa86   :  { %6086 = vrot.lane.b32.xlu0 %v17187_v62, %s14594_s13 }
 0xa88   :  { %6084 = vrot.lane.b32.xlu1 %v17189_v6, %s14594_s13 }
 0xa8a   :  { %6299 = vrot.lane.b32.xlu0 %v5099_v21, %s14598_s28 }
 0xa8c   :  { %6209 = vrot.lane.b32.xlu1 %v16891_v36, %s14599_s29  ;;  %v5092_v36 = vmul.f32 0.2, %v5076_v22 }
 0xa8e   :  { %6211 = vrot.lane.b32.xlu0 %v5099_v21, %s14599_s29 }
 0xa90   :  { %6301 = vrot.lane.b32.xlu1 %v5103_v35, %s14598_s28 }
 0xa92   :  { %6213 = vrot.lane.b32.xlu0 %v16888_v44, %s14599_s29  ;;  %v5100_v44 = vsel %vm5084_vm12, %v5076_v22, %v5092_v36 }
 0xa94   :  { %6215 = vrot.lane.b32.xlu1 %v5103_v35, %s14599_s29 }
 0xa96   :  { %6507 = vrot.lane.b32.xlu0 %v5099_v21, %s14600_s0 }
 0xa98   :  { %6509 = vrot.lane.b32.xlu1 %v5103_v35, %s14600_s0 }
 0xa9a   :  { %6590 = vrot.lane.b32.xlu0 %v5099_v21, %s14601_s17 }
 0xa9c   :  { %6592 = vrot.lane.b32.xlu1 %v5103_v35, %s14601_s17 }
 0xa9e   :  { %6800 = vrot.lane.b32.xlu0 %v5099_v21, %s14602_s3 }
 0xaa0   :  { %6802 = vrot.lane.b32.xlu1 %v5100_v44, %s14602_s3 }
 0xaa2   :  { %6804 = vrot.lane.b32.xlu0 %v5103_v35, %s14602_s3 }
 0xaa4   :  { %6806 = vrot.lane.b32.xlu1 %v5104_v5, %s14602_s3 }
 0xaa6   :  { %6890 = vrot.lane.b32.xlu0 %v5100_v44, %s14603_s20 }
 0xaa8   :  { %6892 = vrot.lane.b32.xlu1 %v5104_v5, %s14603_s20 }
 0xaaa   :  { %v5828_v28 = vpop.permute.xlu0 %5827 }
 0xaab   :  { %12006 = vmatprep.subr.mxu1 %v5828_v28 }
 0xaac   :  { %12007 = vmatpush3.msra.mxu1 %v17022_v43  ;;  %v5826_v39 = vpop.permute.xlu1 %5825 }
 0xaad   :  { %12008 = vmatprep.subr.mxu1 %v5826_v39 }
 0xaae   :  { %v5822_v24 = vpop.permute.xlu0 %5821  ;;  %12009 = vmatpush3.msra.mxu1 %v17032_v45 }
 0xaaf   :  { %12010 = vmatprep.subr.mxu1 %v5822_v24 }
 0xab0   :  { %12011 = vmatpush3.msra.mxu1 %v17025_v19  ;;  %v5820_v33 = vpop.permute.xlu1 %5819 }
 0xab1   :  { %12012 = vmatprep.subr.mxu1 %v5820_v33 }
 0xab2   :  { %v5816_v40 = vpop.permute.xlu0 %5815  ;;  %12013 = vmatpush3.msra.mxu1 %v17036_v52 }
 0xab3   :  { %12014 = vmatprep.subr.mxu1 %v5816_v40 }
 0xab4   :  { %12015 = vmatpush3.msra.mxu1 %v17028_v11  ;;  %v5814_v41 = vpop.permute.xlu1 %5813 }
 0xab5   :  { %12016 = vmatprep.subr.mxu1 %v5814_v41 }
 0xab6   :  { %v5808_v3 = vpop.permute.xlu0 %5807  ;;  %12017 = vmatpush3.msra.mxu1 %v17040_v25 }
 0xab7   :  { %12018 = vmatprep.subr.mxu1 %v17143_v29 }
 0xab8   :  { %12019 = vmatpush3.msra.mxu1 %v16974_v42  ;;  %v5806_v43 = vpop.permute.xlu1 %5805 }
 0xab9   :  { %12020 = vmatprep.subr.mxu1 %v17147_v32 }
 0xaba   :  { %12021 = vmatpush3.msra.mxu1 %v16986_v10  ;;  %v5802_v19 = vpop.permute.xlu0 %5801 }
 0xabb   :  { %12022 = vmatprep.subr.mxu1 %v5808_v3 }
 0xabc   :  { %12023 = vmatpush3.msra.mxu1 %v17016_v56  ;;  %v5800_v11 = vpop.permute.xlu1 %5799 }
 0xabd   :  { %12024 = vmatprep.subr.mxu1 %v5806_v43 }
 0xabe   :  { %12025 = vmatpush3.msra.mxu1 %v17020_v54  ;;  %v5796_v45 = vpop.permute.xlu0 %5795 }
 0xabf   :  { %12026 = vmatprep.subr.mxu1 %v5802_v19 }
 0xac0   :  { %12027 = vmatpush3.msra.mxu1 %v17018_v61  ;;  %v5794_v42 = vpop.permute.xlu1 %5793 }
 0xac1   :  { %12028 = vmatprep.subr.mxu1 %v5800_v11 }
 0xac2   :  { %12029 = vmatpush3.msra.mxu1 %v17045_v63 }
 0xac3   :  { %12030 = vmatprep.subr.mxu1 %v5796_v45 }
 0xac4   :  { %12031 = vmatpush3.msra.mxu1 %v17052_v14 }
 0xac5   :  { %12032 = vmatprep.subr.mxu1 %v5794_v42 }
 0xac6   :  { %12033 = vmatpush3.msra.mxu1 %v17056_v15 }
 0xac7   :  { %12034 = vmatprep.subr.mxu1 %v17139_v1 }
 0xac8   :  { %12035 = vmatpush3.msra.mxu1 %v16958_v7 }
 0xac9   :  { %12036 = vmatprep.subr.mxu1 %v17141_v26 }
 0xaca   :  { %12037 = vmatpush3.msra.mxu1 %v16968_v37 }
 0xacb   :  { %5896 = vmatmul.mubr.f32.vlgmr.msra.gmra.mxu1 %v17064_v46 }
 0xacc   :  { %5900 = vmatprep.mubr.f32.mxu1 %v17070_v27 }
 0xacf   :  { %5901 = vmatmul.mubr.f32.gmra.mxu1 %v17082_v49 }
 0xad0   :  { %5905 = vmatprep.mubr.f32.mxu1 %v17088_v50 }
 0xad3   :  { %5906 = vmatmul.mubr.f32.gmra.mxu1 %v17097_v2 }
 0xad4   :  { %5910 = vmatprep.mubr.f32.mxu1 %v17103_v4 }
 0xad7   :  { %5911 = vmatmul.mubr.f32.gmra.mxu1 %v17114_v20 }
 0xad8   :  { %6186 = vmatprep.mubr.f32.mxu1 %v17005_v47 }
 0xae4   :  { %v17267_v7 = vpop.permute.xlu0 %6118 }
 0xae5   :  { %12062 = vmatprep.subr.mxu1 %v17267_v7 }
 0xae6   :  { %12063 = vmatpush3.msra.mxu1 %v5828_v28  ;;  %v17270_v37 = vpop.permute.xlu1 %6116 }
 0xae7   :  { %12064 = vmatprep.subr.mxu1 %v17270_v37 }
 0xae8   :  { %v17273_v10 = vpop.permute.xlu0 %6112  ;;  %12065 = vmatpush3.msra.mxu1 %v5826_v39  ;;  %v14535_v39 = vld [vmem:[%s19513_s8 + $0x18] sm:$0x3f] }
 0xae9   :  { %12066 = vmatprep.subr.mxu1 %v17273_v10 }
 0xaea   :  { %12067 = vmatpush3.msra.mxu1 %v5822_v24  ;;  %v17276_v56 = vpop.permute.xlu1 %6110 }
 0xaeb   :  { %12068 = vmatprep.subr.mxu1 %v17276_v56 }
 0xaec   :  { %v17279_v61 = vpop.permute.xlu0 %6106  ;;  %12069 = vmatpush3.msra.mxu1 %v5820_v33 }
 0xaed   :  { %12070 = vmatprep.subr.mxu1 %v17279_v61 }
 0xaee   :  { %12071 = vmatpush3.msra.mxu1 %v5816_v40  ;;  %v17282_v54 = vpop.permute.xlu1 %6104 }
 0xaef   :  { %12072 = vmatprep.subr.mxu1 %v17282_v54 }
 0xaf0   :  { %v17285_v52 = vpop.permute.xlu0 %6098  ;;  %12073 = vmatpush3.msra.mxu1 %v5814_v41 }
 0xaf1   :  { %12074 = vmatprep.subr.mxu1 %v17191_v23 }
 0xaf2   :  { %12075 = vmatpush3.msra.mxu1 %v17143_v29  ;;  %v17289_v25 = vpop.permute.xlu1 %6096 }
 0xaf3   :  { %12076 = vmatprep.subr.mxu1 %v17195_v31 }
 0xaf4   :  { %v17292_v63 = vpop.permute.xlu0 %6092  ;;  %12077 = vmatpush3.msra.mxu1 %v17147_v32 }
 0xaf5   :  { %12078 = vmatprep.subr.mxu1 %v17285_v52 }
 0xaf6   :  { %12079 = vmatpush3.msra.mxu1 %v5808_v3  ;;  %v17296_v14 = vpop.permute.xlu1 %6090 }
 0xaf7   :  { %12080 = vmatprep.subr.mxu1 %v17289_v25 }
 0xaf8   :  { %v17299_v15 = vpop.permute.xlu0 %6086  ;;  %12081 = vmatpush3.msra.mxu1 %v5806_v43 }
 0xaf9   :  { %12082 = vmatprep.subr.mxu1 %v17292_v63 }
 0xafa   :  { %12083 = vmatpush3.msra.mxu1 %v5802_v19  ;;  %v17302_v29 = vpop.permute.xlu1 %6084 }
 0xafb   :  { %12084 = vmatprep.subr.mxu1 %v17296_v14 }
 0xafc   :  { %v6300_v21 = vpop.permute.xlu0 %6299  ;;  %12085 = vmatpush3.msra.mxu1 %v5800_v11 }
 0xafd   :  { %12086 = vmatprep.subr.mxu1 %v17299_v15  ;;  %14227 = vmatprep.mubr.msk.f32.mxu0 %vm4940_vm1, %v6300_v21 }
 0xafe   :  { %12087 = vmatpush3.msra.mxu1 %v5796_v45  ;;  %v6210_v32 = vpop.permute.xlu1 %6209 }
 0xaff   :  { %12088 = vmatprep.subr.mxu1 %v17302_v29 }
 0xb00   :  { %12089 = vmatpush3.msra.mxu1 %v5794_v42 }
 0xb01   :  { %12090 = vmatprep.subr.mxu1 %v17187_v62 }
 0xb02   :  { %12091 = vmatpush3.msra.mxu1 %v17139_v1  ;;  %v6302_v58 = vpop.permute.xlu1 %6301  ;;  %v6212_v1 = vpop.permute.xlu0 %6211 }
 0xb03   :  { %12092 = vmatprep.subr.mxu1 %v17189_v6  ;;  %14228 = vmatmul.mubr.msk.f32.vlgmr.msra.gmra.mxu0 %vm4940_vm1, %v6302_v58  ;;  %v6218_v8 = vsel %vm6217_vm14, %v6210_v32, %v6212_v1 }
 0xb04   :  { %12093 = vmatpush3.msra.mxu1 %v17141_v26  ;;  %6486 = vmatprep.mubr.f32.mxu0 %v17005_v47 }
 0xb05   :  { %6187 = vmatmul.mubr.f32.vlgmr.msra.gmra.mxu1 %v17064_v46  ;;  %14208 = vmatprep.subr.msk.mxu1 %vm5123_vm4, %v16817_v17 }
 0xb06   :  { %14209 = vmatpush3.msk.msra.mxu1 %vm5123_vm4, %v16817_v17  ;;  %6191 = vmatprep.mubr.f32.mxu1 %v17070_v27  ;;  %v6214_v26 = vpop.permute.xlu0 %6213  ;;  %v6216_v35 = vpop.permute.xlu1 %6215 }
 0xb07   :  { %14210 = vmatprep.subr.mxu1 %v16828_v57  ;;  %v6219_v22 = vsel %vm6217_vm14, %v6214_v26, %v6216_v35 }
 0xb08   :  { %14211 = vmatpush3.msra.mxu1 %v16828_v57 }
 0xb09   :  { %6192 = vmatmul.mubr.f32.gmra.mxu1 %v17082_v49  ;;  %14212 = vmatprep.subr.mxu1 %v16835_v18 }
 0xb0a   :  { %6196 = vmatprep.mubr.f32.mxu1 %v17088_v50  ;;  %14213 = vmatpush3.msra.mxu1 %v16835_v18  ;;  %v6508_v34 = vpop.permute.xlu0 %6507  ;;  %v6510_v36 = vpop.permute.xlu1 %6509 }
 0xb0b   :  { %14214 = vmatprep.subr.mxu1 %v16840_v48 }
 0xb0c   :  { %14215 = vmatpush3.msra.mxu1 %v16840_v48 }
 0xb0d   :  { %6197 = vmatmul.mubr.f32.gmra.mxu1 %v17097_v2  ;;  %14230 = vmatprep.subr.msk.mxu1 %vm5123_vm4, %v16817_v17 }
 0xb0e   :  { %6201 = vmatprep.mubr.f32.mxu1 %v17103_v4  ;;  %v6591_v59 = vpop.permute.xlu0 %6590  ;;  %v6593_v44 = vpop.permute.xlu1 %6592 }
 0xb11   :  { %6202 = vmatmul.mubr.f32.gmra.mxu1 %v17114_v20 }
 0xb12   :  { %14216 = vmatprep.mubr.msk.f32.mxu1 %vm4940_vm1, %v6218_v8  ;;  %v6801_v55 = vpop.permute.xlu0 %6800  ;;  %v6803_v5 = vpop.permute.xlu1 %6802 }
 0xb13   :  { %v6809_v28 = vsel %vm6808_vm3, %v6801_v55, %v6803_v5 }
 0xb15   :  { %14217 = vmatmul.mubr.msk.f32.vlgmr.msra.gmra.mxu1 %vm4940_vm1, %v6219_v22 }
 0xb16   :  { %14231 = vmatpush3.msk.msra.mxu1 %vm5123_vm4, %v16817_v17  ;;  %14238 = vmatprep.mubr.msk.f32.mxu1 %vm4940_vm1, %v6508_v34  ;;  %v6805_v24 = vpop.permute.xlu0 %6804  ;;  %v6807_v33 = vpop.permute.xlu1 %6806 }
 0xb17   :  { %14232 = vmatprep.subr.mxu1 %v16828_v57 }
 0xb18   :  { %14233 = vmatpush3.msra.mxu1 %v16828_v57 }
 0xb19   :  { %14234 = vmatprep.subr.mxu1 %v16835_v18 }
 0xb1a   :  { %14235 = vmatpush3.msra.mxu1 %v16835_v18  ;;  %v6891_v40 = vpop.permute.xlu0 %6890  ;;  %v6893_v41 = vpop.permute.xlu1 %6892 }
 0xb1b   :  { %14236 = vmatprep.subr.mxu1 %v16840_v48 }
 0xb1c   :  { %14237 = vmatpush3.msra.mxu1 %v16840_v48 }
 0xb1d   :  { %14239 = vmatmul.mubr.msk.f32.vlgmr.msra.gmra.mxu1 %vm4940_vm1, %v6510_v36  ;;  %14241 = vmatprep.subr.msk.mxu1 %vm5123_vm4, %v16817_v17 }
 0xb1e   :  { %14242 = vmatpush3.msk.msra.mxu1 %vm5123_vm4, %v16817_v17  ;;  %14249 = vmatprep.mubr.msk.f32.mxu1 %vm4940_vm1, %v6591_v59 }
 0xb1f   :  { %14243 = vmatprep.subr.mxu1 %v16828_v57 }
 0xb20   :  { %14244 = vmatpush3.msra.mxu1 %v16828_v57 }
 0xb21   :  { %14245 = vmatprep.subr.mxu1 %v16835_v18 }
 0xb22   :  { %14246 = vmatpush3.msra.mxu1 %v16835_v18 }
 0xb23   :  { %14247 = vmatprep.subr.mxu1 %v16840_v48 }
 0xb24   :  { %14248 = vmatpush3.msra.mxu1 %v16840_v48 }
 0xb25   :  { %14250 = vmatmul.mubr.msk.f32.vlgmr.msra.gmra.mxu1 %vm4940_vm1, %v6593_v44  ;;  %14252 = vmatprep.subr.msk.mxu1 %vm5123_vm4, %v16817_v17  ;;  %v6810_v17 = vsel %vm6808_vm3, %v6805_v24, %v6807_v33 }
 0xb26   :  { %14253 = vmatpush3.msk.msra.mxu1 %vm5123_vm4, %v14535_v39  ;;  %14260 = vmatprep.mubr.msk.f32.mxu1 %vm4940_vm1, %v6809_v28 }
 0xb27   :  { %14254 = vmatprep.subr.mxu1 %v16828_v57 }
 0xb28   :  { %14255 = vmatpush3.msra.mxu1 %v16828_v57  ;;  %v14536_v57 = vld [vmem:[%s19513_s8 + $0x10] sm:$0xff] }
 0xb29   :  { %14256 = vmatprep.subr.mxu1 %v16835_v18 }
 0xb2a   :  { %14257 = vmatpush3.msra.mxu1 %v16835_v18  ;;  %v14537_v18 = vld [vmem:[%s19513_s8 + $0x8] sm:$0xff] }
 0xb2b   :  { %14258 = vmatprep.subr.mxu1 %v16840_v48 }
 0xb2c   :  { %14259 = vmatpush3.msra.mxu1 %v16840_v48  ;;  %v14538_v48 = vld [vmem:[%s19513_s8] sm:$0xff]  ;;  %s14604_s8 = smov 12  }
 0xb2d   :  { %14261 = vmatmul.mubr.msk.f32.vlgmr.msra.gmra.mxu1 %vm4940_vm1, %v6810_v17  ;;  %14263 = vmatprep.subr.msk.mxu1 %vm5123_vm4, %v14535_v39 }
 0xb2e   :  { %14264 = vmatpush3.msk.msra.mxu1 %vm5123_vm4, %v14535_v39  ;;  %14271 = vmatprep.mubr.msk.f32.mxu1 %vm4940_vm1, %v6891_v40  ;;  %vm7191_vm4 = vcmask 392192  }
 0xb2f   :  { %14265 = vmatprep.subr.mxu1 %v14536_v57 }
 0xb30   :  { %14266 = vmatpush3.msra.mxu1 %v14536_v57 }
 0xb31   :  { %14267 = vmatprep.subr.mxu1 %v14537_v18 }
 0xb32   :  { %14268 = vmatpush3.msra.mxu1 %v14537_v18 }
 0xb33   :  { %14269 = vmatprep.subr.mxu1 %v14538_v48 }
 0xb34   :  { %14270 = vmatpush3.msra.mxu1 %v14538_v48 }
 0xb35   :  { %14272 = vmatmul.mubr.msk.f32.vlgmr.msra.gmra.mxu1 %vm4940_vm1, %v6893_v41  ;;  %vm7178_vm1 = vcmask 97280  }
 0xb36   :  { %7077 = vmatprep.mubr.f32.mxu1 %v17005_v47 }
 0xb8b   :  { %v17387_v3 = vpop.f32.mrf.mxu1 }
 0xb8d   :  { %v17389_v43 = vpop.f32.mrf.mxu1 }
 0xb8f   :  { %v17391_v19 = vpop.f32.mrf.mxu1 }
 0xb91   :  { %v17393_v11 = vpop.f32.mrf.mxu1 }
 0xb93   :  { %v17395_v45 = vpop.f32.mrf.mxu1 }
 0xb95   :  { %v17397_v42 = vpop.f32.mrf.mxu1 }
 0xb97   :  { %v17399_v21 = vpop.f32.mrf.mxu1 }
 0xb99   :  { %v17401_v32 = vpop.f32.mrf.mxu1 }
 0xbc3   :  { %v17403_v58 = vpop.f32.mrf.mxu0 }
 0xbc4   :  { %6418 = vrot.lane.b32.xlu0 %v17403_v58, %s14593_s25 }
 0xbc5   :  { %v12094_v47 = vpop.f32.mrf.mxu1  ;;  %v17407_v1 = vpop.f32.mrf.mxu0 }
 0xbc6   :  { %6416 = vrot.lane.b32.xlu1 %v17407_v1, %s14593_s25 }
 0xbc7   :  { %v12095_v26 = vpop.f32.mrf.mxu1 }
 0xbc8   :  { %6412 = vrot.lane.b32.xlu0 %v17403_v58, %s14587_s5 }
 0xbc9   :  { %v12097_v35 = vpop.f32.mrf.mxu1 }
 0xbca   :  { %6410 = vrot.lane.b32.xlu1 %v17407_v1, %s14587_s5 }
 0xbcb   :  { %v12098_v8 = vpop.f32.mrf.mxu1 }
 0xbcc   :  { %v12099_v22 = vadd.f32 %v12098_v8, %v12097_v35  ;;  %6406 = vrot.lane.b32.xlu0 %v17403_v58, %s14594_s13  ;;  %v12040_v35 = vadd.f32 %v17389_v43, %v17387_v3  ;;  %v12096_v8 = vadd.f32 %v12095_v26, %v12094_v47  ;;  %v12043_v3 = vadd.f32 %v17393_v11, %v17391_v19 }
 0xbcd   :  { %v12100_v34 = vpop.f32.mrf.mxu1  ;;  %v12046_v43 = vadd.f32 %v17397_v42, %v17395_v45 }
 0xbce   :  { %6404 = vrot.lane.b32.xlu1 %v17407_v1, %s14594_s13 }
 0xbcf   :  { %v12101_v36 = vpop.f32.mrf.mxu1 }
 0xbd0   :  { %v12102_v59 = vadd.f32 %v12101_v36, %v12100_v34  ;;  %v12049_v34 = vadd.f32 %v17401_v32, %v17399_v21 }
 0xbd1   :  { %v12103_v44 = vpop.f32.mrf.mxu1 }
 0xbd3   :  { %v12104_v55 = vpop.f32.mrf.mxu1 }
 0xbd4   :  { %v12105_v5 = vadd.f32 %v12104_v55, %v12103_v44  ;;  %v14541_v55 = vld [vmem:[%s19511_s6 + $0x18] sm:$0xff] }
 0xbd5   :  { %v17419_v28 = vpop.f32.mrf.mxu1 }
 0xbd6   :  { %6398 = vrot.lane.b32.xlu0 %v17419_v28, %s14593_s25 }
 0xbd7   :  { %v17423_v39 = vpop.f32.mrf.mxu1 }
 0xbd8   :  { %6396 = vrot.lane.b32.xlu1 %v17423_v39, %s14593_s25 }
 0xbda   :  { %6392 = vrot.lane.b32.xlu0 %v17419_v28, %s14587_s5 }
 0xbdc   :  { %6390 = vrot.lane.b32.xlu1 %v17423_v39, %s14587_s5 }
 0xbdd   :  { %v17435_v24 = vpop.f32.mrf.mxu1 }
 0xbde   :  { %6386 = vrot.lane.b32.xlu0 %v17419_v28, %s14594_s13 }
 0xbdf   :  { %v17439_v33 = vpop.f32.mrf.mxu1 }
 0xbe0   :  { %6384 = vrot.lane.b32.xlu1 %v17423_v39, %s14594_s13 }
 0xbe2   :  { %6689 = vrot.lane.b32.xlu0 %v17435_v24, %s14593_s25 }
 0xbe5   :  { %v17443_v17 = vpop.f32.mrf.mxu1 }
 0xbe6   :  { %6687 = vrot.lane.b32.xlu0 %v17439_v33, %s14593_s25 }
 0xbe7   :  { %v17447_v40 = vpop.f32.mrf.mxu1 }
 0xbea   :  { %6709 = vrot.lane.b32.xlu0 %v17443_v17, %s14593_s25 }
 0xbed   :  { %v17449_v57 = vpop.f32.mrf.mxu1 }
 0xbee   :  { %6989 = vrot.lane.b32.xlu1 %v17449_v57, %s14593_s25  ;;  %6703 = vrot.lane.b32.xlu0 %v17443_v17, %s14587_s5 }
 0xbef   :  { %v17455_v18 = vpop.f32.mrf.mxu1 }
 0xbf2   :  { %6987 = vrot.lane.b32.xlu1 %v17455_v18, %s14593_s25  ;;  %6697 = vrot.lane.b32.xlu0 %v17443_v17, %s14594_s13 }
 0xbf5   :  { %v17461_v48 = vpop.f32.mrf.mxu1 }
 0xbf6   :  { %7009 = vrot.lane.b32.xlu1 %v17461_v48, %s14593_s25  ;;  %6707 = vrot.lane.b32.xlu0 %v17447_v40, %s14593_s25 }
 0xbf7   :  { %v17475_v41 = vpop.f32.mrf.mxu1 }
 0xbfa   :  { %7003 = vrot.lane.b32.xlu1 %v17461_v48, %s14587_s5  ;;  %6701 = vrot.lane.b32.xlu0 %v17447_v40, %s14587_s5 }
 0xbfe   :  { %6997 = vrot.lane.b32.xlu1 %v17461_v48, %s14594_s13  ;;  %6695 = vrot.lane.b32.xlu0 %v17447_v40, %s14594_s13 }
 0xc02   :  { %7007 = vrot.lane.b32.xlu1 %v17475_v41, %s14593_s25  ;;  %6683 = vrot.lane.b32.xlu0 %v17435_v24, %s14587_s5 }
 0xc06   :  { %7001 = vrot.lane.b32.xlu1 %v17475_v41, %s14587_s5  ;;  %6681 = vrot.lane.b32.xlu0 %v17439_v33, %s14587_s5 }
 0xc0a   :  { %6995 = vrot.lane.b32.xlu1 %v17475_v41, %s14594_s13  ;;  %6677 = vrot.lane.b32.xlu0 %v17435_v24, %s14594_s13 }
 0xc0e   :  { %6983 = vrot.lane.b32.xlu1 %v17449_v57, %s14587_s5  ;;  %6675 = vrot.lane.b32.xlu0 %v17439_v33, %s14594_s13 }
 0xc12   :  { %6981 = vrot.lane.b32.xlu1 %v17455_v18, %s14587_s5  ;;  %7102 = vrot.lane.b32.xlu0 %v12040_v35, %s14604_s8 }
 0xc16   :  { %6977 = vrot.lane.b32.xlu1 %v17449_v57, %s14594_s13  ;;  %7118 = vrot.lane.b32.xlu0 %v12096_v8, %s14602_s3 }
 0xc1a   :  { %6975 = vrot.lane.b32.xlu1 %v17455_v18, %s14594_s13  ;;  %7108 = vrot.lane.b32.xlu0 %v12049_v34, %s14604_s8 }
 0xc1e   :  { %7104 = vrot.lane.b32.xlu1 %v12043_v3, %s14604_s8 }
 0xc22   :  { %7120 = vrot.lane.b32.xlu1 %v12099_v22, %s14602_s3 }
 0xc26   :  { %7106 = vrot.lane.b32.xlu1 %v12046_v43, %s14604_s8 }
 0xc2a   :  { %7122 = vrot.lane.b32.xlu1 %v12102_v59, %s14602_s3  ;;  %v14540_v59 = vld [vmem:[%s19511_s6] sm:$0xff] }
 0xc2e   :  { %7124 = vrot.lane.b32.xlu1 %v12105_v5, %s14602_s3  ;;  %v14542_v5 = vld [vmem:[%s19511_s6 + $0x10] sm:$0xff] }
 0xc36   :  { %v6419_v21 = vpop.permute.xlu0 %6418 }
 0xc37   :  { %12118 = vmatprep.subr.mxu0 %v6419_v21 }
 0xc38   :  { %12119 = vmatpush3.msra.mxu0 %v17267_v7  ;;  %v17516_v32 = vpop.permute.xlu1 %6416 }
 0xc39   :  { %12120 = vmatprep.subr.mxu0 %v17516_v32 }
 0xc3a   :  { %v17519_v19 = vpop.permute.xlu0 %6412  ;;  %12121 = vmatpush3.msra.mxu0 %v17270_v37 }
 0xc3b   :  { %12122 = vmatprep.subr.mxu0 %v17519_v19 }
 0xc3c   :  { %12123 = vmatpush3.msra.mxu0 %v17273_v10  ;;  %v17524_v11 = vpop.permute.xlu1 %6410 }
 0xc3d   :  { %12124 = vmatprep.subr.mxu0 %v17524_v11 }
 0xc3e   :  { %v17527_v45 = vpop.permute.xlu0 %6406  ;;  %12125 = vmatpush3.msra.mxu0 %v17276_v56 }
 0xc3f   :  { %12126 = vmatprep.subr.mxu0 %v17527_v45 }
 0xc40   :  { %12127 = vmatpush3.msra.mxu0 %v17279_v61  ;;  %v17532_v7 = vpop.permute.xlu1 %6404 }
 0xc41   :  { %12128 = vmatprep.subr.mxu0 %v17532_v7 }
 0xc42   :  { %12129 = vmatpush3.msra.mxu0 %v17282_v54 }
 0xc43   :  { %12130 = vmatprep.subr.mxu0 %v17403_v58 }
 0xc44   :  { %12131 = vmatpush3.msra.mxu0 %v17191_v23 }
 0xc45   :  { %12132 = vmatprep.subr.mxu0 %v17407_v1 }
 0xc46   :  { %12133 = vmatpush3.msra.mxu0 %v17195_v31 }
 0xc48   :  { %v17540_v37 = vpop.permute.xlu0 %6398 }
 0xc49   :  { %12134 = vmatprep.subr.mxu0 %v17540_v37 }
 0xc4a   :  { %12135 = vmatpush3.msra.mxu0 %v17285_v52  ;;  %v17544_v10 = vpop.permute.xlu1 %6396 }
 0xc4b   :  { %12136 = vmatprep.subr.mxu0 %v17544_v10 }
 0xc4c   :  { %v17547_v56 = vpop.permute.xlu0 %6392  ;;  %12137 = vmatpush3.msra.mxu0 %v17289_v25 }
 0xc4d   :  { %12138 = vmatprep.subr.mxu0 %v17547_v56 }
 0xc4e   :  { %12139 = vmatpush3.msra.mxu0 %v17292_v63  ;;  %v17552_v23 = vpop.permute.xlu1 %6390 }
 0xc4f   :  { %12140 = vmatprep.subr.mxu0 %v17552_v23 }
 0xc50   :  { %v17555_v31 = vpop.permute.xlu0 %6386  ;;  %12141 = vmatpush3.msra.mxu0 %v17296_v14 }
 0xc51   :  { %12142 = vmatprep.subr.mxu0 %v17555_v31 }
 0xc52   :  { %12143 = vmatpush3.msra.mxu0 %v17299_v15  ;;  %v17560_v61 = vpop.permute.xlu1 %6384 }
 0xc53   :  { %12144 = vmatprep.subr.mxu0 %v17560_v61 }
 0xc54   :  { %v17563_v54 = vpop.permute.xlu0 %6689  ;;  %12145 = vmatpush3.msra.mxu0 %v17302_v29 }
 0xc55   :  { %12146 = vmatprep.subr.mxu0 %v17419_v28 }
 0xc56   :  { %12147 = vmatpush3.msra.mxu0 %v17187_v62 }
 0xc57   :  { %12148 = vmatprep.subr.mxu0 %v17423_v39 }
 0xc58   :  { %v17569_v52 = vpop.permute.xlu0 %6687  ;;  %12149 = vmatpush3.msra.mxu0 %v17189_v6 }
 0xc59   :  { %6487 = vmatmul.mubr.f32.vlgmr.msra.gmra.mxu0 %v17064_v46  ;;  %v14539_v46 = vld [vmem:[%s19511_s6 + $0x8] sm:$0xff] }
 0xc5a   :  { %6491 = vmatprep.mubr.f32.mxu0 %v17070_v27 }
 0xc5c   :  { %v6710_v25 = vpop.permute.xlu0 %6709 }
 0xc5d   :  { %6492 = vmatmul.mubr.f32.gmra.mxu0 %v17082_v49  ;;  %12174 = vmatprep.subr.mxu0 %v6710_v25 }
 0xc5e   :  { %12175 = vmatpush3.msra.mxu0 %v6419_v21  ;;  %6496 = vmatprep.mubr.f32.mxu0 %v17088_v50 }
 0xc60   :  { %v17576_v63 = vpop.permute.xlu1 %6989  ;;  %v6704_v62 = vpop.permute.xlu0 %6703 }
 0xc61   :  { %6497 = vmatmul.mubr.f32.gmra.mxu0 %v17097_v2 }
 0xc62   :  { %6501 = vmatprep.mubr.f32.mxu0 %v17103_v4 }
 0xc64   :  { %v17580_v14 = vpop.permute.xlu1 %6987  ;;  %v6698_v6 = vpop.permute.xlu0 %6697 }
 0xc65   :  { %6502 = vmatmul.mubr.f32.gmra.mxu0 %v17114_v20 }
 0xc66   :  { %6777 = vmatprep.mubr.f32.mxu0 %v14539_v46 }
 0xc68   :  { %v7010_v27 = vpop.permute.xlu1 %7009  ;;  %v6708_v49 = vpop.permute.xlu0 %6707 }
 0xc69   :  { %12230 = vmatprep.subr.mxu1 %v7010_v27  ;;  %12176 = vmatprep.subr.mxu0 %v6708_v49 }
 0xc6a   :  { %12231 = vmatpush3.msra.mxu1 %v6710_v25  ;;  %12177 = vmatpush3.msra.mxu0 %v17516_v32 }
 0xc6b   :  { %12178 = vmatprep.subr.mxu0 %v6704_v62 }
 0xc6c   :  { %v7004_v50 = vpop.permute.xlu1 %7003  ;;  %v6702_v2 = vpop.permute.xlu0 %6701  ;;  %12179 = vmatpush3.msra.mxu0 %v17519_v19 }
 0xc6d   :  { %12180 = vmatprep.subr.mxu0 %v6702_v2 }
 0xc6e   :  { %12181 = vmatpush3.msra.mxu0 %v17524_v11 }
 0xc6f   :  { %12182 = vmatprep.subr.mxu0 %v6698_v6 }
 0xc70   :  { %v6998_v4 = vpop.permute.xlu1 %6997  ;;  %v6696_v20 = vpop.permute.xlu0 %6695  ;;  %12183 = vmatpush3.msra.mxu0 %v17527_v45 }
 0xc71   :  { %12184 = vmatprep.subr.mxu0 %v6696_v20 }
 0xc72   :  { %12185 = vmatpush3.msra.mxu0 %v17532_v7 }
 0xc73   :  { %12186 = vmatprep.subr.mxu0 %v17443_v17 }
 0xc74   :  { %v7008_v15 = vpop.permute.xlu1 %7007  ;;  %v6684_v29 = vpop.permute.xlu0 %6683  ;;  %12187 = vmatpush3.msra.mxu0 %v17403_v58 }
 0xc75   :  { %12232 = vmatprep.subr.mxu1 %v7008_v15  ;;  %12188 = vmatprep.subr.mxu0 %v17447_v40 }
 0xc76   :  { %12233 = vmatpush3.msra.mxu1 %v6708_v49  ;;  %12189 = vmatpush3.msra.mxu0 %v17407_v1 }
 0xc77   :  { %12234 = vmatprep.subr.mxu1 %v7004_v50  ;;  %12190 = vmatprep.subr.mxu0 %v17563_v54 }
 0xc78   :  { %12235 = vmatpush3.msra.mxu1 %v6704_v62  ;;  %v7002_v42 = vpop.permute.xlu1 %7001  ;;  %v6682_v47 = vpop.permute.xlu0 %6681  ;;  %12191 = vmatpush3.msra.mxu0 %v17540_v37 }
 0xc79   :  { %12236 = vmatprep.subr.mxu1 %v7002_v42  ;;  %12192 = vmatprep.subr.mxu0 %v17569_v52 }
 0xc7a   :  { %12237 = vmatpush3.msra.mxu1 %v6702_v2  ;;  %12193 = vmatpush3.msra.mxu0 %v17544_v10 }
 0xc7b   :  { %12238 = vmatprep.subr.mxu1 %v6998_v4  ;;  %12194 = vmatprep.subr.mxu0 %v6684_v29 }
 0xc7c   :  { %12239 = vmatpush3.msra.mxu1 %v6698_v6  ;;  %v6996_v58 = vpop.permute.xlu1 %6995  ;;  %v6678_v26 = vpop.permute.xlu0 %6677  ;;  %12195 = vmatpush3.msra.mxu0 %v17547_v56 }
 0xc7d   :  { %12240 = vmatprep.subr.mxu1 %v6996_v58  ;;  %12196 = vmatprep.subr.mxu0 %v6682_v47 }
 0xc7e   :  { %12241 = vmatpush3.msra.mxu1 %v6696_v20  ;;  %12197 = vmatpush3.msra.mxu0 %v17552_v23 }
 0xc7f   :  { %12242 = vmatprep.subr.mxu1 %v17461_v48  ;;  %12198 = vmatprep.subr.mxu0 %v6678_v26 }
 0xc80   :  { %12243 = vmatpush3.msra.mxu1 %v17443_v17  ;;  %v6984_v1 = vpop.permute.xlu1 %6983  ;;  %v6676_v22 = vpop.permute.xlu0 %6675  ;;  %12199 = vmatpush3.msra.mxu0 %v17555_v31  ;;  %v14544_v17 = vld [vmem:[%s19511_s6 + $0x20] sm:$0xff] }
 0xc81   :  { %12244 = vmatprep.subr.mxu1 %v17475_v41  ;;  %12200 = vmatprep.subr.mxu0 %v6676_v22 }
 0xc82   :  { %12245 = vmatpush3.msra.mxu1 %v17447_v40  ;;  %12201 = vmatpush3.msra.mxu0 %v17560_v61  ;;  %v14545_v40 = vld [vmem:[%s19511_s6 + $0x38] sm:$0xff] }
 0xc83   :  { %12246 = vmatprep.subr.mxu1 %v17576_v63  ;;  %12202 = vmatprep.subr.mxu0 %v17435_v24 }
 0xc84   :  { %12247 = vmatpush3.msra.mxu1 %v17563_v54  ;;  %v6982_v36 = vpop.permute.xlu1 %6981  ;;  %12203 = vmatpush3.msra.mxu0 %v17419_v28  ;;  %v7103_v15 = vpop.permute.xlu0 %7102 }
 0xc85   :  { %12248 = vmatprep.subr.mxu1 %v17580_v14  ;;  %12204 = vmatprep.subr.mxu0 %v17439_v33 }
 0xc86   :  { %12249 = vmatpush3.msra.mxu1 %v17569_v52  ;;  %12205 = vmatpush3.msra.mxu0 %v17423_v39  ;;  %v14543_v39 = vld [vmem:[%s19511_s6 + $0x28] sm:$0xff] }
 0xc87   :  { %12250 = vmatprep.subr.mxu1 %v6984_v1  ;;  %6778 = vmatmul.mubr.f32.vlgmr.msra.gmra.mxu0 %v14540_v59 }
 0xc88   :  { %12251 = vmatpush3.msra.mxu1 %v6684_v29  ;;  %v6978_v44 = vpop.permute.xlu1 %6977  ;;  %6782 = vmatprep.mubr.f32.mxu0 %v14541_v55  ;;  %v7119_v42 = vpop.permute.xlu0 %7118 }
 0xc89   :  { %12252 = vmatprep.subr.mxu1 %v6982_v36 }
 0xc8a   :  { %12253 = vmatpush3.msra.mxu1 %v6682_v47 }
 0xc8b   :  { %12254 = vmatprep.subr.mxu1 %v6978_v44  ;;  %6783 = vmatmul.mubr.f32.gmra.mxu0 %v14542_v5 }
 0xc8c   :  { %12255 = vmatpush3.msra.mxu1 %v6678_v26  ;;  %v6976_v28 = vpop.permute.xlu1 %6975  ;;  %6787 = vmatprep.mubr.f32.mxu0 %v14543_v39  ;;  %v7109_v58 = vpop.permute.xlu0 %7108 }
 0xc8d   :  { %12256 = vmatprep.subr.mxu1 %v6976_v28  ;;  %v11984_v28 = vadd.f32 %v17173_v53, %v17171_v51 }
 0xc8e   :  { %12257 = vmatpush3.msra.mxu1 %v6676_v22 }
 0xc8f   :  { %12258 = vmatprep.subr.mxu1 %v17449_v57  ;;  %6788 = vmatmul.mubr.f32.gmra.mxu0 %v14544_v17  ;;  %v14546_v57 = vld [vmem:[%s19511_s6 + $0x30] sm:$0xff]  ;;  %s14605_s6 = smov 48  }
 0xc90   :  { %12259 = vmatpush3.msra.mxu1 %v17435_v24  ;;  %6792 = vmatprep.mubr.f32.mxu0 %v14545_v40  ;;  %v7105_v29 = vpop.permute.xlu1 %7104 }
 0xc91   :  { %12260 = vmatprep.subr.mxu1 %v17455_v18 }
 0xc92   :  { %12261 = vmatpush3.msra.mxu1 %v17439_v33 }
 0xc93   :  { %7078 = vmatmul.mubr.f32.vlgmr.msra.gmra.mxu1 %v14540_v59  ;;  %6793 = vmatmul.mubr.f32.gmra.mxu0 %v14546_v57 }
 0xc94   :  { %7082 = vmatprep.mubr.f32.mxu1 %v14541_v55  ;;  %v7121_v47 = vpop.permute.xlu1 %7120 }
 0xc97   :  { %7083 = vmatmul.mubr.f32.gmra.mxu1 %v14542_v5 }
 0xc98   :  { %7087 = vmatprep.mubr.f32.mxu1 %v14543_v39  ;;  %v7107_v26 = vpop.permute.xlu1 %7106 }
 0xc9b   :  { %7088 = vmatmul.mubr.f32.gmra.mxu1 %v14544_v17  ;;  %v7179_v17 = vsel %vm7178_vm1, %v11984_v28, %v7103_v15 }
 0xc9c   :  { %7092 = vmatprep.mubr.f32.mxu1 %v14545_v40  ;;  %v7123_v22 = vpop.permute.xlu1 %7122  ;;  %v7183_v40 = vsel %vm6808_vm3, %v7179_v17, %v7119_v42 }
 0xc9f   :  { %7093 = vmatmul.mubr.f32.gmra.mxu1 %v14546_v57  ;;  %v11987_v57 = vadd.f32 %v17177_v60, %v17175_v38  ;;  %v11990_v60 = vadd.f32 %v17181_v16, %v17179_v13  ;;  %v11993_v16 = vadd.f32 %v17185_v30, %v17183_v12 }
 0xca0   :  { %v7125_v59 = vpop.permute.xlu1 %7124 }
 0xd19   :  { %v12150_v24 = vpop.f32.mrf.mxu0 }
 0xd1b   :  { %v12151_v48 = vpop.f32.mrf.mxu0 }
 0xd1c   :  { %v12152_v41 = vadd.f32 %v12151_v48, %v12150_v24 }
 0xd1d   :  { %v12153_v35 = vpop.f32.mrf.mxu0 }
 0xd1e   :  { %7134 = vrot.lane.b32.xlu0 %v12152_v41, %s14589_s22 }
 0xd1f   :  { %v12154_v18 = vpop.f32.mrf.mxu0 }
 0xd20   :  { %v12155_v33 = vadd.f32 %v12154_v18, %v12153_v35  ;;  %v7180_v18 = vsel %vm7178_vm1, %v11987_v57, %v7105_v29 }
 0xd21   :  { %v12156_v8 = vpop.f32.mrf.mxu0  ;;  %v7184_v53 = vsel %vm6808_vm3, %v7180_v18, %v7121_v47 }
 0xd22   :  { %7136 = vrot.lane.b32.xlu1 %v12155_v33, %s14589_s22 }
 0xd23   :  { %v12157_v34 = vpop.f32.mrf.mxu0 }
 0xd24   :  { %v12158_v3 = vadd.f32 %v12157_v34, %v12156_v8 }
 0xd25   :  { %v12159_v43 = vpop.f32.mrf.mxu0 }
 0xd26   :  { %7138 = vrot.lane.b32.xlu0 %v12158_v3, %s14589_s22 }
 0xd27   :  { %v12160_v21 = vpop.f32.mrf.mxu0 }
 0xd28   :  { %v12161_v32 = vadd.f32 %v12160_v21, %v12159_v43  ;;  %v7181_v43 = vsel %vm7178_vm1, %v11990_v60, %v7107_v26  ;;  %v7200_v60 = vld [vmem:[%s19512_s7] sm:$0xff] }
 0xd2a   :  { %7140 = vrot.lane.b32.xlu1 %v12161_v32, %s14589_s22  ;;  %v7185_v32 = vsel %vm6808_vm3, %v7181_v43, %v7123_v22 }
 0xd47   :  { %v12206_v19 = vpop.f32.mrf.mxu0 }
 0xd49   :  { %v12207_v11 = vpop.f32.mrf.mxu0 }
 0xd4a   :  { %v12208_v45 = vadd.f32 %v12207_v11, %v12206_v19 }
 0xd4b   :  { %v12209_v7 = vpop.f32.mrf.mxu0 }
 0xd4c   :  { %7150 = vrot.lane.b32.xlu0 %v12208_v45, %s14605_s6 }
 0xd4d   :  { %v12210_v37 = vpop.f32.mrf.mxu0 }
 0xd4e   :  { %v12211_v10 = vadd.f32 %v12210_v37, %v12209_v7 }
 0xd4f   :  { %v12212_v56 = vpop.f32.mrf.mxu0 }
 0xd50   :  { %7152 = vrot.lane.b32.xlu0 %v12211_v10, %s14605_s6 }
 0xd51   :  { %v12213_v23 = vpop.f32.mrf.mxu0 }
 0xd52   :  { %v12214_v31 = vadd.f32 %v12213_v23, %v12212_v56  ;;  %v7182_v56 = vsel %vm7178_vm1, %v11993_v16, %v7109_v58 }
 0xd53   :  { %v12262_v61 = vpop.f32.mrf.mxu1  ;;  %v12215_v54 = vpop.f32.mrf.mxu0 }
 0xd54   :  { %7154 = vrot.lane.b32.xlu0 %v12214_v31, %s14605_s6  ;;  %v7186_v31 = vsel %vm6808_vm3, %v7182_v56, %v7125_v59 }
 0xd55   :  { %v12263_v52 = vpop.f32.mrf.mxu1  ;;  %v12216_v25 = vpop.f32.mrf.mxu0 }
 0xd56   :  { %v12264_v63 = vadd.f32 %v12263_v52, %v12262_v61  ;;  %v12217_v14 = vadd.f32 %v12216_v25, %v12215_v54 }
 0xd57   :  { %v12265_v62 = vpop.f32.mrf.mxu1 }
 0xd58   :  { %7166 = vrot.lane.b32.xlu1 %v12264_v63, %s14578_s18 }
 0xd59   :  { %v12266_v6 = vpop.f32.mrf.mxu1 }
 0xd5a   :  { %v12267_v46 = vadd.f32 %v12266_v6, %v12265_v62 }
 0xd5b   :  { %v12268_v27 = vpop.f32.mrf.mxu1 }
 0xd5c   :  { %7168 = vrot.lane.b32.xlu0 %v12267_v46, %s14578_s18  ;;  %7156 = vrot.lane.b32.xlu1 %v12217_v14, %s14605_s6 }
 0xd5d   :  { %v12269_v49 = vpop.f32.mrf.mxu1 }
 0xd5e   :  { %v12270_v50 = vadd.f32 %v12269_v49, %v12268_v27 }
 0xd5f   :  { %v12271_v2 = vpop.f32.mrf.mxu1 }
 0xd60   :  { %7170 = vrot.lane.b32.xlu0 %v12270_v50, %s14578_s18 }
 0xd61   :  { %v12272_v4 = vpop.f32.mrf.mxu1 }
 0xd62   :  { %v12273_v20 = vadd.f32 %v12272_v4, %v12271_v2 }
 0xd64   :  { %7172 = vrot.lane.b32.xlu1 %v12273_v20, %s14578_s18 }
 0xd90   :  { %v7135_v1 = vpop.permute.xlu0 %7134 }
 0xd91   :  { %v7187_v24 = vsel %vm4979_vm0, %v7183_v40, %v7135_v1 }
 0xd94   :  { %v7137_v55 = vpop.permute.xlu1 %7136 }
 0xd95   :  { %v7188_v8 = vsel %vm4979_vm0, %v7184_v53, %v7137_v55 }
 0xd98   :  { %v7139_v36 = vpop.permute.xlu0 %7138 }
 0xd99   :  { %v7189_v45 = vsel %vm4979_vm0, %v7185_v32, %v7139_v36 }
 0xd9c   :  { %v7141_v39 = vpop.permute.xlu1 %7140 }
 0xd9d   :  { %v7190_v54 = vsel %vm4979_vm0, %v7186_v31, %v7141_v39 }
 0xdbe   :  { %v7151_v44 = vpop.permute.xlu0 %7150 }
 0xdbf   :  { %v7192_v48 = vsel %vm7191_vm4, %v7187_v24, %v7151_v44 }
 0xdc2   :  { %v7153_v5 = vpop.permute.xlu0 %7152 }
 0xdc3   :  { %v7193_v34 = vsel %vm7191_vm4, %v7188_v8, %v7153_v5 }
 0xdc6   :  { %v7155_v41 = vpop.permute.xlu0 %7154 }
 0xdc7   :  { %v7194_v7 = vsel %vm7191_vm4, %v7189_v45, %v7155_v41 }
 0xdca   :  { %v7167_v35 = vpop.permute.xlu1 %7166 }
 0xdcb   :  { %v17658_v51 = vsel %vm4943_vm2, %v7192_v48, %v7167_v35 }
 0xdcc   :  { %v7205_v33 = vsel %vm7204_vm5, %v17658_v51, 0.0  ;;  %v7221_v38 = vmul.f32 %v17658_v51, %v17658_v51 }
 0xdcd   :  { %7206 = vadd.xlane.f32.xlu0 %v7205_v33 }
 0xdce   :  { %v7169_v3 = vpop.permute.xlu0 %7168  ;;  %v7225_v11 = vsel %vm7204_vm5, %v7221_v38, 0.0  ;;  %v7157_v37 = vpop.permute.xlu1 %7156 }
 0xdcf   :  { %v17671_v21 = vsel %vm4943_vm2, %v7193_v34, %v7169_v3  ;;  %v7195_v52 = vsel %vm7191_vm4, %v7190_v54, %v7157_v37  ;;  %v7201_v3 = vld [vmem:[%s19512_s7 + $0x8] sm:$0xff] }
 0xdd0   :  { %v7208_v19 = vsel %vm7204_vm5, %v17671_v21, 0.0  ;;  %v7222_v13 = vmul.f32 %v17671_v21, %v17671_v21  ;;  %v17725_v54 = vld [vmem:[%s19516_s11 + $0x8] sm:$0xf] }
 0xdd1   :  { %7209 = vadd.xlane.f32.xlu1 %v7208_v19  ;;  %7226 = vadd.xlane.f32.xlu0 %v7225_v11  ;;  %v7202_v11 = vld [vmem:[%s19512_s7 + $0x10] sm:$0xff] }
 0xdd2   :  { %v7171_v10 = vpop.permute.xlu0 %7170  ;;  %v7228_v12 = vsel %vm7204_vm5, %v7222_v13, 0.0 }
 0xdd3   :  { %v17685_v23 = vsel %vm4943_vm2, %v7194_v7, %v7171_v10  ;;  %v7203_v7 = vld [vmem:[%s19512_s7 + $0x18] sm:$0xff] }
 0xdd4   :  { %v7211_v61 = vsel %vm7204_vm5, %v17685_v23, 0.0  ;;  %v7223_v30 = vmul.f32 %v17685_v23, %v17685_v23 }
 0xdd5   :  { %7212 = vadd.xlane.f32.xlu1 %v7211_v61  ;;  %7229 = vadd.xlane.f32.xlu0 %v7228_v12 }
 0xdd6   :  { %v7173_v25 = vpop.permute.xlu1 %7172  ;;  %v7231_v62 = vsel %vm7204_vm5, %v7223_v30, 0.0 }
 0xdd7   :  { %v17696_v63 = vsel %vm4943_vm2, %v7195_v52, %v7173_v25  ;;  %vm7395_vm2 = vcmask 1043456   ;;  %v17736_v25 = vld [vmem:[%s19516_s11] sm:$0xff]  ;;  %s14606_s11 = smov 110  }
 0xdd8   :  { %v7214_v14 = vsel %vm7204_vm5, %v17696_v63, 0.0  ;;  %v7224_v6 = vmul.f32 %v17696_v63, %v17696_v63  ;;  %14274 = vmatprep.subr.msk.mxu0 %vm7395_vm2, %v17725_v54  ;;  %14304 = vmatprep.subr.msk.mxu1 %vm7395_vm2, %v17725_v54 }
 0xdd9   :  { %7232 = vadd.xlane.f32.xlu1 %v7231_v62  ;;  %7215 = vadd.xlane.f32.xlu0 %v7214_v14 }
 0xdda   :  { %v7234_v46 = vsel %vm7204_vm5, %v7224_v6, 0.0  ;;  %14275 = vmatpush3.msk.msra.mxu0 %vm7395_vm2, %v17725_v54  ;;  %14305 = vmatpush3.msk.msra.mxu1 %vm7395_vm2, %v17725_v54  ;;  %vm9375_vm5 = vcmask 80896  }
 0xddb   :  { %14276 = vmatprep.subr.mxu0 %v17736_v25  ;;  %14306 = vmatprep.subr.mxu1 %v17736_v25 }
 0xddc   :  { %14277 = vmatpush3.msra.mxu0 %v17736_v25  ;;  %14307 = vmatpush3.msra.mxu1 %v17736_v25 }
 0xddd   :  { %7235 = vadd.xlane.f32.xlu0 %v7234_v46  ;;  %14284 = vmatprep.subr.msk.mxu0 %vm7395_vm2, %v17725_v54 }
 0xe56   :  { %v7207_v27 = vpop.xlane.xlu0 %7206 }
 0xe57   :  { %v7217_v49 = vmul.f32 0.013888889, %v7207_v27 }
 0xe59   :  { %v7241_v4 = vmul.f32 %v7217_v49, %v7217_v49 }
 0xe5a   :  { %v7227_v50 = vpop.xlane.xlu0 %7226  ;;  %v7210_v2 = vpop.xlane.xlu1 %7209 }
 0xe5b   :  { %v7237_v20 = vmul.f32 0.013888889, %v7227_v50  ;;  %v7218_v15 = vmul.f32 0.013888889, %v7210_v2 }
 0xe5d   :  { %v7245_v29 = vsub.f32 %v7237_v20, %v7241_v4  ;;  %v7242_v26 = vmul.f32 %v7218_v15, %v7218_v15 }
 0xe5e   :  { %v7230_v42 = vpop.xlane.xlu0 %7229  ;;  %v7213_v47 = vpop.xlane.xlu1 %7212 }
 0xe5f   :  { %v7249_v58 = vmax.f32 %v7245_v29, 0.0  ;;  %v7238_v1 = vmul.f32 0.013888889, %v7230_v42  ;;  %v7219_v22 = vmul.f32 0.013888889, %v7213_v47 }
 0xe61   :  { %v7253_v36 = vadd.f32 1e-05, %v7249_v58  ;;  %v7246_v59 = vsub.f32 %v7238_v1, %v7242_v26  ;;  %v7243_v44 = vmul.f32 %v7219_v22, %v7219_v22 }
 0xe62   :  { %v7216_v55 = vpop.xlane.xlu0 %7215  ;;  %v7233_v5 = vpop.xlane.xlu1 %7232 }
 0xe63   :  { %14501 = vrsqrt.f32 %v7253_v36  ;;  %v7250_v28 = vmax.f32 %v7246_v59, 0.0  ;;  %v7220_v39 = vmul.f32 0.013888889, %v7216_v55  ;;  %v7239_v17 = vmul.f32 0.013888889, %v7233_v5 }
 0xe65   :  { %v7254_v40 = vadd.f32 1e-05, %v7250_v28  ;;  %v7247_v57 = vsub.f32 %v7239_v17, %v7243_v44  ;;  %v7244_v48 = vmul.f32 %v7220_v39, %v7220_v39 }
 0xe66   :  { %v7236_v24 = vpop.xlane.xlu0 %7235 }
 0xe67   :  { %14503 = vrsqrt.f32 %v7254_v40  ;;  %v7251_v41 = vmax.f32 %v7247_v57, 0.0  ;;  %v7240_v35 = vmul.f32 0.013888889, %v7236_v24 }
 0xe69   :  { %v7255_v18 = vadd.f32 1e-05, %v7251_v41  ;;  %v7248_v53 = vsub.f32 %v7240_v35, %v7244_v48 }
 0xe6b   :  { %14505 = vrsqrt.f32 %v7255_v18  ;;  %v7252_v33 = vmax.f32 %v7248_v53, 0.0 }
 0xe6d   :  { %v7256_v38 = vadd.f32 1e-05, %v7252_v33 }
 0xe6f   :  { %14507 = vrsqrt.f32 %v7256_v38 }
 0xe70   :  { %v14502_v8 = vpop.eup %14501 }
 0xe71   :  { %v7261_v34 = vmul.f32 %v14502_v8, %v7200_v60 }
 0xe73   :  { %v7265_v43 = vmul.f32 %v7261_v34, %v7217_v49 }
 0xe74   :  { %v14504_v32 = vpop.eup %14503 }
 0xe75   :  { %7273 = vrot.lane.b32.xlu1 %v7265_v43, %s14590_s1  ;;  %v7262_v19 = vmul.f32 %v14504_v32, %v7201_v3 }
 0xe77   :  { %v7266_v13 = vmul.f32 %v7262_v19, %v7218_v15 }
 0xe78   :  { %v14506_v16 = vpop.eup %14505 }
 0xe79   :  { %7275 = vrot.lane.b32.xlu0 %v7266_v13, %s14590_s1  ;;  %v7263_v45 = vmul.f32 %v14506_v16, %v7202_v11 }
 0xe7b   :  { %v7267_v37 = vmul.f32 %v7263_v45, %v7219_v22 }
 0xe7c   :  { %v14508_v10 = vpop.eup %14507 }
 0xe7d   :  { %7291 = vperm.xlu0 %14484, %v7261_v34   ;;  %7277 = vrot.lane.b32.xlu1 %v7267_v37, %s14590_s1  ;;  %v7264_v56 = vmul.f32 %v14508_v10, %v7203_v7  ;;  %v17911_v10 = vld [vmem:[%s19514_s9 + $0x8] sm:$0xff] }
 0xe7f   :  { %v7268_v31 = vmul.f32 %v7264_v56, %v7220_v39 }
 0xe81   :  { %7279 = vrot.lane.b32.xlu1 %v7268_v31, %s14590_s1  ;;  %14488 = vset.pattern.permute.xlu0 %v19525_v0 }
 0xe85   :  { %7296 = vperm.xlu1 %14485, %v7262_v19  }
 0xe89   :  { %7301 = vperm.xlu1 %14485, %v7263_v45  }
 0xe8d   :  { %14486 = vset.pattern.permute.xlu1 %v19525_v0 }
 0xee7   :  { %v7274_v61 = vpop.permute.xlu1 %7273 }
 0xee8   :  { %v7285_v12 = vsub.f32 %v7200_v60, %v7274_v61 }
 0xeea   :  { %7315 = vperm.xlu1 %14486, %v7285_v12  }
 0xeeb   :  { %v7276_v30 = vpop.permute.xlu0 %7275 }
 0xeec   :  { %v7286_v52 = vsub.f32 %v7201_v3, %v7276_v30 }
 0xeee   :  { %7320 = vperm.xlu0 %14488, %v7286_v52   ;;  %14487 = vset.pattern.permute.xlu1 %v19523_v9 }
 0xeef   :  { %7306 = vperm.xlu1 %14487, %v7264_v56   ;;  %v7278_v62 = vpop.permute.xlu1 %7277 }
 0xef0   :  { %v7287_v14 = vsub.f32 %v7202_v11, %v7278_v62 }
 0xef2   :  { %7325 = vperm.xlu0 %14488, %v7287_v14  }
 0xef3   :  { %v7280_v6 = vpop.permute.xlu1 %7279  ;;  %14489 = vset.pattern.permute.xlu1 %v19525_v0  ;;  %v18161_v0 = vld [vmem:[%s19514_s9 + $0xe0] sm:$0xff] }
 0xef4   :  { %v7288_v46 = vsub.f32 %v7203_v7, %v7280_v6  ;;  %19597 = vst [vmem:[#allocation28_spill] sm:$0xff] %v18161_v0 }
 0xef6   :  { %7330 = vperm.xlu1 %14489, %v7288_v46   ;;  %14490 = vset.pattern.permute.xlu0 %v19523_v9  ;;  %v17955_v46 = vld [vmem:[%s19514_s9 + $0x18] sm:$0xff] }
 0xef8   :  { %v7292_v49 = vpop.permute.xlu0 %7291 }
 0xef9   :  { %v7309_v2 = vmul.f32 %v7292_v49, %v17658_v51 }
 0xefa   :  { %14491 = vset.pattern.permute.xlu1 %v19523_v9  ;;  %v18151_v9 = vld [vmem:[%s19514_s9 + $0xe8] sm:$0xff] }
 0xefb   :  { %19596 = vst [vmem:[#allocation27_spill] sm:$0xff] %v18151_v9 }
 0xf00   :  { %v7297_v27 = vpop.permute.xlu1 %7296 }
 0xf01   :  { %v7310_v15 = vmul.f32 %v7297_v27, %v17671_v21 }
 0xf04   :  { %v7302_v50 = vpop.permute.xlu1 %7301 }
 0xf05   :  { %v7311_v26 = vmul.f32 %v7302_v50, %v17685_v23 }
 0xf65   :  { %v7316_v4 = vpop.permute.xlu1 %7315 }
 0xf66   :  { %v7333_v20 = vadd.f32 %v7316_v4, %v7309_v2 }
 0xf68   :  { %vm7337_vm0 = vcmp.ge.f32.partialorder %v7333_v20, 0.0  ;;  %v7341_v29 = vmul.f32 0.2, %v7333_v20 }
 0xf69   :  { %v7321_v42 = vpop.permute.xlu0 %7320 }
 0xf6a   :  { %v17752_v47 = vsel %vm7337_vm0, %v7333_v20, %v7341_v29  ;;  %v7334_v58 = vadd.f32 %v7321_v42, %v7310_v15  ;;  %v7307_v21 = vpop.permute.xlu1 %7306  ;;  %vm11074_vm0 = vcmask 8192  }
 0xf6b   :  { %7585 = vrot.lane.b32.xlu1 %v17752_v47, %s14587_s5  ;;  %7484 = vrot.lane.b32.xlu0 %v17752_v47, %s14594_s13  ;;  %v7312_v59 = vmul.f32 %v7307_v21, %v17696_v63 }
 0xf6c   :  { %vm7338_vm6 = vcmp.ge.f32.partialorder %v7334_v58, 0.0  ;;  %v7342_v51 = vmul.f32 0.2, %v7334_v58  ;;  %14278 = vmatprep.mubr.msk.f32.mxu0 %vm7178_vm1, %v17752_v47 }
 0xf6d   :  { %v7326_v1 = vpop.permute.xlu0 %7325 }
 0xf6e   :  { %v17761_v22 = vsel %vm7338_vm6, %v7334_v58, %v7342_v51  ;;  %v7335_v36 = vadd.f32 %v7326_v1, %v7311_v26 }
 0xf6f   :  { %7486 = vrot.lane.b32.xlu1 %v17761_v22, %s14594_s13  ;;  %7686 = vrot.lane.b32.xlu0 %v17752_v47, %s14593_s25 }
 0xf70   :  { %vm7339_vm7 = vcmp.ge.f32.partialorder %v7335_v36, 0.0  ;;  %v7343_v23 = vmul.f32 0.2, %v7335_v36  ;;  %14279 = vmatmul.mubr.msk.f32.vlgmr.msra.gmra.mxu0 %vm7178_vm1, %v17761_v22 }
 0xf71   :  { %v7331_v44 = vpop.permute.xlu1 %7330  ;;  %14285 = vmatpush3.msk.msra.mxu0 %vm7395_vm2, %v17725_v54 }
 0xf72   :  { %v17772_v55 = vsel %vm7339_vm7, %v7335_v36, %v7343_v23  ;;  %v7336_v5 = vadd.f32 %v7331_v44, %v7312_v59  ;;  %14286 = vmatprep.subr.mxu0 %v17736_v25 }
 0xf73   :  { %7587 = vrot.lane.b32.xlu1 %v17761_v22, %s14587_s5  ;;  %7688 = vrot.lane.b32.xlu0 %v17761_v22, %s14593_s25 }
 0xf74   :  { %vm7340_vm8 = vcmp.ge.f32.partialorder %v7336_v5, 0.0  ;;  %v7344_v63 = vmul.f32 0.2, %v7336_v5  ;;  %14281 = vmatprep.mubr.msk.f32.mxu0 %vm7178_vm1, %v17772_v55  ;;  %14287 = vmatpush3.msra.mxu0 %v17736_v25 }
 0xf75   :  { %14294 = vmatprep.subr.msk.mxu0 %vm7395_vm2, %v17725_v54 }
 0xf76   :  { %v17784_v28 = vsel %vm7340_vm8, %v7336_v5, %v7344_v63 }
 0xf77   :  { %7488 = vrot.lane.b32.xlu0 %v17772_v55, %s14594_s13  ;;  %7490 = vrot.lane.b32.xlu1 %v17784_v28, %s14594_s13 }
 0xf78   :  { %14282 = vmatmul.mubr.msk.f32.gmra.mxu0 %vm7178_vm1, %v17784_v28 }
 0xf7b   :  { %7690 = vrot.lane.b32.xlu0 %v17772_v55, %s14593_s25  ;;  %7589 = vrot.lane.b32.xlu1 %v17772_v55, %s14587_s5 }
 0xf7f   :  { %7692 = vrot.lane.b32.xlu0 %v17784_v28, %s14593_s25  ;;  %7591 = vrot.lane.b32.xlu1 %v17784_v28, %s14587_s5  ;;  %s14547_s5 = scalar_lea.vmem %s11096_s21, 64 }
 0xf80   :  { %p14548_p0 = scmp.ne.s32.totalorder %s11096_s21, %s14547_s5  ;;  %p14553_p2 = scmp.lt.s32.totalorder %s14547_s5, %s14547_s5 }
 0xf82   :  { %p14554_p3 = por %p14553_p2, %p14552_p1 }
 0xf84   :  { %p14555_p4 = pnand %p14554_p3, %p14548_p0 }
 0xfdd   :  { %v7485_v39 = vpop.permute.xlu0 %7484  ;;  %v7586_v17 = vpop.permute.xlu1 %7585 }
 0xfde   :  { %14288 = vmatprep.mubr.msk.f32.mxu0 %vm7178_vm1, %v7485_v39 }
 0xfe1   :  { %v7687_v40 = vpop.permute.xlu0 %7686  ;;  %v7487_v57 = vpop.permute.xlu1 %7486 }
 0xfe2   :  { %14289 = vmatmul.mubr.msk.f32.vlgmr.msra.gmra.mxu0 %vm7178_vm1, %v7487_v57  ;;  %14308 = vmatprep.mubr.msk.f32.mxu1 %vm7178_vm1, %v7687_v40 }
 0xfe3   :  { %14295 = vmatpush3.msk.msra.mxu0 %vm7395_vm2, %v17725_v54 }
 0xfe4   :  { %14296 = vmatprep.subr.mxu0 %v17736_v25 }
 0xfe5   :  { %v7689_v24 = vpop.permute.xlu0 %7688  ;;  %v7588_v48 = vpop.permute.xlu1 %7587  ;;  %14297 = vmatpush3.msra.mxu0 %v17736_v25 }
 0xfe6   :  { %14309 = vmatmul.mubr.msk.f32.vlgmr.msra.gmra.mxu1 %vm7178_vm1, %v7689_v24 }
 0xfe9   :  { %v7489_v41 = vpop.permute.xlu0 %7488  ;;  %v7491_v35 = vpop.permute.xlu1 %7490 }
 0xfea   :  { %14291 = vmatprep.mubr.msk.f32.mxu0 %vm7178_vm1, %v7489_v41 }
 0xfeb   :  { %14292 = vmatmul.mubr.msk.f32.gmra.mxu0 %vm7178_vm1, %v7491_v35 }
 0xfec   :  { %14298 = vmatprep.mubr.msk.f32.mxu0 %vm7178_vm1, %v7586_v17 }
 0xfed   :  { %v7691_v18 = vpop.permute.xlu0 %7690  ;;  %v7590_v53 = vpop.permute.xlu1 %7589 }
 0xfee   :  { %14311 = vmatprep.mubr.msk.f32.mxu1 %vm7178_vm1, %v7691_v18  ;;  %v18042_v18 = vld [vmem:[%s19514_s9] sm:$0xff] }
 0xfef   :  { %14299 = vmatmul.mubr.msk.f32.vlgmr.msra.gmra.mxu0 %vm7178_vm1, %v7588_v48  ;;  %19583 = vst [vmem:[#allocation14_spill] sm:$0xff] %v18042_v18 }
 0xff0   :  { %14301 = vmatprep.mubr.msk.f32.mxu0 %vm7178_vm1, %v7590_v53 }
 0xff1   :  { %v7693_v33 = vpop.permute.xlu0 %7692  ;;  %v7592_v38 = vpop.permute.xlu1 %7591 }
 0xff2   :  { %14312 = vmatmul.mubr.msk.f32.gmra.mxu1 %vm7178_vm1, %v7693_v33  ;;  %v18050_v33 = vld [vmem:[%s19514_s9 + $0x28] sm:$0xff] }
 0xff3   :  { %14302 = vmatmul.mubr.msk.f32.gmra.mxu0 %vm7178_vm1, %v7592_v38  ;;  %8116 = vmatprep.mubr.f32.mxu1 %v17955_v46  ;;  %19584 = vst [vmem:[#allocation15_spill] sm:$0xff] %v18050_v33  ;;  %v18060_v38 = vld [vmem:[%s19514_s9 + $0x20] sm:$0xff] }
 0xff4   :  { %8011 = vmatprep.mubr.f32.mxu0 %v17911_v10  ;;  %19585 = vst [vmem:[#allocation16_spill] sm:$0xff] %v18060_v38 }
0x1030   :  { %v17816_v60 = vpop.f32.mrf.mxu0 }
0x1031   :  { %7817 = vrot.lane.b32.xlu0 %v17816_v60, %s14606_s11 }
0x1032   :  { %v17822_v8 = vpop.f32.mrf.mxu0 }
0x1035   :  { %7805 = vrot.lane.b32.xlu0 %v17816_v60, %s14594_s13 }
0x1038   :  { %v17828_v34 = vpop.f32.mrf.mxu0 }
0x1039   :  { %7815 = vrot.lane.b32.xlu0 %v17822_v8, %s14606_s11 }
0x103a   :  { %v17836_v3 = vpop.f32.mrf.mxu0 }
0x103d   :  { %7803 = vrot.lane.b32.xlu0 %v17822_v8, %s14594_s13 }
0x1041   :  { %7821 = vrot.lane.b32.xlu0 %v17828_v34, %s14606_s11 }
0x1045   :  { %7809 = vrot.lane.b32.xlu0 %v17828_v34, %s14594_s13 }
0x1049   :  { %7797 = vrot.lane.b32.xlu0 %v17828_v34, %s14603_s20 }
0x104d   :  { %7819 = vrot.lane.b32.xlu0 %v17836_v3, %s14606_s11 }
0x1051   :  { %7807 = vrot.lane.b32.xlu0 %v17836_v3, %s14594_s13 }
0x1055   :  { %7795 = vrot.lane.b32.xlu0 %v17836_v3, %s14603_s20 }
0x10a2   :  { %v17844_v43 = vpop.f32.mrf.mxu0 }
0x10a3   :  { %7857 = vrot.lane.b32.xlu0 %v17844_v43, %s14606_s11  ;;  %v7818_v31 = vpop.permute.xlu0 %7817 }
0x10a4   :  { %v17854_v19 = vpop.f32.mrf.mxu0 }
0x10a6   :  { %v17848_v32 = vpop.f32.mrf.mxu1 }
0x10a7   :  { %7937 = vrot.lane.b32.xlu1 %v17848_v32, %s14606_s11  ;;  %7845 = vrot.lane.b32.xlu0 %v17844_v43, %s14594_s13  ;;  %v7806_v61 = vpop.permute.xlu0 %7805 }
0x10a8   :  { %v17860_v11 = vpop.f32.mrf.mxu1 }
0x10ab   :  { %7925 = vrot.lane.b32.xlu1 %v17848_v32, %s14594_s13  ;;  %7855 = vrot.lane.b32.xlu0 %v17854_v19, %s14606_s11  ;;  %v17866_v13 = vpop.f32.mrf.mxu0  ;;  %v7816_v30 = vpop.permute.xlu0 %7815 }
0x10ad   :  { %v17882_v45 = vpop.f32.mrf.mxu0 }
0x10af   :  { %7935 = vrot.lane.b32.xlu1 %v17860_v11, %s14606_s11  ;;  %7843 = vrot.lane.b32.xlu0 %v17854_v19, %s14594_s13  ;;  %v17906_v37 = vpop.f32.mrf.mxu0  ;;  %v7804_v52 = vpop.permute.xlu0 %7803 }
0x10b1   :  { %v17922_v56 = vpop.f32.mrf.mxu0 }
0x10b2   :  { %v17872_v16 = vpop.f32.mrf.mxu1  ;;  %19577 = vst [vmem:[#allocation8_spill] sm:$0xff] %v17922_v56 }
0x10b3   :  { %7923 = vrot.lane.b32.xlu1 %v17860_v11, %s14594_s13  ;;  %7861 = vrot.lane.b32.xlu0 %v17866_v13, %s14606_s11  ;;  %19575 = vst [vmem:[#allocation6_spill] sm:$0xff] %v17872_v16  ;;  %v17930_v12 = vpop.f32.mrf.mxu0  ;;  %v7822_v14 = vpop.permute.xlu0 %7821 }
0x10b4   :  { %v17892_v7 = vpop.f32.mrf.mxu1 }
0x10b5   :  { %19576 = vst [vmem:[#allocation7_spill] sm:$0xff] %v17892_v7  ;;  %v17942_v62 = vpop.f32.mrf.mxu0 }
0x10b7   :  { %7941 = vrot.lane.b32.xlu1 %v17872_v16, %s14606_s11  ;;  %7849 = vrot.lane.b32.xlu0 %v17866_v13, %s14594_s13  ;;  %v7810_v6 = vpop.permute.xlu0 %7809 }
0x10bb   :  { %7929 = vrot.lane.b32.xlu1 %v17872_v16, %s14594_s13  ;;  %7837 = vrot.lane.b32.xlu0 %v17866_v13, %s14603_s20  ;;  %v7798_v27 = vpop.permute.xlu0 %7797 }
0x10bf   :  { %7917 = vrot.lane.b32.xlu1 %v17872_v16, %s14603_s20  ;;  %7859 = vrot.lane.b32.xlu0 %v17882_v45, %s14606_s11  ;;  %v7820_v49 = vpop.permute.xlu0 %7819 }
0x10c3   :  { %7913 = vrot.lane.b32.xlu1 %v17848_v32, %s14603_s20  ;;  %7833 = vrot.lane.b32.xlu0 %v17844_v43, %s14603_s20  ;;  %v7808_v50 = vpop.permute.xlu0 %7807 }
0x10c7   :  { %7939 = vrot.lane.b32.xlu1 %v17892_v7, %s14606_s11  ;;  %7847 = vrot.lane.b32.xlu0 %v17882_v45, %s14594_s13  ;;  %v7796_v2 = vpop.permute.xlu0 %7795 }
0x10cb   :  { %7927 = vrot.lane.b32.xlu1 %v17892_v7, %s14594_s13  ;;  %7793 = vrot.lane.b32.xlu0 %v17816_v60, %s14603_s20 }
0x10cf   :  { %7915 = vrot.lane.b32.xlu1 %v17892_v7, %s14603_s20  ;;  %7835 = vrot.lane.b32.xlu0 %v17882_v45, %s14603_s20 }
0x10d3   :  { %7831 = vrot.lane.b32.xlu0 %v17854_v19, %s14603_s20  ;;  %7897 = vrot.lane.b32.xlu1 %v17906_v37, %s14606_s11 }
0x10d7   :  { %7791 = vrot.lane.b32.xlu0 %v17822_v8, %s14603_s20  ;;  %7885 = vrot.lane.b32.xlu1 %v17906_v37, %s14594_s13 }
0x10db   :  { %8157 = vrot.lane.b32.xlu0 %v17752_v47, %s14607_s26  ;;  %7895 = vrot.lane.b32.xlu1 %v17922_v56, %s14606_s11 }
0x10df   :  { %8161 = vrot.lane.b32.xlu0 %v17772_v55, %s14607_s26  ;;  %7883 = vrot.lane.b32.xlu1 %v17922_v56, %s14594_s13 }
0x10e3   :  { %8508 = vrot.lane.b32.xlu0 %v17752_v47, %s14573_s23  ;;  %7901 = vrot.lane.b32.xlu1 %v17930_v12, %s14606_s11 }
0x10e7   :  { %8512 = vrot.lane.b32.xlu0 %v17772_v55, %s14573_s23  ;;  %7889 = vrot.lane.b32.xlu1 %v17930_v12, %s14594_s13 }
0x10eb   :  { %7877 = vrot.lane.b32.xlu1 %v17930_v12, %s14603_s20 }
0x10ef   :  { %7899 = vrot.lane.b32.xlu1 %v17942_v62, %s14606_s11 }
0x10f3   :  { %7873 = vrot.lane.b32.xlu1 %v17906_v37, %s14603_s20 }
0x10f7   :  { %7887 = vrot.lane.b32.xlu1 %v17942_v62, %s14594_s13 }
0x10fb   :  { %7911 = vrot.lane.b32.xlu1 %v17860_v11, %s14603_s20 }
0x10ff   :  { %7875 = vrot.lane.b32.xlu1 %v17942_v62, %s14603_s20 }
0x1103   :  { %7871 = vrot.lane.b32.xlu1 %v17922_v56, %s14603_s20 }
0x1107   :  { %8159 = vrot.lane.b32.xlu1 %v17761_v22, %s14607_s26 }
0x110b   :  { %8163 = vrot.lane.b32.xlu1 %v17784_v28, %s14607_s26 }
0x110f   :  { %8510 = vrot.lane.b32.xlu1 %v17761_v22, %s14573_s23 }
0x1113   :  { %8514 = vrot.lane.b32.xlu1 %v17784_v28, %s14573_s23 }
0x1115   :  { %v17968_v4 = vpop.permute.xlu0 %7857 }
0x1119   :  { %v17970_v20 = vpop.permute.xlu0 %7845  ;;  %v17972_v15 = vpop.permute.xlu1 %7937 }
0x111d   :  { %v17974_v29 = vpop.permute.xlu0 %7855  ;;  %v17976_v42 = vpop.permute.xlu1 %7925 }
0x111e   :  { %19578 = vst [vmem:[#allocation9_spill] sm:$0xff] %v17976_v42 }
0x1121   :  { %v17978_v47 = vpop.permute.xlu0 %7843  ;;  %v17980_v58 = vpop.permute.xlu1 %7935 }
0x1125   :  { %v17982_v26 = vpop.permute.xlu0 %7861  ;;  %v17984_v51 = vpop.permute.xlu1 %7923 }
0x1126   :  { %19579 = vst [vmem:[#allocation10_spill] sm:$0xff] %v17984_v51  ;;  %12298 = vmatprep.subr.mxu0 %v17982_v26 }
0x1127   :  { %12299 = vmatpush3.msra.mxu0 %v7822_v14  ;;  %v18108_v14 = vld [vmem:[%s19514_s9 + $0x80] sm:$0xff] }
0x1128   :  { %19591 = vst [vmem:[#allocation22_spill] sm:$0xff] %v18108_v14 }
0x1129   :  { %v17987_v21 = vpop.permute.xlu0 %7849  ;;  %v17989_v1 = vpop.permute.xlu1 %7941 }
0x112a   :  { %12354 = vmatprep.subr.mxu1 %v17989_v1 }
0x112d   :  { %v17992_v22 = vpop.permute.xlu0 %7837  ;;  %v17994_v36 = vpop.permute.xlu1 %7929 }
0x112e   :  { %19580 = vst [vmem:[#allocation11_spill] sm:$0xff] %v17994_v36 }
0x1131   :  { %v17996_v59 = vpop.permute.xlu0 %7859  ;;  %v17998_v23 = vpop.permute.xlu1 %7917 }
0x1132   :  { %12300 = vmatprep.subr.mxu0 %v17996_v59 }
0x1133   :  { %12301 = vmatpush3.msra.mxu0 %v7820_v49  ;;  %v18125_v49 = vld [vmem:[%s19514_s9 + $0xa0] sm:$0xff] }
0x1134   :  { %12302 = vmatprep.subr.mxu0 %v17968_v4  ;;  %19593 = vst [vmem:[#allocation24_spill] sm:$0xff] %v18125_v49 }
0x1135   :  { %12303 = vmatpush3.msra.mxu0 %v7818_v31  ;;  %v18002_v44 = vpop.permute.xlu0 %7833  ;;  %v18004_v55 = vpop.permute.xlu1 %7913  ;;  %v18087_v31 = vld [vmem:[%s19514_s9 + $0x68] sm:$0xff] }
0x1136   :  { %12304 = vmatprep.subr.mxu0 %v17974_v29  ;;  %19588 = vst [vmem:[#allocation19_spill] sm:$0xff] %v18087_v31 }
0x1137   :  { %12305 = vmatpush3.msra.mxu0 %v7816_v30 }
0x1138   :  { %12306 = vmatprep.subr.mxu0 %v17987_v21 }
0x1139   :  { %12307 = vmatpush3.msra.mxu0 %v7810_v6  ;;  %v18008_v5 = vpop.permute.xlu0 %7847  ;;  %v18010_v63 = vpop.permute.xlu1 %7939 }
0x113a   :  { %12308 = vmatprep.subr.mxu0 %v18008_v5 }
0x113b   :  { %12309 = vmatpush3.msra.mxu0 %v7808_v50 }
0x113c   :  { %12310 = vmatprep.subr.mxu0 %v17970_v20 }
0x113d   :  { %12311 = vmatpush3.msra.mxu0 %v7806_v61  ;;  %v7794_v28 = vpop.permute.xlu0 %7793  ;;  %v18014_v39 = vpop.permute.xlu1 %7927  ;;  %v18094_v61 = vld [vmem:[%s19514_s9 + $0x60] sm:$0xff] }
0x113e   :  { %19581 = vst [vmem:[#allocation12_spill] sm:$0xff] %v18014_v39  ;;  %12312 = vmatprep.subr.mxu0 %v17978_v47  ;;  %19589 = vst [vmem:[#allocation20_spill] sm:$0xff] %v18094_v61 }
0x113f   :  { %12313 = vmatpush3.msra.mxu0 %v7804_v52  ;;  %v18101_v52 = vld [vmem:[%s19514_s9 + $0x88] sm:$0xff] }
0x1140   :  { %12314 = vmatprep.subr.mxu0 %v17992_v22  ;;  %19590 = vst [vmem:[#allocation21_spill] sm:$0xff] %v18101_v52 }
0x1141   :  { %12315 = vmatpush3.msra.mxu0 %v7798_v27  ;;  %v18018_v17 = vpop.permute.xlu0 %7835  ;;  %v18020_v40 = vpop.permute.xlu1 %7915  ;;  %v18115_v27 = vld [vmem:[%s19514_s9 + $0xa8] sm:$0xff] }
0x1142   :  { %19582 = vst [vmem:[#allocation13_spill] sm:$0xff] %v18020_v40  ;;  %12316 = vmatprep.subr.mxu0 %v18018_v17  ;;  %19592 = vst [vmem:[#allocation23_spill] sm:$0xff] %v18115_v27 }
0x1143   :  { %12317 = vmatpush3.msra.mxu0 %v7796_v2  ;;  %v18133_v2 = vld [vmem:[%s19514_s9 + $0xc8] sm:$0xff] }
0x1144   :  { %12318 = vmatprep.subr.mxu0 %v18002_v44  ;;  %19594 = vst [vmem:[#allocation25_spill] sm:$0xff] %v18133_v2 }
0x1145   :  { %12319 = vmatpush3.msra.mxu0 %v7794_v28  ;;  %v18024_v57 = vpop.permute.xlu0 %7831  ;;  %v18026_v24 = vpop.permute.xlu1 %7897  ;;  %v18143_v28 = vld [vmem:[%s19514_s9 + $0xc0] sm:$0xff] }
0x1146   :  { %12320 = vmatprep.subr.mxu0 %v18024_v57  ;;  %19595 = vst [vmem:[#allocation26_spill] sm:$0xff] %v18143_v28 }
0x1149   :  { %v7792_v48 = vpop.permute.xlu0 %7791  ;;  %v18029_v41 = vpop.permute.xlu1 %7885 }
0x114a   :  { %12321 = vmatpush3.msra.mxu0 %v7792_v48 }
0x114b   :  { %12322 = vmatprep.subr.mxu0 %v17866_v13 }
0x114c   :  { %12323 = vmatpush3.msra.mxu0 %v17828_v34  ;;  %v18080_v34 = vld [vmem:[%s19514_s9 + $0x40] sm:$0xff] }
0x114d   :  { %12324 = vmatprep.subr.mxu0 %v17882_v45  ;;  %v18034_v35 = vpop.permute.xlu1 %7895  ;;  %19587 = vst [vmem:[#allocation18_spill] sm:$0xff] %v18080_v34 }
0x114e   :  { %12325 = vmatpush3.msra.mxu0 %v17836_v3 }
0x114f   :  { %12326 = vmatprep.subr.mxu0 %v17844_v43 }
0x1150   :  { %12327 = vmatpush3.msra.mxu0 %v17816_v60 }
0x1151   :  { %12328 = vmatprep.subr.mxu0 %v17854_v19  ;;  %v18045_v53 = vpop.permute.xlu1 %7883 }
0x1152   :  { %12329 = vmatpush3.msra.mxu0 %v17822_v8  ;;  %v18069_v8 = vld [vmem:[%s19514_s9 + $0x48] sm:$0xff] }
0x1153   :  { %8012 = vmatmul.mubr.f32.vlgmr.msra.gmra.mxu0 %v18042_v18  ;;  %14314 = vmatprep.subr.msk.mxu0 %vm7395_vm2, %v17725_v54  ;;  %19586 = vst [vmem:[#allocation17_spill] sm:$0xff] %v18069_v8 }
0x1154   :  { %8016 = vmatprep.mubr.f32.mxu0 %v18050_v33  ;;  %14315 = vmatpush3.msk.msra.mxu0 %vm7395_vm2, %v17725_v54 }
0x1155   :  { %v18064_v60 = vpop.permute.xlu1 %7901  ;;  %14316 = vmatprep.subr.mxu0 %v17736_v25 }
0x1156   :  { %12355 = vmatpush3.msra.mxu1 %v18064_v60  ;;  %14317 = vmatpush3.msra.mxu0 %v17736_v25 }
0x1157   :  { %8017 = vmatmul.mubr.f32.gmra.mxu0 %v18060_v38  ;;  %12356 = vmatprep.subr.mxu1 %v18010_v63 }
0x1158   :  { %8021 = vmatprep.mubr.f32.mxu0 %v18069_v8 }
0x1159   :  { %v18082_v3 = vpop.permute.xlu1 %7889 }
0x115b   :  { %8022 = vmatmul.mubr.f32.gmra.mxu0 %v18080_v34 }
0x115c   :  { %8026 = vmatprep.mubr.f32.mxu0 %v18087_v31 }
0x115d   :  { %v18096_v30 = vpop.permute.xlu1 %7877 }
0x115f   :  { %8027 = vmatmul.mubr.f32.gmra.mxu0 %v18094_v61 }
0x1160   :  { %8031 = vmatprep.mubr.f32.mxu0 %v18101_v52 }
0x1161   :  { %v18110_v6 = vpop.permute.xlu1 %7899 }
0x1162   :  { %12357 = vmatpush3.msra.mxu1 %v18110_v6 }
0x1163   :  { %8032 = vmatmul.mubr.f32.gmra.mxu0 %v18108_v14  ;;  %12358 = vmatprep.subr.mxu1 %v17972_v15 }
0x1164   :  { %12359 = vmatpush3.msra.mxu1 %v18026_v24  ;;  %8036 = vmatprep.mubr.f32.mxu0 %v18115_v27 }
0x1165   :  { %12360 = vmatprep.subr.mxu1 %v17980_v58  ;;  %v18128_v50 = vpop.permute.xlu1 %7873 }
0x1166   :  { %12361 = vmatpush3.msra.mxu1 %v18034_v35 }
0x1167   :  { %8037 = vmatmul.mubr.f32.gmra.mxu0 %v18125_v49  ;;  %12362 = vmatprep.subr.mxu1 %v17994_v36  ;;  %v8158_v36 = vpop.permute.xlu0 %8157 }
0x1168   :  { %12363 = vmatpush3.msra.mxu1 %v18082_v3  ;;  %8041 = vmatprep.mubr.f32.mxu0 %v18133_v2 }
0x1169   :  { %12364 = vmatprep.subr.mxu1 %v18014_v39  ;;  %v18146_v48 = vpop.permute.xlu1 %7887 }
0x116a   :  { %12365 = vmatpush3.msra.mxu1 %v18146_v48 }
0x116b   :  { %8042 = vmatmul.mubr.f32.gmra.mxu0 %v18143_v28  ;;  %12366 = vmatprep.subr.mxu1 %v17976_v42 }
0x116c   :  { %12367 = vmatpush3.msra.mxu1 %v18029_v41  ;;  %8046 = vmatprep.mubr.f32.mxu0 %v18151_v9 }
0x116d   :  { %12368 = vmatprep.subr.mxu1 %v17984_v51  ;;  %v18164_v39 = vpop.permute.xlu1 %7911 }
0x116e   :  { %19598 = vst [vmem:[#allocation29_spill] sm:$0xff] %v18164_v39  ;;  %12369 = vmatpush3.msra.mxu1 %v18045_v53 }
0x116f   :  { %8047 = vmatmul.mubr.f32.gmra.mxu0 %v18161_v0  ;;  %12370 = vmatprep.subr.mxu1 %v17998_v23 }
0x1170   :  { %12371 = vmatpush3.msra.mxu1 %v18096_v30  ;;  %14318 = vmatprep.mubr.msk.f32.mxu0 %vm7178_vm1, %v8158_v36 }
0x1171   :  { %12372 = vmatprep.subr.mxu1 %v18020_v40  ;;  %v18172_v42 = vpop.permute.xlu1 %7875  ;;  %v8162_v40 = vpop.permute.xlu0 %8161 }
0x1172   :  { %12373 = vmatpush3.msra.mxu1 %v18172_v42 }
0x1173   :  { %12374 = vmatprep.subr.mxu1 %v18004_v55 }
0x1174   :  { %12375 = vmatpush3.msra.mxu1 %v18128_v50 }
0x1175   :  { %12376 = vmatprep.subr.mxu1 %v18164_v39  ;;  %v18178_v51 = vpop.permute.xlu1 %7871  ;;  %v18198_v39 = vld [vmem:[%s19514_s9 + $0x38] sm:$0xff] }
0x1176   :  { %12377 = vmatpush3.msra.mxu1 %v18178_v51 }
0x1177   :  { %12378 = vmatprep.subr.mxu1 %v17872_v16  ;;  %v18192_v16 = vld [vmem:[%s19514_s9 + $0x10] sm:$0xff] }
0x1178   :  { %12379 = vmatpush3.msra.mxu1 %v17930_v12 }
0x1179   :  { %12380 = vmatprep.subr.mxu1 %v17892_v7  ;;  %v8160_v36 = vpop.permute.xlu1 %8159 }
0x117a   :  { %12381 = vmatpush3.msra.mxu1 %v17942_v62  ;;  %14319 = vmatmul.mubr.msk.f32.vlgmr.msra.gmra.mxu0 %vm7178_vm1, %v8160_v36  ;;  %v18215_v36 = vld [vmem:[%s19514_s9 + $0x58] sm:$0xff] }
0x117b   :  { %12382 = vmatprep.subr.mxu1 %v17848_v32  ;;  %14321 = vmatprep.mubr.msk.f32.mxu0 %vm7178_vm1, %v8162_v40  ;;  %v18209_v40 = vld [vmem:[%s19514_s9 + $0x30] sm:$0xff] }
0x117c   :  { %12383 = vmatpush3.msra.mxu1 %v17906_v37 }
0x117d   :  { %12384 = vmatprep.subr.mxu1 %v17860_v11  ;;  %v8164_v7 = vpop.permute.xlu1 %8163 }
0x117e   :  { %12385 = vmatpush3.msra.mxu1 %v17922_v56  ;;  %14322 = vmatmul.mubr.msk.f32.gmra.mxu0 %vm7178_vm1, %v8164_v7  ;;  %v18226_v7 = vld [vmem:[%s19514_s9 + $0x50] sm:$0xff] }
0x117f   :  { %8117 = vmatmul.mubr.f32.vlgmr.msra.gmra.mxu1 %v18192_v16  ;;  %12416 = vmatprep.subr.mxu1 %v18064_v60 }
0x1180   :  { %12417 = vmatpush3.msra.mxu1 %v17982_v26  ;;  %8121 = vmatprep.mubr.f32.mxu1 %v18198_v39  ;;  %v18232_v26 = vld [vmem:[%s19514_s9 + $0x78] sm:$0xff] }
0x1181   :  { %12418 = vmatprep.subr.mxu1 %v18110_v6  ;;  %8467 = vmatprep.mubr.f32.mxu0 %v17955_v46 }
0x1182   :  { %12419 = vmatpush3.msra.mxu1 %v17996_v59  ;;  %v18248_v59 = vld [vmem:[%s19514_s9 + $0x98] sm:$0xff] }
0x1183   :  { %8122 = vmatmul.mubr.f32.gmra.mxu1 %v18209_v40  ;;  %12420 = vmatprep.subr.mxu1 %v18026_v24 }
0x1184   :  { %12421 = vmatpush3.msra.mxu1 %v17968_v4  ;;  %8126 = vmatprep.mubr.f32.mxu1 %v18215_v36  ;;  %v18242_v4 = vld [vmem:[%s19514_s9 + $0x70] sm:$0xff] }
0x1185   :  { %12422 = vmatprep.subr.mxu1 %v18034_v35 }
0x1186   :  { %12423 = vmatpush3.msra.mxu1 %v17974_v29  ;;  %v18258_v29 = vld [vmem:[%s19514_s9 + $0x90] sm:$0xff] }
0x1187   :  { %8127 = vmatmul.mubr.f32.gmra.mxu1 %v18226_v7  ;;  %12424 = vmatprep.subr.mxu1 %v18082_v3 }
0x1188   :  { %12425 = vmatpush3.msra.mxu1 %v17987_v21  ;;  %8131 = vmatprep.mubr.f32.mxu1 %v18232_v26  ;;  %v18264_v21 = vld [vmem:[%s19514_s9 + $0xb8] sm:$0xff] }
0x1189   :  { %12426 = vmatprep.subr.mxu1 %v18146_v48 }
0x118a   :  { %12427 = vmatpush3.msra.mxu1 %v18008_v5  ;;  %v18280_v5 = vld [vmem:[%s19514_s9 + $0xd8] sm:$0xff] }
0x118b   :  { %8132 = vmatmul.mubr.f32.gmra.mxu1 %v18242_v4  ;;  %12428 = vmatprep.subr.mxu1 %v18029_v41 }
0x118c   :  { %12429 = vmatpush3.msra.mxu1 %v17970_v20  ;;  %8136 = vmatprep.mubr.f32.mxu1 %v18248_v59  ;;  %v18274_v20 = vld [vmem:[%s19514_s9 + $0xb0] sm:$0xff] }
0x118d   :  { %12430 = vmatprep.subr.mxu1 %v18045_v53 }
0x118e   :  { %12431 = vmatpush3.msra.mxu1 %v17978_v47  ;;  %v18290_v47 = vld [vmem:[%s19514_s9 + $0xd0] sm:$0xff] }
0x118f   :  { %8137 = vmatmul.mubr.f32.gmra.mxu1 %v18258_v29  ;;  %12432 = vmatprep.subr.mxu1 %v18096_v30 }
0x1190   :  { %12433 = vmatpush3.msra.mxu1 %v17992_v22  ;;  %8141 = vmatprep.mubr.f32.mxu1 %v18264_v21  ;;  %v18296_v22 = vld [vmem:[%s19514_s9 + $0xf8] sm:$0xff] }
0x1191   :  { %12434 = vmatprep.subr.mxu1 %v18172_v42 }
0x1192   :  { %12435 = vmatpush3.msra.mxu1 %v18018_v17 }
0x1193   :  { %8142 = vmatmul.mubr.f32.gmra.mxu1 %v18274_v20  ;;  %12436 = vmatprep.subr.mxu1 %v18128_v50 }
0x1194   :  { %12437 = vmatpush3.msra.mxu1 %v18002_v44  ;;  %8146 = vmatprep.mubr.f32.mxu1 %v18280_v5  ;;  %v18306_v44 = vld [vmem:[%s19514_s9 + $0xf0] sm:$0xff] }
0x1195   :  { %12438 = vmatprep.subr.mxu1 %v18178_v51 }
0x1196   :  { %12439 = vmatpush3.msra.mxu1 %v18024_v57 }
0x1197   :  { %8147 = vmatmul.mubr.f32.gmra.mxu1 %v18290_v47  ;;  %12440 = vmatprep.subr.mxu1 %v17930_v12 }
0x1198   :  { %12441 = vmatpush3.msra.mxu1 %v17866_v13  ;;  %8151 = vmatprep.mubr.f32.mxu1 %v18296_v22 }
0x1199   :  { %12442 = vmatprep.subr.mxu1 %v17942_v62 }
0x119a   :  { %12443 = vmatpush3.msra.mxu1 %v17882_v45 }
0x119b   :  { %8152 = vmatmul.mubr.f32.gmra.mxu1 %v18306_v44  ;;  %12444 = vmatprep.subr.mxu1 %v17906_v37 }
0x119c   :  { %12445 = vmatpush3.msra.mxu1 %v17844_v43  ;;  %8362 = vmatprep.mubr.f32.mxu1 %v17911_v10 }
0x119d   :  { %12446 = vmatprep.subr.mxu1 %v17922_v56 }
0x119e   :  { %12447 = vmatpush3.msra.mxu1 %v17854_v19 }
0x119f   :  { %8363 = vmatmul.mubr.f32.vlgmr.msra.gmra.mxu1 %v18042_v18  ;;  %14324 = vmatprep.subr.msk.mxu1 %vm7395_vm2, %v17725_v54 }
0x11a0   :  { %14325 = vmatpush3.msk.msra.mxu1 %vm7395_vm2, %v17725_v54  ;;  %8367 = vmatprep.mubr.f32.mxu1 %v18050_v33  ;;  %v8509_v54 = vpop.permute.xlu0 %8508  ;;  %vm11061_vm2 = vcmask 31744  }
0x11a1   :  { %14326 = vmatprep.subr.mxu1 %v17736_v25 }
0x11a2   :  { %14327 = vmatpush3.msra.mxu1 %v17736_v25  ;;  %v8511_v25 = vpop.permute.xlu1 %8510 }
0x11a3   :  { %8368 = vmatmul.mubr.f32.gmra.mxu1 %v18060_v38 }
0x11a4   :  { %8372 = vmatprep.mubr.f32.mxu1 %v18069_v8  ;;  %v8513_v43 = vpop.permute.xlu0 %8512 }
0x11a6   :  { %v8515_v19 = vpop.permute.xlu1 %8514 }
0x11a7   :  { %8373 = vmatmul.mubr.f32.gmra.mxu1 %v18080_v34 }
0x11a8   :  { %8377 = vmatprep.mubr.f32.mxu1 %v18087_v31 }
0x11ab   :  { %8378 = vmatmul.mubr.f32.gmra.mxu1 %v18094_v61 }
0x11ac   :  { %8382 = vmatprep.mubr.f32.mxu1 %v18101_v52 }
0x11af   :  { %8383 = vmatmul.mubr.f32.gmra.mxu1 %v18108_v14 }
0x11b0   :  { %8387 = vmatprep.mubr.f32.mxu1 %v18115_v27 }
0x11b3   :  { %8388 = vmatmul.mubr.f32.gmra.mxu1 %v18125_v49 }
0x11b4   :  { %8392 = vmatprep.mubr.f32.mxu1 %v18133_v2 }
0x11b7   :  { %8393 = vmatmul.mubr.f32.gmra.mxu1 %v18143_v28 }
0x11b8   :  { %8397 = vmatprep.mubr.f32.mxu1 %v18151_v9 }
0x11bb   :  { %8398 = vmatmul.mubr.f32.gmra.mxu1 %v18161_v0 }
0x11bc   :  { %14328 = vmatprep.mubr.msk.f32.mxu1 %vm7178_vm1, %v8509_v54 }
0x11bf   :  { %14329 = vmatmul.mubr.msk.f32.vlgmr.msra.gmra.mxu1 %vm7178_vm1, %v8511_v25 }
0x11c0   :  { %14331 = vmatprep.mubr.msk.f32.mxu1 %vm7178_vm1, %v8513_v43 }
0x11c3   :  { %14332 = vmatmul.mubr.msk.f32.gmra.mxu1 %vm7178_vm1, %v8515_v19 }
0x11c4   :  { %8818 = vmatprep.mubr.f32.mxu1 %v17955_v46 }
0x1213   :  { %v12330_v13 = vpop.f32.mrf.mxu0 }
0x1215   :  { %v12331_v45 = vpop.f32.mrf.mxu0 }
0x1216   :  { %v12332_v17 = vadd.f32 %v12331_v45, %v12330_v13 }
0x1217   :  { %v12333_v57 = vpop.f32.mrf.mxu0 }
0x1219   :  { %v12334_v9 = vpop.f32.mrf.mxu0 }
0x121a   :  { %v12335_v28 = vadd.f32 %v12334_v9, %v12333_v57 }
0x121b   :  { %v12336_v0 = vpop.f32.mrf.mxu0 }
0x121d   :  { %v12337_v2 = vpop.f32.mrf.mxu0 }
0x121e   :  { %v12338_v49 = vadd.f32 %v12337_v2, %v12336_v0 }
0x121f   :  { %v12339_v54 = vpop.f32.mrf.mxu0 }
0x1221   :  { %v12340_v27 = vpop.f32.mrf.mxu0 }
0x1222   :  { %v12341_v14 = vadd.f32 %v12340_v27, %v12339_v54 }
0x1223   :  { %v12342_v25 = vpop.f32.mrf.mxu0 }
0x1225   :  { %v12343_v52 = vpop.f32.mrf.mxu0 }
0x1226   :  { %v12344_v43 = vadd.f32 %v12343_v52, %v12342_v25 }
0x1227   :  { %v12345_v61 = vpop.f32.mrf.mxu0 }
0x1229   :  { %v12346_v31 = vpop.f32.mrf.mxu0 }
0x122a   :  { %v12347_v19 = vadd.f32 %v12346_v31, %v12345_v61 }
0x122b   :  { %v12348_v34 = vpop.f32.mrf.mxu0 }
0x122d   :  { %v12349_v46 = vpop.f32.mrf.mxu0 }
0x122e   :  { %v12350_v8 = vadd.f32 %v12349_v46, %v12348_v34 }
0x122f   :  { %v12351_v38 = vpop.f32.mrf.mxu0 }
0x1231   :  { %v12352_v13 = vpop.f32.mrf.mxu0 }
0x1232   :  { %v12353_v45 = vadd.f32 %v12352_v13, %v12351_v38 }
0x123a   :  { %v18342_v33 = vpop.f32.mrf.mxu0 }
0x123c   :  { %v18344_v9 = vpop.f32.mrf.mxu0 }
0x123e   :  { %v18346_v0 = vpop.f32.mrf.mxu0 }
0x123f   :  { %v12386_v2 = vpop.f32.mrf.mxu1  ;;  %8292 = vrot.lane.b32.xlu0 %v18346_v0, %s14606_s11 }
0x1240   :  { %v18350_v52 = vpop.f32.mrf.mxu0 }
0x1241   :  { %v12387_v27 = vpop.f32.mrf.mxu1  ;;  %8290 = vrot.lane.b32.xlu1 %v18350_v52, %s14606_s11 }
0x1242   :  { %v12388_v34 = vadd.f32 %v12387_v27, %v12386_v2 }
0x1243   :  { %v12389_v31 = vpop.f32.mrf.mxu1  ;;  %8288 = vrot.lane.b32.xlu0 %v18342_v33, %s14606_s11 }
0x1244   :  { %v18356_v38 = vadd.f32 %v12388_v34, %v12332_v17 }
0x1245   :  { %v12390_v61 = vpop.f32.mrf.mxu1  ;;  %8286 = vrot.lane.b32.xlu1 %v18344_v9, %s14606_s11 }
0x1246   :  { %19599 = vst [vmem:[#allocation30_spill] sm:$0xff] %v18356_v38  ;;  %v12391_v57 = vadd.f32 %v12390_v61, %v12389_v31 }
0x1247   :  { %v12392_v54 = vpop.f32.mrf.mxu1  ;;  %8280 = vrot.lane.b32.xlu0 %v18346_v0, %s14594_s13 }
0x1248   :  { %v18362_v25 = vadd.f32 %v12391_v57, %v12335_v28 }
0x1249   :  { %v12393_v46 = vpop.f32.mrf.mxu1  ;;  %8278 = vrot.lane.b32.xlu1 %v18350_v52, %s14594_s13 }
0x124a   :  { %19600 = vst [vmem:[#allocation31_spill] sm:$0xff] %v18362_v25  ;;  %v12394_v13 = vadd.f32 %v12393_v46, %v12392_v54 }
0x124b   :  { %v12395_v2 = vpop.f32.mrf.mxu1  ;;  %8276 = vrot.lane.b32.xlu0 %v18342_v33, %s14594_s13 }
0x124c   :  { %v18368_v17 = vadd.f32 %v12394_v13, %v12338_v49 }
0x124d   :  { %v12396_v27 = vpop.f32.mrf.mxu1  ;;  %8274 = vrot.lane.b32.xlu1 %v18344_v9, %s14594_s13 }
0x124e   :  { %19601 = vst [vmem:[#allocation32_spill] sm:$0xff] %v18368_v17  ;;  %v12397_v34 = vadd.f32 %v12396_v27, %v12395_v2 }
0x124f   :  { %v12398_v31 = vpop.f32.mrf.mxu1  ;;  %8268 = vrot.lane.b32.xlu0 %v18346_v0, %s14603_s20 }
0x1250   :  { %v18374_v28 = vadd.f32 %v12397_v34, %v12341_v14 }
0x1251   :  { %v12399_v61 = vpop.f32.mrf.mxu1  ;;  %8266 = vrot.lane.b32.xlu1 %v18350_v52, %s14603_s20 }
0x1252   :  { %19602 = vst [vmem:[#allocation33_spill] sm:$0xff] %v18374_v28  ;;  %v12400_v57 = vadd.f32 %v12399_v61, %v12398_v31 }
0x1253   :  { %v12401_v54 = vpop.f32.mrf.mxu1  ;;  %8264 = vrot.lane.b32.xlu0 %v18342_v33, %s14603_s20 }
0x1254   :  { %v18380_v49 = vadd.f32 %v12400_v57, %v12344_v43 }
0x1255   :  { %v12402_v46 = vpop.f32.mrf.mxu1  ;;  %8262 = vrot.lane.b32.xlu1 %v18344_v9, %s14603_s20 }
0x1256   :  { %19603 = vst [vmem:[#allocation34_spill] sm:$0xff] %v18380_v49  ;;  %v12403_v13 = vadd.f32 %v12402_v46, %v12401_v54 }
0x1257   :  { %v12404_v2 = vpop.f32.mrf.mxu1 }
0x1258   :  { %v18384_v27 = vadd.f32 %v12403_v13, %v12347_v19 }
0x1259   :  { %v12405_v14 = vpop.f32.mrf.mxu1 }
0x125a   :  { %19604 = vst [vmem:[#allocation35_spill] sm:$0xff] %v18384_v27  ;;  %v12406_v34 = vadd.f32 %v12405_v14, %v12404_v2  ;;  %v19619_v27 = vld [vmem:[#allocation12_spill] sm:$0xff] }
0x125b   :  { %v12407_v28 = vpop.f32.mrf.mxu1 }
0x125c   :  { %v18386_v17 = vadd.f32 %v12406_v34, %v12350_v8 }
0x125d   :  { %v12408_v31 = vpop.f32.mrf.mxu1 }
0x125e   :  { %19605 = vst [vmem:[#allocation36_spill] sm:$0xff] %v18386_v17  ;;  %v12409_v61 = vadd.f32 %v12408_v31, %v12407_v28 }
0x125f   :  { %v12448_v25 = vpop.f32.mrf.mxu1 }
0x1260   :  { %v18388_v38 = vadd.f32 %v12409_v61, %v12353_v45 }
0x1261   :  { %v12449_v43 = vpop.f32.mrf.mxu1 }
0x1262   :  { %19606 = vst [vmem:[#allocation37_spill] sm:$0xff] %v18388_v38  ;;  %v18390_v57 = vadd.f32 %v12449_v43, %v12448_v25 }
0x1263   :  { %v12451_v49 = vpop.f32.mrf.mxu1 }
0x1264   :  { %19607 = vst [vmem:[#allocation38_spill] sm:$0xff] %v18390_v57 }
0x1265   :  { %v12452_v18 = vpop.f32.mrf.mxu1 }
0x1266   :  { %v18392_v56 = vadd.f32 %v12452_v18, %v12451_v49 }
0x1267   :  { %v12454_v54 = vpop.f32.mrf.mxu1 }
0x1268   :  { %19608 = vst [vmem:[#allocation39_spill] sm:$0xff] %v18392_v56  ;;  %v19622_v56 = vld [vmem:[#allocation13_spill] sm:$0xff] }
0x1269   :  { %v12455_v19 = vpop.f32.mrf.mxu1 }
0x126a   :  { %v18394_v46 = vadd.f32 %v12455_v19, %v12454_v54 }
0x126b   :  { %v12457_v13 = vpop.f32.mrf.mxu1 }
0x126c   :  { %19609 = vst [vmem:[#allocation40_spill] sm:$0xff] %v18394_v46 }
0x126d   :  { %v12458_v2 = vpop.f32.mrf.mxu1 }
0x126e   :  { %v18396_v8 = vadd.f32 %v12458_v2, %v12457_v13 }
0x126f   :  { %v12460_v14 = vpop.f32.mrf.mxu1 }
0x1270   :  { %19610 = vst [vmem:[#allocation41_spill] sm:$0xff] %v18396_v8 }
0x1271   :  { %v12461_v28 = vpop.f32.mrf.mxu1 }
0x1272   :  { %v18398_v34 = vadd.f32 %v12461_v28, %v12460_v14 }
0x1273   :  { %v12463_v45 = vpop.f32.mrf.mxu1 }
0x1274   :  { %19611 = vst [vmem:[#allocation42_spill] sm:$0xff] %v18398_v34  ;;  %v19621_v34 = vld [vmem:[#allocation10_spill] sm:$0xff] }
0x1275   :  { %v12464_v31 = vpop.f32.mrf.mxu1 }
0x1276   :  { %v18400_v25 = vadd.f32 %v12464_v31, %v12463_v45 }
0x1277   :  { %v12466_v61 = vpop.f32.mrf.mxu1 }
0x1278   :  { %19612 = vst [vmem:[#allocation43_spill] sm:$0xff] %v18400_v25 }
0x1279   :  { %v12467_v43 = vpop.f32.mrf.mxu1 }
0x127a   :  { %v18402_v18 = vadd.f32 %v12467_v43, %v12466_v61  ;;  %v19618_v43 = vld [vmem:[#allocation11_spill] sm:$0xff] }
0x127b   :  { %v12469_v49 = vpop.f32.mrf.mxu1 }
0x127c   :  { %19613 = vst [vmem:[#allocation44_spill] sm:$0xff] %v18402_v18 }
0x127d   :  { %v12470_v38 = vpop.f32.mrf.mxu1 }
0x127e   :  { %v18404_v54 = vadd.f32 %v12470_v38, %v12469_v49 }
0x127f   :  { %v18406_v19 = vpop.f32.mrf.mxu1 }
0x1280   :  { %19614 = vst [vmem:[#allocation45_spill] sm:$0xff] %v18404_v54  ;;  %19615 = vst [vmem:[#allocation46_spill] sm:$0xff] %v18406_v19  ;;  %v19620_v54 = vld [vmem:[#allocation9_spill] sm:$0xff] }
0x1281   :  { %v18408_v13 = vpop.f32.mrf.mxu1 }
0x1282   :  { %19616 = vst [vmem:[#allocation47_spill] sm:$0xff] %v18408_v13 }
0x1283   :  { %v18410_v2 = vpop.f32.mrf.mxu1 }
0x1284   :  { %8643 = vrot.lane.b32.xlu0 %v18410_v2, %s14606_s11 }
0x1285   :  { %v18414_v14 = vpop.f32.mrf.mxu1 }
0x1286   :  { %19617 = vst [vmem:[#allocation48_spill] sm:$0xff] %v18414_v14  ;;  %8641 = vrot.lane.b32.xlu1 %v18414_v14, %s14606_s11 }
0x1288   :  { %8639 = vrot.lane.b32.xlu0 %v18406_v19, %s14606_s11 }
0x128a   :  { %8637 = vrot.lane.b32.xlu1 %v18408_v13, %s14606_s11 }
0x128c   :  { %8631 = vrot.lane.b32.xlu0 %v18410_v2, %s14594_s13 }
0x128e   :  { %8629 = vrot.lane.b32.xlu1 %v18414_v14, %s14594_s13 }
0x1290   :  { %8627 = vrot.lane.b32.xlu0 %v18406_v19, %s14594_s13 }
0x1292   :  { %8625 = vrot.lane.b32.xlu1 %v18408_v13, %s14594_s13 }
0x1294   :  { %8619 = vrot.lane.b32.xlu0 %v18410_v2, %s14603_s20 }
0x1296   :  { %8617 = vrot.lane.b32.xlu1 %v18414_v14, %s14603_s20  ;;  %v19625_v14 = vld [vmem:[#allocation7_spill] sm:$0xff] }
0x1298   :  { %8615 = vrot.lane.b32.xlu0 %v18406_v19, %s14603_s20  ;;  %v19624_v19 = vld [vmem:[#allocation6_spill] sm:$0xff] }
0x129a   :  { %8613 = vrot.lane.b32.xlu1 %v18408_v13, %s14603_s20  ;;  %v19623_v13 = vld [vmem:[#allocation29_spill] sm:$0xff] }
0x12b1   :  { %v18438_v38 = vpop.permute.xlu0 %8292 }
0x12b2   :  { %12472 = vmatprep.subr.mxu0 %v18438_v38 }
0x12b3   :  { %12473 = vmatpush3.msra.mxu0 %v17989_v1  ;;  %v18442_v28 = vpop.permute.xlu1 %8290 }
0x12b4   :  { %12474 = vmatprep.subr.mxu0 %v18442_v28 }
0x12b5   :  { %v18445_v45 = vpop.permute.xlu0 %8288  ;;  %12475 = vmatpush3.msra.mxu0 %v18010_v63 }
0x12b6   :  { %12476 = vmatprep.subr.mxu0 %v18445_v45 }
0x12b7   :  { %12477 = vmatpush3.msra.mxu0 %v17972_v15  ;;  %v18450_v31 = vpop.permute.xlu1 %8286 }
0x12b8   :  { %12478 = vmatprep.subr.mxu0 %v18450_v31 }
0x12b9   :  { %v18453_v61 = vpop.permute.xlu0 %8280  ;;  %12479 = vmatpush3.msra.mxu0 %v17980_v58 }
0x12ba   :  { %12480 = vmatprep.subr.mxu0 %v18453_v61 }
0x12bb   :  { %12481 = vmatpush3.msra.mxu0 %v19618_v43  ;;  %v18458_v49 = vpop.permute.xlu1 %8278 }
0x12bc   :  { %12482 = vmatprep.subr.mxu0 %v18458_v49 }
0x12bd   :  { %v18461_v17 = vpop.permute.xlu0 %8276  ;;  %12483 = vmatpush3.msra.mxu0 %v19619_v27 }
0x12be   :  { %12484 = vmatprep.subr.mxu0 %v18461_v17 }
0x12bf   :  { %12485 = vmatpush3.msra.mxu0 %v19620_v54  ;;  %v18466_v18 = vpop.permute.xlu1 %8274 }
0x12c0   :  { %12486 = vmatprep.subr.mxu0 %v18466_v18 }
0x12c1   :  { %v18469_v25 = vpop.permute.xlu0 %8268  ;;  %12487 = vmatpush3.msra.mxu0 %v19621_v34 }
0x12c2   :  { %12488 = vmatprep.subr.mxu0 %v18469_v25 }
0x12c3   :  { %12489 = vmatpush3.msra.mxu0 %v17998_v23  ;;  %v18474_v8 = vpop.permute.xlu1 %8266 }
0x12c4   :  { %12490 = vmatprep.subr.mxu0 %v18474_v8 }
0x12c5   :  { %v18477_v46 = vpop.permute.xlu0 %8264  ;;  %12491 = vmatpush3.msra.mxu0 %v19622_v56 }
0x12c6   :  { %12492 = vmatprep.subr.mxu0 %v18477_v46 }
0x12c7   :  { %12493 = vmatpush3.msra.mxu0 %v18004_v55  ;;  %v18482_v57 = vpop.permute.xlu1 %8262 }
0x12c8   :  { %12494 = vmatprep.subr.mxu0 %v18482_v57 }
0x12c9   :  { %12495 = vmatpush3.msra.mxu0 %v19623_v13 }
0x12ca   :  { %12496 = vmatprep.subr.mxu0 %v18346_v0 }
0x12cb   :  { %12497 = vmatpush3.msra.mxu0 %v19624_v19 }
0x12cc   :  { %12498 = vmatprep.subr.mxu0 %v18350_v52 }
0x12cd   :  { %12499 = vmatpush3.msra.mxu0 %v19625_v14 }
0x12ce   :  { %12500 = vmatprep.subr.mxu0 %v18342_v33 }
0x12cf   :  { %12501 = vmatpush3.msra.mxu0 %v17848_v32 }
0x12d0   :  { %12502 = vmatprep.subr.mxu0 %v18344_v9 }
0x12d1   :  { %12503 = vmatpush3.msra.mxu0 %v17860_v11 }
0x12d2   :  { %8468 = vmatmul.mubr.f32.vlgmr.msra.gmra.mxu0 %v18192_v16  ;;  %12534 = vmatprep.subr.mxu0 %v17989_v1 }
0x12d3   :  { %12535 = vmatpush3.msra.mxu0 %v18064_v60  ;;  %8472 = vmatprep.mubr.f32.mxu0 %v18198_v39 }
0x12d4   :  { %12536 = vmatprep.subr.mxu0 %v18010_v63 }
0x12d5   :  { %12537 = vmatpush3.msra.mxu0 %v18110_v6 }
0x12d6   :  { %8473 = vmatmul.mubr.f32.gmra.mxu0 %v18209_v40  ;;  %12538 = vmatprep.subr.mxu0 %v17972_v15  ;;  %v19627_v15 = vld [vmem:[#allocation14_spill] sm:$0xff] }
0x12d7   :  { %12539 = vmatpush3.msra.mxu0 %v18026_v24  ;;  %8477 = vmatprep.mubr.f32.mxu0 %v18215_v36 }
0x12d8   :  { %12540 = vmatprep.subr.mxu0 %v17980_v58  ;;  %v19629_v58 = vld [vmem:[#allocation16_spill] sm:$0xff] }
0x12d9   :  { %12541 = vmatpush3.msra.mxu0 %v18034_v35  ;;  %v19636_v35 = vld [vmem:[#allocation23_spill] sm:$0xff] }
0x12da   :  { %8478 = vmatmul.mubr.f32.gmra.mxu0 %v18226_v7  ;;  %12542 = vmatprep.subr.mxu0 %v19618_v43 }
0x12db   :  { %12543 = vmatpush3.msra.mxu0 %v18082_v3  ;;  %8482 = vmatprep.mubr.f32.mxu0 %v18232_v26  ;;  %v19637_v3 = vld [vmem:[#allocation24_spill] sm:$0xff] }
0x12dc   :  { %12544 = vmatprep.subr.mxu0 %v19619_v27 }
0x12dd   :  { %12545 = vmatpush3.msra.mxu0 %v18146_v48  ;;  %v19639_v48 = vld [vmem:[#allocation26_spill] sm:$0xff] }
0x12de   :  { %8483 = vmatmul.mubr.f32.gmra.mxu0 %v18242_v4  ;;  %12546 = vmatprep.subr.mxu0 %v19620_v54 }
0x12df   :  { %12547 = vmatpush3.msra.mxu0 %v18029_v41  ;;  %8487 = vmatprep.mubr.f32.mxu0 %v18248_v59  ;;  %v19635_v41 = vld [vmem:[#allocation22_spill] sm:$0xff] }
0x12e0   :  { %12548 = vmatprep.subr.mxu0 %v19621_v34  ;;  %v19641_v34 = vld [vmem:[#allocation28_spill] sm:$0xff] }
0x12e1   :  { %12549 = vmatpush3.msra.mxu0 %v18045_v53 }
0x12e2   :  { %8488 = vmatmul.mubr.f32.gmra.mxu0 %v18258_v29  ;;  %12550 = vmatprep.subr.mxu0 %v17998_v23  ;;  %v19633_v23 = vld [vmem:[#allocation20_spill] sm:$0xff] }
0x12e3   :  { %12551 = vmatpush3.msra.mxu0 %v18096_v30  ;;  %8492 = vmatprep.mubr.f32.mxu0 %v18264_v21  ;;  %v19638_v30 = vld [vmem:[#allocation25_spill] sm:$0xff] }
0x12e4   :  { %12552 = vmatprep.subr.mxu0 %v19622_v56  ;;  %v19626_v56 = vld [vmem:[#allocation8_spill] sm:$0xff] }
0x12e5   :  { %12553 = vmatpush3.msra.mxu0 %v18172_v42 }
0x12e6   :  { %8493 = vmatmul.mubr.f32.gmra.mxu0 %v18274_v20  ;;  %12554 = vmatprep.subr.mxu0 %v18004_v55  ;;  %v19634_v55 = vld [vmem:[#allocation21_spill] sm:$0xff] }
0x12e7   :  { %12555 = vmatpush3.msra.mxu0 %v18128_v50  ;;  %8497 = vmatprep.mubr.f32.mxu0 %v18280_v5 }
0x12e8   :  { %12556 = vmatprep.subr.mxu0 %v19623_v13 }
0x12e9   :  { %12557 = vmatpush3.msra.mxu0 %v18178_v51 }
0x12ea   :  { %8498 = vmatmul.mubr.f32.gmra.mxu0 %v18290_v47  ;;  %12558 = vmatprep.subr.mxu0 %v19624_v19 }
0x12eb   :  { %12559 = vmatpush3.msra.mxu0 %v17930_v12  ;;  %8502 = vmatprep.mubr.f32.mxu0 %v18296_v22  ;;  %v19628_v12 = vld [vmem:[#allocation15_spill] sm:$0xff] }
0x12ec   :  { %12560 = vmatprep.subr.mxu0 %v19625_v14 }
0x12ed   :  { %12561 = vmatpush3.msra.mxu0 %v17942_v62  ;;  %v19630_v62 = vld [vmem:[#allocation17_spill] sm:$0xff] }
0x12ee   :  { %8503 = vmatmul.mubr.f32.gmra.mxu0 %v18306_v44  ;;  %12562 = vmatprep.subr.mxu0 %v17848_v32 }
0x12ef   :  { %12563 = vmatpush3.msra.mxu0 %v17906_v37  ;;  %8713 = vmatprep.mubr.f32.mxu0 %v17911_v10  ;;  %v19632_v10 = vld [vmem:[#allocation19_spill] sm:$0xff] }
0x12f0   :  { %12564 = vmatprep.subr.mxu0 %v17860_v11  ;;  %v19631_v11 = vld [vmem:[#allocation18_spill] sm:$0xff] }
0x12f1   :  { %12565 = vmatpush3.msra.mxu0 %v19626_v56 }
0x12f2   :  { %8714 = vmatmul.mubr.f32.vlgmr.msra.gmra.mxu0 %v19627_v15  ;;  %v19651_v15 = vld [vmem:[#allocation44_spill] sm:$0xff] }
0x12f3   :  { %8718 = vmatprep.mubr.f32.mxu0 %v19628_v12 }
0x12f6   :  { %v8644_v42 = vpop.permute.xlu0 %8643  ;;  %8719 = vmatmul.mubr.f32.gmra.mxu0 %v19629_v58 }
0x12f7   :  { %12590 = vmatprep.subr.mxu1 %v8644_v42  ;;  %8723 = vmatprep.mubr.f32.mxu0 %v19630_v62  ;;  %v19652_v62 = vld [vmem:[#allocation45_spill] sm:$0xff] }
0x12f8   :  { %12591 = vmatpush3.msra.mxu1 %v18438_v38  ;;  %v8642_v32 = vpop.permute.xlu1 %8641 }
0x12f9   :  { %12592 = vmatprep.subr.mxu1 %v8642_v32 }
0x12fa   :  { %v8640_v37 = vpop.permute.xlu0 %8639  ;;  %12593 = vmatpush3.msra.mxu1 %v18442_v28  ;;  %8724 = vmatmul.mubr.f32.gmra.mxu0 %v19631_v11 }
0x12fb   :  { %12594 = vmatprep.subr.mxu1 %v8640_v37  ;;  %8728 = vmatprep.mubr.f32.mxu0 %v19632_v10 }
0x12fc   :  { %12595 = vmatpush3.msra.mxu1 %v18445_v45  ;;  %v8638_v51 = vpop.permute.xlu1 %8637 }
0x12fd   :  { %12596 = vmatprep.subr.mxu1 %v8638_v51 }
0x12fe   :  { %v8632_v1 = vpop.permute.xlu0 %8631  ;;  %12597 = vmatpush3.msra.mxu1 %v18450_v31  ;;  %8729 = vmatmul.mubr.f32.gmra.mxu0 %v19633_v23  ;;  %v19650_v31 = vld [vmem:[#allocation43_spill] sm:$0xff] }
0x12ff   :  { %12598 = vmatprep.subr.mxu1 %v8632_v1  ;;  %8733 = vmatprep.mubr.f32.mxu0 %v19634_v55 }
0x1300   :  { %12599 = vmatpush3.msra.mxu1 %v18453_v61  ;;  %v8630_v63 = vpop.permute.xlu1 %8629 }
0x1301   :  { %12600 = vmatprep.subr.mxu1 %v8630_v63 }
0x1302   :  { %v8628_v24 = vpop.permute.xlu0 %8627  ;;  %12601 = vmatpush3.msra.mxu1 %v18458_v49  ;;  %8734 = vmatmul.mubr.f32.gmra.mxu0 %v19635_v41 }
0x1303   :  { %12602 = vmatprep.subr.mxu1 %v8628_v24  ;;  %8738 = vmatprep.mubr.f32.mxu0 %v19636_v35 }
0x1304   :  { %12603 = vmatpush3.msra.mxu1 %v18461_v17  ;;  %v8626_v53 = vpop.permute.xlu1 %8625  ;;  %v19640_v17 = vld [vmem:[#allocation27_spill] sm:$0xff] }
0x1305   :  { %12604 = vmatprep.subr.mxu1 %v8626_v53 }
0x1306   :  { %v8620_v60 = vpop.permute.xlu0 %8619  ;;  %12605 = vmatpush3.msra.mxu1 %v18466_v18  ;;  %8739 = vmatmul.mubr.f32.gmra.mxu0 %v19637_v3  ;;  %v19644_v18 = vld [vmem:[#allocation47_spill] sm:$0xff] }
0x1307   :  { %12606 = vmatprep.subr.mxu1 %v8620_v60  ;;  %8743 = vmatprep.mubr.f32.mxu0 %v19638_v30 }
0x1308   :  { %12607 = vmatpush3.msra.mxu1 %v18469_v25  ;;  %v8618_v6 = vpop.permute.xlu1 %8617  ;;  %v19642_v25 = vld [vmem:[#allocation48_spill] sm:$0xff] }
0x1309   :  { %12608 = vmatprep.subr.mxu1 %v8618_v6 }
0x130a   :  { %v8616_v50 = vpop.permute.xlu0 %8615  ;;  %12609 = vmatpush3.msra.mxu1 %v18474_v8  ;;  %8744 = vmatmul.mubr.f32.gmra.mxu0 %v19639_v48  ;;  %v19643_v8 = vld [vmem:[#allocation46_spill] sm:$0xff] }
0x130b   :  { %12610 = vmatprep.subr.mxu1 %v8616_v50  ;;  %8748 = vmatprep.mubr.f32.mxu0 %v19640_v17 }
0x130c   :  { %12611 = vmatpush3.msra.mxu1 %v18477_v46  ;;  %v8614_v27 = vpop.permute.xlu1 %8613 }
0x130d   :  { %12612 = vmatprep.subr.mxu1 %v8614_v27 }
0x130e   :  { %12613 = vmatpush3.msra.mxu1 %v18482_v57  ;;  %8749 = vmatmul.mubr.f32.gmra.mxu0 %v19641_v34  ;;  %v19648_v57 = vld [vmem:[#allocation41_spill] sm:$0xff] }
0x130f   :  { %12614 = vmatprep.subr.mxu1 %v18410_v2  ;;  %v19649_v2 = vld [vmem:[#allocation42_spill] sm:$0xff] }
0x1310   :  { %12615 = vmatpush3.msra.mxu1 %v18346_v0 }
0x1311   :  { %12616 = vmatprep.subr.mxu1 %v19642_v25 }
0x1312   :  { %12617 = vmatpush3.msra.mxu1 %v18350_v52 }
0x1313   :  { %12618 = vmatprep.subr.mxu1 %v19643_v8 }
0x1314   :  { %12619 = vmatpush3.msra.mxu1 %v18342_v33 }
0x1315   :  { %12620 = vmatprep.subr.mxu1 %v19644_v18 }
0x1316   :  { %12621 = vmatpush3.msra.mxu1 %v18344_v9 }
0x1317   :  { %8819 = vmatmul.mubr.f32.vlgmr.msra.gmra.mxu1 %v18192_v16 }
0x1318   :  { %8823 = vmatprep.mubr.f32.mxu1 %v18198_v39 }
0x131b   :  { %8824 = vmatmul.mubr.f32.gmra.mxu1 %v18209_v40 }
0x131c   :  { %8828 = vmatprep.mubr.f32.mxu1 %v18215_v36  ;;  %v19645_v36 = vld [vmem:[#allocation38_spill] sm:$0xff] }
0x131f   :  { %8829 = vmatmul.mubr.f32.gmra.mxu1 %v18226_v7 }
0x1320   :  { %8833 = vmatprep.mubr.f32.mxu1 %v18232_v26 }
0x1323   :  { %8834 = vmatmul.mubr.f32.gmra.mxu1 %v18242_v4 }
0x1324   :  { %8838 = vmatprep.mubr.f32.mxu1 %v18248_v59 }
0x1327   :  { %8839 = vmatmul.mubr.f32.gmra.mxu1 %v18258_v29  ;;  %v19646_v29 = vld [vmem:[#allocation39_spill] sm:$0xff] }
0x1328   :  { %8843 = vmatprep.mubr.f32.mxu1 %v18264_v21 }
0x132b   :  { %8844 = vmatmul.mubr.f32.gmra.mxu1 %v18274_v20 }
0x132c   :  { %8848 = vmatprep.mubr.f32.mxu1 %v18280_v5 }
0x132f   :  { %8849 = vmatmul.mubr.f32.gmra.mxu1 %v18290_v47 }
0x1330   :  { %8853 = vmatprep.mubr.f32.mxu1 %v18296_v22  ;;  %v19647_v22 = vld [vmem:[#allocation40_spill] sm:$0xff] }
0x1333   :  { %8854 = vmatmul.mubr.f32.gmra.mxu1 %v18306_v44 }
0x1392   :  { %v12504_v16 = vpop.f32.mrf.mxu0 }
0x1394   :  { %v12505_v39 = vpop.f32.mrf.mxu0 }
0x1395   :  { %v12506_v33 = vadd.f32 %v12505_v39, %v12504_v16 }
0x1396   :  { %v12507_v40 = vpop.f32.mrf.mxu0 }
0x1397   :  { %v8470_v7 = vadd.f32 %v12506_v33, %v19645_v36 }
0x1398   :  { %v12508_v26 = vpop.f32.mrf.mxu0 }
0x1399   :  { %v12509_v4 = vadd.f32 %v12508_v26, %v12507_v40  ;;  %8867 = vrot.lane.b32.xlu0 %v8470_v7, %s14588_s30 }
0x139a   :  { %v12510_v59 = vpop.f32.mrf.mxu0 }
0x139b   :  { %v8475_v21 = vadd.f32 %v12509_v4, %v19646_v29 }
0x139c   :  { %v12511_v20 = vpop.f32.mrf.mxu0 }
0x139d   :  { %v12512_v5 = vadd.f32 %v12511_v20, %v12510_v59  ;;  %8869 = vrot.lane.b32.xlu1 %v8475_v21, %s14588_s30 }
0x139e   :  { %v12513_v47 = vpop.f32.mrf.mxu0 }
0x139f   :  { %v8480_v44 = vadd.f32 %v12512_v5, %v19647_v22 }
0x13a0   :  { %v12514_v9 = vpop.f32.mrf.mxu0 }
0x13a1   :  { %v12515_v0 = vadd.f32 %v12514_v9, %v12513_v47  ;;  %8871 = vrot.lane.b32.xlu0 %v8480_v44, %s14588_s30 }
0x13a2   :  { %v12516_v52 = vpop.f32.mrf.mxu0 }
0x13a3   :  { %v8485_v46 = vadd.f32 %v12515_v0, %v19648_v57 }
0x13a4   :  { %v12517_v54 = vpop.f32.mrf.mxu0 }
0x13a5   :  { %v12518_v19 = vadd.f32 %v12517_v54, %v12516_v52  ;;  %8873 = vrot.lane.b32.xlu1 %v8485_v46, %s14588_s30 }
0x13a6   :  { %v12519_v13 = vpop.f32.mrf.mxu0 }
0x13a7   :  { %v8490_v14 = vadd.f32 %v12518_v19, %v19649_v2 }
0x13a8   :  { %v12520_v38 = vpop.f32.mrf.mxu0 }
0x13a9   :  { %v12521_v28 = vadd.f32 %v12520_v38, %v12519_v13  ;;  %8875 = vrot.lane.b32.xlu0 %v8490_v14, %s14588_s30 }
0x13aa   :  { %v12522_v45 = vpop.f32.mrf.mxu0 }
0x13ab   :  { %v8495_v61 = vadd.f32 %v12521_v28, %v19650_v31 }
0x13ac   :  { %v12523_v43 = vpop.f32.mrf.mxu0 }
0x13ad   :  { %v12524_v49 = vadd.f32 %v12523_v43, %v12522_v45  ;;  %8877 = vrot.lane.b32.xlu1 %v8495_v61, %s14588_s30 }
0x13ae   :  { %v12525_v56 = vpop.f32.mrf.mxu0 }
0x13af   :  { %v8500_v12 = vadd.f32 %v12524_v49, %v19651_v15 }
0x13b0   :  { %v12526_v42 = vpop.f32.mrf.mxu0 }
0x13b1   :  { %v12527_v58 = vadd.f32 %v12526_v42, %v12525_v56  ;;  %8879 = vrot.lane.b32.xlu0 %v8500_v12, %s14588_s30 }
0x13b2   :  { %v12566_v37 = vpop.f32.mrf.mxu0 }
0x13b3   :  { %v8505_v32 = vadd.f32 %v12527_v58, %v19652_v62 }
0x13b4   :  { %v12567_v11 = vpop.f32.mrf.mxu0 }
0x13b5   :  { %8881 = vrot.lane.b32.xlu1 %v8505_v32, %s14588_s30  ;;  %v12568_v53 = vadd.f32 %v12567_v11, %v12566_v37  ;;  %v19653_v32 = vld [vmem:[#allocation30_spill] sm:$0xff] }
0x13b6   :  { %v12569_v10 = vpop.f32.mrf.mxu0 }
0x13b8   :  { %v12570_v51 = vpop.f32.mrf.mxu0 }
0x13b9   :  { %v12571_v48 = vadd.f32 %v12570_v51, %v12569_v10 }
0x13ba   :  { %v12572_v1 = vpop.f32.mrf.mxu0 }
0x13bc   :  { %v12573_v23 = vpop.f32.mrf.mxu0 }
0x13bd   :  { %v12574_v18 = vadd.f32 %v12573_v23, %v12572_v1 }
0x13be   :  { %v12575_v55 = vpop.f32.mrf.mxu0 }
0x13c0   :  { %v12576_v63 = vpop.f32.mrf.mxu0 }
0x13c1   :  { %v12577_v7 = vadd.f32 %v12576_v63, %v12575_v55  ;;  %v19654_v55 = vld [vmem:[#allocation31_spill] sm:$0xff] }
0x13c2   :  { %v12578_v41 = vpop.f32.mrf.mxu0 }
0x13c4   :  { %v12579_v30 = vpop.f32.mrf.mxu0 }
0x13c5   :  { %v12580_v20 = vadd.f32 %v12579_v30, %v12578_v41 }
0x13c6   :  { %v12581_v34 = vpop.f32.mrf.mxu0 }
0x13c8   :  { %v12582_v33 = vpop.f32.mrf.mxu0 }
0x13c9   :  { %v12583_v0 = vadd.f32 %v12582_v33, %v12581_v34  ;;  %v19656_v34 = vld [vmem:[#allocation33_spill] sm:$0xff] }
0x13ca   :  { %v12584_v59 = vpop.f32.mrf.mxu0 }
0x13cc   :  { %v12585_v22 = vpop.f32.mrf.mxu0 }
0x13cd   :  { %v12586_v13 = vadd.f32 %v12585_v22, %v12584_v59 }
0x13ce   :  { %v12587_v46 = vpop.f32.mrf.mxu0 }
0x13d0   :  { %v12588_v14 = vpop.f32.mrf.mxu0 }
0x13d1   :  { %v12589_v31 = vadd.f32 %v12588_v14, %v12587_v46 }
0x13d7   :  { %v12622_v24 = vpop.f32.mrf.mxu1 }
0x13d9   :  { %v12623_v35 = vpop.f32.mrf.mxu1 }
0x13da   :  { %v12624_v60 = vadd.f32 %v12623_v35, %v12622_v24 }
0x13db   :  { %v12625_v3 = vpop.f32.mrf.mxu1 }
0x13dc   :  { %v8821_v6 = vadd.f32 %v12624_v60, %v12568_v53 }
0x13dd   :  { %v12626_v50 = vpop.f32.mrf.mxu1 }
0x13de   :  { %v12627_v17 = vadd.f32 %v12626_v50, %v12625_v3  ;;  %8899 = vrot.lane.b32.xlu0 %v8821_v6, %s14604_s8  ;;  %v19655_v3 = vld [vmem:[#allocation32_spill] sm:$0xff] }
0x13df   :  { %v12628_v27 = vpop.f32.mrf.mxu1 }
0x13e0   :  { %v8826_v25 = vadd.f32 %v12627_v17, %v12571_v48 }
0x13e1   :  { %v12629_v8 = vpop.f32.mrf.mxu1 }
0x13e2   :  { %v12630_v16 = vadd.f32 %v12629_v8, %v12628_v27  ;;  %8901 = vrot.lane.b32.xlu1 %v8826_v25, %s14604_s8 }
0x13e3   :  { %v12631_v39 = vpop.f32.mrf.mxu1 }
0x13e4   :  { %v8831_v40 = vadd.f32 %v12630_v16, %v12574_v18 }
0x13e5   :  { %v12632_v36 = vpop.f32.mrf.mxu1 }
0x13e6   :  { %v12633_v26 = vadd.f32 %v12632_v36, %v12631_v39  ;;  %8903 = vrot.lane.b32.xlu0 %v8831_v40, %s14604_s8  ;;  %v19657_v40 = vld [vmem:[#allocation34_spill] sm:$0xff] }
0x13e7   :  { %v12634_v4 = vpop.f32.mrf.mxu1 }
0x13e8   :  { %v8836_v29 = vadd.f32 %v12633_v26, %v12577_v7 }
0x13e9   :  { %v12635_v21 = vpop.f32.mrf.mxu1 }
0x13ea   :  { %v12636_v5 = vadd.f32 %v12635_v21, %v12634_v4  ;;  %8905 = vrot.lane.b32.xlu1 %v8836_v29, %s14604_s8  ;;  %v19658_v21 = vld [vmem:[#allocation35_spill] sm:$0xff] }
0x13eb   :  { %v12637_v47 = vpop.f32.mrf.mxu1 }
0x13ec   :  { %v8841_v44 = vadd.f32 %v12636_v5, %v12580_v20 }
0x13ed   :  { %v12638_v9 = vpop.f32.mrf.mxu1 }
0x13ee   :  { %v12639_v52 = vadd.f32 %v12638_v9, %v12637_v47  ;;  %8907 = vrot.lane.b32.xlu0 %v8841_v44, %s14604_s8 }
0x13ef   :  { %v12640_v57 = vpop.f32.mrf.mxu1 }
0x13f0   :  { %v8846_v54 = vadd.f32 %v12639_v52, %v12583_v0  ;;  %v19659_v0 = vld [vmem:[#allocation36_spill] sm:$0xff] }
0x13f1   :  { %v12641_v19 = vpop.f32.mrf.mxu1 }
0x13f2   :  { %v12642_v2 = vadd.f32 %v12641_v19, %v12640_v57  ;;  %8909 = vrot.lane.b32.xlu1 %v8846_v54, %s14604_s8 }
0x13f3   :  { %v12643_v38 = vpop.f32.mrf.mxu1 }
0x13f4   :  { %v8851_v28 = vadd.f32 %v12642_v2, %v12586_v13  ;;  %v19660_v2 = vld [vmem:[#allocation37_spill] sm:$0xff] }
0x13f5   :  { %v12644_v45 = vpop.f32.mrf.mxu1 }
0x13f6   :  { %v12645_v61 = vadd.f32 %v12644_v45, %v12643_v38  ;;  %8911 = vrot.lane.b32.xlu0 %v8851_v28, %s14604_s8 }
0x13f8   :  { %v8856_v43 = vadd.f32 %v12645_v61, %v12589_v31 }
0x13fa   :  { %8913 = vrot.lane.b32.xlu1 %v8856_v43, %s14604_s8  ;;  %s14609_s8 = smov 118  }
0x140b   :  { %v8868_v49 = vpop.permute.xlu0 %8867 }
0x140c   :  { %v8923_v37 = vsel %vm4976_vm15, %v19653_v32, %v8868_v49 }
0x140f   :  { %v8870_v56 = vpop.permute.xlu1 %8869 }
0x1410   :  { %v8924_v63 = vsel %vm4976_vm15, %v19654_v55, %v8870_v56 }
0x1413   :  { %v8872_v15 = vpop.permute.xlu0 %8871 }
0x1414   :  { %v8925_v30 = vsel %vm4976_vm15, %v19655_v3, %v8872_v15 }
0x1417   :  { %v8874_v12 = vpop.permute.xlu1 %8873 }
0x1418   :  { %v8926_v25 = vsel %vm4976_vm15, %v19656_v34, %v8874_v12 }
0x141b   :  { %v8876_v42 = vpop.permute.xlu0 %8875 }
0x141c   :  { %v8927_v36 = vsel %vm4976_vm15, %v19657_v40, %v8876_v42 }
0x141f   :  { %v8878_v58 = vpop.permute.xlu1 %8877 }
0x1420   :  { %v8928_v20 = vsel %vm4976_vm15, %v19658_v21, %v8878_v58 }
0x1423   :  { %v8880_v62 = vpop.permute.xlu0 %8879 }
0x1424   :  { %v8929_v52 = vsel %vm4976_vm15, %v19659_v0, %v8880_v62  ;;  %v18719_v0 = vld [vmem:[%s19515_s10] sm:$0xff] }
0x1427   :  { %v8882_v11 = vpop.permute.xlu1 %8881 }
0x1428   :  { %v8930_v14 = vsel %vm4976_vm15, %v19660_v2, %v8882_v11  ;;  %vm9263_vm15 = vcmask 1041408  }
0x1450   :  { %v8900_v10 = vpop.permute.xlu0 %8899 }
0x1451   :  { %v18619_v51 = vsel %vm7178_vm1, %v8923_v37, %v8900_v10 }
0x1452   :  { %v8948_v1 = vsel %vm8947_vm9, %v18619_v51, 0.0  ;;  %v8980_v23 = vmul.f32 %v18619_v51, %v18619_v51 }
0x1453   :  { %8949 = vadd.xlane.f32.xlu0 %v8948_v1 }
0x1454   :  { %v8902_v24 = vpop.permute.xlu1 %8901  ;;  %v8988_v35 = vsel %vm8947_vm9, %v8980_v23, 0.0 }
0x1455   :  { %v18628_v41 = vsel %vm7178_vm1, %v8924_v63, %v8902_v24 }
0x1456   :  { %v8951_v53 = vsel %vm8947_vm9, %v18628_v41, 0.0  ;;  %v8981_v60 = vmul.f32 %v18628_v41, %v18628_v41 }
0x1457   :  { %8989 = vadd.xlane.f32.xlu0 %v8988_v35  ;;  %8952 = vadd.xlane.f32.xlu1 %v8951_v53 }
0x1458   :  { %v8904_v6 = vpop.permute.xlu0 %8903  ;;  %v8991_v48 = vsel %vm8947_vm9, %v8981_v60, 0.0 }
0x1459   :  { %v18638_v50 = vsel %vm7178_vm1, %v8925_v30, %v8904_v6 }
0x145a   :  { %v8954_v17 = vsel %vm8947_vm9, %v18638_v50, 0.0  ;;  %v8982_v27 = vmul.f32 %v18638_v50, %v18638_v50 }
0x145b   :  { %8992 = vadd.xlane.f32.xlu0 %v8991_v48  ;;  %8955 = vadd.xlane.f32.xlu1 %v8954_v17 }
0x145c   :  { %v8906_v8 = vpop.permute.xlu1 %8905  ;;  %v8994_v16 = vsel %vm8947_vm9, %v8982_v27, 0.0 }
0x145d   :  { %v18648_v18 = vsel %vm7178_vm1, %v8926_v25, %v8906_v8 }
0x145e   :  { %v8957_v39 = vsel %vm8947_vm9, %v18648_v18, 0.0  ;;  %v8983_v33 = vmul.f32 %v18648_v18, %v18648_v18 }
0x145f   :  { %8995 = vadd.xlane.f32.xlu1 %v8994_v16  ;;  %8958 = vadd.xlane.f32.xlu0 %v8957_v39 }
0x1460   :  { %v8908_v7 = vpop.permute.xlu0 %8907  ;;  %v8997_v59 = vsel %vm8947_vm9, %v8983_v33, 0.0 }
0x1461   :  { %v18658_v26 = vsel %vm7178_vm1, %v8927_v36, %v8908_v7 }
0x1462   :  { %v8960_v4 = vsel %vm8947_vm9, %v18658_v26, 0.0  ;;  %v8984_v29 = vmul.f32 %v18658_v26, %v18658_v26 }
0x1463   :  { %8961 = vadd.xlane.f32.xlu1 %v8960_v4  ;;  %8998 = vadd.xlane.f32.xlu0 %v8997_v59 }
0x1464   :  { %v8910_v5 = vpop.permute.xlu1 %8909  ;;  %v9000_v22 = vsel %vm8947_vm9, %v8984_v29, 0.0 }
0x1465   :  { %v18668_v47 = vsel %vm7178_vm1, %v8928_v20, %v8910_v5 }
0x1466   :  { %v8963_v44 = vsel %vm8947_vm9, %v18668_v47, 0.0  ;;  %v8985_v9 = vmul.f32 %v18668_v47, %v18668_v47 }
0x1467   :  { %9001 = vadd.xlane.f32.xlu1 %v9000_v22  ;;  %8964 = vadd.xlane.f32.xlu0 %v8963_v44 }
0x1468   :  { %v8912_v57 = vpop.permute.xlu0 %8911  ;;  %v9003_v19 = vsel %vm8947_vm9, %v8985_v9, 0.0 }
0x1469   :  { %v18678_v46 = vsel %vm7178_vm1, %v8929_v52, %v8912_v57 }
0x146a   :  { %v8966_v54 = vsel %vm8947_vm9, %v18678_v46, 0.0  ;;  %v8986_v13 = vmul.f32 %v18678_v46, %v18678_v46 }
0x146b   :  { %8967 = vadd.xlane.f32.xlu1 %v8966_v54  ;;  %9004 = vadd.xlane.f32.xlu0 %v9003_v19 }
0x146c   :  { %v8914_v38 = vpop.permute.xlu1 %8913  ;;  %v9006_v45 = vsel %vm8947_vm9, %v8986_v13, 0.0 }
0x146d   :  { %v18688_v28 = vsel %vm7178_vm1, %v8930_v14, %v8914_v38 }
0x146e   :  { %v8969_v31 = vsel %vm8947_vm9, %v18688_v28, 0.0  ;;  %v8987_v61 = vmul.f32 %v18688_v28, %v18688_v28 }
0x146f   :  { %9007 = vadd.xlane.f32.xlu1 %v9006_v45  ;;  %8970 = vadd.xlane.f32.xlu0 %v8969_v31 }
0x1470   :  { %v9009_v43 = vsel %vm8947_vm9, %v8987_v61, 0.0  ;;  %v18725_v61 = vld [vmem:[%s19515_s10 + $0x8] sm:$0xff] }
0x1473   :  { %9010 = vadd.xlane.f32.xlu0 %v9009_v43 }
0x14dc   :  { %v8950_v49 = vpop.xlane.xlu0 %8949 }
0x14dd   :  { %v18696_v56 = vmul.f32 0.055555556, %v8950_v49 }
0x14df   :  { %v9020_v42 = vmul.f32 %v18696_v56, %v18696_v56 }
0x14e0   :  { %v8990_v15 = vpop.xlane.xlu0 %8989  ;;  %v8953_v12 = vpop.xlane.xlu1 %8952 }
0x14e1   :  { %v9012_v58 = vmul.f32 0.055555556, %v8990_v15  ;;  %v18700_v62 = vmul.f32 0.055555556, %v8953_v12 }
0x14e3   :  { %v9028_v32 = vsub.f32 %v9012_v58, %v9020_v42  ;;  %v9021_v1 = vmul.f32 %v18700_v62, %v18700_v62 }
0x14e4   :  { %v8993_v37 = vpop.xlane.xlu0 %8992  ;;  %v8956_v11 = vpop.xlane.xlu1 %8955 }
0x14e5   :  { %v9036_v10 = vmax.f32 %v9028_v32, 0.0  ;;  %v9013_v23 = vmul.f32 0.055555556, %v8993_v37  ;;  %v18704_v55 = vmul.f32 0.055555556, %v8956_v11 }
0x14e7   :  { %v9044_v63 = vadd.f32 1e-05, %v9036_v10  ;;  %v9029_v24 = vsub.f32 %v9013_v23, %v9021_v1  ;;  %v9022_v35 = vmul.f32 %v18704_v55, %v18704_v55  ;;  %v18733_v1 = vld [vmem:[%s19515_s10 + $0x10] sm:$0xff] }
0x14e8   :  { %v8959_v53 = vpop.xlane.xlu0 %8958  ;;  %v8996_v60 = vpop.xlane.xlu1 %8995 }
0x14e9   :  { %14509 = vrsqrt.f32 %v9044_v63  ;;  %v9037_v3 = vmax.f32 %v9029_v24, 0.0  ;;  %v18708_v30 = vmul.f32 0.055555556, %v8959_v53  ;;  %v9014_v6 = vmul.f32 0.055555556, %v8996_v60 }
0x14eb   :  { %v9045_v48 = vadd.f32 1e-05, %v9037_v3  ;;  %v9030_v17 = vsub.f32 %v9014_v6, %v9022_v35  ;;  %v9023_v27 = vmul.f32 %v18708_v30, %v18708_v30  ;;  %v8942_v3 = vld [vmem:[%s19515_s10 + $0x18] sm:$0xff] }
0x14ec   :  { %v8999_v34 = vpop.xlane.xlu0 %8998  ;;  %v8962_v25 = vpop.xlane.xlu1 %8961 }
0x14ed   :  { %14511 = vrsqrt.f32 %v9045_v48  ;;  %v9038_v8 = vmax.f32 %v9030_v17, 0.0  ;;  %v9015_v16 = vmul.f32 0.055555556, %v8999_v34  ;;  %v18712_v39 = vmul.f32 0.055555556, %v8962_v25  ;;  %v8943_v34 = vld [vmem:[%s19515_s10 + $0x20] sm:$0xff] }
0x14ef   :  { %v9046_v33 = vadd.f32 1e-05, %v9038_v8  ;;  %v9031_v40 = vsub.f32 %v9015_v16, %v9023_v27  ;;  %v9024_v36 = vmul.f32 %v18712_v39, %v18712_v39 }
0x14f0   :  { %v8965_v7 = vpop.xlane.xlu0 %8964  ;;  %v9002_v4 = vpop.xlane.xlu1 %9001 }
0x14f1   :  { %14513 = vrsqrt.f32 %v9046_v33  ;;  %v9039_v59 = vmax.f32 %v9031_v40, 0.0  ;;  %v8977_v29 = vmul.f32 0.055555556, %v8965_v7  ;;  %v9016_v21 = vmul.f32 0.055555556, %v9002_v4  ;;  %v8945_v7 = vld [vmem:[%s19515_s10 + $0x30] sm:$0xff] }
0x14f3   :  { %v9047_v20 = vadd.f32 1e-05, %v9039_v59  ;;  %v9032_v5 = vsub.f32 %v9016_v21, %v9024_v36  ;;  %v9025_v22 = vmul.f32 %v8977_v29, %v8977_v29  ;;  %v8946_v21 = vld [vmem:[%s19515_s10 + $0x38] sm:$0xff] }
0x14f4   :  { %v9005_v44 = vpop.xlane.xlu0 %9004  ;;  %v8968_v9 = vpop.xlane.xlu1 %8967 }
0x14f5   :  { %14515 = vrsqrt.f32 %v9047_v20  ;;  %v9040_v52 = vmax.f32 %v9032_v5, 0.0  ;;  %v9017_v57 = vmul.f32 0.055555556, %v9005_v44  ;;  %v8978_v54 = vmul.f32 0.055555556, %v8968_v9  ;;  %v9237_v9 = vld [vmem:[%s19520_s15 + $0x8] sm:$0xff] }
0x14f6   :  { %v14510_v19 = vpop.eup %14509  ;;  %v9238_v44 = vld [vmem:[%s19520_s15 + $0x10] sm:$0x3] }
0x14f7   :  { %v9048_v13 = vadd.f32 1e-05, %v9040_v52  ;;  %v9033_v2 = vsub.f32 %v9017_v57, %v9025_v22  ;;  %v9060_v14 = vmul.f32 %v14510_v19, %v18719_v0  ;;  %v9026_v38 = vmul.f32 %v8978_v54, %v8978_v54  ;;  %14334 = vmatprep.subr.msk.mxu0 %vm9263_vm15, %v9238_v44 }
0x14f8   :  { %v8971_v45 = vpop.xlane.xlu0 %8970  ;;  %v9008_v31 = vpop.xlane.xlu1 %9007  ;;  %14335 = vmatpush3.msk.msra.mxu0 %vm9263_vm15, %v9238_v44 }
0x14f9   :  { %14517 = vrsqrt.f32 %v9048_v13  ;;  %v9041_v43 = vmax.f32 %v9033_v2, 0.0  ;;  %v8979_v49 = vmul.f32 0.055555556, %v8971_v45  ;;  %v9018_v15 = vmul.f32 0.055555556, %v9008_v31  ;;  %14336 = vmatprep.subr.mxu0 %v9237_v9  ;;  %v9236_v13 = vld [vmem:[%s19520_s15] sm:$0xff] }
0x14fa   :  { %v14512_v12 = vpop.eup %14511  ;;  %v9068_v42 = vmul.f32 %v9060_v14, %v18696_v56  ;;  %14337 = vmatpush3.msra.mxu0 %v9237_v9 }
0x14fb   :  { %v9049_v58 = vadd.f32 1e-05, %v9041_v43  ;;  %v9034_v32 = vsub.f32 %v9018_v15, %v9026_v38  ;;  %v9061_v37 = vmul.f32 %v14512_v12, %v18725_v61  ;;  %v9027_v11 = vmul.f32 %v8979_v49, %v8979_v49  ;;  %14338 = vmatprep.subr.mxu0 %v9236_v13 }
0x14fc   :  { %9084 = vrot.lane.b32.xlu1 %v9068_v42, %s14590_s1  ;;  %v9011_v10 = vpop.xlane.xlu0 %9010  ;;  %14339 = vmatpush3.msra.mxu0 %v9236_v13 }
0x14fd   :  { %14519 = vrsqrt.f32 %v9049_v58  ;;  %v9042_v23 = vmax.f32 %v9034_v32, 0.0  ;;  %v9019_v63 = vmul.f32 0.055555556, %v9011_v10  ;;  %v9069_v24 = vmul.f32 %v9061_v37, %v18700_v62 }
0x14fe   :  { %v14514_v35 = vpop.eup %14513 }
0x14ff   :  { %v9050_v56 = vadd.f32 1e-05, %v9042_v23  ;;  %v9035_v53 = vsub.f32 %v9019_v63, %v9027_v11  ;;  %9086 = vrot.lane.b32.xlu0 %v9069_v24, %s14590_s1  ;;  %v9062_v60 = vmul.f32 %v14514_v35, %v18733_v1 }
0x1501   :  { %14521 = vrsqrt.f32 %v9050_v56  ;;  %v9043_v6 = vmax.f32 %v9035_v53, 0.0  ;;  %v9070_v48 = vmul.f32 %v9062_v60, %v18704_v55  ;;  %v8944_v55 = vld [vmem:[%s19515_s10 + $0x28] sm:$0xff] }
0x1502   :  { %v14516_v17 = vpop.eup %14515 }
0x1503   :  { %v9051_v27 = vadd.f32 1e-05, %v9043_v6  ;;  %9088 = vrot.lane.b32.xlu1 %v9070_v48, %s14590_s1  ;;  %v9063_v62 = vmul.f32 %v14516_v17, %v8942_v3 }
0x1505   :  { %14523 = vrsqrt.f32 %v9051_v27  ;;  %v9071_v25 = vmul.f32 %v9063_v62, %v18708_v30 }
0x1506   :  { %v14518_v8 = vpop.eup %14517 }
0x1507   :  { %9090 = vrot.lane.b32.xlu1 %v9071_v25, %s14590_s1  ;;  %v9064_v16 = vmul.f32 %v14518_v8, %v8943_v34 }
0x1509   :  { %v9072_v33 = vmul.f32 %v9064_v16, %v18712_v39 }
0x150a   :  { %v14520_v40 = vpop.eup %14519 }
0x150b   :  { %9092 = vrot.lane.b32.xlu0 %v9072_v33, %s14590_s1  ;;  %v9065_v36 = vmul.f32 %v14520_v40, %v8944_v55 }
0x150d   :  { %v9073_v4 = vmul.f32 %v9065_v36, %v8977_v29  ;;  %v19661_v29 = vmov 1  }
0x150e   :  { %v14522_v30 = vpop.eup %14521 }
0x150f   :  { %9094 = vrot.lane.b32.xlu1 %v9073_v4, %s14590_s1  ;;  %v9066_v59 = vmul.f32 %v14522_v30, %v8945_v7 }
0x1511   :  { %v9074_v20 = vmul.f32 %v9066_v59, %v8978_v54 }
0x1512   :  { %v14524_v5 = vpop.eup %14523 }
0x1513   :  { %9096 = vrot.lane.b32.xlu0 %v9074_v20, %s14590_s1  ;;  %v9067_v39 = vmul.f32 %v14524_v5, %v8946_v21 }
0x1515   :  { %v9075_v22 = vmul.f32 %v9067_v39, %v8979_v49 }
0x1517   :  { %9098 = vrot.lane.b32.xlu1 %v9075_v22, %s14590_s1  ;;  %9118 = vperm.xlu0 %14490, %v9060_v14  }
0x151b   :  { %9123 = vperm.xlu1 %14491, %v9061_v37   ;;  %9138 = vperm.xlu0 %14490, %v9064_v16  }
0x151f   :  { %9128 = vperm.xlu1 %14491, %v9062_v60   ;;  %14493 = vset.pattern.permute.xlu0 %v19661_v29 }
0x1523   :  { %9133 = vperm.xlu1 %14491, %v9063_v62  }
0x1527   :  { %9143 = vperm.xlu1 %14491, %v9065_v36  }
0x152b   :  { %9148 = vperm.xlu1 %14491, %v9066_v59  }
0x152f   :  { %14492 = vset.pattern.permute.xlu1 %v19661_v29 }
0x156e   :  { %v9085_v52 = vpop.permute.xlu1 %9084 }
0x156f   :  { %v9108_v57 = vsub.f32 %v18719_v0, %v9085_v52 }
0x1571   :  { %9166 = vperm.xlu1 %14492, %v9108_v57   ;;  %v9087_v54 = vpop.permute.xlu0 %9086 }
0x1572   :  { %v9109_v19 = vsub.f32 %v18725_v61, %v9087_v54  ;;  %v19662_v61 = vmov 0  }
0x1574   :  { %9171 = vperm.xlu0 %14493, %v9109_v19   ;;  %v18800_v19 = vld [vmem:[%s19519_s14 + $0x8] sm:$0x3] }
0x1575   :  { %v9089_v2 = vpop.permute.xlu1 %9088  ;;  %14352 = vmatprep.subr.msk.mxu1 %vm9263_vm15, %v18800_v19  ;;  %14368 = vmatprep.subr.msk.mxu0 %vm9263_vm15, %v18800_v19 }
0x1576   :  { %v9110_v14 = vsub.f32 %v18733_v1, %v9089_v2  ;;  %14353 = vmatpush3.msk.msra.mxu1 %vm9263_vm15, %v18800_v19 }
0x1578   :  { %9176 = vperm.xlu0 %14493, %v9110_v14  }
0x1579   :  { %v9091_v38 = vpop.permute.xlu1 %9090 }
0x157a   :  { %v9111_v45 = vsub.f32 %v8942_v3, %v9091_v38 }
0x157c   :  { %9181 = vperm.xlu1 %14492, %v9111_v45  }
0x157d   :  { %v9093_v31 = vpop.permute.xlu0 %9092 }
0x157e   :  { %v9112_v0 = vsub.f32 %v8943_v34, %v9093_v31 }
0x1580   :  { %9186 = vperm.xlu1 %14492, %v9112_v0  }
0x1581   :  { %v9095_v43 = vpop.permute.xlu1 %9094 }
0x1582   :  { %v9113_v49 = vsub.f32 %v8944_v55, %v9095_v43 }
0x1584   :  { %14494 = vset.pattern.permute.xlu1 %v19662_v61  ;;  %9191 = vperm.xlu0 %14493, %v9113_v49  }
0x1585   :  { %v9097_v15 = vpop.permute.xlu0 %9096  ;;  %9153 = vperm.xlu1 %14494, %v9067_v39  }
0x1586   :  { %v9114_v12 = vsub.f32 %v8945_v7, %v9097_v15 }
0x1588   :  { %9196 = vperm.xlu0 %14493, %v9114_v12  }
0x1589   :  { %v9099_v42 = vpop.permute.xlu1 %9098  ;;  %14495 = vset.pattern.permute.xlu1 %v19661_v29 }
0x158a   :  { %v9115_v58 = vsub.f32 %v8946_v21, %v9099_v42 }
0x158c   :  { %9201 = vperm.xlu1 %14495, %v9115_v58   ;;  %14496 = vset.pattern.permute.xlu0 %v19662_v61 }
0x1592   :  { %v9119_v1 = vpop.permute.xlu0 %9118 }
0x1593   :  { %v9156_v63 = vmul.f32 %v9119_v1, %v18619_v51 }
0x1596   :  { %v9124_v32 = vpop.permute.xlu1 %9123  ;;  %v9139_v24 = vpop.permute.xlu0 %9138 }
0x1597   :  { %v9157_v53 = vmul.f32 %v9124_v32, %v18628_v41 }
0x159a   :  { %v9129_v37 = vpop.permute.xlu1 %9128 }
0x159b   :  { %v9158_v17 = vmul.f32 %v9129_v37, %v18638_v50  ;;  %v9160_v50 = vmul.f32 %v9139_v24, %v18658_v26 }
0x159e   :  { %v9134_v11 = vpop.permute.xlu1 %9133 }
0x159f   :  { %v9159_v51 = vmul.f32 %v9134_v11, %v18648_v18 }
0x15a2   :  { %v9144_v10 = vpop.permute.xlu1 %9143 }
0x15a3   :  { %v9161_v4 = vmul.f32 %v9144_v10, %v18668_v47 }
0x15a6   :  { %v9149_v23 = vpop.permute.xlu1 %9148 }
0x15a7   :  { %v9162_v20 = vmul.f32 %v9149_v23, %v18678_v46 }
0x15ec   :  { %v9167_v35 = vpop.permute.xlu1 %9166 }
0x15ed   :  { %v9204_v56 = vadd.f32 %v9167_v35, %v9156_v63 }
0x15ef   :  { %v9220_v60 = vmul.f32 0.2, %v9204_v56  ;;  %v9172_v3 = vpop.permute.xlu0 %9171  ;;  %vm9212_vm10 = vcmp.ge.f32.partialorder %v9204_v56, 0.0 }
0x15f0   :  { %v9205_v6 = vadd.f32 %v9172_v3, %v9157_v53 }
0x15f1   :  { %v9228_v48 = vsel %vm9212_vm10, %v9204_v56, %v9220_v60 }
0x15f2   :  { %vm9213_vm11 = vcmp.ge.f32.partialorder %v9205_v6, 0.0  ;;  %v9221_v27 = vmul.f32 0.2, %v9205_v6  ;;  %14340 = vmatprep.mubr.msk.f32.mxu0 %vm8947_vm9, %v9228_v48 }
0x15f3   :  { %v9177_v62 = vpop.permute.xlu0 %9176 }
0x15f4   :  { %v9229_v34 = vsel %vm9213_vm11, %v9205_v6, %v9221_v27  ;;  %v9206_v25 = vadd.f32 %v9177_v62, %v9158_v17 }
0x15f5   :  { %14341 = vmatmul.mubr.msk.f32.vlgmr.msra.gmra.mxu0 %vm8947_vm9, %v9229_v34 }
0x15f6   :  { %v9222_v8 = vmul.f32 0.2, %v9206_v25  ;;  %vm9214_vm12 = vcmp.ge.f32.partialorder %v9206_v25, 0.0  ;;  %14369 = vmatpush3.msk.msra.mxu0 %vm9263_vm15, %v18800_v19 }
0x15f7   :  { %v9182_v41 = vpop.permute.xlu1 %9181 }
0x15f8   :  { %v9207_v16 = vadd.f32 %v9182_v41, %v9159_v51  ;;  %v9230_v55 = vsel %vm9214_vm12, %v9206_v25, %v9222_v8 }
0x15f9   :  { %14343 = vmatprep.mubr.msk.f32.mxu0 %vm8947_vm9, %v9230_v55 }
0x15fa   :  { %vm9215_vm13 = vcmp.ge.f32.partialorder %v9207_v16, 0.0  ;;  %v9223_v33 = vmul.f32 0.2, %v9207_v16 }
0x15fb   :  { %v9187_v40 = vpop.permute.xlu1 %9186 }
0x15fc   :  { %v9208_v36 = vadd.f32 %v9187_v40, %v9160_v50  ;;  %v9231_v7 = vsel %vm9215_vm13, %v9207_v16, %v9223_v33 }
0x15fd   :  { %14344 = vmatmul.mubr.msk.f32.gmra.mxu0 %vm8947_vm9, %v9231_v7  ;;  %v10240_v7 = vlaneseq }
0x15fe   :  { %v9224_v30 = vmul.f32 0.2, %v9208_v36  ;;  %vm9216_vm14 = vcmp.ge.f32.partialorder %v9208_v36, 0.0 }
0x15ff   :  { %v9192_v18 = vpop.permute.xlu0 %9191 }
0x1600   :  { %v9209_v59 = vadd.f32 %v9192_v18, %v9161_v4  ;;  %v9232_v21 = vsel %vm9216_vm14, %v9208_v36, %v9224_v30  ;;  %v9154_v5 = vpop.permute.xlu1 %9153  ;;  %v18991_v30 = vshrl.u32 %v10240_v7, 7 }
0x1601   :  { %14346 = vmatprep.mubr.msk.f32.mxu0 %vm8947_vm9, %v9232_v21  ;;  %v9163_v44 = vmul.f32 %v9154_v5, %v18688_v28  ;;  %v18811_v28 = vld [vmem:[%s19519_s14] sm:$0xff]  ;;  %s14608_s14 = smov 108  }
0x1602   :  { %vm9217_vm3 = vcmp.ge.f32.partialorder %v9209_v59, 0.0  ;;  %v9225_v26 = vmul.f32 0.2, %v9209_v59  ;;  %14354 = vmatprep.subr.mxu1 %v18811_v28  ;;  %14370 = vmatprep.subr.mxu0 %v18811_v28  ;;  %v10246_v21 = vsub.s32 1, %v18991_v30 }
0x1603   :  { %v9197_v39 = vpop.permute.xlu0 %9196  ;;  %14355 = vmatpush3.msra.mxu1 %v18811_v28  ;;  %14371 = vmatpush3.msra.mxu0 %v18811_v28 }
0x1604   :  { %v9210_v22 = vadd.f32 %v9197_v39, %v9162_v20  ;;  %v9233_v29 = vsel %vm9217_vm3, %v9209_v59, %v9225_v26  ;;  %14384 = vmatprep.subr.msk.mxu1 %vm9263_vm15, %v18800_v19  ;;  %14400 = vmatprep.subr.msk.mxu0 %vm9263_vm15, %v18800_v19  ;;  %v19005_v20 = vld [vmem:[%s19517_s12] sm:$0xff]  ;;  %s14611_s12 = smov 88  }
0x1605   :  { %14347 = vmatmul.mubr.msk.f32.gmra.mxu0 %vm8947_vm9, %v9233_v29  ;;  %v19008_v26 = vrot.slane %v19005_v20, %v10246_v21 }
0x1606   :  { %v9226_v47 = vmul.f32 0.2, %v9210_v22  ;;  %vm9218_vm1 = vcmp.ge.f32.partialorder %v9210_v22, 0.0 }
0x1607   :  { %v9202_v9 = vpop.permute.xlu1 %9201 }
0x1608   :  { %v9211_v52 = vadd.f32 %v9202_v9, %v9163_v44  ;;  %v9234_v57 = vsel %vm9218_vm1, %v9210_v22, %v9226_v47 }
0x1609   :  { %14349 = vmatprep.mubr.msk.f32.mxu0 %vm8947_vm9, %v9234_v57 }
0x160a   :  { %vm9219_vm4 = vcmp.ge.f32.partialorder %v9211_v52, 0.0  ;;  %v9227_v54 = vmul.f32 0.2, %v9211_v52 }
0x160c   :  { %v9235_v46 = vsel %vm9219_vm4, %v9211_v52, %v9227_v54 }
0x160d   :  { %14350 = vmatmul.mubr.msk.f32.gmra.mxu0 %vm8947_vm9, %v9235_v46 }
0x16b5   :  { %v18823_v13 = vpop.f32.mrf.mxu0 }
0x16b6   :  { %9647 = vrot.lane.b32.xlu1 %v18823_v13, %s14608_s14 }
0x16b7   :  { %v18826_v2 = vpop.f32.mrf.mxu0 }
0x16b8   :  { %9645 = vrot.lane.b32.xlu0 %v18826_v2, %s14608_s14  ;;  %14356 = vmatprep.mubr.msk.f32.mxu1 %vm9375_vm5, %v18826_v2 }
0x16b9   :  { %14357 = vmatmul.mubr.msk.f32.vlgmr.msra.gmra.mxu1 %vm9375_vm5, %v18823_v13 }
0x16ba   :  { %14385 = vmatpush3.msk.msra.mxu1 %vm9263_vm15, %v18800_v19 }
0x16bb   :  { %14386 = vmatprep.subr.mxu1 %v18811_v28 }
0x16bc   :  { %14387 = vmatpush3.msra.mxu1 %v18811_v28 }
0x16bd   :  { %v18837_v14 = vpop.f32.mrf.mxu0 }
0x16be   :  { %9651 = vrot.lane.b32.xlu1 %v18837_v14, %s14608_s14 }
0x16bf   :  { %v18840_v38 = vpop.f32.mrf.mxu0 }
0x16c0   :  { %9649 = vrot.lane.b32.xlu0 %v18840_v38, %s14608_s14  ;;  %14359 = vmatprep.mubr.msk.f32.mxu1 %vm9375_vm5, %v18840_v38 }
0x16c1   :  { %14360 = vmatmul.mubr.msk.f32.gmra.mxu1 %vm9375_vm5, %v18837_v14 }
0x16c5   :  { %v18847_v45 = vpop.f32.mrf.mxu0 }
0x16c6   :  { %9655 = vrot.lane.b32.xlu1 %v18847_v45, %s14608_s14 }
0x16c7   :  { %v18850_v31 = vpop.f32.mrf.mxu0 }
0x16c8   :  { %9653 = vrot.lane.b32.xlu0 %v18850_v31, %s14608_s14  ;;  %14362 = vmatprep.mubr.msk.f32.mxu1 %vm9375_vm5, %v18850_v31 }
0x16c9   :  { %14363 = vmatmul.mubr.msk.f32.gmra.mxu1 %vm9375_vm5, %v18847_v45 }
0x16cd   :  { %v18857_v0 = vpop.f32.mrf.mxu0 }
0x16ce   :  { %9659 = vrot.lane.b32.xlu1 %v18857_v0, %s14608_s14 }
0x16cf   :  { %v18860_v43 = vpop.f32.mrf.mxu0 }
0x16d0   :  { %9657 = vrot.lane.b32.xlu0 %v18860_v43, %s14608_s14  ;;  %14365 = vmatprep.mubr.msk.f32.mxu1 %vm9375_vm5, %v18860_v43 }
0x16d1   :  { %14366 = vmatmul.mubr.msk.f32.gmra.mxu1 %vm9375_vm5, %v18857_v0 }
0x16d2   :  { %9510 = vrot.lane.b32.xlu1 %v18823_v13, %s14609_s8 }
0x16d4   :  { %9508 = vrot.lane.b32.xlu0 %v18826_v2, %s14609_s8 }
0x16d6   :  { %9514 = vrot.lane.b32.xlu1 %v18837_v14, %s14609_s8 }
0x16d8   :  { %9512 = vrot.lane.b32.xlu0 %v18840_v38, %s14609_s8 }
0x16da   :  { %9518 = vrot.lane.b32.xlu1 %v18847_v45, %s14609_s8 }
0x16dc   :  { %9516 = vrot.lane.b32.xlu0 %v18850_v31, %s14609_s8 }
0x16de   :  { %9522 = vrot.lane.b32.xlu1 %v18857_v0, %s14609_s8 }
0x16e0   :  { %9520 = vrot.lane.b32.xlu0 %v18860_v43, %s14609_s8 }
0x16e2   :  { %9782 = vrot.lane.b32.xlu1 %v18826_v2, %s14575_s24 }
0x16e6   :  { %9784 = vrot.lane.b32.xlu1 %v18823_v13, %s14575_s24 }
0x16ea   :  { %9786 = vrot.lane.b32.xlu1 %v18840_v38, %s14575_s24 }
0x16ee   :  { %9788 = vrot.lane.b32.xlu1 %v18837_v14, %s14575_s24 }
0x16f2   :  { %9790 = vrot.lane.b32.xlu1 %v18850_v31, %s14575_s24 }
0x16f6   :  { %9792 = vrot.lane.b32.xlu1 %v18847_v45, %s14575_s24 }
0x16fa   :  { %9796 = vrot.lane.b32.xlu1 %v18857_v0, %s14575_s24 }
0x16fe   :  { %9794 = vrot.lane.b32.xlu1 %v18860_v43, %s14575_s24  ;;  %s14610_s24 = smov 124  }
0x1728   :  { %v9648_v61 = vpop.permute.xlu1 %9647 }
0x172a   :  { %v9646_v49 = vpop.permute.xlu0 %9645 }
0x172b   :  { %14388 = vmatprep.mubr.msk.f32.mxu1 %vm9375_vm5, %v9646_v49 }
0x172c   :  { %14389 = vmatmul.mubr.msk.f32.vlgmr.msra.gmra.mxu1 %vm9375_vm5, %v9648_v61 }
0x1730   :  { %v9652_v12 = vpop.permute.xlu1 %9651 }
0x1732   :  { %v9650_v15 = vpop.permute.xlu0 %9649 }
0x1733   :  { %14391 = vmatprep.mubr.msk.f32.mxu1 %vm9375_vm5, %v9650_v15 }
0x1734   :  { %14392 = vmatmul.mubr.msk.f32.gmra.mxu1 %vm9375_vm5, %v9652_v12 }
0x1738   :  { %v9656_v58 = vpop.permute.xlu1 %9655 }
0x173a   :  { %v9654_v42 = vpop.permute.xlu0 %9653 }
0x173b   :  { %14394 = vmatprep.mubr.msk.f32.mxu1 %vm9375_vm5, %v9654_v42 }
0x173c   :  { %14395 = vmatmul.mubr.msk.f32.gmra.mxu1 %vm9375_vm5, %v9656_v58 }
0x1740   :  { %v9660_v32 = vpop.permute.xlu1 %9659 }
0x1742   :  { %v9658_v37 = vpop.permute.xlu0 %9657 }
0x1743   :  { %14397 = vmatprep.mubr.msk.f32.mxu1 %vm9375_vm5, %v9658_v37 }
0x1744   :  { %14398 = vmatmul.mubr.msk.f32.gmra.mxu1 %vm9375_vm5, %v9660_v32  ;;  %v9511_v11 = vpop.permute.xlu1 %9510 }
0x1745   :  { %10344 = vmatprep.mubr.f32.mxu1 %v19008_v26 }
0x1746   :  { %v9509_v10 = vpop.permute.xlu0 %9508 }
0x1747   :  { %14372 = vmatprep.mubr.msk.f32.mxu0 %vm9375_vm5, %v9509_v10 }
0x1748   :  { %14373 = vmatmul.mubr.msk.f32.vlgmr.msra.gmra.mxu0 %vm9375_vm5, %v9511_v11  ;;  %v9515_v1 = vpop.permute.xlu1 %9514 }
0x1749   :  { %14401 = vmatpush3.msk.msra.mxu0 %vm9263_vm15, %v18800_v19 }
0x174a   :  { %v9513_v23 = vpop.permute.xlu0 %9512  ;;  %14402 = vmatprep.subr.mxu0 %v18811_v28 }
0x174b   :  { %14375 = vmatprep.mubr.msk.f32.mxu0 %vm9375_vm5, %v9513_v23  ;;  %14403 = vmatpush3.msra.mxu0 %v18811_v28 }
0x174c   :  { %14376 = vmatmul.mubr.msk.f32.gmra.mxu0 %vm9375_vm5, %v9515_v1  ;;  %v9519_v63 = vpop.permute.xlu1 %9518 }
0x174e   :  { %v9517_v24 = vpop.permute.xlu0 %9516 }
0x174f   :  { %14378 = vmatprep.mubr.msk.f32.mxu0 %vm9375_vm5, %v9517_v24 }
0x1750   :  { %14379 = vmatmul.mubr.msk.f32.gmra.mxu0 %vm9375_vm5, %v9519_v63  ;;  %v9523_v35 = vpop.permute.xlu1 %9522 }
0x1752   :  { %v9521_v56 = vpop.permute.xlu0 %9520 }
0x1753   :  { %14381 = vmatprep.mubr.msk.f32.mxu0 %vm9375_vm5, %v9521_v56 }
0x1754   :  { %14382 = vmatmul.mubr.msk.f32.gmra.mxu0 %vm9375_vm5, %v9523_v35  ;;  %v9783_v53 = vpop.permute.xlu1 %9782 }
0x1755   :  { %14404 = vmatprep.mubr.msk.f32.mxu0 %vm9375_vm5, %v9783_v53 }
0x1758   :  { %v9785_v60 = vpop.permute.xlu1 %9784 }
0x1759   :  { %14405 = vmatmul.mubr.msk.f32.vlgmr.msra.gmra.mxu0 %vm9375_vm5, %v9785_v60 }
0x175c   :  { %v9787_v3 = vpop.permute.xlu1 %9786 }
0x175d   :  { %14407 = vmatprep.mubr.msk.f32.mxu0 %vm9375_vm5, %v9787_v3 }
0x1760   :  { %v9789_v6 = vpop.permute.xlu1 %9788 }
0x1761   :  { %14408 = vmatmul.mubr.msk.f32.gmra.mxu0 %vm9375_vm5, %v9789_v6 }
0x1764   :  { %v9791_v48 = vpop.permute.xlu1 %9790 }
0x1765   :  { %14410 = vmatprep.mubr.msk.f32.mxu0 %vm9375_vm5, %v9791_v48 }
0x1768   :  { %v9793_v17 = vpop.permute.xlu1 %9792 }
0x1769   :  { %14411 = vmatmul.mubr.msk.f32.gmra.mxu0 %vm9375_vm5, %v9793_v17 }
0x176c   :  { %v9797_v27 = vpop.permute.xlu1 %9796 }
0x1770   :  { %v9795_v62 = vpop.permute.xlu1 %9794 }
0x1771   :  { %14413 = vmatprep.mubr.msk.f32.mxu0 %vm9375_vm5, %v9795_v62 }
0x1772   :  { %14414 = vmatmul.mubr.msk.f32.gmra.mxu0 %vm9375_vm5, %v9797_v27  ;;  %v10254_v27 = vsub.s32 3, %v18991_v30 }
0x1774   :  { %v19170_v62 = vrot.slane %v19005_v20, %v10254_v27 }
0x1776   :  { %10414 = vmatprep.mubr.f32.mxu0 %v19170_v62 }
0x1779   :  { %v18919_v34 = vpop.f32.mrf.mxu1 }
0x177a   :  { %9929 = vrot.lane.b32.xlu1 %v18919_v34, %s14610_s24  ;;  %9977 = vrot.lane.b32.xlu0 %v18919_v34, %s14594_s13 }
0x177b   :  { %v18925_v25 = vpop.f32.mrf.mxu1 }
0x177e   :  { %9975 = vrot.lane.b32.xlu0 %v18925_v25, %s14594_s13 }
0x1781   :  { %v18929_v51 = vpop.f32.mrf.mxu1 }
0x1782   :  { %9933 = vrot.lane.b32.xlu1 %v18929_v51, %s14610_s24  ;;  %9927 = vrot.lane.b32.xlu0 %v18925_v25, %s14610_s24 }
0x1783   :  { %v18937_v8 = vpop.f32.mrf.mxu1 }
0x1786   :  { %9981 = vrot.lane.b32.xlu0 %v18929_v51, %s14594_s13 }
0x1789   :  { %v18939_v41 = vpop.f32.mrf.mxu1 }
0x178a   :  { %9937 = vrot.lane.b32.xlu1 %v18939_v41, %s14610_s24  ;;  %9979 = vrot.lane.b32.xlu0 %v18937_v8, %s14594_s13 }
0x178b   :  { %v18947_v16 = vpop.f32.mrf.mxu1 }
0x178e   :  { %9931 = vrot.lane.b32.xlu0 %v18937_v8, %s14610_s24 }
0x1791   :  { %v18949_v55 = vpop.f32.mrf.mxu1 }
0x1792   :  { %9985 = vrot.lane.b32.xlu0 %v18939_v41, %s14594_s13  ;;  %9941 = vrot.lane.b32.xlu1 %v18949_v55, %s14610_s24 }
0x1793   :  { %v18967_v50 = vpop.f32.mrf.mxu1 }
0x1796   :  { %9983 = vrot.lane.b32.xlu0 %v18947_v16, %s14594_s13  ;;  %9959 = vrot.lane.b32.xlu1 %v18947_v16, %s14579_s19 }
0x179a   :  { %9935 = vrot.lane.b32.xlu0 %v18947_v16, %s14610_s24  ;;  %9955 = vrot.lane.b32.xlu1 %v18937_v8, %s14579_s19 }
0x179e   :  { %9951 = vrot.lane.b32.xlu1 %v18925_v25, %s14579_s19  ;;  %9989 = vrot.lane.b32.xlu0 %v18949_v55, %s14594_s13 }
0x17a2   :  { %9965 = vrot.lane.b32.xlu0 %v18949_v55, %s14579_s19  ;;  %9963 = vrot.lane.b32.xlu1 %v18967_v50, %s14579_s19 }
0x17a6   :  { %9987 = vrot.lane.b32.xlu0 %v18967_v50, %s14594_s13 }
0x17aa   :  { %9939 = vrot.lane.b32.xlu0 %v18967_v50, %s14610_s24 }
0x17ae   :  { %9961 = vrot.lane.b32.xlu0 %v18939_v41, %s14579_s19 }
0x17b2   :  { %9957 = vrot.lane.b32.xlu0 %v18929_v51, %s14579_s19 }
0x17b6   :  { %9953 = vrot.lane.b32.xlu0 %v18919_v34, %s14579_s19 }
0x17ec   :  { %v18983_v33 = vpop.permute.xlu0 %9977  ;;  %v18985_v40 = vpop.f32.mrf.mxu1 }
0x17ed   :  { %19663 = vst [vmem:[#allocation11_spill] sm:$0xff] %v18985_v40  ;;  %v9930_v57 = vpop.permute.xlu1 %9929 }
0x17ee   :  { %v18989_v4 = vpop.f32.mrf.mxu1 }
0x17ef   :  { %19664 = vst [vmem:[#allocation12_spill] sm:$0xff] %v18989_v4 }
0x17f0   :  { %v18987_v36 = vpop.permute.xlu0 %9975 }
0x17f4   :  { %v18993_v18 = vpop.permute.xlu0 %9927  ;;  %v18995_v59 = vpop.f32.mrf.mxu1 }
0x17f5   :  { %19665 = vst [vmem:[#allocation9_spill] sm:$0xff] %v18995_v59  ;;  %10093 = vrot.lane.b32.xlu1 %v18995_v59, %s14610_s24  ;;  %10141 = vrot.lane.b32.xlu0 %v18995_v59, %s14594_s13  ;;  %v9934_v49 = vpop.permute.xlu1 %9933 }
0x17f6   :  { %v19011_v39 = vpop.f32.mrf.mxu1 }
0x17f7   :  { %19666 = vst [vmem:[#allocation10_spill] sm:$0xff] %v19011_v39 }
0x17f8   :  { %v9982_v5 = vpop.permute.xlu0 %9981 }
0x17fc   :  { %v9980_v22 = vpop.permute.xlu0 %9979  ;;  %v19013_v29 = vpop.f32.mrf.mxu1 }
0x17fd   :  { %10097 = vrot.lane.b32.xlu1 %v19013_v29, %s14610_s24  ;;  %10145 = vrot.lane.b32.xlu0 %v19013_v29, %s14594_s13  ;;  %v9938_v15 = vpop.permute.xlu1 %9937 }
0x17fe   :  { %v19019_v44 = vpop.f32.mrf.mxu1 }
0x17ff   :  { %19667 = vst [vmem:[#allocation13_spill] sm:$0xff] %v19019_v44 }
0x1800   :  { %v9932_v47 = vpop.permute.xlu0 %9931 }
0x1801   :  { %10095 = vrot.lane.b32.xlu1 %v19019_v44, %s14610_s24  ;;  %10143 = vrot.lane.b32.xlu0 %v19019_v44, %s14594_s13 }
0x1804   :  { %v9986_v9 = vpop.permute.xlu0 %9985  ;;  %v19025_v52 = vpop.f32.mrf.mxu1 }
0x1805   :  { %10101 = vrot.lane.b32.xlu1 %v19025_v52, %s14610_s24  ;;  %10149 = vrot.lane.b32.xlu0 %v19025_v52, %s14594_s13  ;;  %v9942_v42 = vpop.permute.xlu1 %9941 }
0x1806   :  { %v19031_v54 = vpop.f32.mrf.mxu1 }
0x1808   :  { %v9984_v46 = vpop.permute.xlu0 %9983  ;;  %v19057_v1 = vpop.f32.mrf.mxu0 }
0x1809   :  { %10099 = vrot.lane.b32.xlu1 %v19031_v54, %s14610_s24  ;;  %10147 = vrot.lane.b32.xlu0 %v19031_v54, %s14594_s13  ;;  %v9960_v37 = vpop.permute.xlu1 %9959 }
0x180a   :  { %v19063_v23 = vpop.f32.mrf.mxu0 }
0x180c   :  { %v9936_v61 = vpop.permute.xlu0 %9935  ;;  %v19070_v24 = vpop.f32.mrf.mxu0 }
0x180d   :  { %10091 = vrot.lane.b32.xlu1 %v19011_v39, %s14610_s24  ;;  %10139 = vrot.lane.b32.xlu0 %v19011_v39, %s14594_s13  ;;  %v9956_v10 = vpop.permute.xlu1 %9955 }
0x180e   :  { %v19077_v53 = vpop.f32.mrf.mxu0 }
0x1810   :  { %v9990_v12 = vpop.permute.xlu0 %9989 }
0x1811   :  { %12697 = vmatprep.subr.mxu1 %v9990_v12  ;;  %10089 = vrot.lane.b32.xlu1 %v18985_v40, %s14610_s24  ;;  %v9952_v63 = vpop.permute.xlu1 %9951 }
0x1812   :  { %10137 = vrot.lane.b32.xlu0 %v18985_v40, %s14594_s13  ;;  %12698 = vmatpush3.msra.mxu1 %v9942_v42 }
0x1814   :  { %v9966_v58 = vpop.permute.xlu0 %9965 }
0x1815   :  { %10087 = vrot.lane.b32.xlu1 %v18989_v4, %s14610_s24  ;;  %v9964_v56 = vpop.permute.xlu1 %9963 }
0x1816   :  { %10135 = vrot.lane.b32.xlu0 %v18989_v4, %s14594_s13 }
0x1818   :  { %v9988_v32 = vpop.permute.xlu0 %9987 }
0x1819   :  { %10123 = vrot.lane.b32.xlu1 %v19031_v54, %s14579_s19  ;;  %12699 = vmatprep.subr.mxu1 %v9988_v32 }
0x181a   :  { %10125 = vrot.lane.b32.xlu0 %v19025_v52, %s14579_s19 }
0x181c   :  { %v9940_v11 = vpop.permute.xlu0 %9939 }
0x181d   :  { %10119 = vrot.lane.b32.xlu1 %v19019_v44, %s14579_s19  ;;  %12700 = vmatpush3.msra.mxu1 %v9940_v11  ;;  %v10258_v11 = vsub.s32 4, %v18991_v30 }
0x181e   :  { %10121 = vrot.lane.b32.xlu0 %v19013_v29, %s14579_s19  ;;  %12701 = vmatprep.subr.mxu1 %v9986_v9 }
0x181f   :  { %12702 = vmatpush3.msra.mxu1 %v9938_v15 }
0x1820   :  { %12703 = vmatprep.subr.mxu1 %v9984_v46  ;;  %v9962_v35 = vpop.permute.xlu0 %9961 }
0x1821   :  { %10115 = vrot.lane.b32.xlu1 %v19011_v39, %s14579_s19  ;;  %12704 = vmatpush3.msra.mxu1 %v9936_v61 }
0x1822   :  { %10117 = vrot.lane.b32.xlu0 %v18995_v59, %s14579_s19  ;;  %12705 = vmatprep.subr.mxu1 %v9982_v5 }
0x1823   :  { %12706 = vmatpush3.msra.mxu1 %v9934_v49 }
0x1824   :  { %12707 = vmatprep.subr.mxu1 %v9980_v22  ;;  %v9958_v60 = vpop.permute.xlu0 %9957 }
0x1825   :  { %10111 = vrot.lane.b32.xlu1 %v18989_v4, %s14579_s19  ;;  %12708 = vmatpush3.msra.mxu1 %v9932_v47 }
0x1826   :  { %10113 = vrot.lane.b32.xlu0 %v18985_v40, %s14579_s19  ;;  %12709 = vmatprep.subr.mxu1 %v18983_v33 }
0x1827   :  { %12710 = vmatpush3.msra.mxu1 %v9930_v57 }
0x1828   :  { %12711 = vmatprep.subr.mxu1 %v18987_v36  ;;  %v9954_v3 = vpop.permute.xlu0 %9953 }
0x1829   :  { %10562 = vrot.lane.b32.xlu1 %v18823_v13, %s14611_s12  ;;  %12712 = vmatpush3.msra.mxu1 %v18993_v18  ;;  %v19083_v13 = vpop.f32.mrf.mxu0 }
0x182a   :  { %10560 = vrot.lane.b32.xlu0 %v18826_v2, %s14611_s12  ;;  %12713 = vmatprep.subr.mxu1 %v9966_v58  ;;  %v19562_v2 = vsub.s32 0, %v18991_v30 }
0x182b   :  { %12714 = vmatpush3.msra.mxu1 %v18949_v55 }
0x182c   :  { %12715 = vmatprep.subr.mxu1 %v9964_v56 }
0x182d   :  { %10566 = vrot.lane.b32.xlu1 %v18837_v14, %s14611_s12  ;;  %12716 = vmatpush3.msra.mxu1 %v18967_v50  ;;  %v10262_v14 = vsub.s32 5, %v18991_v30 }
0x182e   :  { %10564 = vrot.lane.b32.xlu0 %v18840_v38, %s14611_s12  ;;  %12717 = vmatprep.subr.mxu1 %v9962_v35  ;;  %v19091_v38 = vpop.f32.mrf.mxu0  ;;  %v19308_v35 = vrot.slane %v19005_v20, %v10258_v11 }
0x182f   :  { %12718 = vmatpush3.msra.mxu1 %v18939_v41 }
0x1830   :  { %12719 = vmatprep.subr.mxu1 %v9960_v37  ;;  %v19105_v6 = vpop.f32.mrf.mxu0 }
0x1831   :  { %10570 = vrot.lane.b32.xlu1 %v18847_v45, %s14611_s12  ;;  %12720 = vmatpush3.msra.mxu1 %v18947_v16  ;;  %v19099_v45 = vrot.slane %v19005_v20, %v19562_v2 }
0x1832   :  { %10568 = vrot.lane.b32.xlu0 %v18850_v31, %s14611_s12  ;;  %12721 = vmatprep.subr.mxu1 %v9958_v60  ;;  %v19103_v31 = vrot.slane %v19005_v20, %v10262_v14 }
0x1833   :  { %12722 = vmatpush3.msra.mxu1 %v18929_v51 }
0x1834   :  { %12723 = vmatprep.subr.mxu1 %v9956_v10 }
0x1835   :  { %10574 = vrot.lane.b32.xlu1 %v18857_v0, %s14611_s12  ;;  %12724 = vmatpush3.msra.mxu1 %v18937_v8  ;;  %v19142_v0 = vpop.f32.mrf.mxu0 }
0x1836   :  { %10572 = vrot.lane.b32.xlu0 %v18860_v43, %s14611_s12  ;;  %12725 = vmatprep.subr.mxu1 %v9954_v3 }
0x1837   :  { %12726 = vmatpush3.msra.mxu1 %v18919_v34  ;;  %v19152_v43 = vpop.f32.mrf.mxu0 }
0x1838   :  { %12727 = vmatprep.subr.mxu1 %v9952_v63 }
0x1839   :  { %10021 = vrot.lane.b32.xlu1 %v19105_v6, %s14610_s24  ;;  %12728 = vmatpush3.msra.mxu1 %v18925_v25  ;;  %v19158_v48 = vpop.f32.mrf.mxu0 }
0x183a   :  { %10069 = vrot.lane.b32.xlu0 %v19105_v6, %s14594_s13  ;;  %10345 = vmatmul.mubr.f32.vlgmr.msra.gmra.mxu1 %v19099_v45 }
0x183b   :  { %10484 = vmatprep.mubr.f32.mxu1 %v19103_v31  ;;  %v19162_v17 = vpop.f32.mrf.mxu0 }
0x183d   :  { %10017 = vrot.lane.b32.xlu1 %v19083_v13, %s14610_s24  ;;  %v19172_v34 = vpop.f32.mrf.mxu0 }
0x183e   :  { %10065 = vrot.lane.b32.xlu0 %v19083_v13, %s14594_s13 }
0x183f   :  { %v19181_v8 = vpop.f32.mrf.mxu0 }
0x1841   :  { %10015 = vrot.lane.b32.xlu1 %v19091_v38, %s14610_s24  ;;  %v19191_v55 = vpop.f32.mrf.mxu0 }
0x1842   :  { %10063 = vrot.lane.b32.xlu0 %v19091_v38, %s14594_s13 }
0x1843   :  { %v19201_v36 = vpop.f32.mrf.mxu0 }
0x1845   :  { %10013 = vrot.lane.b32.xlu1 %v19070_v24, %s14610_s24  ;;  %v19211_v21 = vpop.f32.mrf.mxu0 }
0x1846   :  { %10061 = vrot.lane.b32.xlu0 %v19070_v24, %s14594_s13 }
0x1849   :  { %10011 = vrot.lane.b32.xlu1 %v19077_v53, %s14610_s24 }
0x184a   :  { %10059 = vrot.lane.b32.xlu0 %v19077_v53, %s14594_s13 }
0x184d   :  { %10009 = vrot.lane.b32.xlu1 %v19057_v1, %s14610_s24 }
0x184e   :  { %10057 = vrot.lane.b32.xlu0 %v19057_v1, %s14594_s13 }
0x1851   :  { %10007 = vrot.lane.b32.xlu1 %v19063_v23, %s14610_s24 }
0x1852   :  { %10055 = vrot.lane.b32.xlu0 %v19063_v23, %s14594_s13 }
0x1855   :  { %10039 = vrot.lane.b32.xlu1 %v19091_v38, %s14579_s19 }
0x1856   :  { %10045 = vrot.lane.b32.xlu0 %v19105_v6, %s14579_s19 }
0x1859   :  { %10019 = vrot.lane.b32.xlu1 %v19142_v0, %s14610_s24 }
0x185a   :  { %10067 = vrot.lane.b32.xlu0 %v19142_v0, %s14594_s13 }
0x185d   :  { %10035 = vrot.lane.b32.xlu1 %v19077_v53, %s14579_s19 }
0x185e   :  { %10041 = vrot.lane.b32.xlu0 %v19083_v13, %s14579_s19 }
0x1861   :  { %10031 = vrot.lane.b32.xlu1 %v19063_v23, %s14579_s19 }
0x1862   :  { %10037 = vrot.lane.b32.xlu0 %v19070_v24, %s14579_s19 }
0x1865   :  { %10043 = vrot.lane.b32.xlu1 %v19142_v0, %s14579_s19 }
0x1866   :  { %10033 = vrot.lane.b32.xlu0 %v19057_v1, %s14579_s19 }
0x1867   :  { %v19176_v25 = vpop.permute.xlu0 %10141  ;;  %v19178_v51 = vpop.permute.xlu1 %10093 }
0x1869   :  { %10173 = vrot.lane.b32.xlu1 %v19162_v17, %s14610_s24 }
0x186a   :  { %10221 = vrot.lane.b32.xlu0 %v19162_v17, %s14594_s13 }
0x186d   :  { %10177 = vrot.lane.b32.xlu1 %v19181_v8, %s14610_s24 }
0x186e   :  { %10225 = vrot.lane.b32.xlu0 %v19181_v8, %s14594_s13 }
0x186f   :  { %v19187_v41 = vpop.permute.xlu0 %10145  ;;  %v19189_v16 = vpop.permute.xlu1 %10097 }
0x1871   :  { %10175 = vrot.lane.b32.xlu1 %v19191_v55, %s14610_s24 }
0x1872   :  { %10223 = vrot.lane.b32.xlu0 %v19191_v55, %s14594_s13 }
0x1873   :  { %v19197_v50 = vpop.permute.xlu0 %10143  ;;  %v19199_v33 = vpop.permute.xlu1 %10095 }
0x1875   :  { %10181 = vrot.lane.b32.xlu1 %v19201_v36, %s14610_s24 }
0x1876   :  { %10229 = vrot.lane.b32.xlu0 %v19201_v36, %s14594_s13 }
0x1877   :  { %v19207_v7 = vpop.permute.xlu0 %10149  ;;  %v19209_v18 = vpop.permute.xlu1 %10101 }
0x1878   :  { %12767 = vmatprep.subr.mxu1 %v19207_v7 }
0x1879   :  { %10179 = vrot.lane.b32.xlu1 %v19211_v21, %s14610_s24  ;;  %12768 = vmatpush3.msra.mxu1 %v19209_v18 }
0x187a   :  { %10227 = vrot.lane.b32.xlu0 %v19211_v21, %s14594_s13 }
0x187b   :  { %v19219_v5 = vpop.permute.xlu0 %10147  ;;  %v19221_v22 = vpop.permute.xlu1 %10099 }
0x187c   :  { %12769 = vmatprep.subr.mxu1 %v19219_v5 }
0x187d   :  { %10171 = vrot.lane.b32.xlu1 %v19172_v34, %s14610_s24  ;;  %12770 = vmatpush3.msra.mxu1 %v19221_v22 }
0x187e   :  { %10219 = vrot.lane.b32.xlu0 %v19172_v34, %s14594_s13  ;;  %12771 = vmatprep.subr.mxu1 %v19187_v41 }
0x187f   :  { %v19230_v47 = vpop.permute.xlu0 %10139  ;;  %12772 = vmatpush3.msra.mxu1 %v19189_v16  ;;  %v19233_v9 = vpop.permute.xlu1 %10091 }
0x1880   :  { %12773 = vmatprep.subr.mxu1 %v19197_v50 }
0x1881   :  { %10169 = vrot.lane.b32.xlu1 %v19152_v43, %s14610_s24  ;;  %12774 = vmatpush3.msra.mxu1 %v19199_v33 }
0x1882   :  { %10217 = vrot.lane.b32.xlu0 %v19152_v43, %s14594_s13  ;;  %12775 = vmatprep.subr.mxu1 %v19176_v25 }
0x1883   :  { %12776 = vmatpush3.msra.mxu1 %v19178_v51  ;;  %v19243_v57 = vpop.permute.xlu1 %10089 }
0x1884   :  { %v19245_v46 = vpop.permute.xlu0 %10137  ;;  %12777 = vmatprep.subr.mxu1 %v19230_v47 }
0x1885   :  { %10167 = vrot.lane.b32.xlu1 %v19158_v48, %s14610_s24  ;;  %12778 = vmatpush3.msra.mxu1 %v19233_v9 }
0x1886   :  { %10215 = vrot.lane.b32.xlu0 %v19158_v48, %s14594_s13  ;;  %12779 = vmatprep.subr.mxu1 %v19245_v46 }
0x1887   :  { %12780 = vmatpush3.msra.mxu1 %v19243_v57  ;;  %v19255_v49 = vpop.permute.xlu1 %10087 }
0x1888   :  { %v19257_v61 = vpop.permute.xlu0 %10135 }
0x1889   :  { %12781 = vmatprep.subr.mxu1 %v19257_v61  ;;  %10203 = vrot.lane.b32.xlu1 %v19211_v21, %s14579_s19 }
0x188a   :  { %10205 = vrot.lane.b32.xlu0 %v19201_v36, %s14579_s19  ;;  %12782 = vmatpush3.msra.mxu1 %v19255_v49 }
0x188b   :  { %v19265_v15 = vpop.permute.xlu1 %10123 }
0x188c   :  { %v19267_v12 = vpop.permute.xlu0 %10125 }
0x188d   :  { %12783 = vmatprep.subr.mxu1 %v19267_v12  ;;  %10199 = vrot.lane.b32.xlu1 %v19191_v55, %s14579_s19 }
0x188e   :  { %10201 = vrot.lane.b32.xlu0 %v19181_v8, %s14579_s19  ;;  %12784 = vmatpush3.msra.mxu1 %v19025_v52 }
0x188f   :  { %12785 = vmatprep.subr.mxu1 %v19265_v15  ;;  %v19276_v42 = vpop.permute.xlu1 %10119 }
0x1890   :  { %19668 = vst [vmem:[#allocation29_spill] sm:$0xff] %v19276_v42  ;;  %v19278_v58 = vpop.permute.xlu0 %10121  ;;  %12786 = vmatpush3.msra.mxu1 %v19031_v54 }
0x1891   :  { %12787 = vmatprep.subr.mxu1 %v19278_v58  ;;  %10195 = vrot.lane.b32.xlu1 %v19172_v34, %s14579_s19 }
0x1892   :  { %10197 = vrot.lane.b32.xlu0 %v19162_v17, %s14579_s19  ;;  %12788 = vmatpush3.msra.mxu1 %v19013_v29 }
0x1893   :  { %12789 = vmatprep.subr.mxu1 %v19276_v42  ;;  %v19288_v32 = vpop.permute.xlu1 %10115 }
0x1894   :  { %19669 = vst [vmem:[#allocation6_spill] sm:$0xff] %v19288_v32  ;;  %v19290_v37 = vpop.permute.xlu0 %10117  ;;  %12790 = vmatpush3.msra.mxu1 %v19019_v44 }
0x1895   :  { %19670 = vst [vmem:[#allocation7_spill] sm:$0xff] %v19290_v37  ;;  %12791 = vmatprep.subr.mxu1 %v19290_v37  ;;  %10191 = vrot.lane.b32.xlu1 %v19158_v48, %s14579_s19 }
0x1896   :  { %10193 = vrot.lane.b32.xlu0 %v19152_v43, %s14579_s19  ;;  %12792 = vmatpush3.msra.mxu1 %v18995_v59 }
0x1897   :  { %12793 = vmatprep.subr.mxu1 %v19288_v32  ;;  %v19301_v10 = vpop.permute.xlu1 %10111 }
0x1898   :  { %19671 = vst [vmem:[#allocation8_spill] sm:$0xff] %v19301_v10  ;;  %v19303_v63 = vpop.permute.xlu0 %10113  ;;  %12794 = vmatpush3.msra.mxu1 %v19011_v39 }
0x1899   :  { %19672 = vst [vmem:[#allocation14_spill] sm:$0xff] %v19303_v63  ;;  %12795 = vmatprep.subr.mxu1 %v19303_v63 }
0x189a   :  { %12796 = vmatpush3.msra.mxu1 %v18985_v40 }
0x189b   :  { %12797 = vmatprep.subr.mxu1 %v19301_v10  ;;  %v10563_v56 = vpop.permute.xlu1 %10562 }
0x189c   :  { %v10561_v60 = vpop.permute.xlu0 %10560  ;;  %12798 = vmatpush3.msra.mxu1 %v18989_v4 }
0x189d   :  { %10485 = vmatmul.mubr.f32.vlgmr.msra.gmra.mxu1 %v19308_v35  ;;  %14416 = vmatprep.subr.msk.mxu1 %vm9263_vm15, %v18800_v19 }
0x189e   :  { %14417 = vmatpush3.msk.msra.mxu1 %vm9263_vm15, %v18800_v19  ;;  %14420 = vmatprep.mubr.msk.f32.mxu1 %vm9375_vm5, %v10561_v60 }
0x189f   :  { %14418 = vmatprep.subr.mxu1 %v18811_v28  ;;  %v10567_v14 = vpop.permute.xlu1 %10566 }
0x18a0   :  { %v10565_v3 = vpop.permute.xlu0 %10564  ;;  %14419 = vmatpush3.msra.mxu1 %v18811_v28 }
0x18a1   :  { %14421 = vmatmul.mubr.msk.f32.vlgmr.msra.gmra.mxu1 %vm9375_vm5, %v10563_v56 }
0x18a2   :  { %14423 = vmatprep.mubr.msk.f32.mxu1 %vm9375_vm5, %v10565_v3 }
0x18a3   :  { %v10571_v27 = vpop.permute.xlu1 %10570 }
0x18a4   :  { %v10569_v11 = vpop.permute.xlu0 %10568 }
0x18a5   :  { %14424 = vmatmul.mubr.msk.f32.gmra.mxu1 %vm9375_vm5, %v10567_v14 }
0x18a6   :  { %14426 = vmatprep.mubr.msk.f32.mxu1 %vm9375_vm5, %v10569_v11 }
0x18a7   :  { %v10575_v2 = vpop.permute.xlu1 %10574 }
0x18a8   :  { %v10573_v19 = vpop.permute.xlu0 %10572 }
0x18a9   :  { %14427 = vmatmul.mubr.msk.f32.gmra.mxu1 %vm9375_vm5, %v10571_v27 }
0x18aa   :  { %14429 = vmatprep.mubr.msk.f32.mxu1 %vm9375_vm5, %v10573_v19 }
0x18ab   :  { %v10022_v60 = vpop.permute.xlu1 %10021 }
0x18ac   :  { %v10070_v4 = vpop.permute.xlu0 %10069 }
0x18ad   :  { %12732 = vmatprep.subr.mxu0 %v10070_v4  ;;  %14430 = vmatmul.mubr.msk.f32.gmra.mxu1 %vm9375_vm5, %v10575_v2 }
0x18ae   :  { %12847 = vmatprep.subr.mxu1 %v10070_v4  ;;  %12733 = vmatpush3.msra.mxu0 %v10022_v60 }
0x18af   :  { %12848 = vmatpush3.msra.mxu1 %v10022_v60  ;;  %v10018_v28 = vpop.permute.xlu1 %10017  ;;  %10841 = vmatprep.mubr.f32.mxu1 %v19008_v26 }
0x18b0   :  { %v10066_v56 = vpop.permute.xlu0 %10065 }
0x18b3   :  { %v10016_v14 = vpop.permute.xlu1 %10015 }
0x18b4   :  { %v10064_v3 = vpop.permute.xlu0 %10063 }
0x18b7   :  { %v10014_v11 = vpop.permute.xlu1 %10013 }
0x18b8   :  { %v10062_v10 = vpop.permute.xlu0 %10061 }
0x18bb   :  { %v10012_v40 = vpop.permute.xlu1 %10011 }
0x18bc   :  { %v10060_v27 = vpop.permute.xlu0 %10059 }
0x18bf   :  { %v10010_v63 = vpop.permute.xlu1 %10009 }
0x18c0   :  { %v10058_v19 = vpop.permute.xlu0 %10057 }
0x18c3   :  { %v10008_v39 = vpop.permute.xlu1 %10007 }
0x18c4   :  { %v10056_v32 = vpop.permute.xlu0 %10055 }
0x18c7   :  { %v10040_v59 = vpop.permute.xlu1 %10039 }
0x18c8   :  { %v10046_v37 = vpop.permute.xlu0 %10045 }
0x18cb   :  { %v10020_v2 = vpop.permute.xlu1 %10019 }
0x18cc   :  { %v10068_v4 = vpop.permute.xlu0 %10067 }
0x18cd   :  { %12734 = vmatprep.subr.mxu0 %v10068_v4  ;;  %12849 = vmatprep.subr.mxu1 %v10068_v4  ;;  %v10266_v4 = vsub.s32 6, %v18991_v30 }
0x18ce   :  { %12735 = vmatpush3.msra.mxu0 %v10020_v2  ;;  %12850 = vmatpush3.msra.mxu1 %v10020_v2 }
0x18cf   :  { %12736 = vmatprep.subr.mxu0 %v10066_v56  ;;  %12851 = vmatprep.subr.mxu1 %v10066_v56  ;;  %v10036_v26 = vpop.permute.xlu1 %10035 }
0x18d0   :  { %v10042_v60 = vpop.permute.xlu0 %10041  ;;  %12737 = vmatpush3.msra.mxu0 %v10018_v28  ;;  %12852 = vmatpush3.msra.mxu1 %v10018_v28 }
0x18d1   :  { %12738 = vmatprep.subr.mxu0 %v10064_v3  ;;  %12853 = vmatprep.subr.mxu1 %v10064_v3 }
0x18d2   :  { %12739 = vmatpush3.msra.mxu0 %v10016_v14  ;;  %12854 = vmatpush3.msra.mxu1 %v10016_v14 }
0x18d3   :  { %12740 = vmatprep.subr.mxu0 %v10062_v10  ;;  %12855 = vmatprep.subr.mxu1 %v10062_v10  ;;  %v10032_v44 = vpop.permute.xlu1 %10031 }
0x18d4   :  { %v10038_v42 = vpop.permute.xlu0 %10037  ;;  %12741 = vmatpush3.msra.mxu0 %v10014_v11  ;;  %12856 = vmatpush3.msra.mxu1 %v10014_v11 }
0x18d5   :  { %12742 = vmatprep.subr.mxu0 %v10060_v27  ;;  %12857 = vmatprep.subr.mxu1 %v10060_v27 }
0x18d6   :  { %12743 = vmatpush3.msra.mxu0 %v10012_v40  ;;  %12858 = vmatpush3.msra.mxu1 %v10012_v40 }
0x18d7   :  { %12744 = vmatprep.subr.mxu0 %v10058_v19  ;;  %12859 = vmatprep.subr.mxu1 %v10058_v19  ;;  %v10044_v56 = vpop.permute.xlu1 %10043 }
0x18d8   :  { %v10034_v2 = vpop.permute.xlu0 %10033  ;;  %12745 = vmatpush3.msra.mxu0 %v10010_v63  ;;  %12860 = vmatpush3.msra.mxu1 %v10010_v63 }
0x18d9   :  { %12746 = vmatprep.subr.mxu0 %v10056_v32  ;;  %12861 = vmatprep.subr.mxu1 %v10056_v32  ;;  %v10250_v32 = vsub.s32 2, %v18991_v30 }
0x18da   :  { %12747 = vmatpush3.msra.mxu0 %v10008_v39  ;;  %12862 = vmatpush3.msra.mxu1 %v10008_v39 }
0x18db   :  { %12748 = vmatprep.subr.mxu0 %v10046_v37  ;;  %12863 = vmatprep.subr.mxu1 %v10046_v37  ;;  %v19329_v10 = vpop.permute.xlu1 %10173 }
0x18dc   :  { %v19331_v28 = vpop.permute.xlu0 %10221  ;;  %12749 = vmatpush3.msra.mxu0 %v19105_v6  ;;  %12864 = vmatpush3.msra.mxu1 %v19105_v6 }
0x18dd   :  { %12750 = vmatprep.subr.mxu0 %v10044_v56  ;;  %12865 = vmatprep.subr.mxu1 %v10044_v56 }
0x18de   :  { %12751 = vmatpush3.msra.mxu0 %v19142_v0  ;;  %12866 = vmatpush3.msra.mxu1 %v19142_v0 }
0x18df   :  { %12752 = vmatprep.subr.mxu0 %v10042_v60  ;;  %12867 = vmatprep.subr.mxu1 %v10042_v60  ;;  %v10178_v40 = vpop.permute.xlu1 %10177 }
0x18e0   :  { %v10226_v39 = vpop.permute.xlu0 %10225  ;;  %12753 = vmatpush3.msra.mxu0 %v19083_v13  ;;  %12868 = vmatpush3.msra.mxu1 %v19083_v13  ;;  %v19347_v13 = vrot.slane %v19005_v20, %v10250_v32 }
0x18e1   :  { %12754 = vmatprep.subr.mxu0 %v10040_v59  ;;  %12869 = vmatprep.subr.mxu1 %v10040_v59 }
0x18e2   :  { %12755 = vmatpush3.msra.mxu0 %v19091_v38  ;;  %12870 = vmatpush3.msra.mxu1 %v19091_v38 }
0x18e3   :  { %12756 = vmatprep.subr.mxu0 %v10038_v42  ;;  %12871 = vmatprep.subr.mxu1 %v10038_v42  ;;  %v10176_v6 = vpop.permute.xlu1 %10175  ;;  %v10270_v42 = vsub.s32 7, %v18991_v30 }
0x18e4   :  { %v10224_v0 = vpop.permute.xlu0 %10223  ;;  %12757 = vmatpush3.msra.mxu0 %v19070_v24  ;;  %12872 = vmatpush3.msra.mxu1 %v19070_v24 }
0x18e5   :  { %12758 = vmatprep.subr.mxu0 %v10036_v26  ;;  %12873 = vmatprep.subr.mxu1 %v10036_v26  ;;  %v19361_v63 = vrot.slane %v19005_v20, %v10270_v42 }
0x18e6   :  { %12759 = vmatpush3.msra.mxu0 %v19077_v53  ;;  %12874 = vmatpush3.msra.mxu1 %v19077_v53 }
0x18e7   :  { %12760 = vmatprep.subr.mxu0 %v10034_v2  ;;  %12875 = vmatprep.subr.mxu1 %v10034_v2  ;;  %v10182_v59 = vpop.permute.xlu1 %10181 }
0x18e8   :  { %v10230_v38 = vpop.permute.xlu0 %10229  ;;  %12761 = vmatpush3.msra.mxu0 %v19057_v1  ;;  %12876 = vmatpush3.msra.mxu1 %v19057_v1 }
0x18e9   :  { %12762 = vmatprep.subr.mxu0 %v10032_v44  ;;  %12877 = vmatprep.subr.mxu1 %v10032_v44 }
0x18ea   :  { %12763 = vmatpush3.msra.mxu0 %v19063_v23  ;;  %12878 = vmatpush3.msra.mxu1 %v19063_v23 }
0x18eb   :  { %10415 = vmatmul.mubr.f32.vlgmr.msra.gmra.mxu0 %v19347_v13  ;;  %12802 = vmatprep.subr.mxu0 %v10230_v38  ;;  %v10180_v24 = vpop.permute.xlu1 %10179 }
0x18ec   :  { %12917 = vmatprep.subr.mxu1 %v10230_v38  ;;  %v10228_v53 = vpop.permute.xlu0 %10227  ;;  %12803 = vmatpush3.msra.mxu0 %v10182_v59 }
0x18ed   :  { %10842 = vmatmul.mubr.f32.vlgmr.msra.gmra.mxu1 %v19099_v45  ;;  %12804 = vmatprep.subr.mxu0 %v10228_v53 }
0x18ee   :  { %12918 = vmatpush3.msra.mxu1 %v10182_v59  ;;  %12805 = vmatpush3.msra.mxu0 %v10180_v24 }
0x18ef   :  { %12919 = vmatprep.subr.mxu1 %v10228_v53  ;;  %12806 = vmatprep.subr.mxu0 %v10226_v39  ;;  %v10172_v1 = vpop.permute.xlu1 %10171 }
0x18f0   :  { %12920 = vmatpush3.msra.mxu1 %v10180_v24  ;;  %v10220_v44 = vpop.permute.xlu0 %10219  ;;  %12807 = vmatpush3.msra.mxu0 %v10178_v40 }
0x18f1   :  { %12921 = vmatprep.subr.mxu1 %v10226_v39  ;;  %12808 = vmatprep.subr.mxu0 %v10224_v0 }
0x18f2   :  { %12922 = vmatpush3.msra.mxu1 %v10178_v40  ;;  %12809 = vmatpush3.msra.mxu0 %v10176_v6 }
0x18f3   :  { %12923 = vmatprep.subr.mxu1 %v10224_v0  ;;  %12810 = vmatprep.subr.mxu0 %v19331_v28  ;;  %v10170_v23 = vpop.permute.xlu1 %10169 }
0x18f4   :  { %12924 = vmatpush3.msra.mxu1 %v10176_v6  ;;  %v10218_v45 = vpop.permute.xlu0 %10217  ;;  %12811 = vmatpush3.msra.mxu0 %v19329_v10 }
0x18f5   :  { %12925 = vmatprep.subr.mxu1 %v19331_v28  ;;  %12812 = vmatprep.subr.mxu0 %v10220_v44 }
0x18f6   :  { %12926 = vmatpush3.msra.mxu1 %v19329_v10  ;;  %12813 = vmatpush3.msra.mxu0 %v10172_v1 }
0x18f7   :  { %12927 = vmatprep.subr.mxu1 %v10220_v44  ;;  %12814 = vmatprep.subr.mxu0 %v10218_v45  ;;  %v10168_v37 = vpop.permute.xlu1 %10167 }
0x18f8   :  { %12928 = vmatpush3.msra.mxu1 %v10172_v1  ;;  %v10216_v14 = vpop.permute.xlu0 %10215  ;;  %12815 = vmatpush3.msra.mxu0 %v10170_v23 }
0x18f9   :  { %12929 = vmatprep.subr.mxu1 %v10218_v45  ;;  %12816 = vmatprep.subr.mxu0 %v10216_v14 }
0x18fa   :  { %12930 = vmatpush3.msra.mxu1 %v10170_v23  ;;  %12817 = vmatpush3.msra.mxu0 %v10168_v37 }
0x18fb   :  { %12931 = vmatprep.subr.mxu1 %v10216_v14  ;;  %v10204_v3 = vpop.permute.xlu1 %10203  ;;  %10554 = vmatprep.mubr.f32.mxu0 %v19361_v63 }
0x18fc   :  { %12932 = vmatpush3.msra.mxu1 %v10168_v37  ;;  %v10206_v11 = vpop.permute.xlu0 %10205  ;;  %10981 = vmatprep.mubr.f32.mxu1 %v19103_v31 }
0x18fd   :  { %12818 = vmatprep.subr.mxu0 %v10206_v11  ;;  %12933 = vmatprep.subr.mxu1 %v10206_v11 }
0x18fe   :  { %12819 = vmatpush3.msra.mxu0 %v19201_v36  ;;  %12934 = vmatpush3.msra.mxu1 %v19201_v36 }
0x18ff   :  { %12820 = vmatprep.subr.mxu0 %v10204_v3  ;;  %12935 = vmatprep.subr.mxu1 %v10204_v3  ;;  %v10200_v27 = vpop.permute.xlu1 %10199 }
0x1900   :  { %v10202_v19 = vpop.permute.xlu0 %10201  ;;  %12821 = vmatpush3.msra.mxu0 %v19211_v21  ;;  %12936 = vmatpush3.msra.mxu1 %v19211_v21 }
0x1901   :  { %12822 = vmatprep.subr.mxu0 %v10202_v19  ;;  %12937 = vmatprep.subr.mxu1 %v10202_v19 }
0x1902   :  { %12823 = vmatpush3.msra.mxu0 %v19181_v8  ;;  %12938 = vmatpush3.msra.mxu1 %v19181_v8  ;;  %v19379_v8 = vrot.slane %v19005_v20, %v10266_v4  ;;  %v19673_v20 = vld [vmem:[#allocation29_spill] sm:$0xff] }
0x1903   :  { %12824 = vmatprep.subr.mxu0 %v10200_v27  ;;  %12939 = vmatprep.subr.mxu1 %v10200_v27  ;;  %v10196_v36 = vpop.permute.xlu1 %10195 }
0x1904   :  { %v10198_v31 = vpop.permute.xlu0 %10197  ;;  %12825 = vmatpush3.msra.mxu0 %v19191_v55  ;;  %12940 = vmatpush3.msra.mxu1 %v19191_v55 }
0x1905   :  { %12826 = vmatprep.subr.mxu0 %v10198_v31  ;;  %12941 = vmatprep.subr.mxu1 %v10198_v31 }
0x1906   :  { %12827 = vmatpush3.msra.mxu0 %v19162_v17  ;;  %12942 = vmatpush3.msra.mxu1 %v19162_v17  ;;  %v19676_v17 = vld [vmem:[#allocation9_spill] sm:$0xff] }
0x1907   :  { %12828 = vmatprep.subr.mxu0 %v10196_v36  ;;  %12943 = vmatprep.subr.mxu1 %v10196_v36  ;;  %v10192_v55 = vpop.permute.xlu1 %10191 }
0x1908   :  { %v10194_v21 = vpop.permute.xlu0 %10193  ;;  %12829 = vmatpush3.msra.mxu0 %v19172_v34  ;;  %12944 = vmatpush3.msra.mxu1 %v19172_v34  ;;  %v19678_v34 = vld [vmem:[#allocation10_spill] sm:$0xff] }
0x1909   :  { %12830 = vmatprep.subr.mxu0 %v10194_v21  ;;  %12945 = vmatprep.subr.mxu1 %v10194_v21 }
0x190a   :  { %12831 = vmatpush3.msra.mxu0 %v19152_v43  ;;  %12946 = vmatpush3.msra.mxu1 %v19152_v43  ;;  %v19674_v43 = vld [vmem:[#allocation13_spill] sm:$0xff] }
0x190b   :  { %12832 = vmatprep.subr.mxu0 %v10192_v55  ;;  %12947 = vmatprep.subr.mxu1 %v10192_v55 }
0x190c   :  { %12833 = vmatpush3.msra.mxu0 %v19158_v48  ;;  %12948 = vmatpush3.msra.mxu1 %v19158_v48  ;;  %v19675_v48 = vld [vmem:[#allocation7_spill] sm:$0xff] }
0x190d   :  { %10555 = vmatmul.mubr.f32.vlgmr.msra.gmra.mxu0 %v19379_v8  ;;  %12882 = vmatprep.subr.mxu0 %v19207_v7 }
0x190e   :  { %12883 = vmatpush3.msra.mxu0 %v19209_v18  ;;  %10911 = vmatprep.mubr.f32.mxu0 %v19170_v62  ;;  %v19677_v62 = vld [vmem:[#allocation6_spill] sm:$0xff] }
0x190f   :  { %12884 = vmatprep.subr.mxu0 %v19219_v5  ;;  %10982 = vmatmul.mubr.f32.vlgmr.msra.gmra.mxu1 %v19308_v35 }
0x1910   :  { %12885 = vmatpush3.msra.mxu0 %v19221_v22 }
0x1911   :  { %12886 = vmatprep.subr.mxu0 %v19187_v41 }
0x1912   :  { %12887 = vmatpush3.msra.mxu0 %v19189_v16 }
0x1913   :  { %12888 = vmatprep.subr.mxu0 %v19197_v50 }
0x1914   :  { %12889 = vmatpush3.msra.mxu0 %v19199_v33 }
0x1915   :  { %12890 = vmatprep.subr.mxu0 %v19176_v25  ;;  %v19680_v25 = vld [vmem:[#allocation11_spill] sm:$0xff] }
0x1916   :  { %12891 = vmatpush3.msra.mxu0 %v19178_v51  ;;  %v19682_v51 = vld [vmem:[#allocation12_spill] sm:$0xff] }
0x1917   :  { %12892 = vmatprep.subr.mxu0 %v19230_v47 }
0x1918   :  { %12893 = vmatpush3.msra.mxu0 %v19233_v9 }
0x1919   :  { %12894 = vmatprep.subr.mxu0 %v19245_v46 }
0x191a   :  { %12895 = vmatpush3.msra.mxu0 %v19243_v57 }
0x191b   :  { %12896 = vmatprep.subr.mxu0 %v19257_v61 }
0x191c   :  { %12897 = vmatpush3.msra.mxu0 %v19255_v49  ;;  %v11063_v49 = vld [vmem:[#allocation2] sm:$0x1] }
0x191d   :  { %12898 = vmatprep.subr.mxu0 %v19267_v12 }
0x191e   :  { %12899 = vmatpush3.msra.mxu0 %v19025_v52  ;;  %v19679_v52 = vld [vmem:[#allocation14_spill] sm:$0xff] }
0x191f   :  { %12900 = vmatprep.subr.mxu0 %v19265_v15 }
0x1920   :  { %12901 = vmatpush3.msra.mxu0 %v19031_v54  ;;  %v19681_v54 = vld [vmem:[#allocation8_spill] sm:$0xff] }
0x1921   :  { %12902 = vmatprep.subr.mxu0 %v19278_v58 }
0x1922   :  { %12903 = vmatpush3.msra.mxu0 %v19013_v29  ;;  %v12729_v29 = vpop.f32.mrf.mxu1 }
0x1923   :  { %12904 = vmatprep.subr.mxu0 %v19673_v20 }
0x1924   :  { %12905 = vmatpush3.msra.mxu0 %v19674_v43  ;;  %v12730_v41 = vpop.f32.mrf.mxu1 }
0x1925   :  { %12906 = vmatprep.subr.mxu0 %v19675_v48  ;;  %v12731_v12 = vadd.f32 %v12730_v41, %v12729_v29 }
0x1926   :  { %12907 = vmatpush3.msra.mxu0 %v19676_v17 }
0x1927   :  { %12908 = vmatprep.subr.mxu0 %v19677_v62 }
0x1928   :  { %12909 = vmatpush3.msra.mxu0 %v19678_v34 }
0x1929   :  { %12910 = vmatprep.subr.mxu0 %v19679_v52 }
0x192a   :  { %12911 = vmatpush3.msra.mxu0 %v19680_v25 }
0x192b   :  { %12912 = vmatprep.subr.mxu0 %v19681_v54 }
0x192c   :  { %12913 = vmatpush3.msra.mxu0 %v19682_v51 }
0x192d   :  { %10912 = vmatmul.mubr.f32.vlgmr.msra.gmra.mxu0 %v19347_v13 }
0x192e   :  { %11051 = vmatprep.mubr.f32.mxu0 %v19361_v63 }
0x195d   :  { %v12799_v16 = vpop.f32.mrf.mxu1 }
0x195f   :  { %v12800_v50 = vpop.f32.mrf.mxu1 }
0x1960   :  { %v12801_v33 = vadd.f32 %v12800_v50, %v12799_v16 }
0x1961   :  { %v19422_v7 = vpop.f32.mrf.mxu1 }
0x1963   :  { %v19424_v18 = vpop.f32.mrf.mxu1 }
0x1965   :  { %v19426_v5 = vpop.f32.mrf.mxu1 }
0x1966   :  { %10711 = vrot.lane.b32.xlu1 %v19426_v5, %s14610_s24  ;;  %10759 = vrot.lane.b32.xlu0 %v19426_v5, %s14594_s13 }
0x1967   :  { %v19432_v22 = vpop.f32.mrf.mxu1 }
0x1969   :  { %v19434_v47 = vpop.f32.mrf.mxu1 }
0x196a   :  { %10715 = vrot.lane.b32.xlu1 %v19434_v47, %s14610_s24  ;;  %10763 = vrot.lane.b32.xlu0 %v19434_v47, %s14594_s13 }
0x196b   :  { %v19440_v9 = vpop.f32.mrf.mxu1 }
0x196d   :  { %v19446_v57 = vpop.f32.mrf.mxu1 }
0x196e   :  { %10713 = vrot.lane.b32.xlu1 %v19440_v9, %s14610_s24  ;;  %10761 = vrot.lane.b32.xlu0 %v19440_v9, %s14594_s13 }
0x196f   :  { %v19452_v46 = vpop.f32.mrf.mxu1 }
0x1972   :  { %10719 = vrot.lane.b32.xlu1 %v19446_v57, %s14610_s24  ;;  %10767 = vrot.lane.b32.xlu0 %v19446_v57, %s14594_s13 }
0x1976   :  { %10717 = vrot.lane.b32.xlu1 %v19452_v46, %s14610_s24  ;;  %10765 = vrot.lane.b32.xlu0 %v19452_v46, %s14594_s13 }
0x197a   :  { %10709 = vrot.lane.b32.xlu1 %v19432_v22, %s14610_s24  ;;  %10757 = vrot.lane.b32.xlu0 %v19432_v22, %s14594_s13 }
0x197e   :  { %10707 = vrot.lane.b32.xlu1 %v19422_v7, %s14610_s24  ;;  %10755 = vrot.lane.b32.xlu0 %v19422_v7, %s14594_s13 }
0x1982   :  { %10705 = vrot.lane.b32.xlu1 %v19424_v18, %s14610_s24  ;;  %10753 = vrot.lane.b32.xlu0 %v19424_v18, %s14594_s13  ;;  %s14613_s13 = smov 126  }
0x1986   :  { %10741 = vrot.lane.b32.xlu1 %v19452_v46, %s14579_s19  ;;  %10743 = vrot.lane.b32.xlu0 %v19446_v57, %s14579_s19 }
0x198a   :  { %10737 = vrot.lane.b32.xlu1 %v19440_v9, %s14579_s19  ;;  %10739 = vrot.lane.b32.xlu0 %v19434_v47, %s14579_s19 }
0x198e   :  { %10733 = vrot.lane.b32.xlu1 %v19432_v22, %s14579_s19  ;;  %10735 = vrot.lane.b32.xlu0 %v19426_v5, %s14579_s19 }
0x1992   :  { %10729 = vrot.lane.b32.xlu1 %v19424_v18, %s14579_s19  ;;  %10731 = vrot.lane.b32.xlu0 %v19422_v7, %s14579_s19  ;;  %s14612_s19 = smov 4  }
0x1996   :  { %11066 = vperm.xlu0 %14496, %v11063_v49  }
0x19ab   :  { %v12764_v61 = vpop.f32.mrf.mxu0 }
0x19ad   :  { %v12765_v15 = vpop.f32.mrf.mxu0  ;;  %v12879_v36 = vpop.f32.mrf.mxu1 }
0x19ae   :  { %v12766_v58 = vadd.f32 %v12765_v15, %v12764_v61 }
0x19af   :  { %v12880_v4 = vpop.f32.mrf.mxu1 }
0x19b0   :  { %v10417_v35 = vadd.f32 %v12766_v58, %v12731_v12  ;;  %v12881_v43 = vadd.f32 %v12880_v4, %v12879_v36 }
0x19b2   :  { %v10487_v26 = vadd.f32 %v12801_v33, %v10417_v35 }
0x19cd   :  { %v12834_v60 = vpop.f32.mrf.mxu0 }
0x19cf   :  { %v12835_v56 = vpop.f32.mrf.mxu0  ;;  %v12949_v20 = vpop.f32.mrf.mxu1 }
0x19d0   :  { %v12836_v2 = vadd.f32 %v12835_v56, %v12834_v60 }
0x19d1   :  { %v12950_v17 = vpop.f32.mrf.mxu1 }
0x19d2   :  { %v19486_v10 = vadd.f32 %v12836_v2, %v10487_v26  ;;  %v12951_v34 = vadd.f32 %v12950_v17, %v12949_v20 }
0x19d8   :  { %v10760_v28 = vpop.permute.xlu0 %10759  ;;  %v10712_v40 = vpop.permute.xlu1 %10711 }
0x19dc   :  { %v10764_v39 = vpop.permute.xlu0 %10763  ;;  %v10716_v6 = vpop.permute.xlu1 %10715 }
0x19e0   :  { %v10762_v32 = vpop.permute.xlu0 %10761  ;;  %v10714_v0 = vpop.permute.xlu1 %10713 }
0x19e4   :  { %v10768_v59 = vpop.permute.xlu0 %10767  ;;  %v10720_v13 = vpop.permute.xlu1 %10719 }
0x19e5   :  { %12952 = vmatprep.subr.mxu0 %v10768_v59 }
0x19e6   :  { %12953 = vmatpush3.msra.mxu0 %v10720_v13 }
0x19e8   :  { %v10766_v38 = vpop.permute.xlu0 %10765  ;;  %v10718_v24 = vpop.permute.xlu1 %10717 }
0x19e9   :  { %12954 = vmatprep.subr.mxu0 %v10766_v38 }
0x19ea   :  { %12955 = vmatpush3.msra.mxu0 %v10718_v24 }
0x19eb   :  { %12956 = vmatprep.subr.mxu0 %v10764_v39 }
0x19ec   :  { %v10758_v53 = vpop.permute.xlu0 %10757  ;;  %12957 = vmatpush3.msra.mxu0 %v10716_v6  ;;  %v10710_v1 = vpop.permute.xlu1 %10709 }
0x19ed   :  { %12958 = vmatprep.subr.mxu0 %v10762_v32  ;;  %v12914_v21 = vpop.f32.mrf.mxu0 }
0x19ee   :  { %12959 = vmatpush3.msra.mxu0 %v10714_v0 }
0x19ef   :  { %12960 = vmatprep.subr.mxu0 %v10760_v28  ;;  %v12915_v55 = vpop.f32.mrf.mxu0 }
0x19f0   :  { %v10756_v44 = vpop.permute.xlu0 %10755  ;;  %12961 = vmatpush3.msra.mxu0 %v10712_v40  ;;  %v10708_v23 = vpop.permute.xlu1 %10707  ;;  %v12916_v48 = vadd.f32 %v12915_v55, %v12914_v21 }
0x19f1   :  { %12962 = vmatprep.subr.mxu0 %v10758_v53 }
0x19f2   :  { %12963 = vmatpush3.msra.mxu0 %v10710_v1  ;;  %v10914_v62 = vadd.f32 %v12916_v48, %v12881_v43 }
0x19f3   :  { %12964 = vmatprep.subr.mxu0 %v10756_v44 }
0x19f4   :  { %v10754_v42 = vpop.permute.xlu0 %10753  ;;  %12965 = vmatpush3.msra.mxu0 %v10708_v23  ;;  %v10706_v45 = vpop.permute.xlu1 %10705  ;;  %v10984_v54 = vadd.f32 %v12951_v34, %v10914_v62 }
0x19f5   :  { %12966 = vmatprep.subr.mxu0 %v10754_v42 }
0x19f6   :  { %12967 = vmatpush3.msra.mxu0 %v10706_v45 }
0x19f8   :  { %v10744_v37 = vpop.permute.xlu0 %10743  ;;  %v10742_v63 = vpop.permute.xlu1 %10741 }
0x19f9   :  { %12968 = vmatprep.subr.mxu0 %v10744_v37 }
0x19fa   :  { %12969 = vmatpush3.msra.mxu0 %v19446_v57 }
0x19fb   :  { %12970 = vmatprep.subr.mxu0 %v10742_v63 }
0x19fc   :  { %v10740_v14 = vpop.permute.xlu0 %10739  ;;  %12971 = vmatpush3.msra.mxu0 %v19452_v46  ;;  %v10738_v3 = vpop.permute.xlu1 %10737 }
0x19fd   :  { %12972 = vmatprep.subr.mxu0 %v10740_v14 }
0x19fe   :  { %12973 = vmatpush3.msra.mxu0 %v19434_v47 }
0x19ff   :  { %12974 = vmatprep.subr.mxu0 %v10738_v3 }
0x1a00   :  { %v10736_v11 = vpop.permute.xlu0 %10735  ;;  %12975 = vmatpush3.msra.mxu0 %v19440_v9  ;;  %v10734_v27 = vpop.permute.xlu1 %10733 }
0x1a01   :  { %12976 = vmatprep.subr.mxu0 %v10736_v11 }
0x1a02   :  { %12977 = vmatpush3.msra.mxu0 %v19426_v5 }
0x1a03   :  { %12978 = vmatprep.subr.mxu0 %v10734_v27 }
0x1a04   :  { %v10732_v19 = vpop.permute.xlu0 %10731  ;;  %12979 = vmatpush3.msra.mxu0 %v19432_v22  ;;  %v10730_v31 = vpop.permute.xlu1 %10729 }
0x1a05   :  { %12980 = vmatprep.subr.mxu0 %v10732_v19 }
0x1a06   :  { %12981 = vmatpush3.msra.mxu0 %v19422_v7 }
0x1a07   :  { %12982 = vmatprep.subr.mxu0 %v10730_v31 }
0x1a08   :  { %12983 = vmatpush3.msra.mxu0 %v19424_v18 }
0x1a09   :  { %11052 = vmatmul.mubr.f32.vlgmr.msra.gmra.mxu0 %v19379_v8  ;;  %v19683_v8 = vsub.s32 0, %v18991_v30 }
0x1a11   :  { %v11067_v41 = vpop.permute.xlu0 %11066 }
0x1a12   :  { %v11072_v16 = vrot.slane %v11067_v41, %v19683_v8 }
0x1ac9   :  { %v12984_v52 = vpop.f32.mrf.mxu0 }
0x1acb   :  { %v12985_v25 = vpop.f32.mrf.mxu0 }
0x1acc   :  { %v12986_v51 = vadd.f32 %v12985_v25, %v12984_v52 }
0x1ace   :  { %v11054_v29 = vadd.f32 %v12986_v51, %v10984_v54 }
0x1ad0   :  { %11058 = vrot.lane.b32.xlu1 %v11054_v29, %s14612_s19 }
0x1b42   :  { %v11059_v50 = vpop.permute.xlu1 %11058 }
0x1b43   :  { %v11062_v33 = vsel %vm11061_vm2, %v19486_v10, %v11059_v50 }
0x1b44   :  { %v11073_v7 = vadd.f32 %v11072_v16, %v11062_v33 }
0x1b46   :  { %11082 = vrot.lane.b32.xlu0 %v11073_v7, %s14610_s24  ;;  %11077 = vrot.lane.b32.xlu1 %v11073_v7, %s14613_s13  ;;  %11075 = vst.msk [vmem:[#allocation3] sm:$0x1] %vm11074_vm0, %v11073_v7 }
0x1b4a   :  { %11086 = vrot.lane.b32.xlu1 %v11073_v7, %s14603_s20 }
0x1bb8   :  { %v11083_v18 = vpop.permute.xlu0 %11082  ;;  %v11078_v5 = vpop.permute.xlu1 %11077 }
0x1bb9   :  { %11085 = vst.msk [vmem:[#allocation3 + $0x1] sm:$0x1] %vm11074_vm0, %v11083_v18  ;;  %11081 = vst.msk [vmem:[#allocation3 + $0x2] sm:$0x1] %vm11074_vm0, %v11078_v5 }
0x1bbc   :  { %v11087_v30 = vpop.permute.xlu1 %11086 }
0x1bbd   :  { %11089 = vst.msk [vmem:[#allocation3 + $0x3] sm:$0x1] %vm11074_vm0, %v11087_v30 }
0x1bbe   :  { %14558 = shalt.err (!%p14555_p4)
}
0x1bbf   :  { %s14615_s25 = smov 32   ;;  %s14616_s26 = smov 2  }
0x1bc0   :  { %11101 = dma.vmem_to_hbm [thread:$0]  %s11096_s21, 64, %s19521_s16, [#allocation4], %s14615_s25, %s14615_s25, %s14616_s26  }
0x1bc1   :  { %14567 = dma.done.wait [#allocation4], 64  }
0x1bc2   :  { %14568 = vsyncadd [#allocation4], 4294967232 }
0x1bc3   :  { %11105 = vsyncpa [#allocation4], 1 }

</bundles_post_ra>
